<compile_context>
chip_gen: v7x
topology: tpu7x:2x2x1
jax: 0.10.0
libtpu: 0.0.40
codegen_flags: <defaults>
</compile_context>

<pallas_src>
import functools
import math

import jax
import jax.numpy as jnp
from jax.experimental import pallas as pl
from jax.experimental.pallas import tpu as pltpu


# ----------------------------- fused Pallas kernel ---------------------------
def _fused_net_kernel(xp_ref, w_ref, lwT_ref, lb_ref, o_ref, *,
                      B, inC, outC, outH, outW, kH, kW):
    # xp_ref : (B, inC, Hp, Wp)          zero-padded input (VMEM resident)
    # w_ref  : (K, outC, outH, outW)     K = inC*kH*kW, (c, kh, kw) unfold order
    # lwT_ref: (outW, Nout_pad)          Linear weight, pre-transposed + lane-padded
    # lb_ref : (1, Nout_pad)             Linear bias, lane-padded with zeros
    # o_ref  : (B*outC*outH, Nout_pad)   lane-dense output slab
    xp = xp_ref[...]
    w = w_ref[...]

    # Locally-connected conv on the VPU: one broadcast FMA per (c, kh, kw) tap.
    # acc[b, o, oh, ow] = sum_{c,kh,kw} xp[b, c, oh+kh, ow+kw] * W[oh, ow, o, c, kh, kw]
    acc = jnp.zeros((B, outC, outH, outW), jnp.float32)
    for c in range(inC):
        for kh in range(kH):
            for kw in range(kW):
                k = (c * kH + kh) * kW + kw
                patch = xp[:, c, kh:kh + outH, kw:kw + outW]        # (B, outH, outW)
                acc = acc + patch[:, None, :, :] * w[k][None, :, :, :]

    # (B, outC, outH, outW) -> (B*outC*outH, outW): collapse leading dims only
    # (last two dims already form a full (8, 8) sub-tile, cheap relayout).
    conv2d = acc.reshape(B * outC * outH, outW)

    # nn.Linear over the last (outW) axis: a single small MXU matmul + bias.
    o_ref[...] = (
        jnp.dot(conv2d, lwT_ref[...], preferred_element_type=jnp.float32)
        + lb_ref[...]
    )


# ----------------------------- wrapper ----------------------------------------
def net_forward(x, loc_weight, lin_w, lin_b, *, padding):
    """Fused Conv2dLocal (no bias) + nn.Linear forward, one pallas_call."""
    B, inC, H, W = x.shape
    outH, outW, outC, inC2, kH, kW = loc_weight.shape
    assert inC == inC2
    lin_out, lin_in = lin_w.shape
    assert lin_in == outW, "nn.Linear in_features must equal conv out_width"
    K = inC * kH * kW
    M = B * outC * outH
    n_pad = pl.cdiv(lin_out, 128) * 128            # 504 -> 512: unmasked lane stores

    # Parameter / input prep (cheap one-off XLA layout ops, all shapes tiny).
    xp = jnp.pad(x, ((0, 0), (0, 0), (padding, padding), (padding, padding)))
    # (outH,outW,outC,inC,kH,kW) -> (inC,kH,kW,outC,outH,outW) -> (K,outC,outH,outW)
    w_r = jnp.transpose(loc_weight, (3, 4, 5, 2, 0, 1)).reshape(K, outC, outH, outW)
    lwT = jnp.zeros((outW, n_pad), jnp.float32).at[:, :lin_out].set(lin_w.T)
    lb = jnp.zeros((1, n_pad), jnp.float32).at[:, :lin_out].set(lin_b[None, :])

    flops = 2 * B * outC * outH * outW * K + 2 * M * outW * n_pad
    bytes_accessed = 4 * (xp.size + w_r.size + lwT.size + lb.size + M * n_pad)

    vmem = pl.BlockSpec(memory_space=pltpu.MemorySpace.VMEM)
    out2d = pl.pallas_call(
        functools.partial(_fused_net_kernel, B=B, inC=inC, outC=outC,
                          outH=outH, outW=outW, kH=kH, kW=kW),
        out_shape=jax.ShapeDtypeStruct((M, n_pad), jnp.float32),
        in_specs=[vmem, vmem, vmem, vmem],
        out_specs=vmem,
        cost_estimate=pl.CostEstimate(flops=flops, transcendentals=0,
                                      bytes_accessed=bytes_accessed),
    )(xp, w_r, lwT, lb)

    # Drop the lane padding and restore (B, outC, outH, lin_out).
    return out2d[:, :lin_out].reshape(B, outC, outH, lin_out)


# ----------------------------- pure-JAX reference -----------------------------
def _im2col(x, kH, kW, padding, stride=1):
    """PyTorch F.unfold equivalent. Returns (B, L, K), L=outH*outW, K=C*kH*kW."""
    B, C, H, W = x.shape
    xp = jnp.pad(x, ((0, 0), (0, 0), (padding, padding), (padding, padding)))
    outH = (H + 2 * padding - kH) // stride + 1
    outW = (W + 2 * padding - kW) // stride + 1
    patches = []
    for kh in range(kH):
        for kw in range(kW):
            patches.append(
                xp[:, :, kh:kh + outH * stride:stride, kw:kw + outW * stride:stride]
            )
    p = jnp.stack(patches, axis=2)                  # (B, C, kH*kW, outH, outW)
    p = p.reshape(B, C * kH * kW, outH * outW)      # (B, K, L)
    return jnp.transpose(p, (0, 2, 1)), outH, outW  # (B, L, K)


def _ref_forward(x, loc_weight, lin_w, lin_b, *, padding):
    outH, outW, outC, inC, kH, kW = loc_weight.shape
    cols, _, _ = _im2col(x, kH, kW, padding)
    conv = jnp.einsum(
        "blk,lok->blo", cols, loc_weight.reshape(outH * outW, outC, inC * kH * kW)
    )
    conv = conv.reshape(x.shape[0], outH, outW, outC).transpose(0, 3, 1, 2)
    return jnp.einsum("bchw,jw->bchj", conv, lin_w) + lin_b


# ----------------------------- main --------------------------------------------
if __name__ == "__main__":
    # Small shapes consistent with the module's forward (out_width must be 8).
    B, C_IN, C_OUT = 2, 4, 4
    H = W = 9
    KSIZE = 4
    PAD = 1
    OUT_H = OUT_W = (H + 2 * PAD - KSIZE) + 1        # = 8  (Linear in_features)
    LIN_IN, LIN_OUT = 8, 504

    key = jax.random.PRNGKey(0)
    k_x, k_w, k_lw, k_lb = jax.random.split(key, 4)

    x = jax.random.normal(k_x, (B, C_IN, H, W), dtype=jnp.float32)

    # Conv2dLocal weight: (outH, outW, outC, inC, kH, kW), uniform(-stdv, stdv).
    stdv = 1.0 / math.sqrt(C_IN * KSIZE * KSIZE)
    loc_weight = jax.random.uniform(
        k_w, (OUT_H, OUT_W, C_OUT, C_IN, KSIZE, KSIZE),
        minval=-stdv, maxval=stdv, dtype=jnp.float32)
    # Conv bias is disabled (bias arg = 0 in the module).

    # nn.Linear(8, 504): weight (out, in), bias (out,)
    lin_stdv = 1.0 / math.sqrt(LIN_IN)
    lin_w = jax.random.uniform(k_lw, (LIN_OUT, LIN_IN),
                               minval=-lin_stdv, maxval=lin_stdv, dtype=jnp.float32)
    lin_b = jax.random.uniform(k_lb, (LIN_OUT,),
                               minval=-lin_stdv, maxval=lin_stdv, dtype=jnp.float32)

    fwd = jax.jit(lambda a, w, lw, lb: net_forward(a, w, lw, lb, padding=PAD))
    out = jax.block_until_ready(fwd(x, loc_weight, lin_w, lin_b))

    ref = _ref_forward(x, loc_weight, lin_w, lin_b, padding=PAD)
    assert out.shape == (B, C_OUT, OUT_H, LIN_OUT), out.shape
    assert jnp.allclose(out, ref, rtol=1e-4, atol=1e-4), "mismatch vs JAX reference"

    print("KERNEL_OK")
</pallas_src>

<mosaic_0001>
module attributes {stable_mosaic.version = 11 : i64} {
  func.func @_fused_net_kernel(%arg0: memref<2x4x11x11xf32, #tpu.memory_space<vmem>>, %arg1: memref<64x4x8x8xf32, #tpu.memory_space<vmem>>, %arg2: memref<8x512xf32, #tpu.memory_space<vmem>>, %arg3: memref<1x512xf32, #tpu.memory_space<vmem>>, %arg4: memref<64x512xf32, #tpu.memory_space<vmem>>) attributes {dimension_semantics = [], scalar_prefetch = 0 : i64, scratch_operands = 0 : i64, tpu.core_type = #tpu.core_type<tc>} {
    %c0 = arith.constant 0 : index
    %c0_0 = arith.constant 0 : index
    %c0_1 = arith.constant 0 : index
    %c0_2 = arith.constant 0 : index
    %0 = vector.load %arg0[%c0, %c0_0, %c0_1, %c0_2] : memref<2x4x11x11xf32, #tpu.memory_space<vmem>>, vector<2x4x11x11xf32>
    %c0_3 = arith.constant 0 : index
    %c0_4 = arith.constant 0 : index
    %c0_5 = arith.constant 0 : index
    %c0_6 = arith.constant 0 : index
    %1 = vector.load %arg1[%c0_3, %c0_4, %c0_5, %c0_6] : memref<64x4x8x8xf32, #tpu.memory_space<vmem>>, vector<64x4x8x8xf32>
    %cst = arith.constant 0.000000e+00 : f32
    %2 = vector.broadcast %cst : f32 to vector<2x4x8x8xf32>
    %3 = vector.extract_strided_slice %0 {offsets = [0, 0, 0, 0], sizes = [2, 1, 8, 8], strides = [1, 1, 1, 1]} : vector<2x4x11x11xf32> to vector<2x1x8x8xf32>
    %4 = vector.shape_cast %3 : vector<2x1x8x8xf32> to vector<2x8x8xf32>
    %5 = vector.shape_cast %4 : vector<2x8x8xf32> to vector<2x1x8x8xf32>
    %6 = vector.extract_strided_slice %1 {offsets = [0, 0, 0, 0], sizes = [1, 4, 8, 8], strides = [1, 1, 1, 1]} : vector<64x4x8x8xf32> to vector<1x4x8x8xf32>
    %7 = vector.shape_cast %6 : vector<1x4x8x8xf32> to vector<4x8x8xf32>
    %8 = vector.shape_cast %7 : vector<4x8x8xf32> to vector<1x4x8x8xf32>
    %9 = vector.broadcast %5 : vector<2x1x8x8xf32> to vector<2x4x8x8xf32>
    %10 = vector.broadcast %8 : vector<1x4x8x8xf32> to vector<2x4x8x8xf32>
    %11 = arith.mulf %9, %10 : vector<2x4x8x8xf32>
    %12 = arith.addf %2, %11 : vector<2x4x8x8xf32>
    %13 = vector.extract_strided_slice %0 {offsets = [0, 0, 0, 1], sizes = [2, 1, 8, 8], strides = [1, 1, 1, 1]} : vector<2x4x11x11xf32> to vector<2x1x8x8xf32>
    %14 = vector.shape_cast %13 : vector<2x1x8x8xf32> to vector<2x8x8xf32>
    %15 = vector.shape_cast %14 : vector<2x8x8xf32> to vector<2x1x8x8xf32>
    %16 = vector.extract_strided_slice %1 {offsets = [1, 0, 0, 0], sizes = [1, 4, 8, 8], strides = [1, 1, 1, 1]} : vector<64x4x8x8xf32> to vector<1x4x8x8xf32>
    %17 = vector.shape_cast %16 : vector<1x4x8x8xf32> to vector<4x8x8xf32>
    %18 = vector.shape_cast %17 : vector<4x8x8xf32> to vector<1x4x8x8xf32>
    %19 = vector.broadcast %15 : vector<2x1x8x8xf32> to vector<2x4x8x8xf32>
    %20 = vector.broadcast %18 : vector<1x4x8x8xf32> to vector<2x4x8x8xf32>
    %21 = arith.mulf %19, %20 : vector<2x4x8x8xf32>
    %22 = arith.addf %12, %21 : vector<2x4x8x8xf32>
    %23 = vector.extract_strided_slice %0 {offsets = [0, 0, 0, 2], sizes = [2, 1, 8, 8], strides = [1, 1, 1, 1]} : vector<2x4x11x11xf32> to vector<2x1x8x8xf32>
    %24 = vector.shape_cast %23 : vector<2x1x8x8xf32> to vector<2x8x8xf32>
    %25 = vector.shape_cast %24 : vector<2x8x8xf32> to vector<2x1x8x8xf32>
    %26 = vector.extract_strided_slice %1 {offsets = [2, 0, 0, 0], sizes = [1, 4, 8, 8], strides = [1, 1, 1, 1]} : vector<64x4x8x8xf32> to vector<1x4x8x8xf32>
    %27 = vector.shape_cast %26 : vector<1x4x8x8xf32> to vector<4x8x8xf32>
    %28 = vector.shape_cast %27 : vector<4x8x8xf32> to vector<1x4x8x8xf32>
    %29 = vector.broadcast %25 : vector<2x1x8x8xf32> to vector<2x4x8x8xf32>
    %30 = vector.broadcast %28 : vector<1x4x8x8xf32> to vector<2x4x8x8xf32>
    %31 = arith.mulf %29, %30 : vector<2x4x8x8xf32>
    %32 = arith.addf %22, %31 : vector<2x4x8x8xf32>
    %33 = vector.extract_strided_slice %0 {offsets = [0, 0, 0, 3], sizes = [2, 1, 8, 8], strides = [1, 1, 1, 1]} : vector<2x4x11x11xf32> to vector<2x1x8x8xf32>
    %34 = vector.shape_cast %33 : vector<2x1x8x8xf32> to vector<2x8x8xf32>
    %35 = vector.shape_cast %34 : vector<2x8x8xf32> to vector<2x1x8x8xf32>
    %36 = vector.extract_strided_slice %1 {offsets = [3, 0, 0, 0], sizes = [1, 4, 8, 8], strides = [1, 1, 1, 1]} : vector<64x4x8x8xf32> to vector<1x4x8x8xf32>
    %37 = vector.shape_cast %36 : vector<1x4x8x8xf32> to vector<4x8x8xf32>
    %38 = vector.shape_cast %37 : vector<4x8x8xf32> to vector<1x4x8x8xf32>
    %39 = vector.broadcast %35 : vector<2x1x8x8xf32> to vector<2x4x8x8xf32>
    %40 = vector.broadcast %38 : vector<1x4x8x8xf32> to vector<2x4x8x8xf32>
    %41 = arith.mulf %39, %40 : vector<2x4x8x8xf32>
    %42 = arith.addf %32, %41 : vector<2x4x8x8xf32>
    %43 = vector.extract_strided_slice %0 {offsets = [0, 0, 1, 0], sizes = [2, 1, 8, 8], strides = [1, 1, 1, 1]} : vector<2x4x11x11xf32> to vector<2x1x8x8xf32>
    %44 = vector.shape_cast %43 : vector<2x1x8x8xf32> to vector<2x8x8xf32>
    %45 = vector.shape_cast %44 : vector<2x8x8xf32> to vector<2x1x8x8xf32>
    %46 = vector.extract_strided_slice %1 {offsets = [4, 0, 0, 0], sizes = [1, 4, 8, 8], strides = [1, 1, 1, 1]} : vector<64x4x8x8xf32> to vector<1x4x8x8xf32>
    %47 = vector.shape_cast %46 : vector<1x4x8x8xf32> to vector<4x8x8xf32>
    %48 = vector.shape_cast %47 : vector<4x8x8xf32> to vector<1x4x8x8xf32>
    %49 = vector.broadcast %45 : vector<2x1x8x8xf32> to vector<2x4x8x8xf32>
    %50 = vector.broadcast %48 : vector<1x4x8x8xf32> to vector<2x4x8x8xf32>
    %51 = arith.mulf %49, %50 : vector<2x4x8x8xf32>
    %52 = arith.addf %42, %51 : vector<2x4x8x8xf32>
    %53 = vector.extract_strided_slice %0 {offsets = [0, 0, 1, 1], sizes = [2, 1, 8, 8], strides = [1, 1, 1, 1]} : vector<2x4x11x11xf32> to vector<2x1x8x8xf32>
    %54 = vector.shape_cast %53 : vector<2x1x8x8xf32> to vector<2x8x8xf32>
    %55 = vector.shape_cast %54 : vector<2x8x8xf32> to vector<2x1x8x8xf32>
    %56 = vector.extract_strided_slice %1 {offsets = [5, 0, 0, 0], sizes = [1, 4, 8, 8], strides = [1, 1, 1, 1]} : vector<64x4x8x8xf32> to vector<1x4x8x8xf32>
    %57 = vector.shape_cast %56 : vector<1x4x8x8xf32> to vector<4x8x8xf32>
    %58 = vector.shape_cast %57 : vector<4x8x8xf32> to vector<1x4x8x8xf32>
    %59 = vector.broadcast %55 : vector<2x1x8x8xf32> to vector<2x4x8x8xf32>
    %60 = vector.broadcast %58 : vector<1x4x8x8xf32> to vector<2x4x8x8xf32>
    %61 = arith.mulf %59, %60 : vector<2x4x8x8xf32>
    %62 = arith.addf %52, %61 : vector<2x4x8x8xf32>
    %63 = vector.extract_strided_slice %0 {offsets = [0, 0, 1, 2], sizes = [2, 1, 8, 8], strides = [1, 1, 1, 1]} : vector<2x4x11x11xf32> to vector<2x1x8x8xf32>
    %64 = vector.shape_cast %63 : vector<2x1x8x8xf32> to vector<2x8x8xf32>
    %65 = vector.shape_cast %64 : vector<2x8x8xf32> to vector<2x1x8x8xf32>
    %66 = vector.extract_strided_slice %1 {offsets = [6, 0, 0, 0], sizes = [1, 4, 8, 8], strides = [1, 1, 1, 1]} : vector<64x4x8x8xf32> to vector<1x4x8x8xf32>
    %67 = vector.shape_cast %66 : vector<1x4x8x8xf32> to vector<4x8x8xf32>
    %68 = vector.shape_cast %67 : vector<4x8x8xf32> to vector<1x4x8x8xf32>
    %69 = vector.broadcast %65 : vector<2x1x8x8xf32> to vector<2x4x8x8xf32>
    %70 = vector.broadcast %68 : vector<1x4x8x8xf32> to vector<2x4x8x8xf32>
    %71 = arith.mulf %69, %70 : vector<2x4x8x8xf32>
    %72 = arith.addf %62, %71 : vector<2x4x8x8xf32>
    %73 = vector.extract_strided_slice %0 {offsets = [0, 0, 1, 3], sizes = [2, 1, 8, 8], strides = [1, 1, 1, 1]} : vector<2x4x11x11xf32> to vector<2x1x8x8xf32>
    %74 = vector.shape_cast %73 : vector<2x1x8x8xf32> to vector<2x8x8xf32>
    %75 = vector.shape_cast %74 : vector<2x8x8xf32> to vector<2x1x8x8xf32>
    %76 = vector.extract_strided_slice %1 {offsets = [7, 0, 0, 0], sizes = [1, 4, 8, 8], strides = [1, 1, 1, 1]} : vector<64x4x8x8xf32> to vector<1x4x8x8xf32>
    %77 = vector.shape_cast %76 : vector<1x4x8x8xf32> to vector<4x8x8xf32>
    %78 = vector.shape_cast %77 : vector<4x8x8xf32> to vector<1x4x8x8xf32>
    %79 = vector.broadcast %75 : vector<2x1x8x8xf32> to vector<2x4x8x8xf32>
    %80 = vector.broadcast %78 : vector<1x4x8x8xf32> to vector<2x4x8x8xf32>
    %81 = arith.mulf %79, %80 : vector<2x4x8x8xf32>
    %82 = arith.addf %72, %81 : vector<2x4x8x8xf32>
    %83 = vector.extract_strided_slice %0 {offsets = [0, 0, 2, 0], sizes = [2, 1, 8, 8], strides = [1, 1, 1, 1]} : vector<2x4x11x11xf32> to vector<2x1x8x8xf32>
    %84 = vector.shape_cast %83 : vector<2x1x8x8xf32> to vector<2x8x8xf32>
    %85 = vector.shape_cast %84 : vector<2x8x8xf32> to vector<2x1x8x8xf32>
    %86 = vector.extract_strided_slice %1 {offsets = [8, 0, 0, 0], sizes = [1, 4, 8, 8], strides = [1, 1, 1, 1]} : vector<64x4x8x8xf32> to vector<1x4x8x8xf32>
    %87 = vector.shape_cast %86 : vector<1x4x8x8xf32> to vector<4x8x8xf32>
    %88 = vector.shape_cast %87 : vector<4x8x8xf32> to vector<1x4x8x8xf32>
    %89 = vector.broadcast %85 : vector<2x1x8x8xf32> to vector<2x4x8x8xf32>
    %90 = vector.broadcast %88 : vector<1x4x8x8xf32> to vector<2x4x8x8xf32>
    %91 = arith.mulf %89, %90 : vector<2x4x8x8xf32>
    %92 = arith.addf %82, %91 : vector<2x4x8x8xf32>
    %93 = vector.extract_strided_slice %0 {offsets = [0, 0, 2, 1], sizes = [2, 1, 8, 8], strides = [1, 1, 1, 1]} : vector<2x4x11x11xf32> to vector<2x1x8x8xf32>
    %94 = vector.shape_cast %93 : vector<2x1x8x8xf32> to vector<2x8x8xf32>
    %95 = vector.shape_cast %94 : vector<2x8x8xf32> to vector<2x1x8x8xf32>
    %96 = vector.extract_strided_slice %1 {offsets = [9, 0, 0, 0], sizes = [1, 4, 8, 8], strides = [1, 1, 1, 1]} : vector<64x4x8x8xf32> to vector<1x4x8x8xf32>
    %97 = vector.shape_cast %96 : vector<1x4x8x8xf32> to vector<4x8x8xf32>
    %98 = vector.shape_cast %97 : vector<4x8x8xf32> to vector<1x4x8x8xf32>
    %99 = vector.broadcast %95 : vector<2x1x8x8xf32> to vector<2x4x8x8xf32>
    %100 = vector.broadcast %98 : vector<1x4x8x8xf32> to vector<2x4x8x8xf32>
    %101 = arith.mulf %99, %100 : vector<2x4x8x8xf32>
    %102 = arith.addf %92, %101 : vector<2x4x8x8xf32>
    %103 = vector.extract_strided_slice %0 {offsets = [0, 0, 2, 2], sizes = [2, 1, 8, 8], strides = [1, 1, 1, 1]} : vector<2x4x11x11xf32> to vector<2x1x8x8xf32>
    %104 = vector.shape_cast %103 : vector<2x1x8x8xf32> to vector<2x8x8xf32>
    %105 = vector.shape_cast %104 : vector<2x8x8xf32> to vector<2x1x8x8xf32>
    %106 = vector.extract_strided_slice %1 {offsets = [10, 0, 0, 0], sizes = [1, 4, 8, 8], strides = [1, 1, 1, 1]} : vector<64x4x8x8xf32> to vector<1x4x8x8xf32>
    %107 = vector.shape_cast %106 : vector<1x4x8x8xf32> to vector<4x8x8xf32>
    %108 = vector.shape_cast %107 : vector<4x8x8xf32> to vector<1x4x8x8xf32>
    %109 = vector.broadcast %105 : vector<2x1x8x8xf32> to vector<2x4x8x8xf32>
    %110 = vector.broadcast %108 : vector<1x4x8x8xf32> to vector<2x4x8x8xf32>
    %111 = arith.mulf %109, %110 : vector<2x4x8x8xf32>
    %112 = arith.addf %102, %111 : vector<2x4x8x8xf32>
    %113 = vector.extract_strided_slice %0 {offsets = [0, 0, 2, 3], sizes = [2, 1, 8, 8], strides = [1, 1, 1, 1]} : vector<2x4x11x11xf32> to vector<2x1x8x8xf32>
    %114 = vector.shape_cast %113 : vector<2x1x8x8xf32> to vector<2x8x8xf32>
    %115 = vector.shape_cast %114 : vector<2x8x8xf32> to vector<2x1x8x8xf32>
    %116 = vector.extract_strided_slice %1 {offsets = [11, 0, 0, 0], sizes = [1, 4, 8, 8], strides = [1, 1, 1, 1]} : vector<64x4x8x8xf32> to vector<1x4x8x8xf32>
    %117 = vector.shape_cast %116 : vector<1x4x8x8xf32> to vector<4x8x8xf32>
    %118 = vector.shape_cast %117 : vector<4x8x8xf32> to vector<1x4x8x8xf32>
    %119 = vector.broadcast %115 : vector<2x1x8x8xf32> to vector<2x4x8x8xf32>
    %120 = vector.broadcast %118 : vector<1x4x8x8xf32> to vector<2x4x8x8xf32>
    %121 = arith.mulf %119, %120 : vector<2x4x8x8xf32>
    %122 = arith.addf %112, %121 : vector<2x4x8x8xf32>
    %123 = vector.extract_strided_slice %0 {offsets = [0, 0, 3, 0], sizes = [2, 1, 8, 8], strides = [1, 1, 1, 1]} : vector<2x4x11x11xf32> to vector<2x1x8x8xf32>
    %124 = vector.shape_cast %123 : vector<2x1x8x8xf32> to vector<2x8x8xf32>
    %125 = vector.shape_cast %124 : vector<2x8x8xf32> to vector<2x1x8x8xf32>
    %126 = vector.extract_strided_slice %1 {offsets = [12, 0, 0, 0], sizes = [1, 4, 8, 8], strides = [1, 1, 1, 1]} : vector<64x4x8x8xf32> to vector<1x4x8x8xf32>
    %127 = vector.shape_cast %126 : vector<1x4x8x8xf32> to vector<4x8x8xf32>
    %128 = vector.shape_cast %127 : vector<4x8x8xf32> to vector<1x4x8x8xf32>
    %129 = vector.broadcast %125 : vector<2x1x8x8xf32> to vector<2x4x8x8xf32>
    %130 = vector.broadcast %128 : vector<1x4x8x8xf32> to vector<2x4x8x8xf32>
    %131 = arith.mulf %129, %130 : vector<2x4x8x8xf32>
    %132 = arith.addf %122, %131 : vector<2x4x8x8xf32>
    %133 = vector.extract_strided_slice %0 {offsets = [0, 0, 3, 1], sizes = [2, 1, 8, 8], strides = [1, 1, 1, 1]} : vector<2x4x11x11xf32> to vector<2x1x8x8xf32>
    %134 = vector.shape_cast %133 : vector<2x1x8x8xf32> to vector<2x8x8xf32>
    %135 = vector.shape_cast %134 : vector<2x8x8xf32> to vector<2x1x8x8xf32>
    %136 = vector.extract_strided_slice %1 {offsets = [13, 0, 0, 0], sizes = [1, 4, 8, 8], strides = [1, 1, 1, 1]} : vector<64x4x8x8xf32> to vector<1x4x8x8xf32>
    %137 = vector.shape_cast %136 : vector<1x4x8x8xf32> to vector<4x8x8xf32>
    %138 = vector.shape_cast %137 : vector<4x8x8xf32> to vector<1x4x8x8xf32>
    %139 = vector.broadcast %135 : vector<2x1x8x8xf32> to vector<2x4x8x8xf32>
    %140 = vector.broadcast %138 : vector<1x4x8x8xf32> to vector<2x4x8x8xf32>
    %141 = arith.mulf %139, %140 : vector<2x4x8x8xf32>
    %142 = arith.addf %132, %141 : vector<2x4x8x8xf32>
    %143 = vector.extract_strided_slice %0 {offsets = [0, 0, 3, 2], sizes = [2, 1, 8, 8], strides = [1, 1, 1, 1]} : vector<2x4x11x11xf32> to vector<2x1x8x8xf32>
    %144 = vector.shape_cast %143 : vector<2x1x8x8xf32> to vector<2x8x8xf32>
    %145 = vector.shape_cast %144 : vector<2x8x8xf32> to vector<2x1x8x8xf32>
    %146 = vector.extract_strided_slice %1 {offsets = [14, 0, 0, 0], sizes = [1, 4, 8, 8], strides = [1, 1, 1, 1]} : vector<64x4x8x8xf32> to vector<1x4x8x8xf32>
    %147 = vector.shape_cast %146 : vector<1x4x8x8xf32> to vector<4x8x8xf32>
    %148 = vector.shape_cast %147 : vector<4x8x8xf32> to vector<1x4x8x8xf32>
    %149 = vector.broadcast %145 : vector<2x1x8x8xf32> to vector<2x4x8x8xf32>
    %150 = vector.broadcast %148 : vector<1x4x8x8xf32> to vector<2x4x8x8xf32>
    %151 = arith.mulf %149, %150 : vector<2x4x8x8xf32>
    %152 = arith.addf %142, %151 : vector<2x4x8x8xf32>
    %153 = vector.extract_strided_slice %0 {offsets = [0, 0, 3, 3], sizes = [2, 1, 8, 8], strides = [1, 1, 1, 1]} : vector<2x4x11x11xf32> to vector<2x1x8x8xf32>
    %154 = vector.shape_cast %153 : vector<2x1x8x8xf32> to vector<2x8x8xf32>
    %155 = vector.shape_cast %154 : vector<2x8x8xf32> to vector<2x1x8x8xf32>
    %156 = vector.extract_strided_slice %1 {offsets = [15, 0, 0, 0], sizes = [1, 4, 8, 8], strides = [1, 1, 1, 1]} : vector<64x4x8x8xf32> to vector<1x4x8x8xf32>
    %157 = vector.shape_cast %156 : vector<1x4x8x8xf32> to vector<4x8x8xf32>
    %158 = vector.shape_cast %157 : vector<4x8x8xf32> to vector<1x4x8x8xf32>
    %159 = vector.broadcast %155 : vector<2x1x8x8xf32> to vector<2x4x8x8xf32>
    %160 = vector.broadcast %158 : vector<1x4x8x8xf32> to vector<2x4x8x8xf32>
    %161 = arith.mulf %159, %160 : vector<2x4x8x8xf32>
    %162 = arith.addf %152, %161 : vector<2x4x8x8xf32>
    %163 = vector.extract_strided_slice %0 {offsets = [0, 1, 0, 0], sizes = [2, 1, 8, 8], strides = [1, 1, 1, 1]} : vector<2x4x11x11xf32> to vector<2x1x8x8xf32>
    %164 = vector.shape_cast %163 : vector<2x1x8x8xf32> to vector<2x8x8xf32>
    %165 = vector.shape_cast %164 : vector<2x8x8xf32> to vector<2x1x8x8xf32>
    %166 = vector.extract_strided_slice %1 {offsets = [16, 0, 0, 0], sizes = [1, 4, 8, 8], strides = [1, 1, 1, 1]} : vector<64x4x8x8xf32> to vector<1x4x8x8xf32>
    %167 = vector.shape_cast %166 : vector<1x4x8x8xf32> to vector<4x8x8xf32>
    %168 = vector.shape_cast %167 : vector<4x8x8xf32> to vector<1x4x8x8xf32>
    %169 = vector.broadcast %165 : vector<2x1x8x8xf32> to vector<2x4x8x8xf32>
    %170 = vector.broadcast %168 : vector<1x4x8x8xf32> to vector<2x4x8x8xf32>
    %171 = arith.mulf %169, %170 : vector<2x4x8x8xf32>
    %172 = arith.addf %162, %171 : vector<2x4x8x8xf32>
    %173 = vector.extract_strided_slice %0 {offsets = [0, 1, 0, 1], sizes = [2, 1, 8, 8], strides = [1, 1, 1, 1]} : vector<2x4x11x11xf32> to vector<2x1x8x8xf32>
    %174 = vector.shape_cast %173 : vector<2x1x8x8xf32> to vector<2x8x8xf32>
    %175 = vector.shape_cast %174 : vector<2x8x8xf32> to vector<2x1x8x8xf32>
    %176 = vector.extract_strided_slice %1 {offsets = [17, 0, 0, 0], sizes = [1, 4, 8, 8], strides = [1, 1, 1, 1]} : vector<64x4x8x8xf32> to vector<1x4x8x8xf32>
    %177 = vector.shape_cast %176 : vector<1x4x8x8xf32> to vector<4x8x8xf32>
    %178 = vector.shape_cast %177 : vector<4x8x8xf32> to vector<1x4x8x8xf32>
    %179 = vector.broadcast %175 : vector<2x1x8x8xf32> to vector<2x4x8x8xf32>
    %180 = vector.broadcast %178 : vector<1x4x8x8xf32> to vector<2x4x8x8xf32>
    %181 = arith.mulf %179, %180 : vector<2x4x8x8xf32>
    %182 = arith.addf %172, %181 : vector<2x4x8x8xf32>
    %183 = vector.extract_strided_slice %0 {offsets = [0, 1, 0, 2], sizes = [2, 1, 8, 8], strides = [1, 1, 1, 1]} : vector<2x4x11x11xf32> to vector<2x1x8x8xf32>
    %184 = vector.shape_cast %183 : vector<2x1x8x8xf32> to vector<2x8x8xf32>
    %185 = vector.shape_cast %184 : vector<2x8x8xf32> to vector<2x1x8x8xf32>
    %186 = vector.extract_strided_slice %1 {offsets = [18, 0, 0, 0], sizes = [1, 4, 8, 8], strides = [1, 1, 1, 1]} : vector<64x4x8x8xf32> to vector<1x4x8x8xf32>
    %187 = vector.shape_cast %186 : vector<1x4x8x8xf32> to vector<4x8x8xf32>
    %188 = vector.shape_cast %187 : vector<4x8x8xf32> to vector<1x4x8x8xf32>
    %189 = vector.broadcast %185 : vector<2x1x8x8xf32> to vector<2x4x8x8xf32>
    %190 = vector.broadcast %188 : vector<1x4x8x8xf32> to vector<2x4x8x8xf32>
    %191 = arith.mulf %189, %190 : vector<2x4x8x8xf32>
    %192 = arith.addf %182, %191 : vector<2x4x8x8xf32>
    %193 = vector.extract_strided_slice %0 {offsets = [0, 1, 0, 3], sizes = [2, 1, 8, 8], strides = [1, 1, 1, 1]} : vector<2x4x11x11xf32> to vector<2x1x8x8xf32>
    %194 = vector.shape_cast %193 : vector<2x1x8x8xf32> to vector<2x8x8xf32>
    %195 = vector.shape_cast %194 : vector<2x8x8xf32> to vector<2x1x8x8xf32>
    %196 = vector.extract_strided_slice %1 {offsets = [19, 0, 0, 0], sizes = [1, 4, 8, 8], strides = [1, 1, 1, 1]} : vector<64x4x8x8xf32> to vector<1x4x8x8xf32>
    %197 = vector.shape_cast %196 : vector<1x4x8x8xf32> to vector<4x8x8xf32>
    %198 = vector.shape_cast %197 : vector<4x8x8xf32> to vector<1x4x8x8xf32>
    %199 = vector.broadcast %195 : vector<2x1x8x8xf32> to vector<2x4x8x8xf32>
    %200 = vector.broadcast %198 : vector<1x4x8x8xf32> to vector<2x4x8x8xf32>
    %201 = arith.mulf %199, %200 : vector<2x4x8x8xf32>
    %202 = arith.addf %192, %201 : vector<2x4x8x8xf32>
    %203 = vector.extract_strided_slice %0 {offsets = [0, 1, 1, 0], sizes = [2, 1, 8, 8], strides = [1, 1, 1, 1]} : vector<2x4x11x11xf32> to vector<2x1x8x8xf32>
    %204 = vector.shape_cast %203 : vector<2x1x8x8xf32> to vector<2x8x8xf32>
    %205 = vector.shape_cast %204 : vector<2x8x8xf32> to vector<2x1x8x8xf32>
    %206 = vector.extract_strided_slice %1 {offsets = [20, 0, 0, 0], sizes = [1, 4, 8, 8], strides = [1, 1, 1, 1]} : vector<64x4x8x8xf32> to vector<1x4x8x8xf32>
    %207 = vector.shape_cast %206 : vector<1x4x8x8xf32> to vector<4x8x8xf32>
    %208 = vector.shape_cast %207 : vector<4x8x8xf32> to vector<1x4x8x8xf32>
    %209 = vector.broadcast %205 : vector<2x1x8x8xf32> to vector<2x4x8x8xf32>
    %210 = vector.broadcast %208 : vector<1x4x8x8xf32> to vector<2x4x8x8xf32>
    %211 = arith.mulf %209, %210 : vector<2x4x8x8xf32>
    %212 = arith.addf %202, %211 : vector<2x4x8x8xf32>
    %213 = vector.extract_strided_slice %0 {offsets = [0, 1, 1, 1], sizes = [2, 1, 8, 8], strides = [1, 1, 1, 1]} : vector<2x4x11x11xf32> to vector<2x1x8x8xf32>
    %214 = vector.shape_cast %213 : vector<2x1x8x8xf32> to vector<2x8x8xf32>
    %215 = vector.shape_cast %214 : vector<2x8x8xf32> to vector<2x1x8x8xf32>
    %216 = vector.extract_strided_slice %1 {offsets = [21, 0, 0, 0], sizes = [1, 4, 8, 8], strides = [1, 1, 1, 1]} : vector<64x4x8x8xf32> to vector<1x4x8x8xf32>
    %217 = vector.shape_cast %216 : vector<1x4x8x8xf32> to vector<4x8x8xf32>
    %218 = vector.shape_cast %217 : vector<4x8x8xf32> to vector<1x4x8x8xf32>
    %219 = vector.broadcast %215 : vector<2x1x8x8xf32> to vector<2x4x8x8xf32>
    %220 = vector.broadcast %218 : vector<1x4x8x8xf32> to vector<2x4x8x8xf32>
    %221 = arith.mulf %219, %220 : vector<2x4x8x8xf32>
    %222 = arith.addf %212, %221 : vector<2x4x8x8xf32>
    %223 = vector.extract_strided_slice %0 {offsets = [0, 1, 1, 2], sizes = [2, 1, 8, 8], strides = [1, 1, 1, 1]} : vector<2x4x11x11xf32> to vector<2x1x8x8xf32>
    %224 = vector.shape_cast %223 : vector<2x1x8x8xf32> to vector<2x8x8xf32>
    %225 = vector.shape_cast %224 : vector<2x8x8xf32> to vector<2x1x8x8xf32>
    %226 = vector.extract_strided_slice %1 {offsets = [22, 0, 0, 0], sizes = [1, 4, 8, 8], strides = [1, 1, 1, 1]} : vector<64x4x8x8xf32> to vector<1x4x8x8xf32>
    %227 = vector.shape_cast %226 : vector<1x4x8x8xf32> to vector<4x8x8xf32>
    %228 = vector.shape_cast %227 : vector<4x8x8xf32> to vector<1x4x8x8xf32>
    %229 = vector.broadcast %225 : vector<2x1x8x8xf32> to vector<2x4x8x8xf32>
    %230 = vector.broadcast %228 : vector<1x4x8x8xf32> to vector<2x4x8x8xf32>
    %231 = arith.mulf %229, %230 : vector<2x4x8x8xf32>
    %232 = arith.addf %222, %231 : vector<2x4x8x8xf32>
    %233 = vector.extract_strided_slice %0 {offsets = [0, 1, 1, 3], sizes = [2, 1, 8, 8], strides = [1, 1, 1, 1]} : vector<2x4x11x11xf32> to vector<2x1x8x8xf32>
    %234 = vector.shape_cast %233 : vector<2x1x8x8xf32> to vector<2x8x8xf32>
    %235 = vector.shape_cast %234 : vector<2x8x8xf32> to vector<2x1x8x8xf32>
    %236 = vector.extract_strided_slice %1 {offsets = [23, 0, 0, 0], sizes = [1, 4, 8, 8], strides = [1, 1, 1, 1]} : vector<64x4x8x8xf32> to vector<1x4x8x8xf32>
    %237 = vector.shape_cast %236 : vector<1x4x8x8xf32> to vector<4x8x8xf32>
    %238 = vector.shape_cast %237 : vector<4x8x8xf32> to vector<1x4x8x8xf32>
    %239 = vector.broadcast %235 : vector<2x1x8x8xf32> to vector<2x4x8x8xf32>
    %240 = vector.broadcast %238 : vector<1x4x8x8xf32> to vector<2x4x8x8xf32>
    %241 = arith.mulf %239, %240 : vector<2x4x8x8xf32>
    %242 = arith.addf %232, %241 : vector<2x4x8x8xf32>
    %243 = vector.extract_strided_slice %0 {offsets = [0, 1, 2, 0], sizes = [2, 1, 8, 8], strides = [1, 1, 1, 1]} : vector<2x4x11x11xf32> to vector<2x1x8x8xf32>
    %244 = vector.shape_cast %243 : vector<2x1x8x8xf32> to vector<2x8x8xf32>
    %245 = vector.shape_cast %244 : vector<2x8x8xf32> to vector<2x1x8x8xf32>
    %246 = vector.extract_strided_slice %1 {offsets = [24, 0, 0, 0], sizes = [1, 4, 8, 8], strides = [1, 1, 1, 1]} : vector<64x4x8x8xf32> to vector<1x4x8x8xf32>
    %247 = vector.shape_cast %246 : vector<1x4x8x8xf32> to vector<4x8x8xf32>
    %248 = vector.shape_cast %247 : vector<4x8x8xf32> to vector<1x4x8x8xf32>
    %249 = vector.broadcast %245 : vector<2x1x8x8xf32> to vector<2x4x8x8xf32>
    %250 = vector.broadcast %248 : vector<1x4x8x8xf32> to vector<2x4x8x8xf32>
    %251 = arith.mulf %249, %250 : vector<2x4x8x8xf32>
    %252 = arith.addf %242, %251 : vector<2x4x8x8xf32>
    %253 = vector.extract_strided_slice %0 {offsets = [0, 1, 2, 1], sizes = [2, 1, 8, 8], strides = [1, 1, 1, 1]} : vector<2x4x11x11xf32> to vector<2x1x8x8xf32>
    %254 = vector.shape_cast %253 : vector<2x1x8x8xf32> to vector<2x8x8xf32>
    %255 = vector.shape_cast %254 : vector<2x8x8xf32> to vector<2x1x8x8xf32>
    %256 = vector.extract_strided_slice %1 {offsets = [25, 0, 0, 0], sizes = [1, 4, 8, 8], strides = [1, 1, 1, 1]} : vector<64x4x8x8xf32> to vector<1x4x8x8xf32>
    %257 = vector.shape_cast %256 : vector<1x4x8x8xf32> to vector<4x8x8xf32>
    %258 = vector.shape_cast %257 : vector<4x8x8xf32> to vector<1x4x8x8xf32>
    %259 = vector.broadcast %255 : vector<2x1x8x8xf32> to vector<2x4x8x8xf32>
    %260 = vector.broadcast %258 : vector<1x4x8x8xf32> to vector<2x4x8x8xf32>
    %261 = arith.mulf %259, %260 : vector<2x4x8x8xf32>
    %262 = arith.addf %252, %261 : vector<2x4x8x8xf32>
    %263 = vector.extract_strided_slice %0 {offsets = [0, 1, 2, 2], sizes = [2, 1, 8, 8], strides = [1, 1, 1, 1]} : vector<2x4x11x11xf32> to vector<2x1x8x8xf32>
    %264 = vector.shape_cast %263 : vector<2x1x8x8xf32> to vector<2x8x8xf32>
    %265 = vector.shape_cast %264 : vector<2x8x8xf32> to vector<2x1x8x8xf32>
    %266 = vector.extract_strided_slice %1 {offsets = [26, 0, 0, 0], sizes = [1, 4, 8, 8], strides = [1, 1, 1, 1]} : vector<64x4x8x8xf32> to vector<1x4x8x8xf32>
    %267 = vector.shape_cast %266 : vector<1x4x8x8xf32> to vector<4x8x8xf32>
    %268 = vector.shape_cast %267 : vector<4x8x8xf32> to vector<1x4x8x8xf32>
    %269 = vector.broadcast %265 : vector<2x1x8x8xf32> to vector<2x4x8x8xf32>
    %270 = vector.broadcast %268 : vector<1x4x8x8xf32> to vector<2x4x8x8xf32>
    %271 = arith.mulf %269, %270 : vector<2x4x8x8xf32>
    %272 = arith.addf %262, %271 : vector<2x4x8x8xf32>
    %273 = vector.extract_strided_slice %0 {offsets = [0, 1, 2, 3], sizes = [2, 1, 8, 8], strides = [1, 1, 1, 1]} : vector<2x4x11x11xf32> to vector<2x1x8x8xf32>
    %274 = vector.shape_cast %273 : vector<2x1x8x8xf32> to vector<2x8x8xf32>
    %275 = vector.shape_cast %274 : vector<2x8x8xf32> to vector<2x1x8x8xf32>
    %276 = vector.extract_strided_slice %1 {offsets = [27, 0, 0, 0], sizes = [1, 4, 8, 8], strides = [1, 1, 1, 1]} : vector<64x4x8x8xf32> to vector<1x4x8x8xf32>
    %277 = vector.shape_cast %276 : vector<1x4x8x8xf32> to vector<4x8x8xf32>
    %278 = vector.shape_cast %277 : vector<4x8x8xf32> to vector<1x4x8x8xf32>
    %279 = vector.broadcast %275 : vector<2x1x8x8xf32> to vector<2x4x8x8xf32>
    %280 = vector.broadcast %278 : vector<1x4x8x8xf32> to vector<2x4x8x8xf32>
    %281 = arith.mulf %279, %280 : vector<2x4x8x8xf32>
    %282 = arith.addf %272, %281 : vector<2x4x8x8xf32>
    %283 = vector.extract_strided_slice %0 {offsets = [0, 1, 3, 0], sizes = [2, 1, 8, 8], strides = [1, 1, 1, 1]} : vector<2x4x11x11xf32> to vector<2x1x8x8xf32>
    %284 = vector.shape_cast %283 : vector<2x1x8x8xf32> to vector<2x8x8xf32>
    %285 = vector.shape_cast %284 : vector<2x8x8xf32> to vector<2x1x8x8xf32>
    %286 = vector.extract_strided_slice %1 {offsets = [28, 0, 0, 0], sizes = [1, 4, 8, 8], strides = [1, 1, 1, 1]} : vector<64x4x8x8xf32> to vector<1x4x8x8xf32>
    %287 = vector.shape_cast %286 : vector<1x4x8x8xf32> to vector<4x8x8xf32>
    %288 = vector.shape_cast %287 : vector<4x8x8xf32> to vector<1x4x8x8xf32>
    %289 = vector.broadcast %285 : vector<2x1x8x8xf32> to vector<2x4x8x8xf32>
    %290 = vector.broadcast %288 : vector<1x4x8x8xf32> to vector<2x4x8x8xf32>
    %291 = arith.mulf %289, %290 : vector<2x4x8x8xf32>
    %292 = arith.addf %282, %291 : vector<2x4x8x8xf32>
    %293 = vector.extract_strided_slice %0 {offsets = [0, 1, 3, 1], sizes = [2, 1, 8, 8], strides = [1, 1, 1, 1]} : vector<2x4x11x11xf32> to vector<2x1x8x8xf32>
    %294 = vector.shape_cast %293 : vector<2x1x8x8xf32> to vector<2x8x8xf32>
    %295 = vector.shape_cast %294 : vector<2x8x8xf32> to vector<2x1x8x8xf32>
    %296 = vector.extract_strided_slice %1 {offsets = [29, 0, 0, 0], sizes = [1, 4, 8, 8], strides = [1, 1, 1, 1]} : vector<64x4x8x8xf32> to vector<1x4x8x8xf32>
    %297 = vector.shape_cast %296 : vector<1x4x8x8xf32> to vector<4x8x8xf32>
    %298 = vector.shape_cast %297 : vector<4x8x8xf32> to vector<1x4x8x8xf32>
    %299 = vector.broadcast %295 : vector<2x1x8x8xf32> to vector<2x4x8x8xf32>
    %300 = vector.broadcast %298 : vector<1x4x8x8xf32> to vector<2x4x8x8xf32>
    %301 = arith.mulf %299, %300 : vector<2x4x8x8xf32>
    %302 = arith.addf %292, %301 : vector<2x4x8x8xf32>
    %303 = vector.extract_strided_slice %0 {offsets = [0, 1, 3, 2], sizes = [2, 1, 8, 8], strides = [1, 1, 1, 1]} : vector<2x4x11x11xf32> to vector<2x1x8x8xf32>
    %304 = vector.shape_cast %303 : vector<2x1x8x8xf32> to vector<2x8x8xf32>
    %305 = vector.shape_cast %304 : vector<2x8x8xf32> to vector<2x1x8x8xf32>
    %306 = vector.extract_strided_slice %1 {offsets = [30, 0, 0, 0], sizes = [1, 4, 8, 8], strides = [1, 1, 1, 1]} : vector<64x4x8x8xf32> to vector<1x4x8x8xf32>
    %307 = vector.shape_cast %306 : vector<1x4x8x8xf32> to vector<4x8x8xf32>
    %308 = vector.shape_cast %307 : vector<4x8x8xf32> to vector<1x4x8x8xf32>
    %309 = vector.broadcast %305 : vector<2x1x8x8xf32> to vector<2x4x8x8xf32>
    %310 = vector.broadcast %308 : vector<1x4x8x8xf32> to vector<2x4x8x8xf32>
    %311 = arith.mulf %309, %310 : vector<2x4x8x8xf32>
    %312 = arith.addf %302, %311 : vector<2x4x8x8xf32>
    %313 = vector.extract_strided_slice %0 {offsets = [0, 1, 3, 3], sizes = [2, 1, 8, 8], strides = [1, 1, 1, 1]} : vector<2x4x11x11xf32> to vector<2x1x8x8xf32>
    %314 = vector.shape_cast %313 : vector<2x1x8x8xf32> to vector<2x8x8xf32>
    %315 = vector.shape_cast %314 : vector<2x8x8xf32> to vector<2x1x8x8xf32>
    %316 = vector.extract_strided_slice %1 {offsets = [31, 0, 0, 0], sizes = [1, 4, 8, 8], strides = [1, 1, 1, 1]} : vector<64x4x8x8xf32> to vector<1x4x8x8xf32>
    %317 = vector.shape_cast %316 : vector<1x4x8x8xf32> to vector<4x8x8xf32>
    %318 = vector.shape_cast %317 : vector<4x8x8xf32> to vector<1x4x8x8xf32>
    %319 = vector.broadcast %315 : vector<2x1x8x8xf32> to vector<2x4x8x8xf32>
    %320 = vector.broadcast %318 : vector<1x4x8x8xf32> to vector<2x4x8x8xf32>
    %321 = arith.mulf %319, %320 : vector<2x4x8x8xf32>
    %322 = arith.addf %312, %321 : vector<2x4x8x8xf32>
    %323 = vector.extract_strided_slice %0 {offsets = [0, 2, 0, 0], sizes = [2, 1, 8, 8], strides = [1, 1, 1, 1]} : vector<2x4x11x11xf32> to vector<2x1x8x8xf32>
    %324 = vector.shape_cast %323 : vector<2x1x8x8xf32> to vector<2x8x8xf32>
    %325 = vector.shape_cast %324 : vector<2x8x8xf32> to vector<2x1x8x8xf32>
    %326 = vector.extract_strided_slice %1 {offsets = [32, 0, 0, 0], sizes = [1, 4, 8, 8], strides = [1, 1, 1, 1]} : vector<64x4x8x8xf32> to vector<1x4x8x8xf32>
    %327 = vector.shape_cast %326 : vector<1x4x8x8xf32> to vector<4x8x8xf32>
    %328 = vector.shape_cast %327 : vector<4x8x8xf32> to vector<1x4x8x8xf32>
    %329 = vector.broadcast %325 : vector<2x1x8x8xf32> to vector<2x4x8x8xf32>
    %330 = vector.broadcast %328 : vector<1x4x8x8xf32> to vector<2x4x8x8xf32>
    %331 = arith.mulf %329, %330 : vector<2x4x8x8xf32>
    %332 = arith.addf %322, %331 : vector<2x4x8x8xf32>
    %333 = vector.extract_strided_slice %0 {offsets = [0, 2, 0, 1], sizes = [2, 1, 8, 8], strides = [1, 1, 1, 1]} : vector<2x4x11x11xf32> to vector<2x1x8x8xf32>
    %334 = vector.shape_cast %333 : vector<2x1x8x8xf32> to vector<2x8x8xf32>
    %335 = vector.shape_cast %334 : vector<2x8x8xf32> to vector<2x1x8x8xf32>
    %336 = vector.extract_strided_slice %1 {offsets = [33, 0, 0, 0], sizes = [1, 4, 8, 8], strides = [1, 1, 1, 1]} : vector<64x4x8x8xf32> to vector<1x4x8x8xf32>
    %337 = vector.shape_cast %336 : vector<1x4x8x8xf32> to vector<4x8x8xf32>
    %338 = vector.shape_cast %337 : vector<4x8x8xf32> to vector<1x4x8x8xf32>
    %339 = vector.broadcast %335 : vector<2x1x8x8xf32> to vector<2x4x8x8xf32>
    %340 = vector.broadcast %338 : vector<1x4x8x8xf32> to vector<2x4x8x8xf32>
    %341 = arith.mulf %339, %340 : vector<2x4x8x8xf32>
    %342 = arith.addf %332, %341 : vector<2x4x8x8xf32>
    %343 = vector.extract_strided_slice %0 {offsets = [0, 2, 0, 2], sizes = [2, 1, 8, 8], strides = [1, 1, 1, 1]} : vector<2x4x11x11xf32> to vector<2x1x8x8xf32>
    %344 = vector.shape_cast %343 : vector<2x1x8x8xf32> to vector<2x8x8xf32>
    %345 = vector.shape_cast %344 : vector<2x8x8xf32> to vector<2x1x8x8xf32>
    %346 = vector.extract_strided_slice %1 {offsets = [34, 0, 0, 0], sizes = [1, 4, 8, 8], strides = [1, 1, 1, 1]} : vector<64x4x8x8xf32> to vector<1x4x8x8xf32>
    %347 = vector.shape_cast %346 : vector<1x4x8x8xf32> to vector<4x8x8xf32>
    %348 = vector.shape_cast %347 : vector<4x8x8xf32> to vector<1x4x8x8xf32>
    %349 = vector.broadcast %345 : vector<2x1x8x8xf32> to vector<2x4x8x8xf32>
    %350 = vector.broadcast %348 : vector<1x4x8x8xf32> to vector<2x4x8x8xf32>
    %351 = arith.mulf %349, %350 : vector<2x4x8x8xf32>
    %352 = arith.addf %342, %351 : vector<2x4x8x8xf32>
    %353 = vector.extract_strided_slice %0 {offsets = [0, 2, 0, 3], sizes = [2, 1, 8, 8], strides = [1, 1, 1, 1]} : vector<2x4x11x11xf32> to vector<2x1x8x8xf32>
    %354 = vector.shape_cast %353 : vector<2x1x8x8xf32> to vector<2x8x8xf32>
    %355 = vector.shape_cast %354 : vector<2x8x8xf32> to vector<2x1x8x8xf32>
    %356 = vector.extract_strided_slice %1 {offsets = [35, 0, 0, 0], sizes = [1, 4, 8, 8], strides = [1, 1, 1, 1]} : vector<64x4x8x8xf32> to vector<1x4x8x8xf32>
    %357 = vector.shape_cast %356 : vector<1x4x8x8xf32> to vector<4x8x8xf32>
    %358 = vector.shape_cast %357 : vector<4x8x8xf32> to vector<1x4x8x8xf32>
    %359 = vector.broadcast %355 : vector<2x1x8x8xf32> to vector<2x4x8x8xf32>
    %360 = vector.broadcast %358 : vector<1x4x8x8xf32> to vector<2x4x8x8xf32>
    %361 = arith.mulf %359, %360 : vector<2x4x8x8xf32>
    %362 = arith.addf %352, %361 : vector<2x4x8x8xf32>
    %363 = vector.extract_strided_slice %0 {offsets = [0, 2, 1, 0], sizes = [2, 1, 8, 8], strides = [1, 1, 1, 1]} : vector<2x4x11x11xf32> to vector<2x1x8x8xf32>
    %364 = vector.shape_cast %363 : vector<2x1x8x8xf32> to vector<2x8x8xf32>
    %365 = vector.shape_cast %364 : vector<2x8x8xf32> to vector<2x1x8x8xf32>
    %366 = vector.extract_strided_slice %1 {offsets = [36, 0, 0, 0], sizes = [1, 4, 8, 8], strides = [1, 1, 1, 1]} : vector<64x4x8x8xf32> to vector<1x4x8x8xf32>
    %367 = vector.shape_cast %366 : vector<1x4x8x8xf32> to vector<4x8x8xf32>
    %368 = vector.shape_cast %367 : vector<4x8x8xf32> to vector<1x4x8x8xf32>
    %369 = vector.broadcast %365 : vector<2x1x8x8xf32> to vector<2x4x8x8xf32>
    %370 = vector.broadcast %368 : vector<1x4x8x8xf32> to vector<2x4x8x8xf32>
    %371 = arith.mulf %369, %370 : vector<2x4x8x8xf32>
    %372 = arith.addf %362, %371 : vector<2x4x8x8xf32>
    %373 = vector.extract_strided_slice %0 {offsets = [0, 2, 1, 1], sizes = [2, 1, 8, 8], strides = [1, 1, 1, 1]} : vector<2x4x11x11xf32> to vector<2x1x8x8xf32>
    %374 = vector.shape_cast %373 : vector<2x1x8x8xf32> to vector<2x8x8xf32>
    %375 = vector.shape_cast %374 : vector<2x8x8xf32> to vector<2x1x8x8xf32>
    %376 = vector.extract_strided_slice %1 {offsets = [37, 0, 0, 0], sizes = [1, 4, 8, 8], strides = [1, 1, 1, 1]} : vector<64x4x8x8xf32> to vector<1x4x8x8xf32>
    %377 = vector.shape_cast %376 : vector<1x4x8x8xf32> to vector<4x8x8xf32>
    %378 = vector.shape_cast %377 : vector<4x8x8xf32> to vector<1x4x8x8xf32>
    %379 = vector.broadcast %375 : vector<2x1x8x8xf32> to vector<2x4x8x8xf32>
    %380 = vector.broadcast %378 : vector<1x4x8x8xf32> to vector<2x4x8x8xf32>
    %381 = arith.mulf %379, %380 : vector<2x4x8x8xf32>
    %382 = arith.addf %372, %381 : vector<2x4x8x8xf32>
    %383 = vector.extract_strided_slice %0 {offsets = [0, 2, 1, 2], sizes = [2, 1, 8, 8], strides = [1, 1, 1, 1]} : vector<2x4x11x11xf32> to vector<2x1x8x8xf32>
    %384 = vector.shape_cast %383 : vector<2x1x8x8xf32> to vector<2x8x8xf32>
    %385 = vector.shape_cast %384 : vector<2x8x8xf32> to vector<2x1x8x8xf32>
    %386 = vector.extract_strided_slice %1 {offsets = [38, 0, 0, 0], sizes = [1, 4, 8, 8], strides = [1, 1, 1, 1]} : vector<64x4x8x8xf32> to vector<1x4x8x8xf32>
    %387 = vector.shape_cast %386 : vector<1x4x8x8xf32> to vector<4x8x8xf32>
    %388 = vector.shape_cast %387 : vector<4x8x8xf32> to vector<1x4x8x8xf32>
    %389 = vector.broadcast %385 : vector<2x1x8x8xf32> to vector<2x4x8x8xf32>
    %390 = vector.broadcast %388 : vector<1x4x8x8xf32> to vector<2x4x8x8xf32>
    %391 = arith.mulf %389, %390 : vector<2x4x8x8xf32>
    %392 = arith.addf %382, %391 : vector<2x4x8x8xf32>
    %393 = vector.extract_strided_slice %0 {offsets = [0, 2, 1, 3], sizes = [2, 1, 8, 8], strides = [1, 1, 1, 1]} : vector<2x4x11x11xf32> to vector<2x1x8x8xf32>
    %394 = vector.shape_cast %393 : vector<2x1x8x8xf32> to vector<2x8x8xf32>
    %395 = vector.shape_cast %394 : vector<2x8x8xf32> to vector<2x1x8x8xf32>
    %396 = vector.extract_strided_slice %1 {offsets = [39, 0, 0, 0], sizes = [1, 4, 8, 8], strides = [1, 1, 1, 1]} : vector<64x4x8x8xf32> to vector<1x4x8x8xf32>
    %397 = vector.shape_cast %396 : vector<1x4x8x8xf32> to vector<4x8x8xf32>
    %398 = vector.shape_cast %397 : vector<4x8x8xf32> to vector<1x4x8x8xf32>
    %399 = vector.broadcast %395 : vector<2x1x8x8xf32> to vector<2x4x8x8xf32>
    %400 = vector.broadcast %398 : vector<1x4x8x8xf32> to vector<2x4x8x8xf32>
    %401 = arith.mulf %399, %400 : vector<2x4x8x8xf32>
    %402 = arith.addf %392, %401 : vector<2x4x8x8xf32>
    %403 = vector.extract_strided_slice %0 {offsets = [0, 2, 2, 0], sizes = [2, 1, 8, 8], strides = [1, 1, 1, 1]} : vector<2x4x11x11xf32> to vector<2x1x8x8xf32>
    %404 = vector.shape_cast %403 : vector<2x1x8x8xf32> to vector<2x8x8xf32>
    %405 = vector.shape_cast %404 : vector<2x8x8xf32> to vector<2x1x8x8xf32>
    %406 = vector.extract_strided_slice %1 {offsets = [40, 0, 0, 0], sizes = [1, 4, 8, 8], strides = [1, 1, 1, 1]} : vector<64x4x8x8xf32> to vector<1x4x8x8xf32>
    %407 = vector.shape_cast %406 : vector<1x4x8x8xf32> to vector<4x8x8xf32>
    %408 = vector.shape_cast %407 : vector<4x8x8xf32> to vector<1x4x8x8xf32>
    %409 = vector.broadcast %405 : vector<2x1x8x8xf32> to vector<2x4x8x8xf32>
    %410 = vector.broadcast %408 : vector<1x4x8x8xf32> to vector<2x4x8x8xf32>
    %411 = arith.mulf %409, %410 : vector<2x4x8x8xf32>
    %412 = arith.addf %402, %411 : vector<2x4x8x8xf32>
    %413 = vector.extract_strided_slice %0 {offsets = [0, 2, 2, 1], sizes = [2, 1, 8, 8], strides = [1, 1, 1, 1]} : vector<2x4x11x11xf32> to vector<2x1x8x8xf32>
    %414 = vector.shape_cast %413 : vector<2x1x8x8xf32> to vector<2x8x8xf32>
    %415 = vector.shape_cast %414 : vector<2x8x8xf32> to vector<2x1x8x8xf32>
    %416 = vector.extract_strided_slice %1 {offsets = [41, 0, 0, 0], sizes = [1, 4, 8, 8], strides = [1, 1, 1, 1]} : vector<64x4x8x8xf32> to vector<1x4x8x8xf32>
    %417 = vector.shape_cast %416 : vector<1x4x8x8xf32> to vector<4x8x8xf32>
    %418 = vector.shape_cast %417 : vector<4x8x8xf32> to vector<1x4x8x8xf32>
    %419 = vector.broadcast %415 : vector<2x1x8x8xf32> to vector<2x4x8x8xf32>
    %420 = vector.broadcast %418 : vector<1x4x8x8xf32> to vector<2x4x8x8xf32>
    %421 = arith.mulf %419, %420 : vector<2x4x8x8xf32>
    %422 = arith.addf %412, %421 : vector<2x4x8x8xf32>
    %423 = vector.extract_strided_slice %0 {offsets = [0, 2, 2, 2], sizes = [2, 1, 8, 8], strides = [1, 1, 1, 1]} : vector<2x4x11x11xf32> to vector<2x1x8x8xf32>
    %424 = vector.shape_cast %423 : vector<2x1x8x8xf32> to vector<2x8x8xf32>
    %425 = vector.shape_cast %424 : vector<2x8x8xf32> to vector<2x1x8x8xf32>
    %426 = vector.extract_strided_slice %1 {offsets = [42, 0, 0, 0], sizes = [1, 4, 8, 8], strides = [1, 1, 1, 1]} : vector<64x4x8x8xf32> to vector<1x4x8x8xf32>
    %427 = vector.shape_cast %426 : vector<1x4x8x8xf32> to vector<4x8x8xf32>
    %428 = vector.shape_cast %427 : vector<4x8x8xf32> to vector<1x4x8x8xf32>
    %429 = vector.broadcast %425 : vector<2x1x8x8xf32> to vector<2x4x8x8xf32>
    %430 = vector.broadcast %428 : vector<1x4x8x8xf32> to vector<2x4x8x8xf32>
    %431 = arith.mulf %429, %430 : vector<2x4x8x8xf32>
    %432 = arith.addf %422, %431 : vector<2x4x8x8xf32>
    %433 = vector.extract_strided_slice %0 {offsets = [0, 2, 2, 3], sizes = [2, 1, 8, 8], strides = [1, 1, 1, 1]} : vector<2x4x11x11xf32> to vector<2x1x8x8xf32>
    %434 = vector.shape_cast %433 : vector<2x1x8x8xf32> to vector<2x8x8xf32>
    %435 = vector.shape_cast %434 : vector<2x8x8xf32> to vector<2x1x8x8xf32>
    %436 = vector.extract_strided_slice %1 {offsets = [43, 0, 0, 0], sizes = [1, 4, 8, 8], strides = [1, 1, 1, 1]} : vector<64x4x8x8xf32> to vector<1x4x8x8xf32>
    %437 = vector.shape_cast %436 : vector<1x4x8x8xf32> to vector<4x8x8xf32>
    %438 = vector.shape_cast %437 : vector<4x8x8xf32> to vector<1x4x8x8xf32>
    %439 = vector.broadcast %435 : vector<2x1x8x8xf32> to vector<2x4x8x8xf32>
    %440 = vector.broadcast %438 : vector<1x4x8x8xf32> to vector<2x4x8x8xf32>
    %441 = arith.mulf %439, %440 : vector<2x4x8x8xf32>
    %442 = arith.addf %432, %441 : vector<2x4x8x8xf32>
    %443 = vector.extract_strided_slice %0 {offsets = [0, 2, 3, 0], sizes = [2, 1, 8, 8], strides = [1, 1, 1, 1]} : vector<2x4x11x11xf32> to vector<2x1x8x8xf32>
    %444 = vector.shape_cast %443 : vector<2x1x8x8xf32> to vector<2x8x8xf32>
    %445 = vector.shape_cast %444 : vector<2x8x8xf32> to vector<2x1x8x8xf32>
    %446 = vector.extract_strided_slice %1 {offsets = [44, 0, 0, 0], sizes = [1, 4, 8, 8], strides = [1, 1, 1, 1]} : vector<64x4x8x8xf32> to vector<1x4x8x8xf32>
    %447 = vector.shape_cast %446 : vector<1x4x8x8xf32> to vector<4x8x8xf32>
    %448 = vector.shape_cast %447 : vector<4x8x8xf32> to vector<1x4x8x8xf32>
    %449 = vector.broadcast %445 : vector<2x1x8x8xf32> to vector<2x4x8x8xf32>
    %450 = vector.broadcast %448 : vector<1x4x8x8xf32> to vector<2x4x8x8xf32>
    %451 = arith.mulf %449, %450 : vector<2x4x8x8xf32>
    %452 = arith.addf %442, %451 : vector<2x4x8x8xf32>
    %453 = vector.extract_strided_slice %0 {offsets = [0, 2, 3, 1], sizes = [2, 1, 8, 8], strides = [1, 1, 1, 1]} : vector<2x4x11x11xf32> to vector<2x1x8x8xf32>
    %454 = vector.shape_cast %453 : vector<2x1x8x8xf32> to vector<2x8x8xf32>
    %455 = vector.shape_cast %454 : vector<2x8x8xf32> to vector<2x1x8x8xf32>
    %456 = vector.extract_strided_slice %1 {offsets = [45, 0, 0, 0], sizes = [1, 4, 8, 8], strides = [1, 1, 1, 1]} : vector<64x4x8x8xf32> to vector<1x4x8x8xf32>
    %457 = vector.shape_cast %456 : vector<1x4x8x8xf32> to vector<4x8x8xf32>
    %458 = vector.shape_cast %457 : vector<4x8x8xf32> to vector<1x4x8x8xf32>
    %459 = vector.broadcast %455 : vector<2x1x8x8xf32> to vector<2x4x8x8xf32>
    %460 = vector.broadcast %458 : vector<1x4x8x8xf32> to vector<2x4x8x8xf32>
    %461 = arith.mulf %459, %460 : vector<2x4x8x8xf32>
    %462 = arith.addf %452, %461 : vector<2x4x8x8xf32>
    %463 = vector.extract_strided_slice %0 {offsets = [0, 2, 3, 2], sizes = [2, 1, 8, 8], strides = [1, 1, 1, 1]} : vector<2x4x11x11xf32> to vector<2x1x8x8xf32>
    %464 = vector.shape_cast %463 : vector<2x1x8x8xf32> to vector<2x8x8xf32>
    %465 = vector.shape_cast %464 : vector<2x8x8xf32> to vector<2x1x8x8xf32>
    %466 = vector.extract_strided_slice %1 {offsets = [46, 0, 0, 0], sizes = [1, 4, 8, 8], strides = [1, 1, 1, 1]} : vector<64x4x8x8xf32> to vector<1x4x8x8xf32>
    %467 = vector.shape_cast %466 : vector<1x4x8x8xf32> to vector<4x8x8xf32>
    %468 = vector.shape_cast %467 : vector<4x8x8xf32> to vector<1x4x8x8xf32>
    %469 = vector.broadcast %465 : vector<2x1x8x8xf32> to vector<2x4x8x8xf32>
    %470 = vector.broadcast %468 : vector<1x4x8x8xf32> to vector<2x4x8x8xf32>
    %471 = arith.mulf %469, %470 : vector<2x4x8x8xf32>
    %472 = arith.addf %462, %471 : vector<2x4x8x8xf32>
    %473 = vector.extract_strided_slice %0 {offsets = [0, 2, 3, 3], sizes = [2, 1, 8, 8], strides = [1, 1, 1, 1]} : vector<2x4x11x11xf32> to vector<2x1x8x8xf32>
    %474 = vector.shape_cast %473 : vector<2x1x8x8xf32> to vector<2x8x8xf32>
    %475 = vector.shape_cast %474 : vector<2x8x8xf32> to vector<2x1x8x8xf32>
    %476 = vector.extract_strided_slice %1 {offsets = [47, 0, 0, 0], sizes = [1, 4, 8, 8], strides = [1, 1, 1, 1]} : vector<64x4x8x8xf32> to vector<1x4x8x8xf32>
    %477 = vector.shape_cast %476 : vector<1x4x8x8xf32> to vector<4x8x8xf32>
    %478 = vector.shape_cast %477 : vector<4x8x8xf32> to vector<1x4x8x8xf32>
    %479 = vector.broadcast %475 : vector<2x1x8x8xf32> to vector<2x4x8x8xf32>
    %480 = vector.broadcast %478 : vector<1x4x8x8xf32> to vector<2x4x8x8xf32>
    %481 = arith.mulf %479, %480 : vector<2x4x8x8xf32>
    %482 = arith.addf %472, %481 : vector<2x4x8x8xf32>
    %483 = vector.extract_strided_slice %0 {offsets = [0, 3, 0, 0], sizes = [2, 1, 8, 8], strides = [1, 1, 1, 1]} : vector<2x4x11x11xf32> to vector<2x1x8x8xf32>
    %484 = vector.shape_cast %483 : vector<2x1x8x8xf32> to vector<2x8x8xf32>
    %485 = vector.shape_cast %484 : vector<2x8x8xf32> to vector<2x1x8x8xf32>
    %486 = vector.extract_strided_slice %1 {offsets = [48, 0, 0, 0], sizes = [1, 4, 8, 8], strides = [1, 1, 1, 1]} : vector<64x4x8x8xf32> to vector<1x4x8x8xf32>
    %487 = vector.shape_cast %486 : vector<1x4x8x8xf32> to vector<4x8x8xf32>
    %488 = vector.shape_cast %487 : vector<4x8x8xf32> to vector<1x4x8x8xf32>
    %489 = vector.broadcast %485 : vector<2x1x8x8xf32> to vector<2x4x8x8xf32>
    %490 = vector.broadcast %488 : vector<1x4x8x8xf32> to vector<2x4x8x8xf32>
    %491 = arith.mulf %489, %490 : vector<2x4x8x8xf32>
    %492 = arith.addf %482, %491 : vector<2x4x8x8xf32>
    %493 = vector.extract_strided_slice %0 {offsets = [0, 3, 0, 1], sizes = [2, 1, 8, 8], strides = [1, 1, 1, 1]} : vector<2x4x11x11xf32> to vector<2x1x8x8xf32>
    %494 = vector.shape_cast %493 : vector<2x1x8x8xf32> to vector<2x8x8xf32>
    %495 = vector.shape_cast %494 : vector<2x8x8xf32> to vector<2x1x8x8xf32>
    %496 = vector.extract_strided_slice %1 {offsets = [49, 0, 0, 0], sizes = [1, 4, 8, 8], strides = [1, 1, 1, 1]} : vector<64x4x8x8xf32> to vector<1x4x8x8xf32>
    %497 = vector.shape_cast %496 : vector<1x4x8x8xf32> to vector<4x8x8xf32>
    %498 = vector.shape_cast %497 : vector<4x8x8xf32> to vector<1x4x8x8xf32>
    %499 = vector.broadcast %495 : vector<2x1x8x8xf32> to vector<2x4x8x8xf32>
    %500 = vector.broadcast %498 : vector<1x4x8x8xf32> to vector<2x4x8x8xf32>
    %501 = arith.mulf %499, %500 : vector<2x4x8x8xf32>
    %502 = arith.addf %492, %501 : vector<2x4x8x8xf32>
    %503 = vector.extract_strided_slice %0 {offsets = [0, 3, 0, 2], sizes = [2, 1, 8, 8], strides = [1, 1, 1, 1]} : vector<2x4x11x11xf32> to vector<2x1x8x8xf32>
    %504 = vector.shape_cast %503 : vector<2x1x8x8xf32> to vector<2x8x8xf32>
    %505 = vector.shape_cast %504 : vector<2x8x8xf32> to vector<2x1x8x8xf32>
    %506 = vector.extract_strided_slice %1 {offsets = [50, 0, 0, 0], sizes = [1, 4, 8, 8], strides = [1, 1, 1, 1]} : vector<64x4x8x8xf32> to vector<1x4x8x8xf32>
    %507 = vector.shape_cast %506 : vector<1x4x8x8xf32> to vector<4x8x8xf32>
    %508 = vector.shape_cast %507 : vector<4x8x8xf32> to vector<1x4x8x8xf32>
    %509 = vector.broadcast %505 : vector<2x1x8x8xf32> to vector<2x4x8x8xf32>
    %510 = vector.broadcast %508 : vector<1x4x8x8xf32> to vector<2x4x8x8xf32>
    %511 = arith.mulf %509, %510 : vector<2x4x8x8xf32>
    %512 = arith.addf %502, %511 : vector<2x4x8x8xf32>
    %513 = vector.extract_strided_slice %0 {offsets = [0, 3, 0, 3], sizes = [2, 1, 8, 8], strides = [1, 1, 1, 1]} : vector<2x4x11x11xf32> to vector<2x1x8x8xf32>
    %514 = vector.shape_cast %513 : vector<2x1x8x8xf32> to vector<2x8x8xf32>
    %515 = vector.shape_cast %514 : vector<2x8x8xf32> to vector<2x1x8x8xf32>
    %516 = vector.extract_strided_slice %1 {offsets = [51, 0, 0, 0], sizes = [1, 4, 8, 8], strides = [1, 1, 1, 1]} : vector<64x4x8x8xf32> to vector<1x4x8x8xf32>
    %517 = vector.shape_cast %516 : vector<1x4x8x8xf32> to vector<4x8x8xf32>
    %518 = vector.shape_cast %517 : vector<4x8x8xf32> to vector<1x4x8x8xf32>
    %519 = vector.broadcast %515 : vector<2x1x8x8xf32> to vector<2x4x8x8xf32>
    %520 = vector.broadcast %518 : vector<1x4x8x8xf32> to vector<2x4x8x8xf32>
    %521 = arith.mulf %519, %520 : vector<2x4x8x8xf32>
    %522 = arith.addf %512, %521 : vector<2x4x8x8xf32>
    %523 = vector.extract_strided_slice %0 {offsets = [0, 3, 1, 0], sizes = [2, 1, 8, 8], strides = [1, 1, 1, 1]} : vector<2x4x11x11xf32> to vector<2x1x8x8xf32>
    %524 = vector.shape_cast %523 : vector<2x1x8x8xf32> to vector<2x8x8xf32>
    %525 = vector.shape_cast %524 : vector<2x8x8xf32> to vector<2x1x8x8xf32>
    %526 = vector.extract_strided_slice %1 {offsets = [52, 0, 0, 0], sizes = [1, 4, 8, 8], strides = [1, 1, 1, 1]} : vector<64x4x8x8xf32> to vector<1x4x8x8xf32>
    %527 = vector.shape_cast %526 : vector<1x4x8x8xf32> to vector<4x8x8xf32>
    %528 = vector.shape_cast %527 : vector<4x8x8xf32> to vector<1x4x8x8xf32>
    %529 = vector.broadcast %525 : vector<2x1x8x8xf32> to vector<2x4x8x8xf32>
    %530 = vector.broadcast %528 : vector<1x4x8x8xf32> to vector<2x4x8x8xf32>
    %531 = arith.mulf %529, %530 : vector<2x4x8x8xf32>
    %532 = arith.addf %522, %531 : vector<2x4x8x8xf32>
    %533 = vector.extract_strided_slice %0 {offsets = [0, 3, 1, 1], sizes = [2, 1, 8, 8], strides = [1, 1, 1, 1]} : vector<2x4x11x11xf32> to vector<2x1x8x8xf32>
    %534 = vector.shape_cast %533 : vector<2x1x8x8xf32> to vector<2x8x8xf32>
    %535 = vector.shape_cast %534 : vector<2x8x8xf32> to vector<2x1x8x8xf32>
    %536 = vector.extract_strided_slice %1 {offsets = [53, 0, 0, 0], sizes = [1, 4, 8, 8], strides = [1, 1, 1, 1]} : vector<64x4x8x8xf32> to vector<1x4x8x8xf32>
    %537 = vector.shape_cast %536 : vector<1x4x8x8xf32> to vector<4x8x8xf32>
    %538 = vector.shape_cast %537 : vector<4x8x8xf32> to vector<1x4x8x8xf32>
    %539 = vector.broadcast %535 : vector<2x1x8x8xf32> to vector<2x4x8x8xf32>
    %540 = vector.broadcast %538 : vector<1x4x8x8xf32> to vector<2x4x8x8xf32>
    %541 = arith.mulf %539, %540 : vector<2x4x8x8xf32>
    %542 = arith.addf %532, %541 : vector<2x4x8x8xf32>
    %543 = vector.extract_strided_slice %0 {offsets = [0, 3, 1, 2], sizes = [2, 1, 8, 8], strides = [1, 1, 1, 1]} : vector<2x4x11x11xf32> to vector<2x1x8x8xf32>
    %544 = vector.shape_cast %543 : vector<2x1x8x8xf32> to vector<2x8x8xf32>
    %545 = vector.shape_cast %544 : vector<2x8x8xf32> to vector<2x1x8x8xf32>
    %546 = vector.extract_strided_slice %1 {offsets = [54, 0, 0, 0], sizes = [1, 4, 8, 8], strides = [1, 1, 1, 1]} : vector<64x4x8x8xf32> to vector<1x4x8x8xf32>
    %547 = vector.shape_cast %546 : vector<1x4x8x8xf32> to vector<4x8x8xf32>
    %548 = vector.shape_cast %547 : vector<4x8x8xf32> to vector<1x4x8x8xf32>
    %549 = vector.broadcast %545 : vector<2x1x8x8xf32> to vector<2x4x8x8xf32>
    %550 = vector.broadcast %548 : vector<1x4x8x8xf32> to vector<2x4x8x8xf32>
    %551 = arith.mulf %549, %550 : vector<2x4x8x8xf32>
    %552 = arith.addf %542, %551 : vector<2x4x8x8xf32>
    %553 = vector.extract_strided_slice %0 {offsets = [0, 3, 1, 3], sizes = [2, 1, 8, 8], strides = [1, 1, 1, 1]} : vector<2x4x11x11xf32> to vector<2x1x8x8xf32>
    %554 = vector.shape_cast %553 : vector<2x1x8x8xf32> to vector<2x8x8xf32>
    %555 = vector.shape_cast %554 : vector<2x8x8xf32> to vector<2x1x8x8xf32>
    %556 = vector.extract_strided_slice %1 {offsets = [55, 0, 0, 0], sizes = [1, 4, 8, 8], strides = [1, 1, 1, 1]} : vector<64x4x8x8xf32> to vector<1x4x8x8xf32>
    %557 = vector.shape_cast %556 : vector<1x4x8x8xf32> to vector<4x8x8xf32>
    %558 = vector.shape_cast %557 : vector<4x8x8xf32> to vector<1x4x8x8xf32>
    %559 = vector.broadcast %555 : vector<2x1x8x8xf32> to vector<2x4x8x8xf32>
    %560 = vector.broadcast %558 : vector<1x4x8x8xf32> to vector<2x4x8x8xf32>
    %561 = arith.mulf %559, %560 : vector<2x4x8x8xf32>
    %562 = arith.addf %552, %561 : vector<2x4x8x8xf32>
    %563 = vector.extract_strided_slice %0 {offsets = [0, 3, 2, 0], sizes = [2, 1, 8, 8], strides = [1, 1, 1, 1]} : vector<2x4x11x11xf32> to vector<2x1x8x8xf32>
    %564 = vector.shape_cast %563 : vector<2x1x8x8xf32> to vector<2x8x8xf32>
    %565 = vector.shape_cast %564 : vector<2x8x8xf32> to vector<2x1x8x8xf32>
    %566 = vector.extract_strided_slice %1 {offsets = [56, 0, 0, 0], sizes = [1, 4, 8, 8], strides = [1, 1, 1, 1]} : vector<64x4x8x8xf32> to vector<1x4x8x8xf32>
    %567 = vector.shape_cast %566 : vector<1x4x8x8xf32> to vector<4x8x8xf32>
    %568 = vector.shape_cast %567 : vector<4x8x8xf32> to vector<1x4x8x8xf32>
    %569 = vector.broadcast %565 : vector<2x1x8x8xf32> to vector<2x4x8x8xf32>
    %570 = vector.broadcast %568 : vector<1x4x8x8xf32> to vector<2x4x8x8xf32>
    %571 = arith.mulf %569, %570 : vector<2x4x8x8xf32>
    %572 = arith.addf %562, %571 : vector<2x4x8x8xf32>
    %573 = vector.extract_strided_slice %0 {offsets = [0, 3, 2, 1], sizes = [2, 1, 8, 8], strides = [1, 1, 1, 1]} : vector<2x4x11x11xf32> to vector<2x1x8x8xf32>
    %574 = vector.shape_cast %573 : vector<2x1x8x8xf32> to vector<2x8x8xf32>
    %575 = vector.shape_cast %574 : vector<2x8x8xf32> to vector<2x1x8x8xf32>
    %576 = vector.extract_strided_slice %1 {offsets = [57, 0, 0, 0], sizes = [1, 4, 8, 8], strides = [1, 1, 1, 1]} : vector<64x4x8x8xf32> to vector<1x4x8x8xf32>
    %577 = vector.shape_cast %576 : vector<1x4x8x8xf32> to vector<4x8x8xf32>
    %578 = vector.shape_cast %577 : vector<4x8x8xf32> to vector<1x4x8x8xf32>
    %579 = vector.broadcast %575 : vector<2x1x8x8xf32> to vector<2x4x8x8xf32>
    %580 = vector.broadcast %578 : vector<1x4x8x8xf32> to vector<2x4x8x8xf32>
    %581 = arith.mulf %579, %580 : vector<2x4x8x8xf32>
    %582 = arith.addf %572, %581 : vector<2x4x8x8xf32>
    %583 = vector.extract_strided_slice %0 {offsets = [0, 3, 2, 2], sizes = [2, 1, 8, 8], strides = [1, 1, 1, 1]} : vector<2x4x11x11xf32> to vector<2x1x8x8xf32>
    %584 = vector.shape_cast %583 : vector<2x1x8x8xf32> to vector<2x8x8xf32>
    %585 = vector.shape_cast %584 : vector<2x8x8xf32> to vector<2x1x8x8xf32>
    %586 = vector.extract_strided_slice %1 {offsets = [58, 0, 0, 0], sizes = [1, 4, 8, 8], strides = [1, 1, 1, 1]} : vector<64x4x8x8xf32> to vector<1x4x8x8xf32>
    %587 = vector.shape_cast %586 : vector<1x4x8x8xf32> to vector<4x8x8xf32>
    %588 = vector.shape_cast %587 : vector<4x8x8xf32> to vector<1x4x8x8xf32>
    %589 = vector.broadcast %585 : vector<2x1x8x8xf32> to vector<2x4x8x8xf32>
    %590 = vector.broadcast %588 : vector<1x4x8x8xf32> to vector<2x4x8x8xf32>
    %591 = arith.mulf %589, %590 : vector<2x4x8x8xf32>
    %592 = arith.addf %582, %591 : vector<2x4x8x8xf32>
    %593 = vector.extract_strided_slice %0 {offsets = [0, 3, 2, 3], sizes = [2, 1, 8, 8], strides = [1, 1, 1, 1]} : vector<2x4x11x11xf32> to vector<2x1x8x8xf32>
    %594 = vector.shape_cast %593 : vector<2x1x8x8xf32> to vector<2x8x8xf32>
    %595 = vector.shape_cast %594 : vector<2x8x8xf32> to vector<2x1x8x8xf32>
    %596 = vector.extract_strided_slice %1 {offsets = [59, 0, 0, 0], sizes = [1, 4, 8, 8], strides = [1, 1, 1, 1]} : vector<64x4x8x8xf32> to vector<1x4x8x8xf32>
    %597 = vector.shape_cast %596 : vector<1x4x8x8xf32> to vector<4x8x8xf32>
    %598 = vector.shape_cast %597 : vector<4x8x8xf32> to vector<1x4x8x8xf32>
    %599 = vector.broadcast %595 : vector<2x1x8x8xf32> to vector<2x4x8x8xf32>
    %600 = vector.broadcast %598 : vector<1x4x8x8xf32> to vector<2x4x8x8xf32>
    %601 = arith.mulf %599, %600 : vector<2x4x8x8xf32>
    %602 = arith.addf %592, %601 : vector<2x4x8x8xf32>
    %603 = vector.extract_strided_slice %0 {offsets = [0, 3, 3, 0], sizes = [2, 1, 8, 8], strides = [1, 1, 1, 1]} : vector<2x4x11x11xf32> to vector<2x1x8x8xf32>
    %604 = vector.shape_cast %603 : vector<2x1x8x8xf32> to vector<2x8x8xf32>
    %605 = vector.shape_cast %604 : vector<2x8x8xf32> to vector<2x1x8x8xf32>
    %606 = vector.extract_strided_slice %1 {offsets = [60, 0, 0, 0], sizes = [1, 4, 8, 8], strides = [1, 1, 1, 1]} : vector<64x4x8x8xf32> to vector<1x4x8x8xf32>
    %607 = vector.shape_cast %606 : vector<1x4x8x8xf32> to vector<4x8x8xf32>
    %608 = vector.shape_cast %607 : vector<4x8x8xf32> to vector<1x4x8x8xf32>
    %609 = vector.broadcast %605 : vector<2x1x8x8xf32> to vector<2x4x8x8xf32>
    %610 = vector.broadcast %608 : vector<1x4x8x8xf32> to vector<2x4x8x8xf32>
    %611 = arith.mulf %609, %610 : vector<2x4x8x8xf32>
    %612 = arith.addf %602, %611 : vector<2x4x8x8xf32>
    %613 = vector.extract_strided_slice %0 {offsets = [0, 3, 3, 1], sizes = [2, 1, 8, 8], strides = [1, 1, 1, 1]} : vector<2x4x11x11xf32> to vector<2x1x8x8xf32>
    %614 = vector.shape_cast %613 : vector<2x1x8x8xf32> to vector<2x8x8xf32>
    %615 = vector.shape_cast %614 : vector<2x8x8xf32> to vector<2x1x8x8xf32>
    %616 = vector.extract_strided_slice %1 {offsets = [61, 0, 0, 0], sizes = [1, 4, 8, 8], strides = [1, 1, 1, 1]} : vector<64x4x8x8xf32> to vector<1x4x8x8xf32>
    %617 = vector.shape_cast %616 : vector<1x4x8x8xf32> to vector<4x8x8xf32>
    %618 = vector.shape_cast %617 : vector<4x8x8xf32> to vector<1x4x8x8xf32>
    %619 = vector.broadcast %615 : vector<2x1x8x8xf32> to vector<2x4x8x8xf32>
    %620 = vector.broadcast %618 : vector<1x4x8x8xf32> to vector<2x4x8x8xf32>
    %621 = arith.mulf %619, %620 : vector<2x4x8x8xf32>
    %622 = arith.addf %612, %621 : vector<2x4x8x8xf32>
    %623 = vector.extract_strided_slice %0 {offsets = [0, 3, 3, 2], sizes = [2, 1, 8, 8], strides = [1, 1, 1, 1]} : vector<2x4x11x11xf32> to vector<2x1x8x8xf32>
    %624 = vector.shape_cast %623 : vector<2x1x8x8xf32> to vector<2x8x8xf32>
    %625 = vector.shape_cast %624 : vector<2x8x8xf32> to vector<2x1x8x8xf32>
    %626 = vector.extract_strided_slice %1 {offsets = [62, 0, 0, 0], sizes = [1, 4, 8, 8], strides = [1, 1, 1, 1]} : vector<64x4x8x8xf32> to vector<1x4x8x8xf32>
    %627 = vector.shape_cast %626 : vector<1x4x8x8xf32> to vector<4x8x8xf32>
    %628 = vector.shape_cast %627 : vector<4x8x8xf32> to vector<1x4x8x8xf32>
    %629 = vector.broadcast %625 : vector<2x1x8x8xf32> to vector<2x4x8x8xf32>
    %630 = vector.broadcast %628 : vector<1x4x8x8xf32> to vector<2x4x8x8xf32>
    %631 = arith.mulf %629, %630 : vector<2x4x8x8xf32>
    %632 = arith.addf %622, %631 : vector<2x4x8x8xf32>
    %633 = vector.extract_strided_slice %0 {offsets = [0, 3, 3, 3], sizes = [2, 1, 8, 8], strides = [1, 1, 1, 1]} : vector<2x4x11x11xf32> to vector<2x1x8x8xf32>
    %634 = vector.shape_cast %633 : vector<2x1x8x8xf32> to vector<2x8x8xf32>
    %635 = vector.shape_cast %634 : vector<2x8x8xf32> to vector<2x1x8x8xf32>
    %636 = vector.extract_strided_slice %1 {offsets = [63, 0, 0, 0], sizes = [1, 4, 8, 8], strides = [1, 1, 1, 1]} : vector<64x4x8x8xf32> to vector<1x4x8x8xf32>
    %637 = vector.shape_cast %636 : vector<1x4x8x8xf32> to vector<4x8x8xf32>
    %638 = vector.shape_cast %637 : vector<4x8x8xf32> to vector<1x4x8x8xf32>
    %639 = vector.broadcast %635 : vector<2x1x8x8xf32> to vector<2x4x8x8xf32>
    %640 = vector.broadcast %638 : vector<1x4x8x8xf32> to vector<2x4x8x8xf32>
    %641 = arith.mulf %639, %640 : vector<2x4x8x8xf32>
    %642 = arith.addf %632, %641 : vector<2x4x8x8xf32>
    %643 = vector.shape_cast %642 : vector<2x4x8x8xf32> to vector<64x8xf32>
    %c0_7 = arith.constant 0 : index
    %c0_8 = arith.constant 0 : index
    %644 = vector.load %arg2[%c0_7, %c0_8] : memref<8x512xf32, #tpu.memory_space<vmem>>, vector<8x512xf32>
    %cst_9 = arith.constant dense<0.000000e+00> : vector<64x512xf32>
    %645 = tpu.matmul %643, %644, %cst_9 {dimension_numbers = #tpu.dot_dimension_numbers<[1], [0], [0], [1], [0, 0, 1, 1], [], []>} : vector<64x8xf32>, vector<8x512xf32>, vector<64x512xf32> -> vector<64x512xf32>
    %c0_10 = arith.constant 0 : index
    %c0_11 = arith.constant 0 : index
    %646 = vector.load %arg3[%c0_10, %c0_11] : memref<1x512xf32, #tpu.memory_space<vmem>>, vector<1x512xf32>
    %647 = vector.broadcast %646 : vector<1x512xf32> to vector<64x512xf32>
    %648 = arith.addf %645, %647 : vector<64x512xf32>
    %c0_12 = arith.constant 0 : index
    %c0_13 = arith.constant 0 : index
    %649 = vector.load %arg4[%c0_12, %c0_13] : memref<64x512xf32, #tpu.memory_space<vmem>>, vector<64x512xf32>
    tpu.vector_store %arg4[%c0_12, %c0_13], %648 {strides = array<i32>} : memref<64x512xf32, #tpu.memory_space<vmem>>, vector<64x512xf32>,
    return
  }
}

</mosaic_0001>

<bundles_post_ra>
// kernel: _lambda_.1
= control target key start
LH: loop header
LB: loop body
LE: loop exit
PB: predicated region body
PF: predicated region fallthrough
CT: control target
= control target key end

     0   :  { %s6434_s19 = smov 1   ;;  %s6435_s28 = smov 2   ;;  %s11294_s0 = inlined_call_operand.vmem [shape: f32[2,4,11,11], index: 0, kind: input, shape index: {}]   ;;  %s11295_s1 = inlined_call_operand.vmem [shape: f32[64,4,8,8], index: 1, kind: input, shape index: {}]   ;;  %s11296_s2 = inlined_call_operand.vmem [shape: f32[8,512], index: 2, kind: input, shape index: {}]   ;;  %s11297_s3 = inlined_call_operand.vmem [shape: f32[1,512], index: 3, kind: input, shape index: {}]   ;;  %s11298_s4 = inlined_call_operand.hbm [shape: f32[64,512], index: 4, kind: output, shape index: {}]  }
   0x1   :  { %v38_v0 = vld [vmem:[%s11295_s1 + $0x20] sm:$0xff]  ;;  %v40_v1 = vld [vmem:[%s11295_s1 + $0x30] sm:$0xff]  ;;  %v39_v2 = vld [vmem:[%s11295_s1 + $0x28] sm:$0xff] }
   0x2   :  { %310 = vrot.lane.b32.xlu0 %v38_v0, %s6434_s19  ;;  %314 = vrot.lane.b32.xlu1 %v40_v1, %s6434_s19  ;;  %v41_v3 = vld [vmem:[%s11295_s1 + $0x38] sm:$0xff]  ;;  %v42_v4 = vld [vmem:[%s11295_s1 + $0x40] sm:$0xff] }
   0x3   :  { %v43_v5 = vld [vmem:[%s11295_s1 + $0x48] sm:$0xff] }
   0x6   :  { %312 = vrot.lane.b32.xlu0 %v39_v2, %s6434_s19  ;;  %316 = vrot.lane.b32.xlu1 %v41_v3, %s6434_s19 }
   0xa   :  { %374 = vrot.lane.b32.xlu0 %v42_v4, %s6435_s28  ;;  %376 = vrot.lane.b32.xlu1 %v43_v5, %s6435_s28 }
   0xb   :  { %9 = vsyncpa [#allocation3], 0  ;;  %v44_v6 = vld [vmem:[%s11295_s1 + $0x50] sm:$0xff]  ;;  %v45_v7 = vld [vmem:[%s11295_s1 + $0x58] sm:$0xff]  ;;  %s6436_s11 = smov 3   ;;  %s6437_s15 = smov 127  }
   0xc   :  { %v46_v8 = vld [vmem:[%s11295_s1 + $0x60] sm:$0xff]  ;;  %v47_v9 = vld [vmem:[%s11295_s1 + $0x68] sm:$0xff]  ;;  %v48_v10 = vld [vmem:[%s11295_s1 + $0x70] sm:$0xff]  ;;  %s6438_s18 = smov 126   ;;  %s6439_s20 = smov 125   ;;  %vm542_vm0 = vcmask 1046528  }
   0xd   :  { %v49_v11 = vld [vmem:[%s11295_s1 + $0x78] sm:$0xff]  ;;  %v54_v12 = vld [vmem:[%s11295_s1 + $0xa0] sm:$0xff]  ;;  %v55_v13 = vld [vmem:[%s11295_s1 + $0xa8] sm:$0xff]  ;;  %vm951_vm1 = vcmask 1045504   ;;  %vm1360_vm2 = vcmask 1044480   ;;  %vm6047_vm3 = vcmask 64512  }
   0xe   :  { %378 = vrot.lane.b32.xlu0 %v44_v6, %s6435_s28  ;;  %380 = vrot.lane.b32.xlu1 %v45_v7, %s6435_s28  ;;  %v587_v14 = vrot.slane %v54_v12, 7  ;;  %v588_v15 = vrot.slane %v55_v13, 7  ;;  %v56_v16 = vld [vmem:[%s11295_s1 + $0xb0] sm:$0xff]  ;;  %v57_v17 = vld [vmem:[%s11295_s1 + $0xb8] sm:$0xff] }
   0xf   :  { %v589_v18 = vrot.slane %v56_v16, 7  ;;  %v590_v19 = vrot.slane %v57_v17, 7  ;;  %v58_v20 = vld [vmem:[%s11295_s1 + $0xc0] sm:$0xff]  ;;  %v59_v21 = vld [vmem:[%s11295_s1 + $0xc8] sm:$0xff]  ;;  %v60_v24 = vld [vmem:[%s11295_s1 + $0xd0] sm:$0xff] }
  0x10   :  { %v695_v22 = vrot.slane %v58_v20, 7  ;;  %v696_v23 = vrot.slane %v59_v21, 7  ;;  %v61_v25 = vld [vmem:[%s11295_s1 + $0xd8] sm:$0xff]  ;;  %v697_v26 = vrot.slane %v60_v24, 7  ;;  %v62_v28 = vld [vmem:[%s11295_s1 + $0xe0] sm:$0xff]  ;;  %v63_v29 = vld [vmem:[%s11295_s1 + $0xe8] sm:$0xff] }
  0x11   :  { %v698_v27 = vrot.slane %v61_v25, 7  ;;  %v803_v30 = vrot.slane %v62_v28, 7  ;;  %v804_v31 = vrot.slane %v63_v29, 7  ;;  %v6560_v32 = vld [vmem:[%s11294_s0] sm:$0xff]  ;;  %v6606_v2 = vld [vmem:[%s11294_s0 + $0x8] sm:$0x7] }
  0x12   :  { %438 = vrot.lane.b32.xlu0 %v46_v8, %s6436_s11  ;;  %440 = vrot.lane.b32.xlu1 %v47_v9, %s6436_s11  ;;  %v6569_v40 = vld [vmem:[%s11294_s0 + $0x40] sm:$0xff] }
  0x16   :  { %442 = vrot.lane.b32.xlu0 %v48_v10, %s6436_s11  ;;  %444 = vrot.lane.b32.xlu1 %v49_v11, %s6436_s11 }
  0x1a   :  { %591 = vrot.lane.b32.xlu0 %v587_v14, %s6434_s19  ;;  %593 = vrot.lane.b32.xlu1 %v588_v15, %s6434_s19 }
  0x1e   :  { %595 = vrot.lane.b32.xlu0 %v589_v18, %s6434_s19  ;;  %597 = vrot.lane.b32.xlu1 %v590_v19, %s6434_s19  ;;  %v6625_v18 = vld [vmem:[%s11294_s0 + $0x48] sm:$0x7] }
  0x22   :  { %699 = vrot.lane.b32.xlu0 %v695_v22, %s6435_s28  ;;  %701 = vrot.lane.b32.xlu1 %v696_v23, %s6435_s28 }
  0x26   :  { %703 = vrot.lane.b32.xlu0 %v697_v26, %s6435_s28  ;;  %705 = vrot.lane.b32.xlu1 %v698_v27, %s6435_s28 }
  0x2a   :  { %807 = vrot.lane.b32.xlu0 %v803_v30, %s6436_s11  ;;  %809 = vrot.lane.b32.xlu1 %v804_v31, %s6436_s11 }
  0x74   :  { %v311_v33 = vpop.permute.xlu0 %310  ;;  %v315_v34 = vpop.permute.xlu1 %314 }
  0x75   :  { %v322_v35 = vmul.f32 %v311_v33, %v6560_v32  ;;  %v324_v36 = vmul.f32 %v315_v34, %v6560_v32  ;;  %v326_v42 = vmul.f32 %v311_v33, %v6569_v40  ;;  %v328_v44 = vmul.f32 %v315_v34, %v6569_v40 }
  0x77   :  { %338 = vrot.lane.b32.xlu0 %v322_v35, %s6437_s15 }
  0x78   :  { %v313_v37 = vpop.permute.xlu0 %312  ;;  %v317_v38 = vpop.permute.xlu1 %316 }
  0x79   :  { %v323_v39 = vmul.f32 %v313_v37, %v6560_v32  ;;  %v325_v41 = vmul.f32 %v317_v38, %v6560_v32  ;;  %v327_v45 = vmul.f32 %v313_v37, %v6569_v40  ;;  %v329_v49 = vmul.f32 %v317_v38, %v6569_v40 }
  0x7b   :  { %340 = vrot.lane.b32.xlu1 %v323_v39, %s6437_s15  ;;  %342 = vrot.lane.b32.xlu0 %v324_v36, %s6437_s15 }
  0x7c   :  { %v375_v43 = vpop.permute.xlu0 %374  ;;  %v377_v46 = vpop.permute.xlu1 %376 }
  0x7d   :  { %v386_v47 = vmul.f32 %v375_v43, %v6560_v32  ;;  %v387_v50 = vmul.f32 %v377_v46, %v6560_v32  ;;  %v390_v54 = vmul.f32 %v375_v43, %v6569_v40  ;;  %v391_v56 = vmul.f32 %v377_v46, %v6569_v40 }
  0x7f   :  { %344 = vrot.lane.b32.xlu1 %v325_v41, %s6437_s15  ;;  %346 = vrot.lane.b32.xlu0 %v326_v42, %s6437_s15 }
  0x80   :  { %v379_v48 = vpop.permute.xlu0 %378  ;;  %v381_v52 = vpop.permute.xlu1 %380 }
  0x81   :  { %v388_v51 = vmul.f32 %v379_v48, %v6560_v32  ;;  %v389_v53 = vmul.f32 %v381_v52, %v6560_v32  ;;  %v392_v57 = vmul.f32 %v379_v48, %v6569_v40  ;;  %v393_v61 = vmul.f32 %v381_v52, %v6569_v40 }
  0x83   :  { %348 = vrot.lane.b32.xlu1 %v327_v45, %s6437_s15  ;;  %350 = vrot.lane.b32.xlu0 %v328_v44, %s6437_s15 }
  0x84   :  { %v439_v55 = vpop.permute.xlu0 %438  ;;  %v441_v58 = vpop.permute.xlu1 %440 }
  0x85   :  { %v450_v59 = vmul.f32 %v439_v55, %v6560_v32  ;;  %v451_v62 = vmul.f32 %v441_v58, %v6560_v32  ;;  %v454_v7 = vmul.f32 %v439_v55, %v6569_v40  ;;  %v455_v15 = vmul.f32 %v441_v58, %v6569_v40 }
  0x87   :  { %352 = vrot.lane.b32.xlu1 %v329_v49, %s6437_s15  ;;  %402 = vrot.lane.b32.xlu0 %v386_v47, %s6438_s18 }
  0x88   :  { %v443_v60 = vpop.permute.xlu0 %442  ;;  %v445_v0 = vpop.permute.xlu1 %444 }
  0x89   :  { %v452_v63 = vmul.f32 %v443_v60, %v6560_v32  ;;  %v453_v3 = vmul.f32 %v445_v0, %v6560_v32  ;;  %v456_v16 = vmul.f32 %v443_v60, %v6569_v40  ;;  %v457_v26 = vmul.f32 %v445_v0, %v6569_v40 }
  0x8b   :  { %404 = vrot.lane.b32.xlu1 %v387_v50, %s6438_s18  ;;  %406 = vrot.lane.b32.xlu0 %v388_v51, %s6438_s18 }
  0x8c   :  { %v592_v1 = vpop.permute.xlu0 %591  ;;  %v594_v4 = vpop.permute.xlu1 %593 }
  0x8d   :  { %v603_v5 = vmul.f32 %v592_v1, %v6560_v32  ;;  %v604_v6 = vmul.f32 %v592_v1, %v6606_v2  ;;  %v605_v11 = vmul.f32 %v594_v4, %v6560_v32  ;;  %v606_v12 = vmul.f32 %v594_v4, %v6606_v2 }
  0x8e   :  { %v611_v27 = vmul.f32 %v592_v1, %v6569_v40  ;;  %v612_v28 = vmul.f32 %v592_v1, %v6625_v18  ;;  %v613_v37 = vmul.f32 %v594_v4, %v6569_v40  ;;  %v614_v38 = vmul.f32 %v594_v4, %v6625_v18 }
  0x8f   :  { %408 = vrot.lane.b32.xlu1 %v389_v53, %s6438_s18  ;;  %410 = vrot.lane.b32.xlu0 %v390_v54, %s6438_s18  ;;  %v635_v9 = vrot.slane %v603_v5, 1  ;;  %v636_v10 = vrot.slane %v604_v6, 1  ;;  %v638_v20 = vrot.slane %v605_v11, 1  ;;  %v639_v21 = vrot.slane %v606_v12, 1 }
  0x90   :  { %v596_v8 = vpop.permute.xlu0 %595  ;;  %v598_v17 = vpop.permute.xlu1 %597  ;;  %v647_v35 = vrot.slane %v611_v27, 1  ;;  %v648_v36 = vrot.slane %v612_v28, 1  ;;  %v650_v47 = vrot.slane %v613_v37, 1  ;;  %v651_v48 = vrot.slane %v614_v38, 1 }
  0x91   :  { %v607_v13 = vmul.f32 %v596_v8, %v6560_v32  ;;  %v608_v14 = vmul.f32 %v596_v8, %v6606_v2  ;;  %v637_v19 = vsel %vm542_vm0, %v635_v9, %v636_v10  ;;  %v609_v24 = vmul.f32 %v598_v17, %v6560_v32 }
  0x92   :  { %v610_v25 = vmul.f32 %v598_v17, %v6606_v2  ;;  %v640_v30 = vsel %vm542_vm0, %v638_v20, %v639_v21  ;;  %v615_v39 = vmul.f32 %v596_v8, %v6569_v40  ;;  %v616_v41 = vmul.f32 %v596_v8, %v6625_v18 }
  0x93   :  { %412 = vrot.lane.b32.xlu1 %v391_v56, %s6438_s18  ;;  %414 = vrot.lane.b32.xlu0 %v392_v57, %s6438_s18  ;;  %v641_v22 = vrot.slane %v607_v13, 1  ;;  %v642_v23 = vrot.slane %v608_v14, 1  ;;  %v644_v33 = vrot.slane %v609_v24, 1  ;;  %v649_v46 = vsel %vm542_vm0, %v647_v35, %v648_v36 }
  0x94   :  { %v700_v29 = vpop.permute.xlu0 %699  ;;  %v645_v34 = vrot.slane %v610_v25, 1  ;;  %v702_v42 = vpop.permute.xlu1 %701  ;;  %v653_v50 = vrot.slane %v615_v39, 1  ;;  %v654_v51 = vrot.slane %v616_v41, 1  ;;  %v617_v52 = vmul.f32 %v598_v17, %v6569_v40 }
  0x95   :  { %v643_v31 = vsel %vm542_vm0, %v641_v22, %v642_v23  ;;  %v711_v43 = vmul.f32 %v700_v29, %v6560_v32  ;;  %v712_v44 = vmul.f32 %v700_v29, %v6606_v2  ;;  %v618_v53 = vmul.f32 %v598_v17, %v6625_v18 }
  0x96   :  { %v646_v45 = vsel %vm542_vm0, %v644_v33, %v645_v34  ;;  %v713_v56 = vmul.f32 %v702_v42, %v6560_v32  ;;  %v714_v57 = vmul.f32 %v702_v42, %v6606_v2  ;;  %v719_v9 = vmul.f32 %v700_v29, %v6569_v40  ;;  %v64_v33 = vld [vmem:[%s11295_s1 + $0xf0] sm:$0xff] }
  0x97   :  { %416 = vrot.lane.b32.xlu1 %v393_v61, %s6438_s18  ;;  %466 = vrot.lane.b32.xlu0 %v450_v59, %s6439_s20  ;;  %v743_v54 = vrot.slane %v711_v43, 1  ;;  %v744_v55 = vrot.slane %v712_v44, 1  ;;  %v652_v61 = vsel %vm542_vm0, %v650_v47, %v651_v48  ;;  %v657_v0 = vrot.slane %v618_v53, 1  ;;  %v65_v43 = vld [vmem:[%s11295_s1 + $0xf8] sm:$0xff] }
  0x98   :  { %v704_v49 = vpop.permute.xlu0 %703  ;;  %v706_v60 = vpop.permute.xlu1 %705  ;;  %v747_v4 = vrot.slane %v714_v57, 1  ;;  %v720_v10 = vmul.f32 %v700_v29, %v6625_v18  ;;  %v722_v20 = vmul.f32 %v702_v42, %v6625_v18 }
  0x99   :  { %v715_v58 = vmul.f32 %v704_v49, %v6560_v32  ;;  %v716_v59 = vmul.f32 %v704_v49, %v6606_v2  ;;  %v745_v1 = vsel %vm542_vm0, %v743_v54, %v744_v55  ;;  %v718_v8 = vmul.f32 %v706_v60, %v6606_v2 }
  0x9a   :  { %v756_v17 = vrot.slane %v720_v10, 1  ;;  %v723_v21 = vmul.f32 %v704_v49, %v6569_v40  ;;  %v724_v22 = vmul.f32 %v704_v49, %v6625_v18  ;;  %v806_v49 = vrot.slane %v65_v43, 7 }
  0x9b   :  { %468 = vrot.lane.b32.xlu1 %v451_v62, %s6439_s20  ;;  %470 = vrot.lane.b32.xlu0 %v452_v63, %s6439_s20  ;;  %v655_v62 = vsel %vm542_vm0, %v653_v50, %v654_v51  ;;  %v656_v63 = vrot.slane %v617_v52, 1  ;;  %v749_v5 = vrot.slane %v715_v58, 1  ;;  %v750_v6 = vrot.slane %v716_v59, 1 }
  0x9c   :  { %v6679_v27 = vpop.permute.xlu0 %807  ;;  %v761_v28 = vrot.slane %v723_v21, 1  ;;  %v762_v29 = vrot.slane %v724_v22, 1  ;;  %v6692_v36 = vpop.permute.xlu1 %809 }
  0x9d   :  { %v658_v11 = vsel %vm542_vm0, %v656_v63, %v657_v0  ;;  %v751_v13 = vsel %vm542_vm0, %v749_v5, %v750_v6  ;;  %v819_v34 = vmul.f32 %v6679_v27, %v6560_v32  ;;  %v820_v35 = vmul.f32 %v6679_v27, %v6606_v2 }
  0x9e   :  { %v763_v38 = vsel %vm542_vm0, %v761_v28, %v762_v29  ;;  %v822_v47 = vmul.f32 %v6692_v36, %v6606_v2 }
  0x9f   :  { %472 = vrot.lane.b32.xlu1 %v453_v3, %s6439_s20  ;;  %474 = vrot.lane.b32.xlu0 %v454_v7, %s6439_s20  ;;  %v746_v3 = vrot.slane %v713_v56, 1  ;;  %v717_v7 = vmul.f32 %v706_v60, %v6560_v32  ;;  %v851_v44 = vrot.slane %v819_v34, 1 }
  0xa0   :  { %v855_v52 = vrot.slane %v822_v47, 1 }
  0xa1   :  { %v748_v12 = vsel %vm542_vm0, %v746_v3, %v747_v4  ;;  %v752_v14 = vrot.slane %v717_v7, 1  ;;  %v50_v4 = vld [vmem:[%s11295_s1 + $0x80] sm:$0xff] }
  0xa2   :  { %v6742_v7 = vrot.slane %v50_v4, 7  ;;  %v829_v4 = vmul.f32 %v6692_v36, %v6569_v40 }
  0xa3   :  { %476 = vrot.lane.b32.xlu1 %v455_v15, %s6439_s20  ;;  %478 = vrot.lane.b32.xlu0 %v456_v16, %s6439_s20  ;;  %v753_v15 = vrot.slane %v718_v8, 1  ;;  %v755_v16 = vrot.slane %v719_v9, 1  ;;  %v34_v8 = vld [vmem:[%s11295_s1] sm:$0xff] }
  0xa5   :  { %v754_v23 = vsel %vm542_vm0, %v752_v14, %v753_v15  ;;  %v757_v24 = vsel %vm542_vm0, %v755_v16, %v756_v17 }
  0xa7   :  { %480 = vrot.lane.b32.xlu1 %v457_v26, %s6439_s20  ;;  %659 = vrot.lane.b32.xlu0 %v637_v19, %s6437_s15  ;;  %v721_v19 = vmul.f32 %v702_v42, %v6569_v40  ;;  %v759_v26 = vrot.slane %v722_v20, 1  ;;  %v805_v42 = vrot.slane %v64_v33, 7 }
  0xa9   :  { %v758_v25 = vrot.slane %v721_v19, 1 }
  0xab   :  { %661 = vrot.lane.b32.xlu1 %v640_v30, %s6437_s15  ;;  %663 = vrot.lane.b32.xlu0 %v643_v31, %s6437_s15  ;;  %v725_v30 = vmul.f32 %v706_v60, %v6569_v40  ;;  %v726_v31 = vmul.f32 %v706_v60, %v6625_v18  ;;  %v760_v37 = vsel %vm542_vm0, %v758_v25, %v759_v26 }
  0xad   :  { %v764_v39 = vrot.slane %v725_v30, 1  ;;  %v765_v41 = vrot.slane %v726_v31, 1 }
  0xaf   :  { %665 = vrot.lane.b32.xlu1 %v646_v45, %s6437_s15  ;;  %667 = vrot.lane.b32.xlu0 %v649_v46, %s6437_s15  ;;  %v852_v45 = vrot.slane %v820_v35, 1  ;;  %v821_v46 = vmul.f32 %v6692_v36, %v6560_v32  ;;  %v766_v48 = vsel %vm542_vm0, %v764_v39, %v765_v41 }
  0xb1   :  { %v853_v50 = vsel %vm542_vm0, %v851_v44, %v852_v45  ;;  %v854_v51 = vrot.slane %v821_v46, 1 }
  0xb3   :  { %669 = vrot.lane.b32.xlu1 %v652_v61, %s6437_s15  ;;  %671 = vrot.lane.b32.xlu0 %v655_v62, %s6437_s15  ;;  %v856_v53 = vsel %vm542_vm0, %v854_v51, %v855_v52  ;;  %v828_v51 = vmul.f32 %v6679_v27, %v6625_v18 }
  0xb7   :  { %673 = vrot.lane.b32.xlu1 %v658_v11, %s6437_s15  ;;  %767 = vrot.lane.b32.xlu0 %v745_v1, %s6438_s18  ;;  %v518_v11 = vmul.f32 %v6742_v7, %v6569_v40 }
  0xb9   :  { %v555_v16 = vrot.slane %v518_v11, 1 }
  0xbb   :  { %769 = vrot.lane.b32.xlu1 %v748_v12, %s6438_s18  ;;  %771 = vrot.lane.b32.xlu0 %v751_v13, %s6438_s18  ;;  %v519_v12 = vmul.f32 %v6742_v7, %v6625_v18  ;;  %v294_v13 = vmul.f32 %v34_v8, %v6569_v40 }
  0xbd   :  { %v556_v17 = vrot.slane %v519_v12, 1  ;;  %v864_v12 = vrot.slane %v828_v51, 1 }
  0xbf   :  { %773 = vrot.lane.b32.xlu1 %v754_v23, %s6438_s18  ;;  %775 = vrot.lane.b32.xlu0 %v757_v24, %s6438_s18  ;;  %v557_v22 = vsel %vm542_vm0, %v555_v16, %v556_v17 }
  0xc3   :  { %777 = vrot.lane.b32.xlu1 %v760_v37, %s6438_s18  ;;  %779 = vrot.lane.b32.xlu0 %v763_v38, %s6438_s18 }
  0xc7   :  { %781 = vrot.lane.b32.xlu1 %v766_v48, %s6438_s18  ;;  %811 = vrot.lane.b32.xlu0 %v805_v42, %s6436_s11 }
  0xcb   :  { %813 = vrot.lane.b32.xlu1 %v806_v49, %s6436_s11  ;;  %875 = vrot.lane.b32.xlu0 %v853_v50, %s6439_s20  ;;  %v827_v50 = vmul.f32 %v6679_v27, %v6569_v40 }
  0xcd   :  { %v863_v11 = vrot.slane %v827_v50, 1  ;;  %v866_v50 = vrot.slane %v829_v4, 1 }
  0xcf   :  { %877 = vrot.lane.b32.xlu1 %v856_v53, %s6439_s20 }
  0xe9   :  { %v6713_v54 = vpop.permute.xlu0 %338 }
  0xed   :  { %v6715_v55 = vpop.permute.xlu1 %340  ;;  %v6717_v56 = vpop.permute.xlu0 %342 }
  0xf1   :  { %v6719_v57 = vpop.permute.xlu1 %344  ;;  %v347_v58 = vpop.permute.xlu0 %346 }
  0xf2   :  { %v366_v19 = vadd.f32 %v347_v58, %v294_v13  ;;  %v830_v13 = vmul.f32 %v6692_v36, %v6625_v18 }
  0xf4   :  { %v867_v51 = vrot.slane %v830_v13, 1 }
  0xf5   :  { %v6721_v59 = vpop.permute.xlu1 %348  ;;  %v6723_v60 = vpop.permute.xlu0 %350 }
  0xf9   :  { %v6725_v61 = vpop.permute.xlu1 %352  ;;  %v6727_v62 = vpop.permute.xlu0 %402 }
  0xfd   :  { %v6729_v63 = vpop.permute.xlu1 %404  ;;  %v6731_v0 = vpop.permute.xlu0 %406 }
 0x101   :  { %v6733_v1 = vpop.permute.xlu1 %408  ;;  %v411_v3 = vpop.permute.xlu0 %410 }
 0x102   :  { %v430_v20 = vadd.f32 %v411_v3, %v366_v19 }
 0x105   :  { %v6738_v5 = vpop.permute.xlu1 %412  ;;  %v6740_v6 = vpop.permute.xlu0 %414 }
 0x109   :  { %v6747_v9 = vpop.permute.xlu1 %416  ;;  %v6749_v10 = vpop.permute.xlu0 %466 }
 0x10d   :  { %v6756_v14 = vpop.permute.xlu1 %468  ;;  %v6758_v15 = vpop.permute.xlu0 %470 }
 0x111   :  { %v6760_v21 = vpop.permute.xlu1 %472  ;;  %v475_v23 = vpop.permute.xlu0 %474 }
 0x112   :  { %v494_v24 = vadd.f32 %v475_v23, %v430_v20 }
 0x114   :  { %v6763_v25 = vadd.f32 %v557_v22, %v494_v24  ;;  %v865_v24 = vsel %vm542_vm0, %v863_v11, %v864_v12  ;;  %v868_v11 = vsel %vm542_vm0, %v866_v50, %v867_v51 }
 0x115   :  { %v6765_v26 = vpop.permute.xlu1 %476  ;;  %v6767_v28 = vpop.permute.xlu0 %478 }
 0x119   :  { %v6769_v29 = vpop.permute.xlu1 %480  ;;  %v6771_v30 = vpop.permute.xlu0 %659 }
 0x11a   :  { %11403 = vst [vmem:[#allocation5_spill] sm:$0xff] %v6769_v29  ;;  %11404 = vst [vmem:[#allocation6_spill] sm:$0xff] %v6771_v30 }
 0x11d   :  { %v6773_v31 = vpop.permute.xlu1 %661  ;;  %v6775_v33 = vpop.permute.xlu0 %663 }
 0x11e   :  { %11405 = vst [vmem:[#allocation7_spill] sm:$0xff] %v6773_v31  ;;  %11406 = vst [vmem:[#allocation8_spill] sm:$0xff] %v6775_v33 }
 0x121   :  { %v6777_v34 = vpop.permute.xlu1 %665  ;;  %v6779_v35 = vpop.permute.xlu0 %667 }
 0x122   :  { %11407 = vst [vmem:[#allocation9_spill] sm:$0xff] %v6777_v34 }
 0x125   :  { %v6781_v37 = vpop.permute.xlu1 %669  ;;  %v6783_v38 = vpop.permute.xlu0 %671 }
 0x126   :  { %11408 = vst [vmem:[#allocation10_spill] sm:$0xff] %v6781_v37  ;;  %11409 = vst [vmem:[#allocation11_spill] sm:$0xff] %v6783_v38 }
 0x129   :  { %v6785_v39 = vpop.permute.xlu1 %673  ;;  %v6787_v41 = vpop.permute.xlu0 %767 }
 0x12a   :  { %11410 = vst [vmem:[#allocation12_spill] sm:$0xff] %v6785_v39  ;;  %11411 = vst [vmem:[#allocation13_spill] sm:$0xff] %v6787_v41 }
 0x12d   :  { %v6789_v42 = vpop.permute.xlu1 %769  ;;  %v6791_v43 = vpop.permute.xlu0 %771 }
 0x12e   :  { %11412 = vst [vmem:[#allocation14_spill] sm:$0xff] %v6789_v42  ;;  %11413 = vst [vmem:[#allocation15_spill] sm:$0xff] %v6791_v43 }
 0x131   :  { %v6793_v44 = vpop.permute.xlu1 %773  ;;  %v6795_v45 = vpop.permute.xlu0 %775 }
 0x132   :  { %11414 = vst [vmem:[#allocation16_spill] sm:$0xff] %v6793_v44 }
 0x135   :  { %v6797_v46 = vpop.permute.xlu1 %777  ;;  %v6799_v47 = vpop.permute.xlu0 %779 }
 0x136   :  { %11415 = vst [vmem:[#allocation17_spill] sm:$0xff] %v6797_v46  ;;  %11416 = vst [vmem:[#allocation18_spill] sm:$0xff] %v6799_v47 }
 0x139   :  { %v6801_v48 = vpop.permute.xlu1 %781  ;;  %v812_v49 = vpop.permute.xlu0 %811 }
 0x13a   :  { %11417 = vst [vmem:[#allocation19_spill] sm:$0xff] %v6801_v48  ;;  %v823_v52 = vmul.f32 %v812_v49, %v6560_v32  ;;  %v824_v53 = vmul.f32 %v812_v49, %v6606_v2  ;;  %v831_v16 = vmul.f32 %v812_v49, %v6569_v40  ;;  %v832_v20 = vmul.f32 %v812_v49, %v6625_v18  ;;  %v70_v49 = vld [vmem:[%s11295_s1 + $0x120] sm:$0xff] }
 0x13c   :  { %v857_v58 = vrot.slane %v823_v52, 1  ;;  %v858_v3 = vrot.slane %v824_v53, 1  ;;  %v869_v52 = vrot.slane %v831_v16, 1  ;;  %v870_v53 = vrot.slane %v832_v20, 1 }
 0x13d   :  { %v814_v8 = vpop.permute.xlu1 %813  ;;  %v996_v16 = vrot.slane %v70_v49, 6 }
 0x13e   :  { %v859_v17 = vsel %vm542_vm0, %v857_v58, %v858_v3  ;;  %v825_v27 = vmul.f32 %v814_v8, %v6560_v32  ;;  %v826_v19 = vmul.f32 %v814_v8, %v6606_v2  ;;  %v833_v58 = vmul.f32 %v814_v8, %v6569_v40 }
 0x13f   :  { %879 = vrot.lane.b32.xlu0 %v859_v17, %s6439_s20  ;;  %v834_v3 = vmul.f32 %v814_v8, %v6625_v18  ;;  %v871_v4 = vsel %vm542_vm0, %v869_v52, %v870_v53  ;;  %v71_v8 = vld [vmem:[%s11295_s1 + $0x128] sm:$0xff]  ;;  %v72_v17 = vld [vmem:[%s11295_s1 + $0x130] sm:$0xff] }
 0x140   :  { %v860_v22 = vrot.slane %v825_v27, 1  ;;  %v861_v23 = vrot.slane %v826_v19, 1  ;;  %v872_v12 = vrot.slane %v833_v58, 1  ;;  %v997_v19 = vrot.slane %v71_v8, 6 }
 0x141   :  { %v873_v13 = vrot.slane %v834_v3, 1  ;;  %v998_v20 = vrot.slane %v72_v17, 6  ;;  %v6849_v50 = vpop.permute.xlu1 %877 }
 0x142   :  { %v862_v36 = vsel %vm542_vm0, %v860_v22, %v861_v23  ;;  %v73_v22 = vld [vmem:[%s11295_s1 + $0x138] sm:$0xff]  ;;  %11419 = vst [vmem:[#allocation21_spill] sm:$0xff] %v6849_v50 }
 0x143   :  { %881 = vrot.lane.b32.xlu1 %v862_v36, %s6439_s20  ;;  %883 = vrot.lane.b32.xlu0 %v865_v24, %s6439_s20  ;;  %v874_v27 = vsel %vm542_vm0, %v872_v12, %v873_v13  ;;  %v999_v23 = vrot.slane %v73_v22, 6  ;;  %v6847_v24 = vpop.permute.xlu0 %875 }
 0x144   :  { %11418 = vst [vmem:[#allocation20_spill] sm:$0xff] %v6847_v24 }
 0x147   :  { %885 = vrot.lane.b32.xlu1 %v868_v11, %s6439_s20  ;;  %887 = vrot.lane.b32.xlu0 %v871_v4, %s6439_s20 }
 0x14b   :  { %889 = vrot.lane.b32.xlu1 %v874_v27, %s6439_s20  ;;  %1000 = vrot.lane.b32.xlu0 %v996_v16, %s6434_s19 }
 0x14f   :  { %1002 = vrot.lane.b32.xlu1 %v997_v19, %s6434_s19  ;;  %1004 = vrot.lane.b32.xlu0 %v998_v20, %s6434_s19 }
 0x153   :  { %1006 = vrot.lane.b32.xlu1 %v999_v23, %s6434_s19 }
 0x1b1   :  { %v6851_v51 = vpop.permute.xlu0 %879 }
 0x1b2   :  { %11420 = vst [vmem:[#allocation22_spill] sm:$0xff] %v6851_v51 }
 0x1b5   :  { %v6853_v52 = vpop.permute.xlu1 %881  ;;  %v6855_v36 = vpop.permute.xlu0 %883 }
 0x1b6   :  { %11421 = vst [vmem:[#allocation23_spill] sm:$0xff] %v6853_v52 }
 0x1b9   :  { %v6857_v53 = vpop.permute.xlu1 %885  ;;  %v6859_v58 = vpop.permute.xlu0 %887 }
 0x1ba   :  { %11422 = vst [vmem:[#allocation24_spill] sm:$0xff] %v6857_v53  ;;  %11423 = vst [vmem:[#allocation25_spill] sm:$0xff] %v6859_v58 }
 0x1bd   :  { %v6861_v3 = vpop.permute.xlu1 %889  ;;  %v1001_v49 = vpop.permute.xlu0 %1000 }
 0x1be   :  { %11424 = vst [vmem:[#allocation26_spill] sm:$0xff] %v6861_v3  ;;  %v1012_v11 = vmul.f32 %v1001_v49, %v6560_v32  ;;  %v1013_v4 = vmul.f32 %v1001_v49, %v6606_v2  ;;  %v1020_v17 = vmul.f32 %v1001_v49, %v6569_v40 }
 0x1c0   :  { %v1044_v12 = vrot.slane %v1012_v11, 2  ;;  %v1045_v13 = vrot.slane %v1013_v4, 2  ;;  %v1021_v11 = vmul.f32 %v1001_v49, %v6625_v18  ;;  %v1056_v51 = vrot.slane %v1020_v17, 2 }
 0x1c1   :  { %v1003_v16 = vpop.permute.xlu1 %1002  ;;  %v1005_v8 = vpop.permute.xlu0 %1004 }
 0x1c2   :  { %v1046_v27 = vsel %vm951_vm1, %v1044_v12, %v1045_v13  ;;  %v1014_v19 = vmul.f32 %v1003_v16, %v6560_v32  ;;  %v1015_v20 = vmul.f32 %v1003_v16, %v6606_v2  ;;  %v1016_v22 = vmul.f32 %v1005_v8, %v6560_v32 }
 0x1c3   :  { %1068 = vrot.lane.b32.xlu0 %v1046_v27, %s6437_s15  ;;  %v1017_v23 = vmul.f32 %v1005_v8, %v6606_v2  ;;  %v1022_v12 = vmul.f32 %v1003_v16, %v6569_v40  ;;  %v1023_v27 = vmul.f32 %v1003_v16, %v6625_v18 }
 0x1c4   :  { %v1047_v4 = vrot.slane %v1014_v19, 2  ;;  %v1048_v3 = vrot.slane %v1015_v20, 2  ;;  %v1050_v58 = vrot.slane %v1016_v22, 2  ;;  %v1057_v19 = vrot.slane %v1021_v11, 2 }
 0x1c5   :  { %v1007_v53 = vpop.permute.xlu1 %1006  ;;  %v1051_v52 = vrot.slane %v1017_v23, 2  ;;  %v1024_v20 = vmul.f32 %v1005_v8, %v6569_v40  ;;  %v1025_v22 = vmul.f32 %v1005_v8, %v6625_v18  ;;  %v1060_v48 = vrot.slane %v1023_v27, 2  ;;  %v76_v27 = vld [vmem:[%s11295_s1 + $0x150] sm:$0xff] }
 0x1c6   :  { %v1049_v13 = vsel %vm951_vm1, %v1047_v4, %v1048_v3  ;;  %v1018_v50 = vmul.f32 %v1007_v53, %v6560_v32  ;;  %v1019_v24 = vmul.f32 %v1007_v53, %v6606_v2  ;;  %v1059_v3 = vrot.slane %v1022_v12, 2 }
 0x1c7   :  { %1070 = vrot.lane.b32.xlu1 %v1049_v13, %s6437_s15  ;;  %v1052_v49 = vsel %vm951_vm1, %v1050_v58, %v1051_v52  ;;  %v1026_v47 = vmul.f32 %v1007_v53, %v6569_v40  ;;  %v1027_v16 = vmul.f32 %v1007_v53, %v6625_v18  ;;  %v1058_v52 = vsel %vm951_vm1, %v1056_v51, %v1057_v19  ;;  %v75_v51 = vld [vmem:[%s11295_s1 + $0x148] sm:$0xff]  ;;  %v77_v19 = vld [vmem:[%s11295_s1 + $0x158] sm:$0xff] }
 0x1c8   :  { %1072 = vrot.lane.b32.xlu0 %v1052_v49, %s6437_s15  ;;  %v1053_v17 = vrot.slane %v1018_v50, 2  ;;  %v1054_v23 = vrot.slane %v1019_v24, 2  ;;  %v1062_v58 = vrot.slane %v1024_v20, 2  ;;  %v1063_v11 = vrot.slane %v1025_v22, 2  ;;  %v74_v24 = vld [vmem:[%s11295_s1 + $0x140] sm:$0xff] }
 0x1c9   :  { %v1061_v50 = vsel %vm951_vm1, %v1059_v3, %v1060_v48  ;;  %v1065_v8 = vrot.slane %v1026_v47, 2  ;;  %v1066_v12 = vrot.slane %v1027_v16, 2  ;;  %v1104_v13 = vrot.slane %v74_v24, 6 }
 0x1ca   :  { %v1055_v4 = vsel %vm951_vm1, %v1053_v17, %v1054_v23  ;;  %v1064_v53 = vsel %vm951_vm1, %v1062_v58, %v1063_v11  ;;  %v1105_v47 = vrot.slane %v75_v51, 6  ;;  %v1106_v48 = vrot.slane %v76_v27, 6 }
 0x1cb   :  { %1074 = vrot.lane.b32.xlu1 %v1055_v4, %s6437_s15  ;;  %v1067_v49 = vsel %vm951_vm1, %v1065_v8, %v1066_v12  ;;  %v1107_v20 = vrot.slane %v77_v19, 6 }
 0x1cc   :  { %1076 = vrot.lane.b32.xlu0 %v1058_v52, %s6437_s15 }
 0x1cf   :  { %1078 = vrot.lane.b32.xlu1 %v1061_v50, %s6437_s15 }
 0x1d0   :  { %1080 = vrot.lane.b32.xlu0 %v1064_v53, %s6437_s15 }
 0x1d3   :  { %1082 = vrot.lane.b32.xlu1 %v1067_v49, %s6437_s15 }
 0x1d4   :  { %1108 = vrot.lane.b32.xlu0 %v1104_v13, %s6435_s28 }
 0x1d7   :  { %1110 = vrot.lane.b32.xlu1 %v1105_v47, %s6435_s28 }
 0x1d8   :  { %1112 = vrot.lane.b32.xlu0 %v1106_v48, %s6435_s28 }
 0x1db   :  { %1114 = vrot.lane.b32.xlu1 %v1107_v20, %s6435_s28 }
 0x235   :  { %v6911_v22 = vpop.permute.xlu0 %1068 }
 0x236   :  { %11425 = vst [vmem:[#allocation27_spill] sm:$0xff] %v6911_v22 }
 0x239   :  { %v6913_v17 = vpop.permute.xlu1 %1070 }
 0x23a   :  { %11426 = vst [vmem:[#allocation28_spill] sm:$0xff] %v6913_v17  ;;  %v6915_v23 = vpop.permute.xlu0 %1072 }
 0x23b   :  { %11427 = vst [vmem:[#allocation29_spill] sm:$0xff] %v6915_v23 }
 0x23d   :  { %v6917_v3 = vpop.permute.xlu1 %1074 }
 0x23e   :  { %11428 = vst [vmem:[#allocation30_spill] sm:$0xff] %v6917_v3  ;;  %v6919_v4 = vpop.permute.xlu0 %1076 }
 0x241   :  { %v6921_v16 = vpop.permute.xlu1 %1078 }
 0x242   :  { %11429 = vst [vmem:[#allocation31_spill] sm:$0xff] %v6921_v16  ;;  %v6923_v52 = vpop.permute.xlu0 %1080 }
 0x243   :  { %11430 = vst [vmem:[#allocation32_spill] sm:$0xff] %v6923_v52 }
 0x245   :  { %v6925_v58 = vpop.permute.xlu1 %1082 }
 0x246   :  { %11431 = vst [vmem:[#allocation33_spill] sm:$0xff] %v6925_v58  ;;  %v1109_v11 = vpop.permute.xlu0 %1108 }
 0x247   :  { %v1120_v24 = vmul.f32 %v1109_v11, %v6560_v32  ;;  %v1121_v50 = vmul.f32 %v1109_v11, %v6606_v2  ;;  %v1128_v13 = vmul.f32 %v1109_v11, %v6569_v40  ;;  %v1129_v20 = vmul.f32 %v1109_v11, %v6625_v18 }
 0x249   :  { %v1111_v8 = vpop.permute.xlu1 %1110  ;;  %v1152_v12 = vrot.slane %v1120_v24, 2  ;;  %v1153_v53 = vrot.slane %v1121_v50, 2  ;;  %v1164_v3 = vrot.slane %v1128_v13, 2 }
 0x24a   :  { %v1113_v51 = vpop.permute.xlu0 %1112  ;;  %v1122_v27 = vmul.f32 %v1111_v8, %v6560_v32  ;;  %v1123_v49 = vmul.f32 %v1111_v8, %v6606_v2  ;;  %v1130_v23 = vmul.f32 %v1111_v8, %v6569_v40  ;;  %v1131_v22 = vmul.f32 %v1111_v8, %v6625_v18 }
 0x24b   :  { %v1154_v47 = vsel %vm951_vm1, %v1152_v12, %v1153_v53  ;;  %v1124_v48 = vmul.f32 %v1113_v51, %v6560_v32  ;;  %v1125_v19 = vmul.f32 %v1113_v51, %v6606_v2 }
 0x24c   :  { %1176 = vrot.lane.b32.xlu0 %v1154_v47, %s6438_s18  ;;  %v1155_v58 = vrot.slane %v1122_v27, 2  ;;  %v1156_v24 = vrot.slane %v1123_v49, 2  ;;  %v1165_v27 = vrot.slane %v1129_v20, 2  ;;  %v1132_v49 = vmul.f32 %v1113_v51, %v6569_v40 }
 0x24d   :  { %v1115_v50 = vpop.permute.xlu1 %1114  ;;  %v1158_v52 = vrot.slane %v1124_v48, 2  ;;  %v1159_v16 = vrot.slane %v1125_v19, 2  ;;  %v1133_v47 = vmul.f32 %v1113_v51, %v6625_v18  ;;  %v78_v51 = vld [vmem:[%s11295_s1 + $0x160] sm:$0xff] }
 0x24e   :  { %v1157_v17 = vsel %vm951_vm1, %v1155_v58, %v1156_v24  ;;  %v1126_v12 = vmul.f32 %v1115_v50, %v6560_v32  ;;  %v1127_v53 = vmul.f32 %v1115_v50, %v6606_v2  ;;  %v1167_v58 = vrot.slane %v1130_v23, 2 }
 0x24f   :  { %1178 = vrot.lane.b32.xlu1 %v1157_v17, %s6438_s18  ;;  %v1160_v11 = vsel %vm951_vm1, %v1158_v52, %v1159_v16  ;;  %v1168_v24 = vrot.slane %v1131_v22, 2  ;;  %v1134_v46 = vmul.f32 %v1115_v50, %v6569_v40  ;;  %v1135_v8 = vmul.f32 %v1115_v50, %v6625_v18 }
 0x250   :  { %1180 = vrot.lane.b32.xlu0 %v1160_v11, %s6438_s18  ;;  %v1161_v13 = vrot.slane %v1126_v12, 2  ;;  %v1162_v48 = vrot.slane %v1127_v53, 2  ;;  %v1166_v17 = vsel %vm951_vm1, %v1164_v3, %v1165_v27  ;;  %v1170_v16 = vrot.slane %v1132_v49, 2  ;;  %v79_v3 = vld [vmem:[%s11295_s1 + $0x168] sm:$0xff]  ;;  %v80_v53 = vld [vmem:[%s11295_s1 + $0x170] sm:$0xff]  ;;  %v81_v49 = vld [vmem:[%s11295_s1 + $0x178] sm:$0xff] }
 0x251   :  { %v1171_v52 = vrot.slane %v1133_v47, 2  ;;  %v1169_v23 = vsel %vm951_vm1, %v1167_v58, %v1168_v24  ;;  %v1173_v20 = vrot.slane %v1134_v46, 2  ;;  %v1174_v22 = vrot.slane %v1135_v8, 2 }
 0x252   :  { %v1163_v19 = vsel %vm951_vm1, %v1161_v13, %v1162_v48  ;;  %v1212_v12 = vrot.slane %v78_v51, 6  ;;  %v1213_v46 = vrot.slane %v79_v3, 6  ;;  %v1214_v27 = vrot.slane %v80_v53, 6 }
 0x253   :  { %1182 = vrot.lane.b32.xlu1 %v1163_v19, %s6438_s18  ;;  %v1172_v50 = vsel %vm951_vm1, %v1170_v16, %v1171_v52  ;;  %v1175_v11 = vsel %vm951_vm1, %v1173_v20, %v1174_v22  ;;  %v1215_v47 = vrot.slane %v81_v49, 6 }
 0x254   :  { %1184 = vrot.lane.b32.xlu0 %v1166_v17, %s6438_s18 }
 0x257   :  { %1186 = vrot.lane.b32.xlu1 %v1169_v23, %s6438_s18 }
 0x258   :  { %1188 = vrot.lane.b32.xlu0 %v1172_v50, %s6438_s18 }
 0x25b   :  { %1190 = vrot.lane.b32.xlu1 %v1175_v11, %s6438_s18 }
 0x25c   :  { %1216 = vrot.lane.b32.xlu0 %v1212_v12, %s6436_s11 }
 0x25f   :  { %1218 = vrot.lane.b32.xlu1 %v1213_v46, %s6436_s11 }
 0x260   :  { %1220 = vrot.lane.b32.xlu0 %v1214_v27, %s6436_s11 }
 0x263   :  { %1222 = vrot.lane.b32.xlu1 %v1215_v47, %s6436_s11 }
 0x2be   :  { %v6975_v13 = vpop.permute.xlu0 %1176 }
 0x2bf   :  { %11432 = vst [vmem:[#allocation34_spill] sm:$0xff] %v6975_v13 }
 0x2c1   :  { %v6977_v48 = vpop.permute.xlu1 %1178 }
 0x2c2   :  { %11433 = vst [vmem:[#allocation35_spill] sm:$0xff] %v6977_v48  ;;  %v6979_v58 = vpop.permute.xlu0 %1180 }
 0x2c3   :  { %11434 = vst [vmem:[#allocation36_spill] sm:$0xff] %v6979_v58 }
 0x2c5   :  { %v6981_v19 = vpop.permute.xlu1 %1182 }
 0x2c6   :  { %11435 = vst [vmem:[#allocation37_spill] sm:$0xff] %v6981_v19  ;;  %v6983_v24 = vpop.permute.xlu0 %1184 }
 0x2c9   :  { %v6985_v8 = vpop.permute.xlu1 %1186 }
 0x2ca   :  { %11436 = vst [vmem:[#allocation38_spill] sm:$0xff] %v6985_v8  ;;  %v6987_v17 = vpop.permute.xlu0 %1188 }
 0x2cb   :  { %11437 = vst [vmem:[#allocation39_spill] sm:$0xff] %v6987_v17 }
 0x2cd   :  { %v6989_v16 = vpop.permute.xlu1 %1190 }
 0x2ce   :  { %11438 = vst [vmem:[#allocation40_spill] sm:$0xff] %v6989_v16  ;;  %v1217_v52 = vpop.permute.xlu0 %1216 }
 0x2cf   :  { %v1228_v51 = vmul.f32 %v1217_v52, %v6560_v32  ;;  %v1229_v23 = vmul.f32 %v1217_v52, %v6606_v2  ;;  %v1236_v12 = vmul.f32 %v1217_v52, %v6569_v40  ;;  %v1237_v47 = vmul.f32 %v1217_v52, %v6625_v18 }
 0x2d1   :  { %v1219_v20 = vpop.permute.xlu1 %1218  ;;  %v1260_v22 = vrot.slane %v1228_v51, 2  ;;  %v1261_v50 = vrot.slane %v1229_v23, 2  ;;  %v1272_v19 = vrot.slane %v1236_v12, 2 }
 0x2d2   :  { %v1221_v3 = vpop.permute.xlu0 %1220  ;;  %v1230_v53 = vmul.f32 %v1219_v20, %v6560_v32  ;;  %v1231_v11 = vmul.f32 %v1219_v20, %v6606_v2  ;;  %v1238_v58 = vmul.f32 %v1219_v20, %v6569_v40  ;;  %v1239_v13 = vmul.f32 %v1219_v20, %v6625_v18 }
 0x2d3   :  { %v1262_v46 = vsel %vm951_vm1, %v1260_v22, %v1261_v50  ;;  %v1232_v27 = vmul.f32 %v1221_v3, %v6560_v32  ;;  %v1233_v49 = vmul.f32 %v1221_v3, %v6606_v2 }
 0x2d4   :  { %1284 = vrot.lane.b32.xlu0 %v1262_v46, %s6439_s20  ;;  %v1263_v16 = vrot.slane %v1230_v53, 2  ;;  %v1264_v51 = vrot.slane %v1231_v11, 2  ;;  %v1273_v53 = vrot.slane %v1237_v47, 2  ;;  %v1240_v11 = vmul.f32 %v1221_v3, %v6569_v40 }
 0x2d5   :  { %v1223_v23 = vpop.permute.xlu1 %1222  ;;  %v1266_v17 = vrot.slane %v1232_v27, 2  ;;  %v1267_v8 = vrot.slane %v1233_v49, 2  ;;  %v1241_v46 = vmul.f32 %v1221_v3, %v6625_v18  ;;  %v1276_v49 = vrot.slane %v1239_v13, 2  ;;  %v86_v3 = vld [vmem:[%s11295_s1 + $0x1a0] sm:$0xff] }
 0x2d6   :  { %v1265_v48 = vsel %vm951_vm1, %v1263_v16, %v1264_v51  ;;  %v1234_v22 = vmul.f32 %v1223_v23, %v6560_v32  ;;  %v1235_v50 = vmul.f32 %v1223_v23, %v6606_v2  ;;  %v1275_v16 = vrot.slane %v1238_v58, 2 }
 0x2d7   :  { %1286 = vrot.lane.b32.xlu1 %v1265_v48, %s6439_s20  ;;  %v1268_v52 = vsel %vm951_vm1, %v1266_v17, %v1267_v8  ;;  %v1242_v51 = vmul.f32 %v1223_v23, %v6569_v40  ;;  %v1243_v20 = vmul.f32 %v1223_v23, %v6625_v18  ;;  %v1274_v48 = vsel %vm951_vm1, %v1272_v19, %v1273_v53  ;;  %v87_v19 = vld [vmem:[%s11295_s1 + $0x1a8] sm:$0xff] }
 0x2d8   :  { %1288 = vrot.lane.b32.xlu0 %v1268_v52, %s6439_s20  ;;  %v1269_v12 = vrot.slane %v1234_v22, 2  ;;  %v1270_v27 = vrot.slane %v1235_v50, 2  ;;  %v1278_v8 = vrot.slane %v1240_v11, 2  ;;  %v1279_v17 = vrot.slane %v1241_v46, 2  ;;  %v88_v22 = vld [vmem:[%s11295_s1 + $0x1b0] sm:$0xff]  ;;  %v89_v11 = vld [vmem:[%s11295_s1 + $0x1b8] sm:$0xff] }
 0x2d9   :  { %v1277_v58 = vsel %vm951_vm1, %v1275_v16, %v1276_v49  ;;  %v1281_v47 = vrot.slane %v1242_v51, 2  ;;  %v1282_v13 = vrot.slane %v1243_v20, 2  ;;  %v1405_v23 = vrot.slane %v86_v3, 5 }
 0x2da   :  { %v1271_v32 = vsel %vm951_vm1, %v1269_v12, %v1270_v27  ;;  %v1280_v40 = vsel %vm951_vm1, %v1278_v8, %v1279_v17  ;;  %v1406_v52 = vrot.slane %v87_v19, 5  ;;  %v1407_v53 = vrot.slane %v88_v22, 5  ;;  %v7058_v17 = vld [vmem:[%s11294_s0] sm:$0xff] }
 0x2db   :  { %1290 = vrot.lane.b32.xlu1 %v1271_v32, %s6439_s20  ;;  %v1283_v50 = vsel %vm951_vm1, %v1281_v47, %v1282_v13  ;;  %v1408_v46 = vrot.slane %v89_v11, 5 }
 0x2dc   :  { %1292 = vrot.lane.b32.xlu0 %v1274_v48, %s6439_s20 }
 0x2df   :  { %1294 = vrot.lane.b32.xlu1 %v1277_v58, %s6439_s20 }
 0x2e0   :  { %1296 = vrot.lane.b32.xlu0 %v1280_v40, %s6439_s20 }
 0x2e3   :  { %1298 = vrot.lane.b32.xlu1 %v1283_v50, %s6439_s20 }
 0x2e4   :  { %1409 = vrot.lane.b32.xlu0 %v1405_v23, %s6434_s19  ;;  %v7065_v23 = vld [vmem:[%s11294_s0 + $0x40] sm:$0xff] }
 0x2e7   :  { %1411 = vrot.lane.b32.xlu1 %v1406_v52, %s6434_s19 }
 0x2e8   :  { %1413 = vrot.lane.b32.xlu0 %v1407_v53, %s6434_s19 }
 0x2eb   :  { %1415 = vrot.lane.b32.xlu1 %v1408_v46, %s6434_s19 }
 0x346   :  { %v7039_v12 = vpop.permute.xlu0 %1284 }
 0x347   :  { %11439 = vst [vmem:[#allocation41_spill] sm:$0xff] %v7039_v12 }
 0x349   :  { %v7041_v27 = vpop.permute.xlu1 %1286 }
 0x34a   :  { %11440 = vst [vmem:[#allocation42_spill] sm:$0xff] %v7041_v27  ;;  %v7043_v16 = vpop.permute.xlu0 %1288 }
 0x34b   :  { %11441 = vst [vmem:[#allocation43_spill] sm:$0xff] %v7043_v16 }
 0x34d   :  { %v7045_v32 = vpop.permute.xlu1 %1290 }
 0x34e   :  { %11442 = vst [vmem:[#allocation44_spill] sm:$0xff] %v7045_v32  ;;  %v7047_v49 = vpop.permute.xlu0 %1292 }
 0x351   :  { %v7049_v51 = vpop.permute.xlu1 %1294 }
 0x352   :  { %11443 = vst [vmem:[#allocation45_spill] sm:$0xff] %v7049_v51  ;;  %v7051_v20 = vpop.permute.xlu0 %1296 }
 0x353   :  { %11444 = vst [vmem:[#allocation46_spill] sm:$0xff] %v7051_v20 }
 0x355   :  { %v7053_v48 = vpop.permute.xlu1 %1298 }
 0x356   :  { %11445 = vst [vmem:[#allocation47_spill] sm:$0xff] %v7053_v48  ;;  %v1410_v8 = vpop.permute.xlu0 %1409 }
 0x357   :  { %v1421_v3 = vmul.f32 %v7058_v17, %v1410_v8  ;;  %v1422_v58 = vmul.f32 %v1410_v8, %v6606_v2  ;;  %v1429_v19 = vmul.f32 %v7065_v23, %v1410_v8 }
 0x359   :  { %v1412_v47 = vpop.permute.xlu1 %1411  ;;  %v1453_v13 = vrot.slane %v1421_v3, 3  ;;  %v1454_v40 = vrot.slane %v1422_v58, 3  ;;  %v1430_v3 = vmul.f32 %v1410_v8, %v6625_v18  ;;  %v1465_v16 = vrot.slane %v1429_v19, 3 }
 0x35a   :  { %v1414_v22 = vpop.permute.xlu0 %1413  ;;  %v1423_v50 = vmul.f32 %v7058_v17, %v1412_v47  ;;  %v1424_v52 = vmul.f32 %v1412_v47, %v6606_v2  ;;  %v1431_v27 = vmul.f32 %v7065_v23, %v1412_v47  ;;  %v1432_v44 = vmul.f32 %v1412_v47, %v6625_v18 }
 0x35b   :  { %v1455_v53 = vsel %vm1360_vm2, %v1453_v13, %v1454_v40  ;;  %v1425_v11 = vmul.f32 %v7058_v17, %v1414_v22  ;;  %v1426_v46 = vmul.f32 %v1414_v22, %v6606_v2 }
 0x35c   :  { %1477 = vrot.lane.b32.xlu0 %v1455_v53, %s6437_s15  ;;  %v1456_v58 = vrot.slane %v1423_v50, 3  ;;  %v1457_v48 = vrot.slane %v1424_v52, 3  ;;  %v1466_v50 = vrot.slane %v1430_v3, 3  ;;  %v1433_v52 = vmul.f32 %v7065_v23, %v1414_v22 }
 0x35d   :  { %v1416_v20 = vpop.permute.xlu1 %1415  ;;  %v1459_v51 = vrot.slane %v1425_v11, 3  ;;  %v1460_v32 = vrot.slane %v1426_v46, 3  ;;  %v1434_v53 = vmul.f32 %v1414_v22, %v6625_v18  ;;  %v90_v22 = vld [vmem:[%s11295_s1 + $0x1c0] sm:$0xff] }
 0x35e   :  { %v1458_v12 = vsel %vm1360_vm2, %v1456_v58, %v1457_v48  ;;  %v1427_v13 = vmul.f32 %v7058_v17, %v1416_v20  ;;  %v1428_v40 = vmul.f32 %v1416_v20, %v6606_v2  ;;  %v1468_v48 = vrot.slane %v1431_v27, 3 }
 0x35f   :  { %1479 = vrot.lane.b32.xlu1 %v1458_v12, %s6437_s15  ;;  %v1461_v8 = vsel %vm1360_vm2, %v1459_v51, %v1460_v32  ;;  %v1469_v58 = vrot.slane %v1432_v44, 3  ;;  %v1435_v2 = vmul.f32 %v7065_v23, %v1416_v20  ;;  %v1436_v47 = vmul.f32 %v1416_v20, %v6625_v18 }
 0x360   :  { %1481 = vrot.lane.b32.xlu0 %v1461_v8, %s6437_s15  ;;  %v1462_v19 = vrot.slane %v1427_v13, 3  ;;  %v1463_v11 = vrot.slane %v1428_v40, 3  ;;  %v1467_v12 = vsel %vm1360_vm2, %v1465_v16, %v1466_v50  ;;  %v1471_v32 = vrot.slane %v1433_v52, 3  ;;  %v91_v16 = vld [vmem:[%s11295_s1 + $0x1c8] sm:$0xff]  ;;  %v92_v13 = vld [vmem:[%s11295_s1 + $0x1d0] sm:$0xff]  ;;  %v93_v52 = vld [vmem:[%s11295_s1 + $0x1d8] sm:$0xff] }
 0x361   :  { %v1472_v51 = vrot.slane %v1434_v53, 3  ;;  %v1470_v27 = vsel %vm1360_vm2, %v1468_v48, %v1469_v58  ;;  %v1474_v3 = vrot.slane %v1435_v2, 3  ;;  %v1475_v44 = vrot.slane %v1436_v47, 3 }
 0x362   :  { %v1464_v46 = vsel %vm1360_vm2, %v1462_v19, %v1463_v11  ;;  %v1513_v20 = vrot.slane %v90_v22, 5  ;;  %v1514_v8 = vrot.slane %v91_v16, 5  ;;  %v1515_v50 = vrot.slane %v92_v13, 5  ;;  %v7133_v22 = vld [vmem:[%s11294_s0 + $0x8] sm:$0x7] }
 0x363   :  { %1483 = vrot.lane.b32.xlu1 %v1464_v46, %s6437_s15  ;;  %v1473_v18 = vsel %vm1360_vm2, %v1471_v32, %v1472_v51  ;;  %v1476_v40 = vsel %vm1360_vm2, %v1474_v3, %v1475_v44  ;;  %v1516_v53 = vrot.slane %v93_v52, 5 }
 0x364   :  { %1485 = vrot.lane.b32.xlu0 %v1467_v12, %s6437_s15 }
 0x367   :  { %1487 = vrot.lane.b32.xlu1 %v1470_v27, %s6437_s15 }
 0x368   :  { %1489 = vrot.lane.b32.xlu0 %v1473_v18, %s6437_s15 }
 0x36b   :  { %1491 = vrot.lane.b32.xlu1 %v1476_v40, %s6437_s15 }
 0x36c   :  { %1517 = vrot.lane.b32.xlu0 %v1513_v20, %s6435_s28 }
 0x36f   :  { %1519 = vrot.lane.b32.xlu1 %v1514_v8, %s6435_s28 }
 0x370   :  { %1521 = vrot.lane.b32.xlu0 %v1515_v50, %s6435_s28 }
 0x373   :  { %1523 = vrot.lane.b32.xlu1 %v1516_v53, %s6435_s28  ;;  %v7145_v53 = vld [vmem:[%s11294_s0 + $0x48] sm:$0x7] }
 0x3ce   :  { %v7113_v19 = vpop.permute.xlu0 %1477 }
 0x3cf   :  { %11446 = vst [vmem:[#allocation48_spill] sm:$0xff] %v7113_v19 }
 0x3d1   :  { %v7115_v11 = vpop.permute.xlu1 %1479 }
 0x3d2   :  { %11447 = vst [vmem:[#allocation49_spill] sm:$0xff] %v7115_v11  ;;  %v7117_v48 = vpop.permute.xlu0 %1481 }
 0x3d3   :  { %11448 = vst [vmem:[#allocation50_spill] sm:$0xff] %v7117_v48 }
 0x3d5   :  { %v7119_v46 = vpop.permute.xlu1 %1483 }
 0x3d6   :  { %11449 = vst [vmem:[#allocation51_spill] sm:$0xff] %v7119_v46  ;;  %v7121_v58 = vpop.permute.xlu0 %1485 }
 0x3d9   :  { %v7123_v2 = vpop.permute.xlu1 %1487 }
 0x3da   :  { %11450 = vst [vmem:[#allocation52_spill] sm:$0xff] %v7123_v2  ;;  %v7125_v47 = vpop.permute.xlu0 %1489 }
 0x3db   :  { %11451 = vst [vmem:[#allocation53_spill] sm:$0xff] %v7125_v47 }
 0x3dd   :  { %v7127_v12 = vpop.permute.xlu1 %1491 }
 0x3de   :  { %11452 = vst [vmem:[#allocation54_spill] sm:$0xff] %v7127_v12  ;;  %v1518_v32 = vpop.permute.xlu0 %1517 }
 0x3df   :  { %v1529_v51 = vmul.f32 %v7058_v17, %v1518_v32  ;;  %v1530_v27 = vmul.f32 %v7133_v22, %v1518_v32  ;;  %v1537_v20 = vmul.f32 %v7065_v23, %v1518_v32 }
 0x3e1   :  { %v1520_v3 = vpop.permute.xlu1 %1519  ;;  %v1561_v44 = vrot.slane %v1529_v51, 3  ;;  %v1562_v18 = vrot.slane %v1530_v27, 3  ;;  %v1538_v51 = vmul.f32 %v7145_v53, %v1518_v32  ;;  %v1573_v48 = vrot.slane %v1537_v20, 3 }
 0x3e2   :  { %v1522_v16 = vpop.permute.xlu0 %1521  ;;  %v1531_v13 = vmul.f32 %v7058_v17, %v1520_v3  ;;  %v1532_v40 = vmul.f32 %v7133_v22, %v1520_v3  ;;  %v1540_v43 = vmul.f32 %v7145_v53, %v1520_v3 }
 0x3e3   :  { %v1563_v8 = vsel %vm1360_vm2, %v1561_v44, %v1562_v18  ;;  %v1533_v50 = vmul.f32 %v7058_v17, %v1522_v16  ;;  %v1534_v52 = vmul.f32 %v7133_v22, %v1522_v16  ;;  %v1539_v44 = vmul.f32 %v7065_v23, %v1520_v3 }
 0x3e4   :  { %1585 = vrot.lane.b32.xlu0 %v1563_v8, %s6438_s18  ;;  %v1564_v27 = vrot.slane %v1531_v13, 3  ;;  %v1565_v12 = vrot.slane %v1532_v40, 3  ;;  %v1574_v13 = vrot.slane %v1538_v51, 3  ;;  %v1541_v40 = vmul.f32 %v7065_v23, %v1522_v16 }
 0x3e5   :  { %v1524_v47 = vpop.permute.xlu1 %1523  ;;  %v1567_v2 = vrot.slane %v1533_v50, 3  ;;  %v1568_v46 = vrot.slane %v1534_v52, 3  ;;  %v1542_v8 = vmul.f32 %v7145_v53, %v1522_v16 }
 0x3e6   :  { %v1566_v18 = vsel %vm1360_vm2, %v1564_v27, %v1565_v12  ;;  %v1535_v11 = vmul.f32 %v7058_v17, %v1524_v47  ;;  %v1536_v19 = vmul.f32 %v7133_v22, %v1524_v47  ;;  %v1576_v12 = vrot.slane %v1539_v44, 3 }
 0x3e7   :  { %1587 = vrot.lane.b32.xlu1 %v1566_v18, %s6438_s18  ;;  %v1569_v32 = vsel %vm1360_vm2, %v1567_v2, %v1568_v46  ;;  %v1577_v27 = vrot.slane %v1540_v43, 3  ;;  %v1543_v42 = vmul.f32 %v7065_v23, %v1524_v47  ;;  %v1544_v3 = vmul.f32 %v7145_v53, %v1524_v47  ;;  %v96_v18 = vld [vmem:[%s11295_s1 + $0x1f0] sm:$0xff] }
 0x3e8   :  { %1589 = vrot.lane.b32.xlu0 %v1569_v32, %s6438_s18  ;;  %v1570_v20 = vrot.slane %v1535_v11, 3  ;;  %v1571_v50 = vrot.slane %v1536_v19, 3  ;;  %v1575_v46 = vsel %vm1360_vm2, %v1573_v48, %v1574_v13  ;;  %v1579_v2 = vrot.slane %v1541_v40, 3  ;;  %v94_v19 = vld [vmem:[%s11295_s1 + $0x1e0] sm:$0xff]  ;;  %v95_v48 = vld [vmem:[%s11295_s1 + $0x1e8] sm:$0xff]  ;;  %v97_v40 = vld [vmem:[%s11295_s1 + $0x1f8] sm:$0xff] }
 0x3e9   :  { %v1580_v51 = vrot.slane %v1542_v8, 3  ;;  %v1578_v11 = vsel %vm1360_vm2, %v1576_v12, %v1577_v27  ;;  %v1582_v16 = vrot.slane %v1543_v42, 3  ;;  %v1583_v43 = vrot.slane %v1544_v3, 3 }
 0x3ea   :  { %v1572_v52 = vsel %vm1360_vm2, %v1570_v20, %v1571_v50  ;;  %v1621_v44 = vrot.slane %v94_v19, 5  ;;  %v1622_v42 = vrot.slane %v95_v48, 5  ;;  %v1623_v13 = vrot.slane %v96_v18, 5 }
 0x3eb   :  { %1591 = vrot.lane.b32.xlu1 %v1572_v52, %s6438_s18  ;;  %v1581_v47 = vsel %vm1360_vm2, %v1579_v2, %v1580_v51  ;;  %v1584_v32 = vsel %vm1360_vm2, %v1582_v16, %v1583_v43  ;;  %v1624_v8 = vrot.slane %v97_v40, 5 }
 0x3ec   :  { %1593 = vrot.lane.b32.xlu0 %v1575_v46, %s6438_s18 }
 0x3ef   :  { %1595 = vrot.lane.b32.xlu1 %v1578_v11, %s6438_s18 }
 0x3f0   :  { %1597 = vrot.lane.b32.xlu0 %v1581_v47, %s6438_s18 }
 0x3f3   :  { %1599 = vrot.lane.b32.xlu1 %v1584_v32, %s6438_s18 }
 0x3f4   :  { %1625 = vrot.lane.b32.xlu0 %v1621_v44, %s6436_s11 }
 0x3f7   :  { %1627 = vrot.lane.b32.xlu1 %v1622_v42, %s6436_s11 }
 0x3f8   :  { %1629 = vrot.lane.b32.xlu0 %v1623_v13, %s6436_s11 }
 0x3fb   :  { %1631 = vrot.lane.b32.xlu1 %v1624_v8, %s6436_s11 }
 0x456   :  { %v7187_v20 = vpop.permute.xlu0 %1585 }
 0x457   :  { %11453 = vst [vmem:[#allocation55_spill] sm:$0xff] %v7187_v20 }
 0x459   :  { %v7189_v50 = vpop.permute.xlu1 %1587 }
 0x45a   :  { %11454 = vst [vmem:[#allocation56_spill] sm:$0xff] %v7189_v50  ;;  %v7191_v12 = vpop.permute.xlu0 %1589 }
 0x45b   :  { %11455 = vst [vmem:[#allocation57_spill] sm:$0xff] %v7191_v12 }
 0x45d   :  { %v7193_v52 = vpop.permute.xlu1 %1591 }
 0x45e   :  { %11456 = vst [vmem:[#allocation58_spill] sm:$0xff] %v7193_v52  ;;  %v7195_v27 = vpop.permute.xlu0 %1593 }
 0x461   :  { %v7197_v3 = vpop.permute.xlu1 %1595 }
 0x462   :  { %11457 = vst [vmem:[#allocation59_spill] sm:$0xff] %v7197_v3  ;;  %v7199_v46 = vpop.permute.xlu0 %1597 }
 0x463   :  { %11458 = vst [vmem:[#allocation60_spill] sm:$0xff] %v7199_v46 }
 0x465   :  { %v7201_v2 = vpop.permute.xlu1 %1599 }
 0x466   :  { %11459 = vst [vmem:[#allocation61_spill] sm:$0xff] %v7201_v2  ;;  %v1626_v51 = vpop.permute.xlu0 %1625 }
 0x467   :  { %v1637_v19 = vmul.f32 %v7058_v17, %v1626_v51  ;;  %v1638_v11 = vmul.f32 %v7133_v22, %v1626_v51  ;;  %v1645_v44 = vmul.f32 %v7065_v23, %v1626_v51  ;;  %v1646_v8 = vmul.f32 %v7145_v53, %v1626_v51 }
 0x469   :  { %v1628_v16 = vpop.permute.xlu1 %1627  ;;  %v1669_v43 = vrot.slane %v1637_v19, 3  ;;  %v1670_v47 = vrot.slane %v1638_v11, 3  ;;  %v1681_v52 = vrot.slane %v1645_v44, 3 }
 0x46a   :  { %v1630_v48 = vpop.permute.xlu0 %1629  ;;  %v1639_v18 = vmul.f32 %v7058_v17, %v1628_v16  ;;  %v1640_v32 = vmul.f32 %v7133_v22, %v1628_v16  ;;  %v1647_v12 = vmul.f32 %v7065_v23, %v1628_v16  ;;  %v1648_v20 = vmul.f32 %v7145_v53, %v1628_v16 }
 0x46b   :  { %v1671_v42 = vsel %vm1360_vm2, %v1669_v43, %v1670_v47  ;;  %v1641_v13 = vmul.f32 %v7058_v17, %v1630_v48  ;;  %v1642_v40 = vmul.f32 %v7133_v22, %v1630_v48 }
 0x46c   :  { %1693 = vrot.lane.b32.xlu0 %v1671_v42, %s6439_s20  ;;  %v1672_v2 = vrot.slane %v1639_v18, 3  ;;  %v1673_v19 = vrot.slane %v1640_v32, 3  ;;  %v1682_v18 = vrot.slane %v1646_v8, 3  ;;  %v1649_v32 = vmul.f32 %v7065_v23, %v1630_v48 }
 0x46d   :  { %v1632_v11 = vpop.permute.xlu1 %1631  ;;  %v1675_v46 = vrot.slane %v1641_v13, 3  ;;  %v1676_v3 = vrot.slane %v1642_v40, 3  ;;  %v1650_v42 = vmul.f32 %v7145_v53, %v1630_v48  ;;  %v1685_v40 = vrot.slane %v1648_v20, 3 }
 0x46e   :  { %v1674_v50 = vsel %vm1360_vm2, %v1672_v2, %v1673_v19  ;;  %v1643_v43 = vmul.f32 %v7058_v17, %v1632_v11  ;;  %v1644_v47 = vmul.f32 %v7133_v22, %v1632_v11  ;;  %v1684_v2 = vrot.slane %v1647_v12, 3  ;;  %v103_v12 = vld [vmem:[%s11295_s1 + $0x228] sm:$0xff] }
 0x46f   :  { %1695 = vrot.lane.b32.xlu1 %v1674_v50, %s6439_s20  ;;  %v1677_v51 = vsel %vm1360_vm2, %v1675_v46, %v1676_v3  ;;  %v1651_v22 = vmul.f32 %v7065_v23, %v1632_v11  ;;  %v1652_v16 = vmul.f32 %v7145_v53, %v1632_v11  ;;  %v1683_v50 = vsel %vm1360_vm2, %v1681_v52, %v1682_v18  ;;  %v102_v23 = vld [vmem:[%s11295_s1 + $0x220] sm:$0xff]  ;;  %v104_v52 = vld [vmem:[%s11295_s1 + $0x230] sm:$0xff]  ;;  %v105_v11 = vld [vmem:[%s11295_s1 + $0x238] sm:$0xff] }
 0x470   :  { %1697 = vrot.lane.b32.xlu0 %v1677_v51, %s6439_s20  ;;  %v1678_v44 = vrot.slane %v1643_v43, 3  ;;  %v1679_v13 = vrot.slane %v1644_v47, 3  ;;  %v1687_v3 = vrot.slane %v1649_v32, 3  ;;  %v1688_v46 = vrot.slane %v1650_v42, 3 }
 0x471   :  { %v1686_v48 = vsel %vm1360_vm2, %v1684_v2, %v1685_v40  ;;  %v1690_v8 = vrot.slane %v1651_v22, 3  ;;  %v1691_v19 = vrot.slane %v1652_v16, 3  ;;  %v7270_v2 = vld [vmem:[%s11294_s0 + $0x10] sm:$0xff] }
 0x472   :  { %v1680_v17 = vsel %vm1360_vm2, %v1678_v44, %v1679_v13  ;;  %v1689_v20 = vsel %vm1360_vm2, %v1687_v3, %v1688_v46 }
 0x473   :  { %1699 = vrot.lane.b32.xlu1 %v1680_v17, %s6439_s20  ;;  %v1692_v53 = vsel %vm1360_vm2, %v1690_v8, %v1691_v19 }
 0x474   :  { %1701 = vrot.lane.b32.xlu0 %v1683_v50, %s6439_s20 }
 0x477   :  { %1703 = vrot.lane.b32.xlu1 %v1686_v48, %s6439_s20  ;;  %v7281_v48 = vld [vmem:[%s11294_s0 + $0x50] sm:$0xff] }
 0x478   :  { %1705 = vrot.lane.b32.xlu0 %v1689_v20, %s6439_s20 }
 0x47b   :  { %1707 = vrot.lane.b32.xlu1 %v1692_v53, %s6439_s20 }
 0x47c   :  { %1745 = vrot.lane.b32.xlu0 %v102_v23, %s6434_s19 }
 0x47f   :  { %1747 = vrot.lane.b32.xlu1 %v103_v12, %s6434_s19  ;;  %v106_v12 = vld [vmem:[%s11295_s1 + $0x240] sm:$0xff] }
 0x480   :  { %1749 = vrot.lane.b32.xlu0 %v104_v52, %s6434_s19  ;;  %v107_v52 = vld [vmem:[%s11295_s1 + $0x248] sm:$0xff] }
 0x483   :  { %1751 = vrot.lane.b32.xlu1 %v105_v11, %s6434_s19  ;;  %v108_v11 = vld [vmem:[%s11295_s1 + $0x250] sm:$0xff] }
 0x4de   :  { %v7251_v43 = vpop.permute.xlu0 %1693 }
 0x4df   :  { %11460 = vst [vmem:[#allocation62_spill] sm:$0xff] %v7251_v43 }
 0x4e1   :  { %v7253_v47 = vpop.permute.xlu1 %1695 }
 0x4e2   :  { %11461 = vst [vmem:[#allocation63_spill] sm:$0xff] %v7253_v47  ;;  %v7255_v51 = vpop.permute.xlu0 %1697 }
 0x4e3   :  { %11462 = vst [vmem:[#allocation64_spill] sm:$0xff] %v7255_v51 }
 0x4e5   :  { %v7257_v18 = vpop.permute.xlu1 %1699 }
 0x4e6   :  { %11463 = vst [vmem:[#allocation65_spill] sm:$0xff] %v7257_v18  ;;  %v7259_v32 = vpop.permute.xlu0 %1701 }
 0x4e9   :  { %v7261_v42 = vpop.permute.xlu1 %1703 }
 0x4ea   :  { %11464 = vst [vmem:[#allocation66_spill] sm:$0xff] %v7261_v42  ;;  %v7263_v44 = vpop.permute.xlu0 %1705 }
 0x4eb   :  { %11465 = vst [vmem:[#allocation67_spill] sm:$0xff] %v7263_v44 }
 0x4ed   :  { %v7265_v13 = vpop.permute.xlu1 %1707 }
 0x4ee   :  { %11466 = vst [vmem:[#allocation68_spill] sm:$0xff] %v7265_v13  ;;  %v1746_v17 = vpop.permute.xlu0 %1745 }
 0x4ef   :  { %v1757_v40 = vmul.f32 %v1746_v17, %v7270_v2  ;;  %v1761_v19 = vmul.f32 %v1746_v17, %v7281_v48  ;;  %v109_v17 = vld [vmem:[%s11295_s1 + $0x258] sm:$0xff] }
 0x4f1   :  { %1773 = vrot.lane.b32.xlu0 %v1757_v40, %s6437_s15  ;;  %v1748_v22 = vpop.permute.xlu1 %1747 }
 0x4f2   :  { %v1758_v16 = vmul.f32 %v1748_v22, %v7270_v2  ;;  %v1750_v50 = vpop.permute.xlu0 %1749  ;;  %v1762_v20 = vmul.f32 %v1748_v22, %v7281_v48 }
 0x4f3   :  { %v1759_v3 = vmul.f32 %v1750_v50, %v7270_v2  ;;  %v1763_v23 = vmul.f32 %v1750_v50, %v7281_v48 }
 0x4f4   :  { %1775 = vrot.lane.b32.xlu1 %v1758_v16, %s6437_s15 }
 0x4f5   :  { %1777 = vrot.lane.b32.xlu0 %v1759_v3, %s6437_s15  ;;  %v1752_v46 = vpop.permute.xlu1 %1751 }
 0x4f6   :  { %v1760_v8 = vmul.f32 %v1752_v46, %v7270_v2  ;;  %v1764_v53 = vmul.f32 %v1752_v46, %v7281_v48 }
 0x4f8   :  { %1779 = vrot.lane.b32.xlu1 %v1760_v8, %s6437_s15 }
 0x4f9   :  { %1781 = vrot.lane.b32.xlu0 %v1761_v19, %s6437_s15 }
 0x4fc   :  { %1783 = vrot.lane.b32.xlu1 %v1762_v20, %s6437_s15 }
 0x4fd   :  { %1785 = vrot.lane.b32.xlu0 %v1763_v23, %s6437_s15 }
 0x500   :  { %1787 = vrot.lane.b32.xlu1 %v1764_v53, %s6437_s15 }
 0x501   :  { %1809 = vrot.lane.b32.xlu0 %v106_v12, %s6435_s28 }
 0x504   :  { %1811 = vrot.lane.b32.xlu1 %v107_v52, %s6435_s28 }
 0x505   :  { %1813 = vrot.lane.b32.xlu0 %v108_v11, %s6435_s28 }
 0x508   :  { %1815 = vrot.lane.b32.xlu1 %v109_v17, %s6435_s28 }
 0x563   :  { %v7309_v40 = vpop.permute.xlu0 %1773 }
 0x564   :  { %11467 = vst [vmem:[#allocation69_spill] sm:$0xff] %v7309_v40 }
 0x566   :  { %v7311_v22 = vpop.permute.xlu1 %1775 }
 0x567   :  { %11468 = vst [vmem:[#allocation70_spill] sm:$0xff] %v7311_v22  ;;  %v7313_v16 = vpop.permute.xlu0 %1777 }
 0x568   :  { %11469 = vst [vmem:[#allocation71_spill] sm:$0xff] %v7313_v16 }
 0x56a   :  { %v7315_v50 = vpop.permute.xlu1 %1779 }
 0x56b   :  { %11470 = vst [vmem:[#allocation72_spill] sm:$0xff] %v7315_v50  ;;  %v7317_v3 = vpop.permute.xlu0 %1781 }
 0x56e   :  { %v7319_v46 = vpop.permute.xlu1 %1783 }
 0x56f   :  { %11471 = vst [vmem:[#allocation73_spill] sm:$0xff] %v7319_v46  ;;  %v7321_v8 = vpop.permute.xlu0 %1785 }
 0x570   :  { %11472 = vst [vmem:[#allocation74_spill] sm:$0xff] %v7321_v8 }
 0x572   :  { %v7323_v19 = vpop.permute.xlu1 %1787 }
 0x573   :  { %11473 = vst [vmem:[#allocation75_spill] sm:$0xff] %v7323_v19  ;;  %v1810_v20 = vpop.permute.xlu0 %1809 }
 0x574   :  { %v1821_v23 = vmul.f32 %v1810_v20, %v7270_v2  ;;  %v1825_v19 = vmul.f32 %v1810_v20, %v7281_v48 }
 0x576   :  { %1837 = vrot.lane.b32.xlu0 %v1821_v23, %s6438_s18  ;;  %v1812_v53 = vpop.permute.xlu1 %1811 }
 0x577   :  { %v1822_v12 = vmul.f32 %v1812_v53, %v7270_v2  ;;  %v1814_v52 = vpop.permute.xlu0 %1813  ;;  %v1826_v23 = vmul.f32 %v1812_v53, %v7281_v48 }
 0x578   :  { %v1823_v11 = vmul.f32 %v1814_v52, %v7270_v2  ;;  %v1827_v46 = vmul.f32 %v1814_v52, %v7281_v48 }
 0x579   :  { %1839 = vrot.lane.b32.xlu1 %v1822_v12, %s6438_s18 }
 0x57a   :  { %1841 = vrot.lane.b32.xlu0 %v1823_v11, %s6438_s18  ;;  %v1816_v17 = vpop.permute.xlu1 %1815  ;;  %v110_v11 = vld [vmem:[%s11295_s1 + $0x260] sm:$0xff] }
 0x57b   :  { %v1824_v8 = vmul.f32 %v1816_v17, %v7270_v2  ;;  %v1828_v12 = vmul.f32 %v1816_v17, %v7281_v48 }
 0x57d   :  { %1843 = vrot.lane.b32.xlu1 %v1824_v8, %s6438_s18  ;;  %v111_v8 = vld [vmem:[%s11295_s1 + $0x268] sm:$0xff] }
 0x57e   :  { %1845 = vrot.lane.b32.xlu0 %v1825_v19, %s6438_s18  ;;  %v112_v19 = vld [vmem:[%s11295_s1 + $0x270] sm:$0xff] }
 0x581   :  { %1847 = vrot.lane.b32.xlu1 %v1826_v23, %s6438_s18 }
 0x582   :  { %1849 = vrot.lane.b32.xlu0 %v1827_v46, %s6438_s18  ;;  %v113_v46 = vld [vmem:[%s11295_s1 + $0x278] sm:$0xff] }
 0x585   :  { %1851 = vrot.lane.b32.xlu1 %v1828_v12, %s6438_s18 }
 0x586   :  { %1873 = vrot.lane.b32.xlu0 %v110_v11, %s6436_s11 }
 0x589   :  { %1875 = vrot.lane.b32.xlu1 %v111_v8, %s6436_s11 }
 0x58a   :  { %1877 = vrot.lane.b32.xlu0 %v112_v19, %s6436_s11 }
 0x58d   :  { %1879 = vrot.lane.b32.xlu1 %v113_v46, %s6436_s11 }
 0x5e8   :  { %v7357_v20 = vpop.permute.xlu0 %1837 }
 0x5e9   :  { %11474 = vst [vmem:[#allocation76_spill] sm:$0xff] %v7357_v20 }
 0x5eb   :  { %v7359_v53 = vpop.permute.xlu1 %1839 }
 0x5ec   :  { %11475 = vst [vmem:[#allocation77_spill] sm:$0xff] %v7359_v53  ;;  %v7361_v52 = vpop.permute.xlu0 %1841 }
 0x5ed   :  { %11476 = vst [vmem:[#allocation78_spill] sm:$0xff] %v7361_v52 }
 0x5ef   :  { %v7363_v17 = vpop.permute.xlu1 %1843 }
 0x5f0   :  { %11477 = vst [vmem:[#allocation79_spill] sm:$0xff] %v7363_v17  ;;  %v7365_v23 = vpop.permute.xlu0 %1845  ;;  %v118_v17 = vld [vmem:[%s11295_s1 + $0x2a0] sm:$0xff] }
 0x5f3   :  { %v7367_v12 = vpop.permute.xlu1 %1847 }
 0x5f4   :  { %11478 = vst [vmem:[#allocation80_spill] sm:$0xff] %v7367_v12  ;;  %v7369_v11 = vpop.permute.xlu0 %1849 }
 0x5f5   :  { %11479 = vst [vmem:[#allocation81_spill] sm:$0xff] %v7369_v11 }
 0x5f7   :  { %v7371_v8 = vpop.permute.xlu1 %1851 }
 0x5f8   :  { %11480 = vst [vmem:[#allocation82_spill] sm:$0xff] %v7371_v8  ;;  %v1874_v19 = vpop.permute.xlu0 %1873 }
 0x5f9   :  { %v1885_v50 = vmul.f32 %v1874_v19, %v7270_v2  ;;  %v1889_v8 = vmul.f32 %v1874_v19, %v7281_v48 }
 0x5fb   :  { %1901 = vrot.lane.b32.xlu0 %v1885_v50, %s6439_s20  ;;  %v1876_v46 = vpop.permute.xlu1 %1875 }
 0x5fc   :  { %v1886_v53 = vmul.f32 %v1876_v46, %v7270_v2  ;;  %v1878_v20 = vpop.permute.xlu0 %1877  ;;  %v1890_v50 = vmul.f32 %v1876_v46, %v7281_v48 }
 0x5fd   :  { %v1887_v52 = vmul.f32 %v1878_v20, %v7270_v2  ;;  %v1891_v16 = vmul.f32 %v1878_v20, %v7281_v48 }
 0x5fe   :  { %1903 = vrot.lane.b32.xlu1 %v1886_v53, %s6439_s20  ;;  %v2021_v53 = vrot.slane %v118_v17, 7 }
 0x5ff   :  { %1905 = vrot.lane.b32.xlu0 %v1887_v52, %s6439_s20  ;;  %v1880_v12 = vpop.permute.xlu1 %1879  ;;  %v119_v52 = vld [vmem:[%s11295_s1 + $0x2a8] sm:$0xff] }
 0x600   :  { %v1888_v11 = vmul.f32 %v1880_v12, %v7270_v2  ;;  %v2022_v19 = vrot.slane %v119_v52, 7 }
 0x602   :  { %1907 = vrot.lane.b32.xlu1 %v1888_v11, %s6439_s20  ;;  %v1892_v11 = vmul.f32 %v1880_v12, %v7281_v48 }
 0x603   :  { %1909 = vrot.lane.b32.xlu0 %v1889_v8, %s6439_s20  ;;  %v120_v8 = vld [vmem:[%s11295_s1 + $0x2b0] sm:$0xff] }
 0x604   :  { %v2023_v20 = vrot.slane %v120_v8, 7 }
 0x606   :  { %1911 = vrot.lane.b32.xlu1 %v1890_v50, %s6439_s20 }
 0x607   :  { %1913 = vrot.lane.b32.xlu0 %v1891_v16, %s6439_s20  ;;  %v121_v16 = vld [vmem:[%s11295_s1 + $0x2b8] sm:$0xff] }
 0x608   :  { %v2024_v17 = vrot.slane %v121_v16, 7 }
 0x60a   :  { %1915 = vrot.lane.b32.xlu1 %v1892_v11, %s6439_s20 }
 0x60b   :  { %2025 = vrot.lane.b32.xlu0 %v2021_v53, %s6434_s19 }
 0x60e   :  { %2027 = vrot.lane.b32.xlu1 %v2022_v19, %s6434_s19 }
 0x60f   :  { %2029 = vrot.lane.b32.xlu0 %v2023_v20, %s6434_s19  ;;  %v7424_v20 = vld [vmem:[%s11294_s0 + $0x18] sm:$0x7] }
 0x612   :  { %2031 = vrot.lane.b32.xlu1 %v2024_v17, %s6434_s19 }
 0x66d   :  { %v7405_v12 = vpop.permute.xlu0 %1901 }
 0x66e   :  { %11481 = vst [vmem:[#allocation83_spill] sm:$0xff] %v7405_v12 }
 0x670   :  { %v7407_v46 = vpop.permute.xlu1 %1903 }
 0x671   :  { %11482 = vst [vmem:[#allocation84_spill] sm:$0xff] %v7407_v46  ;;  %v7409_v50 = vpop.permute.xlu0 %1905 }
 0x672   :  { %11483 = vst [vmem:[#allocation85_spill] sm:$0xff] %v7409_v50 }
 0x674   :  { %v7411_v52 = vpop.permute.xlu1 %1907 }
 0x675   :  { %11484 = vst [vmem:[#allocation86_spill] sm:$0xff] %v7411_v52  ;;  %v7413_v53 = vpop.permute.xlu0 %1909 }
 0x678   :  { %v7415_v11 = vpop.permute.xlu1 %1911 }
 0x679   :  { %11485 = vst [vmem:[#allocation87_spill] sm:$0xff] %v7415_v11  ;;  %v7417_v8 = vpop.permute.xlu0 %1913 }
 0x67a   :  { %11486 = vst [vmem:[#allocation88_spill] sm:$0xff] %v7417_v8  ;;  %v7432_v8 = vld [vmem:[%s11294_s0 + $0x58] sm:$0x7] }
 0x67c   :  { %v7419_v19 = vpop.permute.xlu1 %1915 }
 0x67d   :  { %11487 = vst [vmem:[#allocation89_spill] sm:$0xff] %v7419_v19  ;;  %v2026_v16 = vpop.permute.xlu0 %2025 }
 0x67e   :  { %v2037_v17 = vmul.f32 %v2026_v16, %v7270_v2  ;;  %v2038_v50 = vmul.f32 %v2026_v16, %v7424_v20  ;;  %v2045_v22 = vmul.f32 %v2026_v16, %v7281_v48 }
 0x680   :  { %v2028_v46 = vpop.permute.xlu1 %2027  ;;  %v2069_v52 = vrot.slane %v2037_v17, 1  ;;  %v2070_v12 = vrot.slane %v2038_v50, 1  ;;  %v2046_v50 = vmul.f32 %v2026_v16, %v7432_v8  ;;  %v2081_v41 = vrot.slane %v2045_v22, 1 }
 0x681   :  { %v2030_v19 = vpop.permute.xlu0 %2029  ;;  %v2039_v11 = vmul.f32 %v2028_v46, %v7270_v2  ;;  %v2040_v40 = vmul.f32 %v2028_v46, %v7424_v20  ;;  %v2047_v39 = vmul.f32 %v2028_v46, %v7281_v48  ;;  %v2048_v37 = vmul.f32 %v2028_v46, %v7432_v8 }
 0x682   :  { %v2071_v13 = vsel %vm542_vm0, %v2069_v52, %v2070_v12  ;;  %v2041_v44 = vmul.f32 %v2030_v19, %v7270_v2  ;;  %v2042_v42 = vmul.f32 %v2030_v19, %v7424_v20 }
 0x683   :  { %2093 = vrot.lane.b32.xlu0 %v2071_v13, %s6437_s15  ;;  %v2072_v17 = vrot.slane %v2039_v11, 1  ;;  %v2073_v18 = vrot.slane %v2040_v40, 1  ;;  %v2082_v11 = vrot.slane %v2046_v50, 1  ;;  %v2049_v40 = vmul.f32 %v2030_v19, %v7281_v48 }
 0x684   :  { %v2032_v51 = vpop.permute.xlu1 %2031  ;;  %v2075_v47 = vrot.slane %v2041_v44, 1  ;;  %v2076_v43 = vrot.slane %v2042_v42, 1  ;;  %v2050_v42 = vmul.f32 %v2030_v19, %v7432_v8  ;;  %v122_v19 = vld [vmem:[%s11295_s1 + $0x2c0] sm:$0xff] }
 0x685   :  { %v2074_v38 = vsel %vm542_vm0, %v2072_v17, %v2073_v18  ;;  %v2043_v12 = vmul.f32 %v2032_v51, %v7270_v2  ;;  %v2044_v52 = vmul.f32 %v2032_v51, %v7424_v20  ;;  %v2084_v18 = vrot.slane %v2047_v39, 1 }
 0x686   :  { %2095 = vrot.lane.b32.xlu1 %v2074_v38, %s6437_s15  ;;  %v2077_v13 = vsel %vm542_vm0, %v2075_v47, %v2076_v43  ;;  %v2085_v17 = vrot.slane %v2048_v37, 1  ;;  %v2051_v34 = vmul.f32 %v2032_v51, %v7281_v48  ;;  %v2052_v46 = vmul.f32 %v2032_v51, %v7432_v8 }
 0x687   :  { %2097 = vrot.lane.b32.xlu0 %v2077_v13, %s6437_s15  ;;  %v2078_v44 = vrot.slane %v2043_v12, 1  ;;  %v2079_v22 = vrot.slane %v2044_v52, 1  ;;  %v2083_v38 = vsel %vm542_vm0, %v2081_v41, %v2082_v11  ;;  %v2087_v43 = vrot.slane %v2049_v40, 1  ;;  %v123_v41 = vld [vmem:[%s11295_s1 + $0x2c8] sm:$0xff]  ;;  %v124_v52 = vld [vmem:[%s11295_s1 + $0x2d0] sm:$0xff]  ;;  %v125_v40 = vld [vmem:[%s11295_s1 + $0x2d8] sm:$0xff] }
 0x688   :  { %v2088_v47 = vrot.slane %v2050_v42, 1  ;;  %v2086_v39 = vsel %vm542_vm0, %v2084_v18, %v2085_v17  ;;  %v2090_v50 = vrot.slane %v2051_v34, 1  ;;  %v2091_v37 = vrot.slane %v2052_v46, 1 }
 0x689   :  { %v2080_v16 = vsel %vm542_vm0, %v2078_v44, %v2079_v22  ;;  %v2129_v12 = vrot.slane %v122_v19, 7  ;;  %v2130_v34 = vrot.slane %v123_v41, 7  ;;  %v2131_v11 = vrot.slane %v124_v52, 7 }
 0x68a   :  { %2099 = vrot.lane.b32.xlu1 %v2080_v16, %s6437_s15  ;;  %v2089_v51 = vsel %vm542_vm0, %v2087_v43, %v2088_v47  ;;  %v2092_v13 = vsel %vm542_vm0, %v2090_v50, %v2091_v37  ;;  %v2132_v42 = vrot.slane %v125_v40, 7 }
 0x68b   :  { %2101 = vrot.lane.b32.xlu0 %v2083_v38, %s6437_s15 }
 0x68e   :  { %2103 = vrot.lane.b32.xlu1 %v2086_v39, %s6437_s15 }
 0x68f   :  { %2105 = vrot.lane.b32.xlu0 %v2089_v51, %s6437_s15 }
 0x692   :  { %2107 = vrot.lane.b32.xlu1 %v2092_v13, %s6437_s15 }
 0x693   :  { %2133 = vrot.lane.b32.xlu0 %v2129_v12, %s6435_s28 }
 0x696   :  { %2135 = vrot.lane.b32.xlu1 %v2130_v34, %s6435_s28 }
 0x697   :  { %2137 = vrot.lane.b32.xlu0 %v2131_v11, %s6435_s28 }
 0x69a   :  { %2139 = vrot.lane.b32.xlu1 %v2132_v42, %s6435_s28 }
 0x6f5   :  { %v7479_v44 = vpop.permute.xlu0 %2093 }
 0x6f6   :  { %11488 = vst [vmem:[#allocation90_spill] sm:$0xff] %v7479_v44 }
 0x6f8   :  { %v7481_v22 = vpop.permute.xlu1 %2095 }
 0x6f9   :  { %11489 = vst [vmem:[#allocation91_spill] sm:$0xff] %v7481_v22  ;;  %v7483_v18 = vpop.permute.xlu0 %2097 }
 0x6fa   :  { %11490 = vst [vmem:[#allocation92_spill] sm:$0xff] %v7483_v18 }
 0x6fc   :  { %v7485_v16 = vpop.permute.xlu1 %2099 }
 0x6fd   :  { %11491 = vst [vmem:[#allocation93_spill] sm:$0xff] %v7485_v16  ;;  %v7487_v17 = vpop.permute.xlu0 %2101 }
 0x700   :  { %v7489_v46 = vpop.permute.xlu1 %2103 }
 0x701   :  { %11492 = vst [vmem:[#allocation94_spill] sm:$0xff] %v7489_v46  ;;  %v7491_v38 = vpop.permute.xlu0 %2105 }
 0x702   :  { %11493 = vst [vmem:[#allocation95_spill] sm:$0xff] %v7491_v38 }
 0x704   :  { %v7493_v43 = vpop.permute.xlu1 %2107 }
 0x705   :  { %11494 = vst [vmem:[#allocation96_spill] sm:$0xff] %v7493_v43  ;;  %v2134_v47 = vpop.permute.xlu0 %2133 }
 0x706   :  { %v2145_v19 = vmul.f32 %v2134_v47, %v7270_v2  ;;  %v2146_v39 = vmul.f32 %v2134_v47, %v7424_v20  ;;  %v2153_v12 = vmul.f32 %v2134_v47, %v7281_v48  ;;  %v2154_v42 = vmul.f32 %v2134_v47, %v7432_v8 }
 0x708   :  { %v2136_v50 = vpop.permute.xlu1 %2135  ;;  %v2177_v37 = vrot.slane %v2145_v19, 1  ;;  %v2178_v51 = vrot.slane %v2146_v39, 1  ;;  %v2189_v16 = vrot.slane %v2153_v12, 1 }
 0x709   :  { %v2138_v41 = vpop.permute.xlu0 %2137  ;;  %v2147_v52 = vmul.f32 %v2136_v50, %v7270_v2  ;;  %v2148_v13 = vmul.f32 %v2136_v50, %v7424_v20  ;;  %v2155_v18 = vmul.f32 %v2136_v50, %v7281_v48  ;;  %v2156_v44 = vmul.f32 %v2136_v50, %v7432_v8 }
 0x70a   :  { %v2179_v34 = vsel %vm542_vm0, %v2177_v37, %v2178_v51  ;;  %v2149_v11 = vmul.f32 %v2138_v41, %v7270_v2  ;;  %v2150_v40 = vmul.f32 %v2138_v41, %v7424_v20 }
 0x70b   :  { %2201 = vrot.lane.b32.xlu0 %v2179_v34, %s6438_s18  ;;  %v2180_v43 = vrot.slane %v2147_v52, 1  ;;  %v2181_v19 = vrot.slane %v2148_v13, 1  ;;  %v2190_v52 = vrot.slane %v2154_v42, 1  ;;  %v2157_v13 = vmul.f32 %v2138_v41, %v7281_v48 }
 0x70c   :  { %v2140_v39 = vpop.permute.xlu1 %2139  ;;  %v2183_v38 = vrot.slane %v2149_v11, 1  ;;  %v2184_v46 = vrot.slane %v2150_v40, 1  ;;  %v2158_v34 = vmul.f32 %v2138_v41, %v7432_v8  ;;  %v126_v41 = vld [vmem:[%s11295_s1 + $0x2e0] sm:$0xff] }
 0x70d   :  { %v2182_v22 = vsel %vm542_vm0, %v2180_v43, %v2181_v19  ;;  %v2151_v37 = vmul.f32 %v2140_v39, %v7270_v2  ;;  %v2152_v51 = vmul.f32 %v2140_v39, %v7424_v20  ;;  %v2192_v43 = vrot.slane %v2155_v18, 1 }
 0x70e   :  { %2203 = vrot.lane.b32.xlu1 %v2182_v22, %s6438_s18  ;;  %v2185_v47 = vsel %vm542_vm0, %v2183_v38, %v2184_v46  ;;  %v2193_v19 = vrot.slane %v2156_v44, 1  ;;  %v2159_v33 = vmul.f32 %v2140_v39, %v7281_v48  ;;  %v2160_v50 = vmul.f32 %v2140_v39, %v7432_v8 }
 0x70f   :  { %2205 = vrot.lane.b32.xlu0 %v2185_v47, %s6438_s18  ;;  %v2186_v12 = vrot.slane %v2151_v37, 1  ;;  %v2187_v11 = vrot.slane %v2152_v51, 1  ;;  %v2191_v22 = vsel %vm542_vm0, %v2189_v16, %v2190_v52  ;;  %v2195_v46 = vrot.slane %v2157_v13, 1  ;;  %v127_v16 = vld [vmem:[%s11295_s1 + $0x2e8] sm:$0xff]  ;;  %v128_v51 = vld [vmem:[%s11295_s1 + $0x2f0] sm:$0xff]  ;;  %v129_v13 = vld [vmem:[%s11295_s1 + $0x2f8] sm:$0xff] }
 0x710   :  { %v2196_v38 = vrot.slane %v2158_v34, 1  ;;  %v2194_v18 = vsel %vm542_vm0, %v2192_v43, %v2193_v19  ;;  %v2198_v42 = vrot.slane %v2159_v33, 1  ;;  %v2199_v44 = vrot.slane %v2160_v50, 1 }
 0x711   :  { %v2188_v40 = vsel %vm542_vm0, %v2186_v12, %v2187_v11  ;;  %v2237_v37 = vrot.slane %v126_v41, 7  ;;  %v2238_v33 = vrot.slane %v127_v16, 7  ;;  %v2239_v52 = vrot.slane %v128_v51, 7 }
 0x712   :  { %2207 = vrot.lane.b32.xlu1 %v2188_v40, %s6438_s18  ;;  %v2197_v39 = vsel %vm542_vm0, %v2195_v46, %v2196_v38  ;;  %v2200_v47 = vsel %vm542_vm0, %v2198_v42, %v2199_v44  ;;  %v2240_v34 = vrot.slane %v129_v13, 7 }
 0x713   :  { %2209 = vrot.lane.b32.xlu0 %v2191_v22, %s6438_s18 }
 0x716   :  { %2211 = vrot.lane.b32.xlu1 %v2194_v18, %s6438_s18 }
 0x717   :  { %2213 = vrot.lane.b32.xlu0 %v2197_v39, %s6438_s18 }
 0x71a   :  { %2215 = vrot.lane.b32.xlu1 %v2200_v47, %s6438_s18 }
 0x71b   :  { %2241 = vrot.lane.b32.xlu0 %v2237_v37, %s6436_s11 }
 0x71e   :  { %2243 = vrot.lane.b32.xlu1 %v2238_v33, %s6436_s11 }
 0x71f   :  { %2245 = vrot.lane.b32.xlu0 %v2239_v52, %s6436_s11 }
 0x722   :  { %2247 = vrot.lane.b32.xlu1 %v2240_v34, %s6436_s11 }
 0x77d   :  { %v7543_v12 = vpop.permute.xlu0 %2201 }
 0x77e   :  { %11495 = vst [vmem:[#allocation97_spill] sm:$0xff] %v7543_v12 }
 0x780   :  { %v7545_v11 = vpop.permute.xlu1 %2203 }
 0x781   :  { %11496 = vst [vmem:[#allocation98_spill] sm:$0xff] %v7545_v11  ;;  %v7547_v43 = vpop.permute.xlu0 %2205 }
 0x782   :  { %11497 = vst [vmem:[#allocation99_spill] sm:$0xff] %v7547_v43 }
 0x784   :  { %v7549_v40 = vpop.permute.xlu1 %2207 }
 0x785   :  { %11498 = vst [vmem:[#allocation100_spill] sm:$0xff] %v7549_v40  ;;  %v7551_v19 = vpop.permute.xlu0 %2209 }
 0x788   :  { %v7553_v50 = vpop.permute.xlu1 %2211 }
 0x789   :  { %11499 = vst [vmem:[#allocation101_spill] sm:$0xff] %v7553_v50  ;;  %v7555_v22 = vpop.permute.xlu0 %2213 }
 0x78a   :  { %11500 = vst [vmem:[#allocation102_spill] sm:$0xff] %v7555_v22 }
 0x78c   :  { %v7557_v46 = vpop.permute.xlu1 %2215 }
 0x78d   :  { %11501 = vst [vmem:[#allocation103_spill] sm:$0xff] %v7557_v46  ;;  %v2242_v38 = vpop.permute.xlu0 %2241 }
 0x78e   :  { %v2253_v41 = vmul.f32 %v2242_v38, %v7270_v2  ;;  %v2254_v18 = vmul.f32 %v2242_v38, %v7424_v20  ;;  %v2261_v37 = vmul.f32 %v2242_v38, %v7281_v48  ;;  %v2262_v34 = vmul.f32 %v2242_v38, %v7432_v8 }
 0x790   :  { %v2244_v42 = vpop.permute.xlu1 %2243  ;;  %v2285_v44 = vrot.slane %v2253_v41, 1  ;;  %v2286_v39 = vrot.slane %v2254_v18, 1  ;;  %v2297_v40 = vrot.slane %v2261_v37, 1 }
 0x791   :  { %v2246_v16 = vpop.permute.xlu0 %2245  ;;  %v2255_v51 = vmul.f32 %v2244_v42, %v7270_v2  ;;  %v2256_v47 = vmul.f32 %v2244_v42, %v7424_v20  ;;  %v2263_v43 = vmul.f32 %v2244_v42, %v7281_v48  ;;  %v2264_v12 = vmul.f32 %v2244_v42, %v7432_v8 }
 0x792   :  { %v2287_v33 = vsel %vm542_vm0, %v2285_v44, %v2286_v39  ;;  %v2257_v52 = vmul.f32 %v2246_v16, %v7270_v2  ;;  %v2258_v13 = vmul.f32 %v2246_v16, %v7424_v20 }
 0x793   :  { %2309 = vrot.lane.b32.xlu0 %v2287_v33, %s6439_s20  ;;  %v2288_v46 = vrot.slane %v2255_v51, 1  ;;  %v2289_v41 = vrot.slane %v2256_v47, 1  ;;  %v2298_v51 = vrot.slane %v2262_v34, 1  ;;  %v2265_v47 = vmul.f32 %v2246_v16, %v7281_v48 }
 0x794   :  { %v2248_v18 = vpop.permute.xlu1 %2247  ;;  %v2291_v22 = vrot.slane %v2257_v52, 1  ;;  %v2292_v50 = vrot.slane %v2258_v13, 1  ;;  %v2266_v33 = vmul.f32 %v2246_v16, %v7432_v8  ;;  %v134_v16 = vld [vmem:[%s11295_s1 + $0x320] sm:$0xff] }
 0x795   :  { %v2290_v11 = vsel %vm542_vm0, %v2288_v46, %v2289_v41  ;;  %v2259_v44 = vmul.f32 %v2248_v18, %v7270_v2  ;;  %v2260_v39 = vmul.f32 %v2248_v18, %v7424_v20  ;;  %v2300_v46 = vrot.slane %v2263_v43, 1 }
 0x796   :  { %2311 = vrot.lane.b32.xlu1 %v2290_v11, %s6439_s20  ;;  %v2293_v38 = vsel %vm542_vm0, %v2291_v22, %v2292_v50  ;;  %v2301_v41 = vrot.slane %v2264_v12, 1  ;;  %v2267_v31 = vmul.f32 %v2248_v18, %v7281_v48  ;;  %v2268_v42 = vmul.f32 %v2248_v18, %v7432_v8 }
 0x797   :  { %2313 = vrot.lane.b32.xlu0 %v2293_v38, %s6439_s20  ;;  %v2294_v37 = vrot.slane %v2259_v44, 1  ;;  %v2295_v52 = vrot.slane %v2260_v39, 1  ;;  %v2299_v11 = vsel %vm542_vm0, %v2297_v40, %v2298_v51  ;;  %v2303_v50 = vrot.slane %v2265_v47, 1  ;;  %v135_v40 = vld [vmem:[%s11295_s1 + $0x328] sm:$0xff]  ;;  %v136_v39 = vld [vmem:[%s11295_s1 + $0x330] sm:$0xff]  ;;  %v137_v47 = vld [vmem:[%s11295_s1 + $0x338] sm:$0xff] }
 0x798   :  { %v2304_v22 = vrot.slane %v2266_v33, 1  ;;  %v2302_v43 = vsel %vm542_vm0, %v2300_v46, %v2301_v41  ;;  %v2306_v34 = vrot.slane %v2267_v31, 1  ;;  %v2307_v12 = vrot.slane %v2268_v42, 1 }
 0x799   :  { %v2296_v13 = vsel %vm542_vm0, %v2294_v37, %v2295_v52  ;;  %v2429_v44 = vrot.slane %v134_v16, 6  ;;  %v2430_v31 = vrot.slane %v135_v40, 6  ;;  %v2431_v51 = vrot.slane %v136_v39, 6 }
 0x79a   :  { %2315 = vrot.lane.b32.xlu1 %v2296_v13, %s6439_s20  ;;  %v2305_v18 = vsel %vm542_vm0, %v2303_v50, %v2304_v22  ;;  %v2308_v38 = vsel %vm542_vm0, %v2306_v34, %v2307_v12  ;;  %v2432_v33 = vrot.slane %v137_v47, 6 }
 0x79b   :  { %2317 = vrot.lane.b32.xlu0 %v2299_v11, %s6439_s20 }
 0x79e   :  { %2319 = vrot.lane.b32.xlu1 %v2302_v43, %s6439_s20 }
 0x79f   :  { %2321 = vrot.lane.b32.xlu0 %v2305_v18, %s6439_s20 }
 0x7a2   :  { %2323 = vrot.lane.b32.xlu1 %v2308_v38, %s6439_s20 }
 0x7a3   :  { %2433 = vrot.lane.b32.xlu0 %v2429_v44, %s6434_s19 }
 0x7a6   :  { %2435 = vrot.lane.b32.xlu1 %v2430_v31, %s6434_s19 }
 0x7a7   :  { %2437 = vrot.lane.b32.xlu0 %v2431_v51, %s6434_s19 }
 0x7aa   :  { %2439 = vrot.lane.b32.xlu1 %v2432_v33, %s6434_s19 }
 0x805   :  { %v7607_v37 = vpop.permute.xlu0 %2309 }
 0x806   :  { %11502 = vst [vmem:[#allocation104_spill] sm:$0xff] %v7607_v37 }
 0x808   :  { %v7609_v52 = vpop.permute.xlu1 %2311 }
 0x809   :  { %11503 = vst [vmem:[#allocation105_spill] sm:$0xff] %v7609_v52  ;;  %v7611_v46 = vpop.permute.xlu0 %2313 }
 0x80a   :  { %11504 = vst [vmem:[#allocation106_spill] sm:$0xff] %v7611_v46 }
 0x80c   :  { %v7613_v13 = vpop.permute.xlu1 %2315 }
 0x80d   :  { %11505 = vst [vmem:[#allocation107_spill] sm:$0xff] %v7613_v13  ;;  %v7615_v41 = vpop.permute.xlu0 %2317 }
 0x810   :  { %v7617_v42 = vpop.permute.xlu1 %2319 }
 0x811   :  { %11506 = vst [vmem:[#allocation108_spill] sm:$0xff] %v7617_v42  ;;  %v7619_v11 = vpop.permute.xlu0 %2321 }
 0x812   :  { %11507 = vst [vmem:[#allocation109_spill] sm:$0xff] %v7619_v11 }
 0x814   :  { %v7621_v50 = vpop.permute.xlu1 %2323 }
 0x815   :  { %11508 = vst [vmem:[#allocation110_spill] sm:$0xff] %v7621_v50  ;;  %v2434_v22 = vpop.permute.xlu0 %2433 }
 0x816   :  { %v2445_v16 = vmul.f32 %v2434_v22, %v7270_v2  ;;  %v2446_v43 = vmul.f32 %v2434_v22, %v7424_v20  ;;  %v2453_v44 = vmul.f32 %v2434_v22, %v7281_v48  ;;  %v2454_v33 = vmul.f32 %v2434_v22, %v7432_v8 }
 0x818   :  { %v2436_v34 = vpop.permute.xlu1 %2435  ;;  %v2477_v12 = vrot.slane %v2445_v16, 2  ;;  %v2478_v18 = vrot.slane %v2446_v43, 2  ;;  %v2489_v13 = vrot.slane %v2453_v44, 2 }
 0x819   :  { %v2438_v40 = vpop.permute.xlu0 %2437  ;;  %v2447_v39 = vmul.f32 %v2436_v34, %v7270_v2  ;;  %v2448_v38 = vmul.f32 %v2436_v34, %v7424_v20  ;;  %v2455_v46 = vmul.f32 %v2436_v34, %v7281_v48  ;;  %v2456_v37 = vmul.f32 %v2436_v34, %v7432_v8 }
 0x81a   :  { %v2479_v31 = vsel %vm951_vm1, %v2477_v12, %v2478_v18  ;;  %v2449_v51 = vmul.f32 %v2438_v40, %v7270_v2  ;;  %v2450_v47 = vmul.f32 %v2438_v40, %v7424_v20 }
 0x81b   :  { %2501 = vrot.lane.b32.xlu0 %v2479_v31, %s6437_s15  ;;  %v2480_v50 = vrot.slane %v2447_v39, 2  ;;  %v2481_v16 = vrot.slane %v2448_v38, 2  ;;  %v2490_v39 = vrot.slane %v2454_v33, 2  ;;  %v2457_v38 = vmul.f32 %v2438_v40, %v7281_v48 }
 0x81c   :  { %v2440_v43 = vpop.permute.xlu1 %2439  ;;  %v2483_v11 = vrot.slane %v2449_v51, 2  ;;  %v2484_v42 = vrot.slane %v2450_v47, 2  ;;  %v2458_v31 = vmul.f32 %v2438_v40, %v7432_v8  ;;  %v138_v40 = vld [vmem:[%s11295_s1 + $0x340] sm:$0xff] }
 0x81d   :  { %v2482_v52 = vsel %vm951_vm1, %v2480_v50, %v2481_v16  ;;  %v2451_v12 = vmul.f32 %v2440_v43, %v7270_v2  ;;  %v2452_v18 = vmul.f32 %v2440_v43, %v7424_v20  ;;  %v2492_v50 = vrot.slane %v2455_v46, 2 }
 0x81e   :  { %2503 = vrot.lane.b32.xlu1 %v2482_v52, %s6437_s15  ;;  %v2485_v22 = vsel %vm951_vm1, %v2483_v11, %v2484_v42  ;;  %v2493_v16 = vrot.slane %v2456_v37, 2  ;;  %v2459_v30 = vmul.f32 %v2440_v43, %v7281_v48  ;;  %v2460_v34 = vmul.f32 %v2440_v43, %v7432_v8 }
 0x81f   :  { %2505 = vrot.lane.b32.xlu0 %v2485_v22, %s6437_s15  ;;  %v2486_v44 = vrot.slane %v2451_v12, 2  ;;  %v2487_v51 = vrot.slane %v2452_v18, 2  ;;  %v2491_v52 = vsel %vm951_vm1, %v2489_v13, %v2490_v39  ;;  %v2495_v42 = vrot.slane %v2457_v38, 2  ;;  %v139_v13 = vld [vmem:[%s11295_s1 + $0x348] sm:$0xff]  ;;  %v140_v18 = vld [vmem:[%s11295_s1 + $0x350] sm:$0xff]  ;;  %v141_v38 = vld [vmem:[%s11295_s1 + $0x358] sm:$0xff] }
 0x820   :  { %v2496_v11 = vrot.slane %v2458_v31, 2  ;;  %v2494_v46 = vsel %vm951_vm1, %v2492_v50, %v2493_v16  ;;  %v2498_v33 = vrot.slane %v2459_v30, 2  ;;  %v2499_v37 = vrot.slane %v2460_v34, 2 }
 0x821   :  { %v2488_v47 = vsel %vm951_vm1, %v2486_v44, %v2487_v51  ;;  %v2537_v12 = vrot.slane %v138_v40, 6  ;;  %v2538_v30 = vrot.slane %v139_v13, 6  ;;  %v2539_v39 = vrot.slane %v140_v18, 6 }
 0x822   :  { %2507 = vrot.lane.b32.xlu1 %v2488_v47, %s6437_s15  ;;  %v2497_v43 = vsel %vm951_vm1, %v2495_v42, %v2496_v11  ;;  %v2500_v22 = vsel %vm951_vm1, %v2498_v33, %v2499_v37  ;;  %v2540_v31 = vrot.slane %v141_v38, 6 }
 0x823   :  { %2509 = vrot.lane.b32.xlu0 %v2491_v52, %s6437_s15 }
 0x826   :  { %2511 = vrot.lane.b32.xlu1 %v2494_v46, %s6437_s15 }
 0x827   :  { %2513 = vrot.lane.b32.xlu0 %v2497_v43, %s6437_s15 }
 0x82a   :  { %2515 = vrot.lane.b32.xlu1 %v2500_v22, %s6437_s15 }
 0x82b   :  { %2541 = vrot.lane.b32.xlu0 %v2537_v12, %s6435_s28 }
 0x82e   :  { %2543 = vrot.lane.b32.xlu1 %v2538_v30, %s6435_s28 }
 0x82f   :  { %2545 = vrot.lane.b32.xlu0 %v2539_v39, %s6435_s28 }
 0x832   :  { %2547 = vrot.lane.b32.xlu1 %v2540_v31, %s6435_s28 }
 0x88d   :  { %v7671_v44 = vpop.permute.xlu0 %2501 }
 0x88e   :  { %11509 = vst [vmem:[#allocation111_spill] sm:$0xff] %v7671_v44 }
 0x890   :  { %v7673_v51 = vpop.permute.xlu1 %2503 }
 0x891   :  { %11510 = vst [vmem:[#allocation112_spill] sm:$0xff] %v7673_v51  ;;  %v7675_v50 = vpop.permute.xlu0 %2505 }
 0x892   :  { %11511 = vst [vmem:[#allocation113_spill] sm:$0xff] %v7675_v50 }
 0x894   :  { %v7677_v47 = vpop.permute.xlu1 %2507 }
 0x895   :  { %11512 = vst [vmem:[#allocation114_spill] sm:$0xff] %v7677_v47  ;;  %v7679_v16 = vpop.permute.xlu0 %2509 }
 0x898   :  { %v7681_v34 = vpop.permute.xlu1 %2511 }
 0x899   :  { %11513 = vst [vmem:[#allocation115_spill] sm:$0xff] %v7681_v34  ;;  %v7683_v52 = vpop.permute.xlu0 %2513 }
 0x89a   :  { %11514 = vst [vmem:[#allocation116_spill] sm:$0xff] %v7683_v52 }
 0x89c   :  { %v7685_v42 = vpop.permute.xlu1 %2515 }
 0x89d   :  { %11515 = vst [vmem:[#allocation117_spill] sm:$0xff] %v7685_v42  ;;  %v2542_v11 = vpop.permute.xlu0 %2541 }
 0x89e   :  { %v2553_v40 = vmul.f32 %v2542_v11, %v7270_v2  ;;  %v2554_v46 = vmul.f32 %v2542_v11, %v7424_v20  ;;  %v2561_v12 = vmul.f32 %v2542_v11, %v7281_v48  ;;  %v2562_v31 = vmul.f32 %v2542_v11, %v7432_v8 }
 0x8a0   :  { %v2544_v33 = vpop.permute.xlu1 %2543  ;;  %v2585_v37 = vrot.slane %v2553_v40, 2  ;;  %v2586_v43 = vrot.slane %v2554_v46, 2  ;;  %v2597_v47 = vrot.slane %v2561_v12, 2 }
 0x8a1   :  { %v2546_v13 = vpop.permute.xlu0 %2545  ;;  %v2555_v18 = vmul.f32 %v2544_v33, %v7270_v2  ;;  %v2556_v22 = vmul.f32 %v2544_v33, %v7424_v20  ;;  %v2563_v50 = vmul.f32 %v2544_v33, %v7281_v48  ;;  %v2564_v44 = vmul.f32 %v2544_v33, %v7432_v8 }
 0x8a2   :  { %v2587_v30 = vsel %vm951_vm1, %v2585_v37, %v2586_v43  ;;  %v2557_v39 = vmul.f32 %v2546_v13, %v7270_v2  ;;  %v2558_v38 = vmul.f32 %v2546_v13, %v7424_v20 }
 0x8a3   :  { %2609 = vrot.lane.b32.xlu0 %v2587_v30, %s6438_s18  ;;  %v2588_v42 = vrot.slane %v2555_v18, 2  ;;  %v2589_v40 = vrot.slane %v2556_v22, 2  ;;  %v2598_v18 = vrot.slane %v2562_v31, 2  ;;  %v2565_v22 = vmul.f32 %v2546_v13, %v7281_v48 }
 0x8a4   :  { %v2548_v46 = vpop.permute.xlu1 %2547  ;;  %v2591_v52 = vrot.slane %v2557_v39, 2  ;;  %v2592_v34 = vrot.slane %v2558_v38, 2  ;;  %v2566_v30 = vmul.f32 %v2546_v13, %v7432_v8  ;;  %v142_v13 = vld [vmem:[%s11295_s1 + $0x360] sm:$0xff] }
 0x8a5   :  { %v2590_v51 = vsel %vm951_vm1, %v2588_v42, %v2589_v40  ;;  %v2559_v37 = vmul.f32 %v2548_v46, %v7270_v2  ;;  %v2560_v43 = vmul.f32 %v2548_v46, %v7424_v20  ;;  %v2600_v42 = vrot.slane %v2563_v50, 2 }
 0x8a6   :  { %2611 = vrot.lane.b32.xlu1 %v2590_v51, %s6438_s18  ;;  %v2593_v11 = vsel %vm951_vm1, %v2591_v52, %v2592_v34  ;;  %v2601_v40 = vrot.slane %v2564_v44, 2  ;;  %v2567_v29 = vmul.f32 %v2548_v46, %v7281_v48  ;;  %v2568_v33 = vmul.f32 %v2548_v46, %v7432_v8 }
 0x8a7   :  { %2613 = vrot.lane.b32.xlu0 %v2593_v11, %s6438_s18  ;;  %v2594_v12 = vrot.slane %v2559_v37, 2  ;;  %v2595_v39 = vrot.slane %v2560_v43, 2  ;;  %v2599_v51 = vsel %vm951_vm1, %v2597_v47, %v2598_v18  ;;  %v2603_v34 = vrot.slane %v2565_v22, 2  ;;  %v143_v47 = vld [vmem:[%s11295_s1 + $0x368] sm:$0xff]  ;;  %v144_v43 = vld [vmem:[%s11295_s1 + $0x370] sm:$0xff]  ;;  %v145_v22 = vld [vmem:[%s11295_s1 + $0x378] sm:$0xff] }
 0x8a8   :  { %v2604_v52 = vrot.slane %v2566_v30, 2  ;;  %v2602_v50 = vsel %vm951_vm1, %v2600_v42, %v2601_v40  ;;  %v2606_v31 = vrot.slane %v2567_v29, 2  ;;  %v2607_v44 = vrot.slane %v2568_v33, 2 }
 0x8a9   :  { %v2596_v38 = vsel %vm951_vm1, %v2594_v12, %v2595_v39  ;;  %v2645_v37 = vrot.slane %v142_v13, 6  ;;  %v2646_v29 = vrot.slane %v143_v47, 6  ;;  %v2647_v18 = vrot.slane %v144_v43, 6 }
 0x8aa   :  { %2615 = vrot.lane.b32.xlu1 %v2596_v38, %s6438_s18  ;;  %v2605_v46 = vsel %vm951_vm1, %v2603_v34, %v2604_v52  ;;  %v2608_v11 = vsel %vm951_vm1, %v2606_v31, %v2607_v44  ;;  %v2648_v30 = vrot.slane %v145_v22, 6 }
 0x8ab   :  { %2617 = vrot.lane.b32.xlu0 %v2599_v51, %s6438_s18 }
 0x8ae   :  { %2619 = vrot.lane.b32.xlu1 %v2602_v50, %s6438_s18 }
 0x8af   :  { %2621 = vrot.lane.b32.xlu0 %v2605_v46, %s6438_s18 }
 0x8b2   :  { %2623 = vrot.lane.b32.xlu1 %v2608_v11, %s6438_s18 }
 0x8b3   :  { %2649 = vrot.lane.b32.xlu0 %v2645_v37, %s6436_s11 }
 0x8b6   :  { %2651 = vrot.lane.b32.xlu1 %v2646_v29, %s6436_s11 }
 0x8b7   :  { %2653 = vrot.lane.b32.xlu0 %v2647_v18, %s6436_s11 }
 0x8ba   :  { %2655 = vrot.lane.b32.xlu1 %v2648_v30, %s6436_s11 }
 0x915   :  { %v7735_v12 = vpop.permute.xlu0 %2609 }
 0x916   :  { %11516 = vst [vmem:[#allocation118_spill] sm:$0xff] %v7735_v12 }
 0x918   :  { %v7737_v39 = vpop.permute.xlu1 %2611 }
 0x919   :  { %11517 = vst [vmem:[#allocation119_spill] sm:$0xff] %v7737_v39  ;;  %v7739_v42 = vpop.permute.xlu0 %2613 }
 0x91a   :  { %11518 = vst [vmem:[#allocation120_spill] sm:$0xff] %v7739_v42 }
 0x91c   :  { %v7741_v38 = vpop.permute.xlu1 %2615 }
 0x91d   :  { %11519 = vst [vmem:[#allocation121_spill] sm:$0xff] %v7741_v38  ;;  %v7743_v40 = vpop.permute.xlu0 %2617 }
 0x920   :  { %v7745_v33 = vpop.permute.xlu1 %2619 }
 0x921   :  { %11520 = vst [vmem:[#allocation122_spill] sm:$0xff] %v7745_v33  ;;  %v7747_v51 = vpop.permute.xlu0 %2621 }
 0x922   :  { %11521 = vst [vmem:[#allocation123_spill] sm:$0xff] %v7747_v51 }
 0x924   :  { %v7749_v34 = vpop.permute.xlu1 %2623 }
 0x925   :  { %11522 = vst [vmem:[#allocation124_spill] sm:$0xff] %v7749_v34  ;;  %v2650_v52 = vpop.permute.xlu0 %2649 }
 0x926   :  { %v2661_v13 = vmul.f32 %v2650_v52, %v7270_v2  ;;  %v2662_v50 = vmul.f32 %v2650_v52, %v7424_v20  ;;  %v2669_v37 = vmul.f32 %v2650_v52, %v7281_v48  ;;  %v2670_v30 = vmul.f32 %v2650_v52, %v7432_v8 }
 0x928   :  { %v2652_v31 = vpop.permute.xlu1 %2651  ;;  %v2693_v44 = vrot.slane %v2661_v13, 2  ;;  %v2694_v46 = vrot.slane %v2662_v50, 2  ;;  %v2705_v38 = vrot.slane %v2669_v37, 2 }
 0x929   :  { %v2654_v47 = vpop.permute.xlu0 %2653  ;;  %v2663_v43 = vmul.f32 %v2652_v31, %v7270_v2  ;;  %v2664_v11 = vmul.f32 %v2652_v31, %v7424_v20  ;;  %v2671_v42 = vmul.f32 %v2652_v31, %v7281_v48  ;;  %v2672_v12 = vmul.f32 %v2652_v31, %v7432_v8 }
 0x92a   :  { %v2695_v29 = vsel %vm951_vm1, %v2693_v44, %v2694_v46  ;;  %v2665_v18 = vmul.f32 %v2654_v47, %v7270_v2  ;;  %v2666_v22 = vmul.f32 %v2654_v47, %v7424_v20 }
 0x92b   :  { %2717 = vrot.lane.b32.xlu0 %v2695_v29, %s6439_s20  ;;  %v2696_v34 = vrot.slane %v2663_v43, 2  ;;  %v2697_v13 = vrot.slane %v2664_v11, 2  ;;  %v2706_v43 = vrot.slane %v2670_v30, 2  ;;  %v2673_v11 = vmul.f32 %v2654_v47, %v7281_v48 }
 0x92c   :  { %v2656_v50 = vpop.permute.xlu1 %2655  ;;  %v2699_v51 = vrot.slane %v2665_v18, 2  ;;  %v2700_v33 = vrot.slane %v2666_v22, 2  ;;  %v2674_v29 = vmul.f32 %v2654_v47, %v7432_v8  ;;  %v2709_v22 = vrot.slane %v2672_v12, 2  ;;  %v150_v47 = vld [vmem:[%s11295_s1 + $0x3a0] sm:$0xff] }
 0x92d   :  { %v2698_v39 = vsel %vm951_vm1, %v2696_v34, %v2697_v13  ;;  %v2667_v44 = vmul.f32 %v2656_v50, %v7270_v2  ;;  %v2668_v46 = vmul.f32 %v2656_v50, %v7424_v20  ;;  %v2708_v34 = vrot.slane %v2671_v42, 2 }
 0x92e   :  { %2719 = vrot.lane.b32.xlu1 %v2698_v39, %s6439_s20  ;;  %v2701_v52 = vsel %vm951_vm1, %v2699_v51, %v2700_v33  ;;  %v2675_v13 = vmul.f32 %v2656_v50, %v7281_v48  ;;  %v2676_v31 = vmul.f32 %v2656_v50, %v7432_v8  ;;  %v2707_v39 = vsel %vm951_vm1, %v2705_v38, %v2706_v43  ;;  %v151_v38 = vld [vmem:[%s11295_s1 + $0x3a8] sm:$0xff] }
 0x92f   :  { %2721 = vrot.lane.b32.xlu0 %v2701_v52, %s6439_s20  ;;  %v2702_v37 = vrot.slane %v2667_v44, 2  ;;  %v2703_v18 = vrot.slane %v2668_v46, 2  ;;  %v2711_v33 = vrot.slane %v2673_v11, 2  ;;  %v2712_v51 = vrot.slane %v2674_v29, 2  ;;  %v152_v44 = vld [vmem:[%s11295_s1 + $0x3b0] sm:$0xff]  ;;  %v153_v11 = vld [vmem:[%s11295_s1 + $0x3b8] sm:$0xff] }
 0x930   :  { %v2710_v42 = vsel %vm951_vm1, %v2708_v34, %v2709_v22  ;;  %v2714_v30 = vrot.slane %v2675_v13, 2  ;;  %v2715_v12 = vrot.slane %v2676_v31, 2  ;;  %v2837_v50 = vrot.slane %v150_v47, 5  ;;  %v6376_v34 = vld [vmem:[%s11294_s0 + $0x40] sm:$0xff]  ;;  %v6377_v22 = vld [vmem:[%s11294_s0 + $0x48] sm:$0x7] }
 0x931   :  { %v2704_v2 = vsel %vm951_vm1, %v2702_v37, %v2703_v18  ;;  %v2713_v48 = vsel %vm951_vm1, %v2711_v33, %v2712_v51  ;;  %v2838_v52 = vrot.slane %v151_v38, 5  ;;  %v2839_v43 = vrot.slane %v152_v44, 5  ;;  %v66_v37 = vld [vmem:[%s11295_s1 + $0x100] sm:$0xff] }
 0x932   :  { %2723 = vrot.lane.b32.xlu1 %v2704_v2, %s6439_s20  ;;  %v2716_v46 = vsel %vm951_vm1, %v2714_v30, %v2715_v12  ;;  %v2840_v29 = vrot.slane %v153_v11, 5  ;;  %v7802_v18 = vrot.slane %v66_v37, 6  ;;  %v687_v31 = vadd.f32 %v6779_v35, %v6763_v25  ;;  %v82_v47 = vld [vmem:[%s11295_s1 + $0x180] sm:$0xff] }
 0x933   :  { %2725 = vrot.lane.b32.xlu0 %v2707_v39, %s6439_s20  ;;  %v7820_v12 = vrot.slane %v82_v47, 5 }
 0x934   :  { %v927_v2 = vmul.f32 %v6376_v34, %v7802_v18  ;;  %v928_v13 = vmul.f32 %v6377_v22, %v7802_v18  ;;  %v795_v51 = vadd.f32 %v6795_v45, %v687_v31 }
 0x936   :  { %2727 = vrot.lane.b32.xlu1 %v2710_v42, %s6439_s20  ;;  %v964_v39 = vrot.slane %v927_v2, 2  ;;  %v965_v33 = vrot.slane %v928_v13, 2  ;;  %v903_v42 = vadd.f32 %v6855_v36, %v795_v51 }
 0x937   :  { %2729 = vrot.lane.b32.xlu0 %v2713_v48, %s6439_s20  ;;  %v1336_v48 = vmul.f32 %v6376_v34, %v7820_v12 }
 0x938   :  { %v966_v30 = vsel %vm951_vm1, %v964_v39, %v965_v33  ;;  %v130_v33 = vld [vmem:[%s11295_s1 + $0x300] sm:$0xff] }
 0x939   :  { %v988_v38 = vadd.f32 %v966_v30, %v903_v42  ;;  %v1373_v35 = vrot.slane %v1336_v48, 3  ;;  %v7856_v47 = vrot.slane %v130_v33, 6 }
 0x93a   :  { %2731 = vrot.lane.b32.xlu1 %v2716_v46, %s6439_s20 }
 0x93b   :  { %2841 = vrot.lane.b32.xlu0 %v2837_v50, %s6434_s19  ;;  %v1337_v50 = vmul.f32 %v6377_v22, %v7820_v12  ;;  %v1096_v25 = vadd.f32 %v6919_v4, %v988_v38  ;;  %v98_v4 = vld [vmem:[%s11295_s1 + $0x200] sm:$0xff] }
 0x93d   :  { %v1374_v44 = vrot.slane %v1337_v50, 3  ;;  %v1204_v45 = vadd.f32 %v6983_v24, %v1096_v25  ;;  %v7839_v24 = vld [vmem:[%s11294_s0 + $0x50] sm:$0xff] }
 0x93e   :  { %2843 = vrot.lane.b32.xlu1 %v2838_v52, %s6434_s19  ;;  %v2361_v42 = vmul.f32 %v7839_v24, %v7856_v47 }
 0x93f   :  { %2845 = vrot.lane.b32.xlu0 %v2839_v43, %s6434_s19  ;;  %v1312_v46 = vadd.f32 %v7047_v49, %v1204_v45  ;;  %v1375_v52 = vsel %vm1360_vm2, %v1373_v35, %v1374_v44  ;;  %v1729_v49 = vmul.f32 %v7839_v24, %v98_v4 }
 0x940   :  { %v2397_v50 = vrot.slane %v2361_v42, 2 }
 0x941   :  { %v1397_v36 = vadd.f32 %v1375_v52, %v1312_v46 }
 0x942   :  { %2847 = vrot.lane.b32.xlu1 %v2840_v29, %s6434_s19  ;;  %v114_v29 = vld [vmem:[%s11295_s1 + $0x280] sm:$0xff] }
 0x943   :  { %v1505_v43 = vadd.f32 %v7121_v58, %v1397_v36  ;;  %v7843_v58 = vrot.slane %v114_v29, 7 }
 0x945   :  { %v1613_v11 = vadd.f32 %v7195_v27, %v1505_v43  ;;  %v1953_v27 = vmul.f32 %v7839_v24, %v7843_v58  ;;  %v1954_v34 = vmul.f32 %v7843_v58, %v7432_v8 }
 0x947   :  { %v1721_v37 = vadd.f32 %v7259_v32, %v1613_v11  ;;  %v1989_v13 = vrot.slane %v1953_v27, 1  ;;  %v1990_v31 = vrot.slane %v1954_v34, 1 }
 0x949   :  { %v1737_v2 = vadd.f32 %v1729_v49, %v1721_v37  ;;  %v1991_v51 = vsel %vm542_vm0, %v1989_v13, %v1990_v31 }
 0x94b   :  { %v1801_v22 = vadd.f32 %v7317_v3, %v1737_v2  ;;  %v2362_v3 = vmul.f32 %v7856_v47, %v7432_v8 }
 0x94d   :  { %v1865_v39 = vadd.f32 %v7365_v23, %v1801_v22  ;;  %v146_v23 = vld [vmem:[%s11295_s1 + $0x380] sm:$0xff]  ;;  %v2398_v38 = vrot.slane %v2362_v3, 2 }
 0x94e   :  { %v7867_v25 = vrot.slane %v146_v23, 5 }
 0x94f   :  { %v1929_v32 = vadd.f32 %v7413_v53, %v1865_v39  ;;  %v2399_v44 = vsel %vm951_vm1, %v2397_v50, %v2398_v38 }
 0x950   :  { %11523 = vst [vmem:[#allocation125_spill] sm:$0xff] %v7867_v25  ;;  %v2769_v46 = vmul.f32 %v7839_v24, %v7867_v25 }
 0x951   :  { %v2013_v30 = vadd.f32 %v1991_v51, %v1929_v32 }
 0x953   :  { %v2121_v48 = vadd.f32 %v7487_v17, %v2013_v30  ;;  %v2770_v17 = vmul.f32 %v7867_v25, %v7432_v8 }
 0x955   :  { %v2229_v53 = vadd.f32 %v7551_v19, %v2121_v48  ;;  %v2805_v19 = vrot.slane %v2769_v46, 3  ;;  %v2806_v11 = vrot.slane %v2770_v17, 3 }
 0x957   :  { %v2337_v35 = vadd.f32 %v7615_v41, %v2229_v53  ;;  %v2807_v37 = vsel %vm1360_vm2, %v2805_v19, %v2806_v11 }
 0x959   :  { %v2421_v52 = vadd.f32 %v2399_v44, %v2337_v35 }
 0x95b   :  { %v2529_v29 = vadd.f32 %v7679_v16, %v2421_v52  ;;  %v7897_v16 = vld [vmem:[%s11294_s0 + $0x10] sm:$0xff] }
 0x95d   :  { %v2637_v41 = vadd.f32 %v7743_v40, %v2529_v29 }
 0x99d   :  { %v7871_v45 = vpop.permute.xlu0 %2717 }
 0x99e   :  { %11524 = vst [vmem:[#allocation126_spill] sm:$0xff] %v7871_v45 }
 0x9a0   :  { %v7877_v36 = vpop.permute.xlu1 %2719 }
 0x9a1   :  { %11525 = vst [vmem:[#allocation127_spill] sm:$0xff] %v7877_v36  ;;  %v7879_v43 = vpop.permute.xlu0 %2721 }
 0x9a2   :  { %11526 = vst [vmem:[#allocation128_spill] sm:$0xff] %v7879_v43 }
 0x9a4   :  { %v7883_v4 = vpop.permute.xlu1 %2723 }
 0x9a5   :  { %11527 = vst [vmem:[#allocation129_spill] sm:$0xff] %v7883_v4  ;;  %v2726_v49 = vpop.permute.xlu0 %2725 }
 0x9a6   :  { %v2745_v27 = vadd.f32 %v2726_v49, %v2637_v41  ;;  %v7921_v49 = vld [vmem:[%s11294_s0 + $0x58] sm:$0x7] }
 0x9a8   :  { %v7886_v34 = vpop.permute.xlu1 %2727  ;;  %v7888_v2 = vadd.f32 %v2807_v37, %v2745_v27 }
 0x9a9   :  { %11528 = vst [vmem:[#allocation130_spill] sm:$0xff] %v7886_v34  ;;  %v7890_v22 = vpop.permute.xlu0 %2729 }
 0x9aa   :  { %11529 = vst [vmem:[#allocation131_spill] sm:$0xff] %v7890_v22 }
 0x9ac   :  { %v7892_v13 = vpop.permute.xlu1 %2731 }
 0x9ad   :  { %11530 = vst [vmem:[#allocation132_spill] sm:$0xff] %v7892_v13  ;;  %v2842_v31 = vpop.permute.xlu0 %2841 }
 0x9ae   :  { %v2853_v40 = vmul.f32 %v7897_v16, %v2842_v31  ;;  %v2854_v39 = vmul.f32 %v2842_v31, %v7424_v20  ;;  %v2861_v42 = vmul.f32 %v7839_v24, %v2842_v31  ;;  %v2862_v53 = vmul.f32 %v2842_v31, %v7432_v8 }
 0x9b0   :  { %v2844_v33 = vpop.permute.xlu1 %2843  ;;  %v2885_v32 = vrot.slane %v2853_v40, 3  ;;  %v2886_v51 = vrot.slane %v2854_v39, 3  ;;  %v2897_v19 = vrot.slane %v2861_v42, 3  ;;  %v2898_v31 = vrot.slane %v2862_v53, 3 }
 0x9b1   :  { %v2846_v3 = vpop.permute.xlu0 %2845  ;;  %v2855_v30 = vmul.f32 %v7897_v16, %v2844_v33  ;;  %v2856_v48 = vmul.f32 %v2844_v33, %v7424_v20  ;;  %v2863_v11 = vmul.f32 %v7839_v24, %v2844_v33  ;;  %v2864_v37 = vmul.f32 %v7921_v49, %v2844_v33 }
 0x9b2   :  { %v2887_v23 = vsel %vm1360_vm2, %v2885_v32, %v2886_v51  ;;  %v2857_v50 = vmul.f32 %v7897_v16, %v2846_v3  ;;  %v2858_v38 = vmul.f32 %v2846_v3, %v7424_v20  ;;  %v7915_v20 = vld [vmem:[%s11294_s0 + $0x18] sm:$0x7]  ;;  %v2865_v40 = vmul.f32 %v7839_v24, %v2846_v3 }
 0x9b3   :  { %2909 = vrot.lane.b32.xlu0 %v2887_v23, %s6437_s15  ;;  %v2888_v35 = vrot.slane %v2855_v30, 3  ;;  %v2889_v44 = vrot.slane %v2856_v48, 3  ;;  %v2866_v39 = vmul.f32 %v7921_v49, %v2846_v3  ;;  %v2900_v42 = vrot.slane %v2863_v11, 3  ;;  %v154_v3 = vld [vmem:[%s11295_s1 + $0x3c0] sm:$0xff]  ;;  %v156_v11 = vld [vmem:[%s11295_s1 + $0x3d0] sm:$0xff] }
 0x9b4   :  { %v2848_v46 = vpop.permute.xlu1 %2847  ;;  %v2891_v17 = vrot.slane %v2857_v50, 3  ;;  %v2892_v52 = vrot.slane %v2858_v38, 3  ;;  %v2901_v48 = vrot.slane %v2864_v37, 3  ;;  %v2899_v50 = vsel %vm1360_vm2, %v2897_v19, %v2898_v31  ;;  %v155_v19 = vld [vmem:[%s11295_s1 + $0x3c8] sm:$0xff]  ;;  %v157_v37 = vld [vmem:[%s11295_s1 + $0x3d8] sm:$0xff] }
 0x9b5   :  { %v2890_v29 = vsel %vm1360_vm2, %v2888_v35, %v2889_v44  ;;  %v2859_v41 = vmul.f32 %v7897_v16, %v2848_v46  ;;  %v2860_v8 = vmul.f32 %v7915_v20, %v2848_v46  ;;  %v2867_v23 = vmul.f32 %v7839_v24, %v2848_v46 }
 0x9b6   :  { %2911 = vrot.lane.b32.xlu1 %v2890_v29, %s6437_s15  ;;  %v2893_v27 = vsel %vm1360_vm2, %v2891_v17, %v2892_v52  ;;  %v2868_v33 = vmul.f32 %v7921_v49, %v2848_v46  ;;  %v2903_v38 = vrot.slane %v2865_v40, 3  ;;  %v2904_v53 = vrot.slane %v2866_v39, 3 }
 0x9b7   :  { %2913 = vrot.lane.b32.xlu0 %v2893_v27, %s6437_s15  ;;  %v2894_v32 = vrot.slane %v2859_v41, 3  ;;  %v2895_v51 = vrot.slane %v2860_v8, 3  ;;  %v2902_v35 = vsel %vm1360_vm2, %v2900_v42, %v2901_v48  ;;  %v2906_v44 = vrot.slane %v2867_v23, 3 }
 0x9b8   :  { %v2907_v17 = vrot.slane %v2868_v33, 3  ;;  %v2905_v46 = vsel %vm1360_vm2, %v2903_v38, %v2904_v53  ;;  %v2945_v52 = vrot.slane %v154_v3, 5  ;;  %v2946_v41 = vrot.slane %v155_v19, 5 }
 0x9b9   :  { %v2896_v30 = vsel %vm1360_vm2, %v2894_v32, %v2895_v51  ;;  %v2947_v8 = vrot.slane %v156_v11, 5  ;;  %v2948_v27 = vrot.slane %v157_v37, 5 }
 0x9ba   :  { %2915 = vrot.lane.b32.xlu1 %v2896_v30, %s6437_s15  ;;  %v2908_v29 = vsel %vm1360_vm2, %v2906_v44, %v2907_v17 }
 0x9bb   :  { %2917 = vrot.lane.b32.xlu0 %v2899_v50, %s6437_s15 }
 0x9be   :  { %2919 = vrot.lane.b32.xlu1 %v2902_v35, %s6437_s15 }
 0x9bf   :  { %2921 = vrot.lane.b32.xlu0 %v2905_v46, %s6437_s15 }
 0x9c2   :  { %2923 = vrot.lane.b32.xlu1 %v2908_v29, %s6437_s15 }
 0x9c3   :  { %2949 = vrot.lane.b32.xlu0 %v2945_v52, %s6435_s28 }
 0x9c6   :  { %2951 = vrot.lane.b32.xlu1 %v2946_v41, %s6435_s28 }
 0x9c7   :  { %2953 = vrot.lane.b32.xlu0 %v2947_v8, %s6435_s28 }
 0x9ca   :  { %2955 = vrot.lane.b32.xlu1 %v2948_v27, %s6435_s28 }
 0xa25   :  { %v7957_v31 = vpop.permute.xlu0 %2909 }
 0xa26   :  { %11531 = vst [vmem:[#allocation133_spill] sm:$0xff] %v7957_v31 }
 0xa28   :  { %v7959_v40 = vpop.permute.xlu1 %2911 }
 0xa29   :  { %11532 = vst [vmem:[#allocation134_spill] sm:$0xff] %v7959_v40  ;;  %v7961_v39 = vpop.permute.xlu0 %2913 }
 0xa2a   :  { %11533 = vst [vmem:[#allocation135_spill] sm:$0xff] %v7961_v39 }
 0xa2c   :  { %v7963_v32 = vpop.permute.xlu1 %2915 }
 0xa2d   :  { %11534 = vst [vmem:[#allocation136_spill] sm:$0xff] %v7963_v32  ;;  %v7965_v51 = vpop.permute.xlu0 %2917 }
 0xa30   :  { %v7967_v42 = vpop.permute.xlu1 %2919 }
 0xa31   :  { %11535 = vst [vmem:[#allocation137_spill] sm:$0xff] %v7967_v42  ;;  %v7969_v30 = vpop.permute.xlu0 %2921 }
 0xa32   :  { %11536 = vst [vmem:[#allocation138_spill] sm:$0xff] %v7969_v30 }
 0xa34   :  { %v7971_v48 = vpop.permute.xlu1 %2923 }
 0xa35   :  { %11537 = vst [vmem:[#allocation139_spill] sm:$0xff] %v7971_v48  ;;  %v2950_v23 = vpop.permute.xlu0 %2949 }
 0xa36   :  { %v2961_v33 = vmul.f32 %v7897_v16, %v2950_v23  ;;  %v2962_v50 = vmul.f32 %v7915_v20, %v2950_v23  ;;  %v2969_v35 = vmul.f32 %v7839_v24, %v2950_v23  ;;  %v2970_v29 = vmul.f32 %v7921_v49, %v2950_v23 }
 0xa38   :  { %v2952_v38 = vpop.permute.xlu1 %2951  ;;  %v2993_v53 = vrot.slane %v2961_v33, 3  ;;  %v2994_v3 = vrot.slane %v2962_v50, 3  ;;  %v3005_v50 = vrot.slane %v2969_v35, 3 }
 0xa39   :  { %v2954_v44 = vpop.permute.xlu0 %2953  ;;  %v2963_v17 = vmul.f32 %v7897_v16, %v2952_v38  ;;  %v2964_v46 = vmul.f32 %v7915_v20, %v2952_v38  ;;  %v2971_v48 = vmul.f32 %v7839_v24, %v2952_v38  ;;  %v2972_v42 = vmul.f32 %v7921_v49, %v2952_v38 }
 0xa3a   :  { %v2995_v52 = vsel %vm1360_vm2, %v2993_v53, %v2994_v3  ;;  %v2965_v19 = vmul.f32 %v7897_v16, %v2954_v44  ;;  %v2966_v11 = vmul.f32 %v7915_v20, %v2954_v44 }
 0xa3b   :  { %3017 = vrot.lane.b32.xlu0 %v2995_v52, %s6438_s18  ;;  %v2996_v41 = vrot.slane %v2963_v17, 3  ;;  %v2997_v8 = vrot.slane %v2964_v46, 3  ;;  %v3006_v17 = vrot.slane %v2970_v29, 3  ;;  %v2973_v46 = vmul.f32 %v7839_v24, %v2954_v44 }
 0xa3c   :  { %v2956_v37 = vpop.permute.xlu1 %2955  ;;  %v2999_v27 = vrot.slane %v2965_v19, 3  ;;  %v3000_v33 = vrot.slane %v2966_v11, 3  ;;  %v2974_v52 = vmul.f32 %v7921_v49, %v2954_v44  ;;  %v3008_v11 = vrot.slane %v2971_v48, 3  ;;  %v158_v44 = vld [vmem:[%s11295_s1 + $0x3e0] sm:$0xff] }
 0xa3d   :  { %v2998_v30 = vsel %vm1360_vm2, %v2996_v41, %v2997_v8  ;;  %v2967_v53 = vmul.f32 %v7897_v16, %v2956_v37  ;;  %v2968_v3 = vmul.f32 %v7915_v20, %v2956_v37  ;;  %v3009_v8 = vrot.slane %v2972_v42, 3 }
 0xa3e   :  { %3019 = vrot.lane.b32.xlu1 %v2998_v30, %s6438_s18  ;;  %v3001_v23 = vsel %vm1360_vm2, %v2999_v27, %v3000_v33  ;;  %v2975_v32 = vmul.f32 %v7839_v24, %v2956_v37  ;;  %v2976_v38 = vmul.f32 %v7921_v49, %v2956_v37  ;;  %v3007_v30 = vsel %vm1360_vm2, %v3005_v50, %v3006_v17  ;;  %v159_v50 = vld [vmem:[%s11295_s1 + $0x3e8] sm:$0xff] }
 0xa3f   :  { %3021 = vrot.lane.b32.xlu0 %v3001_v23, %s6438_s18  ;;  %v3002_v35 = vrot.slane %v2967_v53, 3  ;;  %v3003_v19 = vrot.slane %v2968_v3, 3  ;;  %v3011_v29 = vrot.slane %v2973_v46, 3  ;;  %v3012_v27 = vrot.slane %v2974_v52, 3  ;;  %v160_v3 = vld [vmem:[%s11295_s1 + $0x3f0] sm:$0xff]  ;;  %v161_v46 = vld [vmem:[%s11295_s1 + $0x3f8] sm:$0xff] }
 0xa40   :  { %v3010_v48 = vsel %vm1360_vm2, %v3008_v11, %v3009_v8  ;;  %v3014_v33 = vrot.slane %v2975_v32, 3  ;;  %v3015_v42 = vrot.slane %v2976_v38, 3  ;;  %v3053_v53 = vrot.slane %v158_v44, 5 }
 0xa41   :  { %v3004_v41 = vsel %vm1360_vm2, %v3002_v35, %v3003_v19  ;;  %v3013_v37 = vsel %vm1360_vm2, %v3011_v29, %v3012_v27  ;;  %v3054_v32 = vrot.slane %v159_v50, 5  ;;  %v3055_v17 = vrot.slane %v160_v3, 5 }
 0xa42   :  { %3023 = vrot.lane.b32.xlu1 %v3004_v41, %s6438_s18  ;;  %v3016_v23 = vsel %vm1360_vm2, %v3014_v33, %v3015_v42  ;;  %v3056_v52 = vrot.slane %v161_v46, 5 }
 0xa43   :  { %3025 = vrot.lane.b32.xlu0 %v3007_v30, %s6438_s18 }
 0xa46   :  { %3027 = vrot.lane.b32.xlu1 %v3010_v48, %s6438_s18 }
 0xa47   :  { %3029 = vrot.lane.b32.xlu0 %v3013_v37, %s6438_s18 }
 0xa4a   :  { %3031 = vrot.lane.b32.xlu1 %v3016_v23, %s6438_s18 }
 0xa4b   :  { %3057 = vrot.lane.b32.xlu0 %v3053_v53, %s6436_s11 }
 0xa4e   :  { %3059 = vrot.lane.b32.xlu1 %v3054_v32, %s6436_s11 }
 0xa4f   :  { %3061 = vrot.lane.b32.xlu0 %v3055_v17, %s6436_s11 }
 0xa52   :  { %3063 = vrot.lane.b32.xlu1 %v3056_v52, %s6436_s11 }
 0xaad   :  { %v8021_v35 = vpop.permute.xlu0 %3017 }
 0xaae   :  { %11538 = vst [vmem:[#allocation140_spill] sm:$0xff] %v8021_v35 }
 0xab0   :  { %v8023_v19 = vpop.permute.xlu1 %3019 }
 0xab1   :  { %11539 = vst [vmem:[#allocation141_spill] sm:$0xff] %v8023_v19  ;;  %v8025_v11 = vpop.permute.xlu0 %3021 }
 0xab2   :  { %11540 = vst [vmem:[#allocation142_spill] sm:$0xff] %v8025_v11 }
 0xab4   :  { %v8027_v41 = vpop.permute.xlu1 %3023 }
 0xab5   :  { %11541 = vst [vmem:[#allocation143_spill] sm:$0xff] %v8027_v41  ;;  %v8029_v8 = vpop.permute.xlu0 %3025 }
 0xab8   :  { %v8031_v38 = vpop.permute.xlu1 %3027 }
 0xab9   :  { %11542 = vst [vmem:[#allocation144_spill] sm:$0xff] %v8031_v38  ;;  %v8033_v30 = vpop.permute.xlu0 %3029 }
 0xaba   :  { %11543 = vst [vmem:[#allocation145_spill] sm:$0xff] %v8033_v30 }
 0xabc   :  { %v8035_v29 = vpop.permute.xlu1 %3031 }
 0xabd   :  { %11544 = vst [vmem:[#allocation146_spill] sm:$0xff] %v8035_v29  ;;  %v3058_v27 = vpop.permute.xlu0 %3057 }
 0xabe   :  { %v3069_v44 = vmul.f32 %v7897_v16, %v3058_v27  ;;  %v3070_v48 = vmul.f32 %v7915_v20, %v3058_v27  ;;  %v3077_v53 = vmul.f32 %v7839_v24, %v3058_v27  ;;  %v3078_v52 = vmul.f32 %v7921_v49, %v3058_v27 }
 0xac0   :  { %v3060_v33 = vpop.permute.xlu1 %3059  ;;  %v3101_v42 = vrot.slane %v3069_v44, 3  ;;  %v3102_v37 = vrot.slane %v3070_v48, 3  ;;  %v3113_v41 = vrot.slane %v3077_v53, 3 }
 0xac1   :  { %v3062_v50 = vpop.permute.xlu0 %3061  ;;  %v3071_v3 = vmul.f32 %v7897_v16, %v3060_v33  ;;  %v3072_v23 = vmul.f32 %v7915_v20, %v3060_v33  ;;  %v3079_v11 = vmul.f32 %v7839_v24, %v3060_v33  ;;  %v3080_v35 = vmul.f32 %v7921_v49, %v3060_v33 }
 0xac2   :  { %v3103_v32 = vsel %vm1360_vm2, %v3101_v42, %v3102_v37  ;;  %v3073_v17 = vmul.f32 %v7897_v16, %v3062_v50  ;;  %v3074_v46 = vmul.f32 %v7915_v20, %v3062_v50 }
 0xac3   :  { %3125 = vrot.lane.b32.xlu0 %v3103_v32, %s6439_s20  ;;  %v3104_v29 = vrot.slane %v3071_v3, 3  ;;  %v3105_v44 = vrot.slane %v3072_v23, 3  ;;  %v3114_v3 = vrot.slane %v3078_v52, 3  ;;  %v3081_v23 = vmul.f32 %v7839_v24, %v3062_v50 }
 0xac4   :  { %v3064_v48 = vpop.permute.xlu1 %3063  ;;  %v3107_v30 = vrot.slane %v3073_v17, 3  ;;  %v3108_v38 = vrot.slane %v3074_v46, 3  ;;  %v3082_v32 = vmul.f32 %v7921_v49, %v3062_v50  ;;  %v3117_v46 = vrot.slane %v3080_v35, 3 }
 0xac5   :  { %v3106_v19 = vsel %vm1360_vm2, %v3104_v29, %v3105_v44  ;;  %v3075_v42 = vmul.f32 %v7897_v16, %v3064_v48  ;;  %v3076_v37 = vmul.f32 %v7915_v20, %v3064_v48  ;;  %v3116_v29 = vrot.slane %v3079_v11, 3  ;;  %v167_v11 = vld [vmem:[%s11295_s1 + $0x428] sm:$0xff] }
 0xac6   :  { %3127 = vrot.lane.b32.xlu1 %v3106_v19, %s6439_s20  ;;  %v3109_v27 = vsel %vm1360_vm2, %v3107_v30, %v3108_v38  ;;  %v3083_v20 = vmul.f32 %v7839_v24, %v3064_v48  ;;  %v3084_v33 = vmul.f32 %v7921_v49, %v3064_v48  ;;  %v3115_v19 = vsel %vm1360_vm2, %v3113_v41, %v3114_v3  ;;  %v166_v24 = vld [vmem:[%s11295_s1 + $0x420] sm:$0xff]  ;;  %v168_v41 = vld [vmem:[%s11295_s1 + $0x430] sm:$0xff]  ;;  %v169_v48 = vld [vmem:[%s11295_s1 + $0x438] sm:$0xff] }
 0xac7   :  { %3129 = vrot.lane.b32.xlu0 %v3109_v27, %s6439_s20  ;;  %v3110_v53 = vrot.slane %v3075_v42, 3  ;;  %v3111_v17 = vrot.slane %v3076_v37, 3  ;;  %v3119_v38 = vrot.slane %v3081_v23, 3  ;;  %v3120_v30 = vrot.slane %v3082_v32, 3  ;;  %v8094_v3 = vld [vmem:[%s11294_s0 + $0x60] sm:$0xff] }
 0xac8   :  { %v3118_v50 = vsel %vm1360_vm2, %v3116_v29, %v3117_v46  ;;  %v3122_v52 = vrot.slane %v3083_v20, 3  ;;  %v3123_v44 = vrot.slane %v3084_v33, 3  ;;  %v2937_v23 = vadd.f32 %v7965_v51, %v7888_v2  ;;  %v162_v32 = vld [vmem:[%s11295_s1 + $0x400] sm:$0xff] }
 0xac9   :  { %v3112_v16 = vsel %vm1360_vm2, %v3110_v53, %v3111_v17  ;;  %v3121_v35 = vsel %vm1360_vm2, %v3119_v38, %v3120_v30  ;;  %v3161_v29 = vmul.f32 %v162_v32, %v8094_v3  ;;  %v8116_v2 = vld [vmem:[%s11294_s0 + $0x20] sm:$0xff]  ;;  %v171_v32 = vld [vmem:[%s11295_s1 + $0x448] sm:$0xff] }
 0xaca   :  { %3131 = vrot.lane.b32.xlu1 %v3112_v16, %s6439_s20  ;;  %v3124_v49 = vsel %vm1360_vm2, %v3122_v52, %v3123_v44  ;;  %v3045_v53 = vadd.f32 %v8029_v8, %v2937_v23  ;;  %v170_v23 = vld [vmem:[%s11295_s1 + $0x440] sm:$0xff] }
 0xacb   :  { %3133 = vrot.lane.b32.xlu0 %v3115_v19, %s6439_s20 }
 0xace   :  { %3135 = vrot.lane.b32.xlu1 %v3118_v50, %s6439_s20 }
 0xacf   :  { %3137 = vrot.lane.b32.xlu0 %v3121_v35, %s6439_s20 }
 0xad2   :  { %3139 = vrot.lane.b32.xlu1 %v3124_v49, %s6439_s20 }
 0xad3   :  { %3177 = vrot.lane.b32.xlu0 %v166_v24, %s6434_s19 }
 0xad6   :  { %3179 = vrot.lane.b32.xlu1 %v167_v11, %s6434_s19 }
 0xad7   :  { %3181 = vrot.lane.b32.xlu0 %v168_v41, %s6434_s19 }
 0xada   :  { %3183 = vrot.lane.b32.xlu1 %v169_v48, %s6434_s19 }
 0xb35   :  { %v8085_v42 = vpop.permute.xlu0 %3125 }
 0xb36   :  { %11545 = vst [vmem:[#allocation147_spill] sm:$0xff] %v8085_v42 }
 0xb38   :  { %v8087_v37 = vpop.permute.xlu1 %3127 }
 0xb39   :  { %11546 = vst [vmem:[#allocation148_spill] sm:$0xff] %v8087_v37  ;;  %v8089_v27 = vpop.permute.xlu0 %3129 }
 0xb3a   :  { %11547 = vst [vmem:[#allocation149_spill] sm:$0xff] %v8089_v27 }
 0xb3c   :  { %v8102_v17 = vpop.permute.xlu1 %3131 }
 0xb3d   :  { %11548 = vst [vmem:[#allocation150_spill] sm:$0xff] %v8102_v17  ;;  %v3134_v16 = vpop.permute.xlu0 %3133 }
 0xb3e   :  { %v3153_v46 = vadd.f32 %v3134_v16, %v3045_v53  ;;  %v172_v53 = vld [vmem:[%s11295_s1 + $0x450] sm:$0xff] }
 0xb40   :  { %v8105_v20 = vpop.permute.xlu1 %3135  ;;  %v8107_v33 = vadd.f32 %v3161_v29, %v3153_v46  ;;  %v173_v29 = vld [vmem:[%s11295_s1 + $0x458] sm:$0xff] }
 0xb41   :  { %11549 = vst [vmem:[#allocation151_spill] sm:$0xff] %v8105_v20  ;;  %v8109_v19 = vpop.permute.xlu0 %3137 }
 0xb42   :  { %11550 = vst [vmem:[#allocation152_spill] sm:$0xff] %v8109_v19 }
 0xb44   :  { %v8111_v38 = vpop.permute.xlu1 %3139 }
 0xb45   :  { %11551 = vst [vmem:[#allocation153_spill] sm:$0xff] %v8111_v38  ;;  %v3178_v51 = vpop.permute.xlu0 %3177 }
 0xb46   :  { %v3189_v8 = vmul.f32 %v3178_v51, %v8116_v2  ;;  %v3193_v49 = vmul.f32 %v3178_v51, %v8094_v3 }
 0xb48   :  { %3205 = vrot.lane.b32.xlu0 %v3189_v8, %s6437_s15  ;;  %v3180_v30 = vpop.permute.xlu1 %3179 }
 0xb49   :  { %v3190_v50 = vmul.f32 %v3180_v30, %v8116_v2  ;;  %v3182_v52 = vpop.permute.xlu0 %3181  ;;  %v3194_v11 = vmul.f32 %v3180_v30, %v8094_v3 }
 0xb4a   :  { %v3191_v44 = vmul.f32 %v3182_v52, %v8116_v2  ;;  %v3195_v41 = vmul.f32 %v3182_v52, %v8094_v3 }
 0xb4b   :  { %3207 = vrot.lane.b32.xlu1 %v3190_v50, %s6437_s15 }
 0xb4c   :  { %3209 = vrot.lane.b32.xlu0 %v3191_v44, %s6437_s15  ;;  %v3184_v35 = vpop.permute.xlu1 %3183 }
 0xb4d   :  { %v3192_v24 = vmul.f32 %v3184_v35, %v8116_v2  ;;  %v3196_v48 = vmul.f32 %v3184_v35, %v8094_v3 }
 0xb4f   :  { %3211 = vrot.lane.b32.xlu1 %v3192_v24, %s6437_s15 }
 0xb50   :  { %3213 = vrot.lane.b32.xlu0 %v3193_v49, %s6437_s15 }
 0xb53   :  { %3215 = vrot.lane.b32.xlu1 %v3194_v11, %s6437_s15 }
 0xb54   :  { %3217 = vrot.lane.b32.xlu0 %v3195_v41, %s6437_s15 }
 0xb57   :  { %3219 = vrot.lane.b32.xlu1 %v3196_v48, %s6437_s15 }
 0xb58   :  { %3241 = vrot.lane.b32.xlu0 %v170_v23, %s6435_s28 }
 0xb5b   :  { %3243 = vrot.lane.b32.xlu1 %v171_v32, %s6435_s28 }
 0xb5c   :  { %3245 = vrot.lane.b32.xlu0 %v172_v53, %s6435_s28 }
 0xb5f   :  { %3247 = vrot.lane.b32.xlu1 %v173_v29, %s6435_s28 }
 0xbba   :  { %v8150_v16 = vpop.permute.xlu0 %3205 }
 0xbbb   :  { %11552 = vst [vmem:[#allocation154_spill] sm:$0xff] %v8150_v16 }
 0xbbd   :  { %v8152_v46 = vpop.permute.xlu1 %3207 }
 0xbbe   :  { %11553 = vst [vmem:[#allocation155_spill] sm:$0xff] %v8152_v46  ;;  %v8154_v51 = vpop.permute.xlu0 %3209 }
 0xbbf   :  { %11554 = vst [vmem:[#allocation156_spill] sm:$0xff] %v8154_v51 }
 0xbc1   :  { %v8156_v8 = vpop.permute.xlu1 %3211 }
 0xbc2   :  { %11555 = vst [vmem:[#allocation157_spill] sm:$0xff] %v8156_v8  ;;  %v8158_v30 = vpop.permute.xlu0 %3213 }
 0xbc5   :  { %v8160_v50 = vpop.permute.xlu1 %3215 }
 0xbc6   :  { %11556 = vst [vmem:[#allocation158_spill] sm:$0xff] %v8160_v50  ;;  %v8162_v52 = vpop.permute.xlu0 %3217 }
 0xbc7   :  { %11557 = vst [vmem:[#allocation159_spill] sm:$0xff] %v8162_v52 }
 0xbc9   :  { %v8164_v44 = vpop.permute.xlu1 %3219 }
 0xbca   :  { %11558 = vst [vmem:[#allocation160_spill] sm:$0xff] %v8164_v44  ;;  %v3242_v35 = vpop.permute.xlu0 %3241 }
 0xbcb   :  { %v3253_v24 = vmul.f32 %v3242_v35, %v8116_v2  ;;  %v3257_v53 = vmul.f32 %v3242_v35, %v8094_v3  ;;  %v175_v35 = vld [vmem:[%s11295_s1 + $0x468] sm:$0xff] }
 0xbcd   :  { %3269 = vrot.lane.b32.xlu0 %v3253_v24, %s6438_s18  ;;  %v3244_v49 = vpop.permute.xlu1 %3243 }
 0xbce   :  { %v3254_v11 = vmul.f32 %v3244_v49, %v8116_v2  ;;  %v3246_v41 = vpop.permute.xlu0 %3245  ;;  %v3258_v29 = vmul.f32 %v3244_v49, %v8094_v3  ;;  %v176_v49 = vld [vmem:[%s11295_s1 + $0x470] sm:$0xff] }
 0xbcf   :  { %v3255_v48 = vmul.f32 %v3246_v41, %v8116_v2  ;;  %v3259_v24 = vmul.f32 %v3246_v41, %v8094_v3  ;;  %v177_v41 = vld [vmem:[%s11295_s1 + $0x478] sm:$0xff] }
 0xbd0   :  { %3271 = vrot.lane.b32.xlu1 %v3254_v11, %s6438_s18 }
 0xbd1   :  { %3273 = vrot.lane.b32.xlu0 %v3255_v48, %s6438_s18  ;;  %v3248_v23 = vpop.permute.xlu1 %3247  ;;  %v174_v48 = vld [vmem:[%s11295_s1 + $0x460] sm:$0xff] }
 0xbd2   :  { %v3256_v32 = vmul.f32 %v3248_v23, %v8116_v2  ;;  %v3260_v11 = vmul.f32 %v3248_v23, %v8094_v3 }
 0xbd4   :  { %3275 = vrot.lane.b32.xlu1 %v3256_v32, %s6438_s18 }
 0xbd5   :  { %3277 = vrot.lane.b32.xlu0 %v3257_v53, %s6438_s18 }
 0xbd8   :  { %3279 = vrot.lane.b32.xlu1 %v3258_v29, %s6438_s18 }
 0xbd9   :  { %3281 = vrot.lane.b32.xlu0 %v3259_v24, %s6438_s18 }
 0xbdc   :  { %3283 = vrot.lane.b32.xlu1 %v3260_v11, %s6438_s18 }
 0xbdd   :  { %3305 = vrot.lane.b32.xlu0 %v174_v48, %s6436_s11 }
 0xbe0   :  { %3307 = vrot.lane.b32.xlu1 %v175_v35, %s6436_s11 }
 0xbe1   :  { %3309 = vrot.lane.b32.xlu0 %v176_v49, %s6436_s11 }
 0xbe4   :  { %3311 = vrot.lane.b32.xlu1 %v177_v41, %s6436_s11 }
 0xc3f   :  { %v8198_v23 = vpop.permute.xlu0 %3269 }
 0xc40   :  { %11559 = vst [vmem:[#allocation161_spill] sm:$0xff] %v8198_v23 }
 0xc42   :  { %v8200_v32 = vpop.permute.xlu1 %3271 }
 0xc43   :  { %11560 = vst [vmem:[#allocation162_spill] sm:$0xff] %v8200_v32  ;;  %v8202_v53 = vpop.permute.xlu0 %3273 }
 0xc44   :  { %11561 = vst [vmem:[#allocation163_spill] sm:$0xff] %v8202_v53 }
 0xc46   :  { %v8204_v29 = vpop.permute.xlu1 %3275 }
 0xc47   :  { %11562 = vst [vmem:[#allocation164_spill] sm:$0xff] %v8204_v29  ;;  %v3278_v24 = vpop.permute.xlu0 %3277  ;;  %v182_v29 = vld [vmem:[%s11295_s1 + $0x4a0] sm:$0xff] }
 0xc4a   :  { %v8206_v11 = vpop.permute.xlu1 %3279 }
 0xc4b   :  { %11563 = vst [vmem:[#allocation165_spill] sm:$0xff] %v8206_v11  ;;  %v8208_v48 = vpop.permute.xlu0 %3281 }
 0xc4c   :  { %11564 = vst [vmem:[#allocation166_spill] sm:$0xff] %v8208_v48 }
 0xc4e   :  { %v8210_v35 = vpop.permute.xlu1 %3283 }
 0xc4f   :  { %11565 = vst [vmem:[#allocation167_spill] sm:$0xff] %v8210_v35  ;;  %v3306_v49 = vpop.permute.xlu0 %3305 }
 0xc50   :  { %v3317_v44 = vmul.f32 %v3306_v49, %v8116_v2  ;;  %v3321_v35 = vmul.f32 %v3306_v49, %v8094_v3 }
 0xc52   :  { %3333 = vrot.lane.b32.xlu0 %v3317_v44, %s6439_s20  ;;  %v3308_v41 = vpop.permute.xlu1 %3307 }
 0xc53   :  { %v3318_v23 = vmul.f32 %v3308_v41, %v8116_v2  ;;  %v3310_v32 = vpop.permute.xlu0 %3309  ;;  %v3322_v44 = vmul.f32 %v3308_v41, %v8094_v3  ;;  %v8250_v41 = vld [vmem:[%s11294_s0 + $0x68] sm:$0x7] }
 0xc54   :  { %v3319_v53 = vmul.f32 %v3310_v32, %v8116_v2  ;;  %v3323_v52 = vmul.f32 %v3310_v32, %v8094_v3 }
 0xc55   :  { %3335 = vrot.lane.b32.xlu1 %v3318_v23, %s6439_s20  ;;  %v3453_v23 = vrot.slane %v182_v29, 7 }
 0xc56   :  { %3337 = vrot.lane.b32.xlu0 %v3319_v53, %s6439_s20  ;;  %v3312_v11 = vpop.permute.xlu1 %3311  ;;  %v183_v53 = vld [vmem:[%s11295_s1 + $0x4a8] sm:$0xff] }
 0xc57   :  { %v3320_v48 = vmul.f32 %v3312_v11, %v8116_v2  ;;  %v3454_v49 = vrot.slane %v183_v53, 7 }
 0xc59   :  { %3339 = vrot.lane.b32.xlu1 %v3320_v48, %s6439_s20  ;;  %v3324_v48 = vmul.f32 %v3312_v11, %v8094_v3  ;;  %v178_v11 = vld [vmem:[%s11295_s1 + $0x480] sm:$0xff] }
 0xc5a   :  { %3341 = vrot.lane.b32.xlu0 %v3321_v35, %s6439_s20  ;;  %v184_v35 = vld [vmem:[%s11295_s1 + $0x4b0] sm:$0xff] }
 0xc5b   :  { %v3455_v32 = vrot.slane %v184_v35, 7 }
 0xc5d   :  { %3343 = vrot.lane.b32.xlu1 %v3322_v44, %s6439_s20  ;;  %v8252_v44 = vrot.slane %v178_v11, 7 }
 0xc5e   :  { %3345 = vrot.lane.b32.xlu0 %v3323_v52, %s6439_s20  ;;  %v185_v52 = vld [vmem:[%s11295_s1 + $0x4b8] sm:$0xff] }
 0xc5f   :  { %v3456_v29 = vrot.slane %v185_v52, 7  ;;  %11566 = vst [vmem:[#allocation168_spill] sm:$0xff] %v8252_v44  ;;  %v3385_v53 = vmul.f32 %v8252_v44, %v8094_v3 }
 0xc61   :  { %3347 = vrot.lane.b32.xlu1 %v3324_v48, %s6439_s20  ;;  %v3386_v48 = vmul.f32 %v8252_v44, %v8250_v41 }
 0xc62   :  { %3457 = vrot.lane.b32.xlu0 %v3453_v23, %s6434_s19 }
 0xc63   :  { %v3422_v52 = vrot.slane %v3386_v48, 1 }
 0xc65   :  { %3459 = vrot.lane.b32.xlu1 %v3454_v49, %s6434_s19 }
 0xc66   :  { %3461 = vrot.lane.b32.xlu0 %v3455_v32, %s6434_s19  ;;  %v3421_v32 = vrot.slane %v3385_v53, 1 }
 0xc69   :  { %3463 = vrot.lane.b32.xlu1 %v3456_v29, %s6434_s19  ;;  %v3233_v29 = vadd.f32 %v8158_v30, %v8107_v33  ;;  %v8280_v33 = vld [vmem:[%s11294_s0 + $0x28] sm:$0x7] }
 0xc6b   :  { %v3297_v50 = vadd.f32 %v3278_v24, %v3233_v29 }
 0xcc4   :  { %v8254_v23 = vpop.permute.xlu0 %3333 }
 0xcc5   :  { %11567 = vst [vmem:[#allocation169_spill] sm:$0xff] %v8254_v23  ;;  %v3423_v23 = vsel %vm542_vm0, %v3421_v32, %v3422_v52 }
 0xcc7   :  { %v8260_v35 = vpop.permute.xlu1 %3335 }
 0xcc8   :  { %11568 = vst [vmem:[#allocation170_spill] sm:$0xff] %v8260_v35  ;;  %v8262_v49 = vpop.permute.xlu0 %3337 }
 0xcc9   :  { %11569 = vst [vmem:[#allocation171_spill] sm:$0xff] %v8262_v49 }
 0xccb   :  { %v8266_v11 = vpop.permute.xlu1 %3339 }
 0xccc   :  { %11570 = vst [vmem:[#allocation172_spill] sm:$0xff] %v8266_v11  ;;  %v3342_v8 = vpop.permute.xlu0 %3341 }
 0xccd   :  { %v3361_v51 = vadd.f32 %v3342_v8, %v3297_v50 }
 0xccf   :  { %v8269_v46 = vpop.permute.xlu1 %3343  ;;  %v8271_v16 = vadd.f32 %v3423_v23, %v3361_v51 }
 0xcd0   :  { %11571 = vst [vmem:[#allocation173_spill] sm:$0xff] %v8269_v46  ;;  %v8273_v44 = vpop.permute.xlu0 %3345 }
 0xcd1   :  { %11572 = vst [vmem:[#allocation174_spill] sm:$0xff] %v8273_v44 }
 0xcd3   :  { %v8275_v35 = vpop.permute.xlu1 %3347 }
 0xcd4   :  { %11573 = vst [vmem:[#allocation175_spill] sm:$0xff] %v8275_v35  ;;  %v3458_v53 = vpop.permute.xlu0 %3457 }
 0xcd5   :  { %v3469_v30 = vmul.f32 %v3458_v53, %v8116_v2  ;;  %v3470_v24 = vmul.f32 %v3458_v53, %v8280_v33  ;;  %v3477_v51 = vmul.f32 %v3458_v53, %v8094_v3  ;;  %v3478_v46 = vmul.f32 %v3458_v53, %v8250_v41 }
 0xcd7   :  { %v3460_v48 = vpop.permute.xlu1 %3459  ;;  %v3501_v8 = vrot.slane %v3469_v30, 1  ;;  %v3502_v50 = vrot.slane %v3470_v24, 1  ;;  %v3513_v19 = vrot.slane %v3477_v51, 1 }
 0xcd8   :  { %v3462_v23 = vpop.permute.xlu0 %3461  ;;  %v3471_v32 = vmul.f32 %v3460_v48, %v8116_v2  ;;  %v3472_v52 = vmul.f32 %v3460_v48, %v8280_v33  ;;  %v3479_v20 = vmul.f32 %v3460_v48, %v8094_v3  ;;  %v3480_v27 = vmul.f32 %v3460_v48, %v8250_v41 }
 0xcd9   :  { %v3503_v29 = vsel %vm542_vm0, %v3501_v8, %v3502_v50  ;;  %v3473_v35 = vmul.f32 %v3462_v23, %v8116_v2  ;;  %v3474_v44 = vmul.f32 %v3462_v23, %v8280_v33 }
 0xcda   :  { %3525 = vrot.lane.b32.xlu0 %v3503_v29, %s6437_s15  ;;  %v3504_v11 = vrot.slane %v3471_v32, 1  ;;  %v3505_v30 = vrot.slane %v3472_v52, 1  ;;  %v3514_v32 = vrot.slane %v3478_v46, 1  ;;  %v3481_v52 = vmul.f32 %v3462_v23, %v8094_v3 }
 0xcdb   :  { %v3464_v24 = vpop.permute.xlu1 %3463  ;;  %v3507_v49 = vrot.slane %v3473_v35, 1  ;;  %v3508_v38 = vrot.slane %v3474_v44, 1  ;;  %v3482_v44 = vmul.f32 %v3462_v23, %v8250_v41 }
 0xcdc   :  { %v3506_v17 = vsel %vm542_vm0, %v3504_v11, %v3505_v30  ;;  %v3475_v8 = vmul.f32 %v3464_v24, %v8116_v2  ;;  %v3476_v50 = vmul.f32 %v3464_v24, %v8280_v33  ;;  %v3516_v11 = vrot.slane %v3479_v20, 1 }
 0xcdd   :  { %3527 = vrot.lane.b32.xlu1 %v3506_v17, %s6437_s15  ;;  %v3509_v53 = vsel %vm542_vm0, %v3507_v49, %v3508_v38  ;;  %v3517_v30 = vrot.slane %v3480_v27, 1  ;;  %v3483_v37 = vmul.f32 %v3464_v24, %v8094_v3  ;;  %v3484_v48 = vmul.f32 %v3464_v24, %v8250_v41  ;;  %v186_v49 = vld [vmem:[%s11295_s1 + $0x4c0] sm:$0xff] }
 0xcde   :  { %3529 = vrot.lane.b32.xlu0 %v3509_v53, %s6437_s15  ;;  %v3510_v35 = vrot.slane %v3475_v8, 1  ;;  %v3511_v51 = vrot.slane %v3476_v50, 1  ;;  %v3515_v17 = vsel %vm542_vm0, %v3513_v19, %v3514_v32  ;;  %v3519_v38 = vrot.slane %v3481_v52, 1  ;;  %v187_v19 = vld [vmem:[%s11295_s1 + $0x4c8] sm:$0xff]  ;;  %v188_v50 = vld [vmem:[%s11295_s1 + $0x4d0] sm:$0xff]  ;;  %v189_v52 = vld [vmem:[%s11295_s1 + $0x4d8] sm:$0xff] }
 0xcdf   :  { %v3520_v46 = vrot.slane %v3482_v44, 1  ;;  %v3518_v20 = vsel %vm542_vm0, %v3516_v11, %v3517_v30  ;;  %v3522_v23 = vrot.slane %v3483_v37, 1  ;;  %v3523_v27 = vrot.slane %v3484_v48, 1 }
 0xce0   :  { %v3512_v29 = vsel %vm542_vm0, %v3510_v35, %v3511_v51  ;;  %v3561_v8 = vrot.slane %v186_v49, 7  ;;  %v3562_v37 = vrot.slane %v187_v19, 7  ;;  %v3563_v32 = vrot.slane %v188_v50, 7 }
 0xce1   :  { %3531 = vrot.lane.b32.xlu1 %v3512_v29, %s6437_s15  ;;  %v3521_v24 = vsel %vm542_vm0, %v3519_v38, %v3520_v46  ;;  %v3524_v53 = vsel %vm542_vm0, %v3522_v23, %v3523_v27  ;;  %v3564_v44 = vrot.slane %v189_v52, 7 }
 0xce2   :  { %3533 = vrot.lane.b32.xlu0 %v3515_v17, %s6437_s15 }
 0xce5   :  { %3535 = vrot.lane.b32.xlu1 %v3518_v20, %s6437_s15 }
 0xce6   :  { %3537 = vrot.lane.b32.xlu0 %v3521_v24, %s6437_s15 }
 0xce9   :  { %3539 = vrot.lane.b32.xlu1 %v3524_v53, %s6437_s15 }
 0xcea   :  { %3565 = vrot.lane.b32.xlu0 %v3561_v8, %s6435_s28 }
 0xced   :  { %3567 = vrot.lane.b32.xlu1 %v3562_v37, %s6435_s28 }
 0xcee   :  { %3569 = vrot.lane.b32.xlu0 %v3563_v32, %s6435_s28 }
 0xcf1   :  { %3571 = vrot.lane.b32.xlu1 %v3564_v44, %s6435_s28 }
 0xd4c   :  { %v8330_v35 = vpop.permute.xlu0 %3525 }
 0xd4d   :  { %11574 = vst [vmem:[#allocation176_spill] sm:$0xff] %v8330_v35 }
 0xd4f   :  { %v8332_v51 = vpop.permute.xlu1 %3527 }
 0xd50   :  { %11575 = vst [vmem:[#allocation177_spill] sm:$0xff] %v8332_v51  ;;  %v8334_v11 = vpop.permute.xlu0 %3529 }
 0xd51   :  { %11576 = vst [vmem:[#allocation178_spill] sm:$0xff] %v8334_v11 }
 0xd53   :  { %v8336_v29 = vpop.permute.xlu1 %3531 }
 0xd54   :  { %11577 = vst [vmem:[#allocation179_spill] sm:$0xff] %v8336_v29  ;;  %v8338_v30 = vpop.permute.xlu0 %3533 }
 0xd57   :  { %v8340_v48 = vpop.permute.xlu1 %3535 }
 0xd58   :  { %11578 = vst [vmem:[#allocation180_spill] sm:$0xff] %v8340_v48  ;;  %v8342_v17 = vpop.permute.xlu0 %3537 }
 0xd59   :  { %11579 = vst [vmem:[#allocation181_spill] sm:$0xff] %v8342_v17 }
 0xd5b   :  { %v8344_v38 = vpop.permute.xlu1 %3539 }
 0xd5c   :  { %11580 = vst [vmem:[#allocation182_spill] sm:$0xff] %v8344_v38  ;;  %v3566_v46 = vpop.permute.xlu0 %3565 }
 0xd5d   :  { %v3577_v49 = vmul.f32 %v3566_v46, %v8116_v2  ;;  %v3578_v20 = vmul.f32 %v3566_v46, %v8280_v33  ;;  %v3585_v8 = vmul.f32 %v3566_v46, %v8094_v3  ;;  %v3586_v44 = vmul.f32 %v3566_v46, %v8250_v41 }
 0xd5f   :  { %v3568_v23 = vpop.permute.xlu1 %3567  ;;  %v3609_v27 = vrot.slane %v3577_v49, 1  ;;  %v3610_v24 = vrot.slane %v3578_v20, 1  ;;  %v3621_v29 = vrot.slane %v3585_v8, 1 }
 0xd60   :  { %v3570_v19 = vpop.permute.xlu0 %3569  ;;  %v3579_v50 = vmul.f32 %v3568_v23, %v8116_v2  ;;  %v3580_v53 = vmul.f32 %v3568_v23, %v8280_v33  ;;  %v3587_v11 = vmul.f32 %v3568_v23, %v8094_v3  ;;  %v3588_v35 = vmul.f32 %v3568_v23, %v8250_v41 }
 0xd61   :  { %v3611_v37 = vsel %vm542_vm0, %v3609_v27, %v3610_v24  ;;  %v3581_v32 = vmul.f32 %v3570_v19, %v8116_v2  ;;  %v3582_v52 = vmul.f32 %v3570_v19, %v8280_v33 }
 0xd62   :  { %3633 = vrot.lane.b32.xlu0 %v3611_v37, %s6438_s18  ;;  %v3612_v38 = vrot.slane %v3579_v50, 1  ;;  %v3613_v49 = vrot.slane %v3580_v53, 1  ;;  %v3622_v50 = vrot.slane %v3586_v44, 1  ;;  %v3589_v53 = vmul.f32 %v3570_v19, %v8094_v3 }
 0xd63   :  { %v3572_v20 = vpop.permute.xlu1 %3571  ;;  %v3615_v17 = vrot.slane %v3581_v32, 1  ;;  %v3616_v48 = vrot.slane %v3582_v52, 1  ;;  %v3590_v37 = vmul.f32 %v3570_v19, %v8250_v41  ;;  %v190_v19 = vld [vmem:[%s11295_s1 + $0x4e0] sm:$0xff] }
 0xd64   :  { %v3614_v51 = vsel %vm542_vm0, %v3612_v38, %v3613_v49  ;;  %v3583_v27 = vmul.f32 %v3572_v20, %v8116_v2  ;;  %v3584_v24 = vmul.f32 %v3572_v20, %v8280_v33  ;;  %v3624_v38 = vrot.slane %v3587_v11, 1 }
 0xd65   :  { %3635 = vrot.lane.b32.xlu1 %v3614_v51, %s6438_s18  ;;  %v3617_v46 = vsel %vm542_vm0, %v3615_v17, %v3616_v48  ;;  %v3625_v49 = vrot.slane %v3588_v35, 1  ;;  %v3591_v42 = vmul.f32 %v3572_v20, %v8094_v3  ;;  %v3592_v23 = vmul.f32 %v3572_v20, %v8250_v41 }
 0xd66   :  { %3637 = vrot.lane.b32.xlu0 %v3617_v46, %s6438_s18  ;;  %v3618_v8 = vrot.slane %v3583_v27, 1  ;;  %v3619_v32 = vrot.slane %v3584_v24, 1  ;;  %v3623_v51 = vsel %vm542_vm0, %v3621_v29, %v3622_v50  ;;  %v3627_v48 = vrot.slane %v3589_v53, 1  ;;  %v191_v29 = vld [vmem:[%s11295_s1 + $0x4e8] sm:$0xff]  ;;  %v192_v24 = vld [vmem:[%s11295_s1 + $0x4f0] sm:$0xff]  ;;  %v193_v53 = vld [vmem:[%s11295_s1 + $0x4f8] sm:$0xff] }
 0xd67   :  { %v3628_v17 = vrot.slane %v3590_v37, 1  ;;  %v3626_v11 = vsel %vm542_vm0, %v3624_v38, %v3625_v49  ;;  %v3630_v44 = vrot.slane %v3591_v42, 1  ;;  %v3631_v35 = vrot.slane %v3592_v23, 1 }
 0xd68   :  { %v3620_v52 = vsel %vm542_vm0, %v3618_v8, %v3619_v32  ;;  %v3669_v27 = vrot.slane %v190_v19, 7  ;;  %v3670_v42 = vrot.slane %v191_v29, 7  ;;  %v3671_v50 = vrot.slane %v192_v24, 7 }
 0xd69   :  { %3639 = vrot.lane.b32.xlu1 %v3620_v52, %s6438_s18  ;;  %v3629_v20 = vsel %vm542_vm0, %v3627_v48, %v3628_v17  ;;  %v3632_v46 = vsel %vm542_vm0, %v3630_v44, %v3631_v35  ;;  %v3672_v37 = vrot.slane %v193_v53, 7 }
 0xd6a   :  { %3641 = vrot.lane.b32.xlu0 %v3623_v51, %s6438_s18 }
 0xd6d   :  { %3643 = vrot.lane.b32.xlu1 %v3626_v11, %s6438_s18 }
 0xd6e   :  { %3645 = vrot.lane.b32.xlu0 %v3629_v20, %s6438_s18 }
 0xd71   :  { %3647 = vrot.lane.b32.xlu1 %v3632_v46, %s6438_s18 }
 0xd72   :  { %3673 = vrot.lane.b32.xlu0 %v3669_v27, %s6436_s11 }
 0xd75   :  { %3675 = vrot.lane.b32.xlu1 %v3670_v42, %s6436_s11 }
 0xd76   :  { %3677 = vrot.lane.b32.xlu0 %v3671_v50, %s6436_s11 }
 0xd79   :  { %3679 = vrot.lane.b32.xlu1 %v3672_v37, %s6436_s11 }
 0xdd4   :  { %v8394_v8 = vpop.permute.xlu0 %3633 }
 0xdd5   :  { %11581 = vst [vmem:[#allocation183_spill] sm:$0xff] %v8394_v8 }
 0xdd7   :  { %v8396_v32 = vpop.permute.xlu1 %3635 }
 0xdd8   :  { %11582 = vst [vmem:[#allocation184_spill] sm:$0xff] %v8396_v32  ;;  %v8398_v38 = vpop.permute.xlu0 %3637 }
 0xdd9   :  { %11583 = vst [vmem:[#allocation185_spill] sm:$0xff] %v8398_v38 }
 0xddb   :  { %v8400_v52 = vpop.permute.xlu1 %3639 }
 0xddc   :  { %11584 = vst [vmem:[#allocation186_spill] sm:$0xff] %v8400_v52  ;;  %v8402_v49 = vpop.permute.xlu0 %3641 }
 0xddf   :  { %v8404_v23 = vpop.permute.xlu1 %3643 }
 0xde0   :  { %11585 = vst [vmem:[#allocation187_spill] sm:$0xff] %v8404_v23  ;;  %v8406_v51 = vpop.permute.xlu0 %3645 }
 0xde1   :  { %11586 = vst [vmem:[#allocation188_spill] sm:$0xff] %v8406_v51 }
 0xde3   :  { %v8408_v48 = vpop.permute.xlu1 %3647 }
 0xde4   :  { %11587 = vst [vmem:[#allocation189_spill] sm:$0xff] %v8408_v48  ;;  %v3674_v17 = vpop.permute.xlu0 %3673 }
 0xde5   :  { %v3685_v19 = vmul.f32 %v3674_v17, %v8116_v2  ;;  %v3686_v11 = vmul.f32 %v3674_v17, %v8280_v33  ;;  %v3693_v27 = vmul.f32 %v3674_v17, %v8094_v3  ;;  %v3694_v37 = vmul.f32 %v3674_v17, %v8250_v41 }
 0xde7   :  { %v3676_v44 = vpop.permute.xlu1 %3675  ;;  %v3717_v35 = vrot.slane %v3685_v19, 1  ;;  %v3718_v20 = vrot.slane %v3686_v11, 1  ;;  %v3729_v52 = vrot.slane %v3693_v27, 1 }
 0xde8   :  { %v3678_v29 = vpop.permute.xlu0 %3677  ;;  %v3687_v24 = vmul.f32 %v3676_v44, %v8116_v2  ;;  %v3688_v46 = vmul.f32 %v3676_v44, %v8280_v33  ;;  %v3695_v38 = vmul.f32 %v3676_v44, %v8094_v3  ;;  %v3696_v8 = vmul.f32 %v3676_v44, %v8250_v41 }
 0xde9   :  { %v3719_v42 = vsel %vm542_vm0, %v3717_v35, %v3718_v20  ;;  %v3689_v50 = vmul.f32 %v3678_v29, %v8116_v2  ;;  %v3690_v53 = vmul.f32 %v3678_v29, %v8280_v33 }
 0xdea   :  { %3741 = vrot.lane.b32.xlu0 %v3719_v42, %s6439_s20  ;;  %v3720_v48 = vrot.slane %v3687_v24, 1  ;;  %v3721_v19 = vrot.slane %v3688_v46, 1  ;;  %v3730_v24 = vrot.slane %v3694_v37, 1  ;;  %v3697_v46 = vmul.f32 %v3678_v29, %v8094_v3 }
 0xdeb   :  { %v3680_v11 = vpop.permute.xlu1 %3679  ;;  %v3723_v51 = vrot.slane %v3689_v50, 1  ;;  %v3724_v23 = vrot.slane %v3690_v53, 1  ;;  %v3698_v42 = vmul.f32 %v3678_v29, %v8250_v41  ;;  %v198_v29 = vld [vmem:[%s11295_s1 + $0x520] sm:$0xff] }
 0xdec   :  { %v3722_v32 = vsel %vm542_vm0, %v3720_v48, %v3721_v19  ;;  %v3691_v35 = vmul.f32 %v3680_v11, %v8116_v2  ;;  %v3692_v20 = vmul.f32 %v3680_v11, %v8280_v33  ;;  %v3732_v48 = vrot.slane %v3695_v38, 1 }
 0xded   :  { %3743 = vrot.lane.b32.xlu1 %v3722_v32, %s6439_s20  ;;  %v3725_v17 = vsel %vm542_vm0, %v3723_v51, %v3724_v23  ;;  %v3733_v19 = vrot.slane %v3696_v8, 1  ;;  %v3699_v39 = vmul.f32 %v3680_v11, %v8094_v3  ;;  %v3700_v44 = vmul.f32 %v3680_v11, %v8250_v41 }
 0xdee   :  { %3745 = vrot.lane.b32.xlu0 %v3725_v17, %s6439_s20  ;;  %v3726_v27 = vrot.slane %v3691_v35, 1  ;;  %v3727_v50 = vrot.slane %v3692_v20, 1  ;;  %v3731_v32 = vsel %vm542_vm0, %v3729_v52, %v3730_v24  ;;  %v3735_v23 = vrot.slane %v3697_v46, 1  ;;  %v199_v52 = vld [vmem:[%s11295_s1 + $0x528] sm:$0xff]  ;;  %v200_v20 = vld [vmem:[%s11295_s1 + $0x530] sm:$0xff]  ;;  %v201_v46 = vld [vmem:[%s11295_s1 + $0x538] sm:$0xff] }
 0xdef   :  { %v3736_v51 = vrot.slane %v3698_v42, 1  ;;  %v3734_v38 = vsel %vm542_vm0, %v3732_v48, %v3733_v19  ;;  %v3738_v37 = vrot.slane %v3699_v39, 1  ;;  %v3739_v8 = vrot.slane %v3700_v44, 1 }
 0xdf0   :  { %v3728_v53 = vsel %vm542_vm0, %v3726_v27, %v3727_v50  ;;  %v3861_v35 = vrot.slane %v198_v29, 6  ;;  %v3862_v39 = vrot.slane %v199_v52, 6  ;;  %v3863_v24 = vrot.slane %v200_v20, 6  ;;  %v194_v27 = vld [vmem:[%s11295_s1 + $0x500] sm:$0xff] }
 0xdf1   :  { %3747 = vrot.lane.b32.xlu1 %v3728_v53, %s6439_s20  ;;  %v3737_v11 = vsel %vm542_vm0, %v3735_v23, %v3736_v51  ;;  %v3740_v17 = vsel %vm542_vm0, %v3738_v37, %v3739_v8  ;;  %v3864_v42 = vrot.slane %v201_v46, 6  ;;  %v8461_v50 = vrot.slane %v194_v27, 6 }
 0xdf2   :  { %3749 = vrot.lane.b32.xlu0 %v3731_v32, %s6439_s20  ;;  %v3553_v29 = vadd.f32 %v8338_v30, %v8271_v16 }
 0xdf3   :  { %11588 = vst [vmem:[#allocation190_spill] sm:$0xff] %v8461_v50  ;;  %v3793_v53 = vmul.f32 %v8461_v50, %v8094_v3  ;;  %v3794_v19 = vmul.f32 %v8461_v50, %v8250_v41 }
 0xdf5   :  { %3751 = vrot.lane.b32.xlu1 %v3734_v38, %s6439_s20  ;;  %v3829_v23 = vrot.slane %v3793_v53, 2  ;;  %v3830_v51 = vrot.slane %v3794_v19, 2  ;;  %v3661_v38 = vadd.f32 %v8402_v49, %v3553_v29 }
 0xdf6   :  { %3753 = vrot.lane.b32.xlu0 %v3737_v11, %s6439_s20 }
 0xdf7   :  { %v3831_v11 = vsel %vm951_vm1, %v3829_v23, %v3830_v51 }
 0xdf9   :  { %3755 = vrot.lane.b32.xlu1 %v3740_v17, %s6439_s20 }
 0xdfa   :  { %3865 = vrot.lane.b32.xlu0 %v3861_v35, %s6434_s19 }
 0xdfd   :  { %3867 = vrot.lane.b32.xlu1 %v3862_v39, %s6434_s19 }
 0xdfe   :  { %3869 = vrot.lane.b32.xlu0 %v3863_v24, %s6434_s19 }
 0xe01   :  { %3871 = vrot.lane.b32.xlu1 %v3864_v42, %s6434_s19 }
 0xe5c   :  { %v8463_v48 = vpop.permute.xlu0 %3741 }
 0xe5d   :  { %11589 = vst [vmem:[#allocation191_spill] sm:$0xff] %v8463_v48 }
 0xe5f   :  { %v8469_v44 = vpop.permute.xlu1 %3743 }
 0xe60   :  { %11590 = vst [vmem:[#allocation192_spill] sm:$0xff] %v8469_v44  ;;  %v8471_v32 = vpop.permute.xlu0 %3745 }
 0xe61   :  { %11591 = vst [vmem:[#allocation193_spill] sm:$0xff] %v8471_v32 }
 0xe63   :  { %v8476_v37 = vpop.permute.xlu1 %3747 }
 0xe64   :  { %11592 = vst [vmem:[#allocation194_spill] sm:$0xff] %v8476_v37  ;;  %v3750_v8 = vpop.permute.xlu0 %3749 }
 0xe65   :  { %v3769_v35 = vadd.f32 %v3750_v8, %v3661_v38 }
 0xe67   :  { %v8479_v52 = vpop.permute.xlu1 %3751  ;;  %v8481_v20 = vadd.f32 %v3831_v11, %v3769_v35 }
 0xe68   :  { %11593 = vst [vmem:[#allocation195_spill] sm:$0xff] %v8479_v52  ;;  %v8483_v17 = vpop.permute.xlu0 %3753 }
 0xe69   :  { %11594 = vst [vmem:[#allocation196_spill] sm:$0xff] %v8481_v20  ;;  %11595 = vst [vmem:[#allocation197_spill] sm:$0xff] %v8483_v17  ;;  %v68_v20 = vld [vmem:[%s11295_s1 + $0x110] sm:$0xff] }
 0xe6b   :  { %v8485_v39 = vpop.permute.xlu1 %3755 }
 0xe6c   :  { %11596 = vst [vmem:[#allocation198_spill] sm:$0xff] %v8485_v39  ;;  %v3866_v24 = vpop.permute.xlu0 %3865 }
 0xe6d   :  { %v3877_v46 = vmul.f32 %v3866_v24, %v8116_v2  ;;  %v3878_v16 = vmul.f32 %v3866_v24, %v8280_v33  ;;  %v3885_v27 = vmul.f32 %v3866_v24, %v8094_v3  ;;  %v3886_v8 = vmul.f32 %v3866_v24, %v8250_v41 }
 0xe6f   :  { %v3868_v30 = vpop.permute.xlu1 %3867  ;;  %v3909_v49 = vrot.slane %v3877_v46, 2  ;;  %v3910_v42 = vrot.slane %v3878_v16, 2  ;;  %v3921_v17 = vrot.slane %v3885_v27, 2 }
 0xe70   :  { %v3870_v53 = vpop.permute.xlu0 %3869  ;;  %v3879_v19 = vmul.f32 %v3868_v30, %v8116_v2  ;;  %v3880_v23 = vmul.f32 %v3868_v30, %v8280_v33  ;;  %v3887_v52 = vmul.f32 %v3868_v30, %v8094_v3  ;;  %v3888_v32 = vmul.f32 %v3868_v30, %v8250_v41 }
 0xe71   :  { %v3911_v51 = vsel %vm951_vm1, %v3909_v49, %v3910_v42  ;;  %v3881_v29 = vmul.f32 %v3870_v53, %v8116_v2  ;;  %v3882_v38 = vmul.f32 %v3870_v53, %v8280_v33 }
 0xe72   :  { %3933 = vrot.lane.b32.xlu0 %v3911_v51, %s6437_s15  ;;  %v3912_v11 = vrot.slane %v3879_v19, 2  ;;  %v3913_v35 = vrot.slane %v3880_v23, 2  ;;  %v3922_v19 = vrot.slane %v3886_v8, 2  ;;  %v3889_v23 = vmul.f32 %v3870_v53, %v8094_v3 }
 0xe73   :  { %v3872_v46 = vpop.permute.xlu1 %3871  ;;  %v3915_v16 = vrot.slane %v3881_v29, 2  ;;  %v3916_v39 = vrot.slane %v3882_v38, 2  ;;  %v3890_v51 = vmul.f32 %v3870_v53, %v8250_v41  ;;  %v3924_v38 = vrot.slane %v3887_v52, 2  ;;  %v202_v53 = vld [vmem:[%s11295_s1 + $0x540] sm:$0xff] }
 0xe74   :  { %v3914_v37 = vsel %vm951_vm1, %v3912_v11, %v3913_v35  ;;  %v3883_v49 = vmul.f32 %v3872_v46, %v8116_v2  ;;  %v3884_v42 = vmul.f32 %v3872_v46, %v8280_v33  ;;  %v3925_v11 = vrot.slane %v3888_v32, 2 }
 0xe75   :  { %3935 = vrot.lane.b32.xlu1 %v3914_v37, %s6437_s15  ;;  %v3917_v24 = vsel %vm951_vm1, %v3915_v16, %v3916_v39  ;;  %v3891_v33 = vmul.f32 %v3872_v46, %v8094_v3  ;;  %v3892_v30 = vmul.f32 %v3872_v46, %v8250_v41  ;;  %v3923_v37 = vsel %vm951_vm1, %v3921_v17, %v3922_v19  ;;  %v206_v17 = vld [vmem:[%s11295_s1 + $0x560] sm:$0xff]  ;;  %v203_v46 = vld [vmem:[%s11295_s1 + $0x548] sm:$0xff] }
 0xe76   :  { %3937 = vrot.lane.b32.xlu0 %v3917_v24, %s6437_s15  ;;  %v3918_v27 = vrot.slane %v3883_v49, 2  ;;  %v3919_v29 = vrot.slane %v3884_v42, 2  ;;  %v3927_v39 = vrot.slane %v3889_v23, 2  ;;  %v3928_v8 = vrot.slane %v3890_v51, 2  ;;  %v207_v24 = vld [vmem:[%s11295_s1 + $0x568] sm:$0xff]  ;;  %v214_v19 = vld [vmem:[%s11295_s1 + $0x5a0] sm:$0xff] }
 0xe77   :  { %v3926_v52 = vsel %vm951_vm1, %v3924_v38, %v3925_v11  ;;  %v3930_v35 = vrot.slane %v3891_v33, 2  ;;  %v3931_v32 = vrot.slane %v3892_v30, 2  ;;  %v3969_v41 = vrot.slane %v202_v53, 6  ;;  %v208_v11 = vld [vmem:[%s11295_s1 + $0x570] sm:$0xff]  ;;  %v215_v33 = vld [vmem:[%s11295_s1 + $0x5a8] sm:$0xff] }
 0xe78   :  { %v3920_v2 = vsel %vm951_vm1, %v3918_v27, %v3919_v29  ;;  %v3929_v3 = vsel %vm951_vm1, %v3927_v39, %v3928_v8  ;;  %v4077_v49 = vrot.slane %v206_v17, 6  ;;  %v3970_v42 = vrot.slane %v203_v46, 6  ;;  %v204_v27 = vld [vmem:[%s11295_s1 + $0x550] sm:$0xff]  ;;  %v218_v29 = vld [vmem:[%s11295_s1 + $0x5c0] sm:$0xff]  ;;  %v205_v8 = vld [vmem:[%s11295_s1 + $0x558] sm:$0xff] }
 0xe79   :  { %3939 = vrot.lane.b32.xlu1 %v3920_v2, %s6437_s15  ;;  %v3932_v16 = vsel %vm951_vm1, %v3930_v35, %v3931_v32  ;;  %v4078_v23 = vrot.slane %v207_v24, 6  ;;  %v4269_v51 = vrot.slane %v214_v19, 5  ;;  %v3971_v38 = vrot.slane %v204_v27, 6  ;;  %v222_v39 = vld [vmem:[%s11295_s1 + $0x5e0] sm:$0xff]  ;;  %v219_v35 = vld [vmem:[%s11295_s1 + $0x5c8] sm:$0xff]  ;;  %v209_v32 = vld [vmem:[%s11295_s1 + $0x578] sm:$0xff] }
 0xe7a   :  { %3941 = vrot.lane.b32.xlu0 %v3923_v37, %s6437_s15  ;;  %v4377_v2 = vrot.slane %v218_v29, 5  ;;  %v4079_v30 = vrot.slane %v208_v11, 6  ;;  %v4270_v37 = vrot.slane %v215_v33, 5  ;;  %v4485_v53 = vrot.slane %v222_v39, 5  ;;  %v216_v17 = vld [vmem:[%s11295_s1 + $0x5b0] sm:$0xff]  ;;  %v223_v46 = vld [vmem:[%s11295_s1 + $0x5e8] sm:$0xff] }
 0xe7b   :  { %v217_v19 = vld [vmem:[%s11295_s1 + $0x5b8] sm:$0xff]  ;;  %v231_v33 = vld [vmem:[%s11295_s1 + $0x628] sm:$0xff]  ;;  %v238_v39 = vld [vmem:[%s11295_s1 + $0x660] sm:$0xff] }
 0xe7c   :  { %v4272_v27 = vrot.slane %v217_v19, 5 }
 0xe7d   :  { %3943 = vrot.lane.b32.xlu1 %v3926_v52, %s6437_s15  ;;  %v3972_v52 = vrot.slane %v205_v8, 6  ;;  %v246_v8 = vld [vmem:[%s11295_s1 + $0x6a0] sm:$0xff] }
 0xe7e   :  { %3945 = vrot.lane.b32.xlu0 %v3929_v3, %s6437_s15  ;;  %v4378_v3 = vrot.slane %v219_v35, 5 }
 0xe81   :  { %3947 = vrot.lane.b32.xlu1 %v3932_v16, %s6437_s15  ;;  %v4271_v16 = vrot.slane %v216_v17, 5  ;;  %v250_v17 = vld [vmem:[%s11295_s1 + $0x6c0] sm:$0xff] }
 0xe82   :  { %3973 = vrot.lane.b32.xlu0 %v3969_v41, %s6435_s28  ;;  %v4080_v41 = vrot.slane %v209_v32, 6 }
 0xe85   :  { %4081 = vrot.lane.b32.xlu1 %v4077_v49, %s6436_s11  ;;  %v4486_v49 = vrot.slane %v223_v46, 5 }
 0xe86   :  { %3975 = vrot.lane.b32.xlu0 %v3970_v42, %s6435_s28  ;;  %v220_v42 = vld [vmem:[%s11295_s1 + $0x5d0] sm:$0xff] }
 0xe87   :  { %v4379_v24 = vrot.slane %v220_v42, 5  ;;  %v37_v42 = vld [vmem:[%s11295_s1 + $0x18] sm:$0xff] }
 0xe89   :  { %4083 = vrot.lane.b32.xlu1 %v4078_v23, %s6436_s11  ;;  %v230_v23 = vld [vmem:[%s11295_s1 + $0x620] sm:$0xff] }
 0xe8a   :  { %4273 = vrot.lane.b32.xlu0 %v4269_v51, %s6434_s19  ;;  %v224_v51 = vld [vmem:[%s11295_s1 + $0x5f0] sm:$0xff] }
 0xe8b   :  { %v4487_v29 = vrot.slane %v224_v51, 5 }
 0xe8d   :  { %3977 = vrot.lane.b32.xlu1 %v3971_v38, %s6435_s28  ;;  %v221_v38 = vld [vmem:[%s11295_s1 + $0x5d8] sm:$0xff] }
 0xe8e   :  { %4381 = vrot.lane.b32.xlu0 %v4377_v2, %s6435_s28  ;;  %v234_v2 = vld [vmem:[%s11295_s1 + $0x640] sm:$0xff]  ;;  %v4380_v11 = vrot.slane %v221_v38, 5  ;;  %v235_v38 = vld [vmem:[%s11295_s1 + $0x648] sm:$0xff] }
 0xe91   :  { %4085 = vrot.lane.b32.xlu1 %v4079_v30, %s6436_s11  ;;  %v225_v30 = vld [vmem:[%s11295_s1 + $0x5f8] sm:$0xff] }
 0xe92   :  { %4275 = vrot.lane.b32.xlu0 %v4270_v37, %s6434_s19  ;;  %v51_v37 = vld [vmem:[%s11295_s1 + $0x88] sm:$0xff]  ;;  %v4488_v35 = vrot.slane %v225_v30, 5 }
 0xe93   :  { %v503_v32 = vrot.slane %v51_v37, 7 }
 0xe95   :  { %4489 = vrot.lane.b32.xlu1 %v4485_v53, %s6436_s11  ;;  %v52_v53 = vld [vmem:[%s11295_s1 + $0x90] sm:$0xff] }
 0xe96   :  { %3979 = vrot.lane.b32.xlu0 %v3972_v52, %s6435_s28  ;;  %v53_v52 = vld [vmem:[%s11295_s1 + $0x98] sm:$0xff] }
 0xe97   :  { %v505_v46 = vrot.slane %v53_v52, 7  ;;  %v67_v52 = vld [vmem:[%s11295_s1 + $0x108] sm:$0xff] }
 0xe99   :  { %4383 = vrot.lane.b32.xlu1 %v4378_v3, %s6435_s28  ;;  %v4885_v3 = vrot.slane %v246_v8, 7 }
 0xe9a   :  { %4087 = vrot.lane.b32.xlu0 %v4080_v41, %s6436_s11  ;;  %v504_v41 = vrot.slane %v52_v53, 7 }
 0xe9d   :  { %4277 = vrot.lane.b32.xlu1 %v4271_v16, %s6434_s19  ;;  %v35_v16 = vld [vmem:[%s11295_s1 + $0x8] sm:$0xff] }
 0xe9e   :  { %4491 = vrot.lane.b32.xlu0 %v4486_v49, %s6436_s11  ;;  %v36_v49 = vld [vmem:[%s11295_s1 + $0x10] sm:$0xff] }
 0xea1   :  { %4385 = vrot.lane.b32.xlu1 %v4379_v24, %s6435_s28  ;;  %v8641_v24 = vld [vmem:[%s11294_s0] sm:$0xff] }
 0xea2   :  { %4609 = vrot.lane.b32.xlu0 %v230_v23, %s6434_s19  ;;  %v510_v19 = vmul.f32 %v8641_v24, %v6742_v7  ;;  %v8649_v23 = vld [vmem:[%s11294_s0 + $0x8] sm:$0x7]  ;;  %v8668_v37 = vmul.f32 %v8641_v24, %v35_v16  ;;  %v8674_v8 = vmul.f32 %v8641_v24, %v37_v42  ;;  %v516_v53 = vmul.f32 %v8641_v24, %v505_v46 }
 0xea3   :  { %v511_v51 = vmul.f32 %v8649_v23, %v6742_v7  ;;  %v514_v7 = vmul.f32 %v8641_v24, %v504_v41  ;;  %v515_v30 = vmul.f32 %v8649_v23, %v504_v41  ;;  %v517_v44 = vmul.f32 %v8649_v23, %v505_v46 }
 0xea4   :  { %v543_v48 = vrot.slane %v510_v19, 1  ;;  %v239_v19 = vld [vmem:[%s11295_s1 + $0x668] sm:$0xff] }
 0xea5   :  { %4279 = vrot.lane.b32.xlu1 %v4272_v27, %s6434_s19  ;;  %v512_v27 = vmul.f32 %v8641_v24, %v503_v32  ;;  %v544_v50 = vrot.slane %v511_v51, 1  ;;  %v550_v13 = vrot.slane %v515_v30, 1  ;;  %v254_v51 = vld [vmem:[%s11295_s1 + $0x6e0] sm:$0xff]  ;;  %v8722_v30 = vrot.slane %v68_v20, 6 }
 0xea6   :  { %4493 = vrot.lane.b32.xlu0 %v4487_v29, %s6436_s11  ;;  %v513_v29 = vmul.f32 %v8649_v23, %v503_v32  ;;  %v8739_v20 = vmul.f32 %v8641_v24, %v7802_v18 }
 0xea7   :  { %v546_v40 = vrot.slane %v512_v27, 1  ;;  %v552_v27 = vrot.slane %v516_v53, 1  ;;  %v8732_v43 = vsel %vm542_vm0, %v543_v48, %v544_v50 }
 0xea8   :  { %v547_v31 = vrot.slane %v513_v29, 1  ;;  %v8714_v29 = vld [vmem:[%s11294_s0 + $0x48] sm:$0x7] }
 0xea9   :  { %4673 = vrot.lane.b32.xlu1 %v234_v2, %s6435_s28  ;;  %v4993_v2 = vrot.slane %v250_v17, 7  ;;  %v8725_v34 = vmul.f32 %v8714_v29, %v504_v41 }
 0xeaa   :  { %4387 = vrot.lane.b32.xlu0 %v4380_v11, %s6435_s28  ;;  %v6384_v11 = vld [vmem:[%s11295_s1] sm:$0xff] }
 0xeab   :  { %v562_v36 = vrot.slane %v8725_v34, 1 }
 0xead   :  { %4611 = vrot.lane.b32.xlu1 %v231_v33, %s6434_s19  ;;  %v8663_v33 = vmul.f32 %v6384_v11, %v8641_v24 }
 0xeae   :  { %4737 = vrot.lane.b32.xlu0 %v238_v39, %s6436_s11  ;;  %v8671_v39 = vmul.f32 %v8641_v24, %v36_v49 }
 0xeaf   :  { %v362_v34 = vadd.f32 %v6713_v54, %v8663_v33 }
 0xeb1   :  { %4495 = vrot.lane.b32.xlu1 %v4488_v35, %s6436_s11  ;;  %v8683_v35 = vld [vmem:[%s11294_s0 + $0x40] sm:$0xff] }
 0xeb2   :  { %4889 = vrot.lane.b32.xlu0 %v4885_v3, %s6434_s19  ;;  %v295_v3 = vmul.f32 %v8683_v35, %v35_v16  ;;  %v296_v17 = vmul.f32 %v8683_v35, %v36_v49  ;;  %v297_v11 = vmul.f32 %v8683_v35, %v37_v42  ;;  %v232_v16 = vld [vmem:[%s11295_s1 + $0x630] sm:$0xff]  ;;  %v247_v49 = vld [vmem:[%s11295_s1 + $0x6a8] sm:$0xff]  ;;  %v549_v42 = vrot.slane %v514_v7, 1 }
 0xeb3   :  { %v8701_v22 = vmul.f32 %v8683_v35, %v503_v32  ;;  %v8720_v7 = vmul.f32 %v8683_v35, %v504_v41  ;;  %v8728_v4 = vmul.f32 %v8683_v35, %v505_v46  ;;  %v4886_v53 = vrot.slane %v247_v49, 7 }
 0xeb4   :  { %v8743_v41 = vsel %vm542_vm0, %v546_v40, %v547_v31  ;;  %v551_v49 = vsel %vm542_vm0, %v549_v42, %v550_v13  ;;  %v952_v13 = vrot.slane %v8739_v20, 2  ;;  %v236_v42 = vld [vmem:[%s11295_s1 + $0x650] sm:$0xff]  ;;  %v368_v54 = vadd.f32 %v6723_v60, %v296_v17 }
 0xeb5   :  { %4675 = vrot.lane.b32.xlu1 %v235_v38, %s6435_s28  ;;  %v8703_v38 = vrot.slane %v67_v52, 6  ;;  %v553_v52 = vrot.slane %v517_v44, 1  ;;  %v5101_v44 = vrot.slane %v254_v51, 7  ;;  %v558_v31 = vrot.slane %v8701_v22, 1  ;;  %v248_v60 = vld [vmem:[%s11295_s1 + $0x6b0] sm:$0xff] }
 0xeb6   :  { %4997 = vrot.lane.b32.xlu0 %v4993_v2, %s6435_s28  ;;  %v8717_v2 = vmul.f32 %v8714_v29, %v503_v32  ;;  %v8735_v32 = vmul.f32 %v8714_v29, %v505_v46  ;;  %v251_v46 = vld [vmem:[%s11295_s1 + $0x6c8] sm:$0xff]  ;;  %v561_v51 = vrot.slane %v8720_v7, 1  ;;  %v564_v45 = vrot.slane %v8728_v4, 1 }
 0xeb7   :  { %v8751_v50 = vmul.f32 %v8641_v24, %v8703_v38  ;;  %v8755_v48 = vmul.f32 %v8649_v23, %v8703_v38  ;;  %v924_v22 = vmul.f32 %v8649_v23, %v8722_v30  ;;  %v369_v33 = vadd.f32 %v6725_v61, %v297_v11 }
 0xeb8   :  { %v559_v40 = vrot.slane %v8717_v2, 1  ;;  %v565_v25 = vrot.slane %v8735_v32, 1  ;;  %v365_v32 = vadd.f32 %v6719_v57, %v8674_v8  ;;  %v4887_v11 = vrot.slane %v248_v60, 7 }
 0xeb9   :  { %4613 = vrot.lane.b32.xlu1 %v232_v16, %s6434_s19  ;;  %v8747_v16 = vmul.f32 %v8649_v23, %v7802_v18  ;;  %v923_v18 = vmul.f32 %v8641_v24, %v8722_v30  ;;  %v955_v2 = vrot.slane %v8751_v50, 2  ;;  %v956_v7 = vrot.slane %v8755_v48, 2  ;;  %v69_v50 = vld [vmem:[%s11295_s1 + $0x118] sm:$0xff] }
 0xeba   :  { %4739 = vrot.lane.b32.xlu0 %v239_v19, %s6436_s11  ;;  %v554_v19 = vsel %vm542_vm0, %v552_v27, %v553_v52  ;;  %v4994_v27 = vrot.slane %v251_v46, 7  ;;  %v363_v52 = vadd.f32 %v6715_v55, %v8668_v37  ;;  %v429_v57 = vadd.f32 %v6733_v1, %v365_v32  ;;  %v240_v1 = vld [vmem:[%s11295_s1 + $0x670] sm:$0xff]  ;;  %v11601_v32 = vld [vmem:[#allocation9_spill] sm:$0xff] }
 0xebb   :  { %v953_v4 = vrot.slane %v8747_v16, 2  ;;  %v958_v20 = vrot.slane %v923_v18, 2  ;;  %v426_v16 = vadd.f32 %v6727_v62, %v362_v34  ;;  %v959_v37 = vrot.slane %v924_v22, 2  ;;  %v11597_v18 = vld [vmem:[#allocation5_spill] sm:$0xff]  ;;  %v11598_v34 = vld [vmem:[#allocation6_spill] sm:$0xff] }
 0xebc   :  { %v427_v55 = vadd.f32 %v6729_v63, %v363_v52  ;;  %v432_v62 = vadd.f32 %v6740_v6, %v368_v54  ;;  %v433_v63 = vadd.f32 %v6747_v9, %v369_v33  ;;  %v914_v17 = vrot.slane %v69_v50, 6  ;;  %v11600_v52 = vld [vmem:[#allocation8_spill] sm:$0xff] }
 0xebd   :  { %4891 = vrot.lane.b32.xlu1 %v4886_v53, %s6434_s19  ;;  %v364_v53 = vadd.f32 %v6717_v56, %v8671_v39  ;;  %v255_v39 = vld [vmem:[%s11295_s1 + $0x6e8] sm:$0xff]  ;;  %v560_v6 = vsel %vm542_vm0, %v558_v31, %v559_v40  ;;  %v563_v48 = vsel %vm542_vm0, %v561_v51, %v562_v36  ;;  %v566_v46 = vsel %vm542_vm0, %v564_v45, %v565_v25  ;;  %v237_v33 = vld [vmem:[%s11295_s1 + $0x658] sm:$0xff] }
 0xebe   :  { %5105 = vrot.lane.b32.xlu0 %v5101_v44, %s6436_s11  ;;  %v367_v44 = vadd.f32 %v6721_v59, %v295_v3  ;;  %v233_v59 = vld [vmem:[%s11295_s1 + $0x638] sm:$0xff]  ;;  %v491_v8 = vadd.f32 %v6756_v14, %v427_v55  ;;  %v497_v14 = vadd.f32 %v11597_v18, %v433_v63  ;;  %v8836_v31 = vsel %vm951_vm1, %v955_v2, %v956_v7  ;;  %v11610_v18 = vld [vmem:[#allocation18_spill] sm:$0xff] }
 0xebf   :  { %v428_v56 = vadd.f32 %v6731_v0, %v364_v53  ;;  %v490_v0 = vadd.f32 %v6749_v10, %v426_v16  ;;  %v496_v10 = vadd.f32 %v6767_v28, %v432_v62  ;;  %v8833_v28 = vsel %vm951_vm1, %v952_v13, %v953_v4  ;;  %v11603_v16 = vld [vmem:[#allocation11_spill] sm:$0xff]  ;;  %v11604_v62 = vld [vmem:[#allocation12_spill] sm:$0xff] }
 0xec0   :  { %v431_v61 = vadd.f32 %v6738_v5, %v367_v44  ;;  %v493_v5 = vadd.f32 %v6760_v21, %v429_v57  ;;  %v262_v21 = vld [vmem:[%s11295_s1 + $0x720] sm:$0xff]  ;;  %v8839_v36 = vsel %vm951_vm1, %v958_v20, %v959_v37  ;;  %v576_v25 = vadd.f32 %v8743_v41, %v491_v8  ;;  %v11602_v44 = vld [vmem:[#allocation10_spill] sm:$0xff] }
 0xec1   :  { %4677 = vrot.lane.b32.xlu1 %v236_v42, %s6435_s28  ;;  %v492_v3 = vadd.f32 %v6758_v15, %v428_v56  ;;  %v5102_v15 = vrot.slane %v255_v39, 7  ;;  %v925_v51 = vmul.f32 %v8641_v24, %v914_v17  ;;  %v581_v42 = vadd.f32 %v563_v48, %v496_v10  ;;  %v11605_v8 = vld [vmem:[#allocation13_spill] sm:$0xff]  ;;  %v11608_v10 = vld [vmem:[#allocation16_spill] sm:$0xff] }
 0xec2   :  { %4999 = vrot.lane.b32.xlu0 %v4994_v27, %s6435_s28  ;;  %v495_v9 = vadd.f32 %v6765_v26, %v431_v61  ;;  %v575_v26 = vadd.f32 %v8732_v43, %v490_v0  ;;  %v578_v40 = vadd.f32 %v554_v19, %v493_v5  ;;  %v926_v27 = vmul.f32 %v8649_v23, %v914_v17  ;;  %v11599_v19 = vld [vmem:[#allocation7_spill] sm:$0xff]  ;;  %v11606_v5 = vld [vmem:[#allocation14_spill] sm:$0xff]  ;;  %v11609_v48 = vld [vmem:[#allocation17_spill] sm:$0xff] }
 0xec3   :  { %v577_v45 = vadd.f32 %v551_v49, %v492_v3  ;;  %v5293_v43 = vrot.slane %v262_v21, 6  ;;  %v582_v13 = vadd.f32 %v566_v46, %v497_v14  ;;  %v929_v2 = vmul.f32 %v8683_v35, %v8703_v38  ;;  %v252_v49 = vld [vmem:[%s11295_s1 + $0x6d0] sm:$0xff] }
 0xec4   :  { %v580_v22 = vadd.f32 %v560_v6, %v495_v9  ;;  %v683_v4 = vadd.f32 %v11598_v34, %v575_v26  ;;  %v930_v41 = vmul.f32 %v8714_v29, %v8703_v38  ;;  %v684_v7 = vadd.f32 %v11599_v19, %v576_v25  ;;  %v266_v38 = vld [vmem:[%s11295_s1 + $0x740] sm:$0xff]  ;;  %v11611_v26 = vld [vmem:[#allocation19_spill] sm:$0xff]  ;;  %v83_v34 = vld [vmem:[%s11295_s1 + $0x188] sm:$0xff] }
 0xec5   :  { %4615 = vrot.lane.b32.xlu1 %v233_v59, %s6434_s19  ;;  %v685_v53 = vadd.f32 %v11600_v52, %v577_v45  ;;  %v686_v20 = vadd.f32 %v11601_v32, %v578_v40  ;;  %v689_v50 = vadd.f32 %v11603_v16, %v581_v42  ;;  %v961_v55 = vrot.slane %v925_v51, 2 }
 0xec6   :  { %4741 = vrot.lane.b32.xlu0 %v240_v1, %s6436_s11  ;;  %v688_v54 = vadd.f32 %v11602_v44, %v580_v22  ;;  %v931_v56 = vmul.f32 %v8683_v35, %v8722_v30  ;;  %v932_v57 = vmul.f32 %v8714_v29, %v8722_v30  ;;  %v962_v37 = vrot.slane %v926_v27, 2  ;;  %v11607_v30 = vld [vmem:[#allocation15_spill] sm:$0xff]  ;;  %v11612_v22 = vld [vmem:[#allocation20_spill] sm:$0xff]  ;;  %v11613_v27 = vld [vmem:[#allocation21_spill] sm:$0xff] }
 0xec7   :  { %v933_v59 = vmul.f32 %v8683_v35, %v914_v17  ;;  %v934_v60 = vmul.f32 %v8714_v29, %v914_v17  ;;  %v4995_v61 = vrot.slane %v252_v49, 7  ;;  %v690_v63 = vadd.f32 %v11604_v62, %v582_v13  ;;  %v249_v17 = vld [vmem:[%s11295_s1 + $0x6b8] sm:$0xff]  ;;  %v11614_v49 = vld [vmem:[#allocation22_spill] sm:$0xff] }
 0xec8   :  { %v967_v0 = vrot.slane %v929_v2, 2  ;;  %v968_v1 = vrot.slane %v930_v41, 2  ;;  %v5401_v39 = vrot.slane %v266_v38, 6  ;;  %v791_v3 = vadd.f32 %v11605_v8, %v683_v4  ;;  %v241_v4 = vld [vmem:[%s11295_s1 + $0x678] sm:$0xff]  ;;  %v256_v41 = vld [vmem:[%s11295_s1 + $0x6f0] sm:$0xff]  ;;  %v11618_v38 = vld [vmem:[#allocation26_spill] sm:$0xff] }
 0xec9   :  { %4893 = vrot.lane.b32.xlu1 %v4887_v11, %s6434_s19  ;;  %v792_v6 = vadd.f32 %v11606_v5, %v684_v7  ;;  %v793_v9 = vadd.f32 %v11607_v30, %v685_v53  ;;  %v794_v11 = vadd.f32 %v11608_v10, %v686_v20  ;;  %v796_v46 = vadd.f32 %v11609_v48, %v688_v54  ;;  %v11615_v7 = vld [vmem:[#allocation23_spill] sm:$0xff]  ;;  %v11616_v53 = vld [vmem:[#allocation24_spill] sm:$0xff]  ;;  %v11617_v20 = vld [vmem:[#allocation25_spill] sm:$0xff] }
 0xeca   :  { %5107 = vrot.lane.b32.xlu0 %v5102_v15, %s6436_s11  ;;  %v797_v14 = vadd.f32 %v11610_v18, %v689_v50  ;;  %v970_v15 = vrot.slane %v931_v56, 2  ;;  %v971_v21 = vrot.slane %v932_v57, 2  ;;  %v798_v25 = vadd.f32 %v11611_v26, %v690_v63  ;;  %v263_v54 = vld [vmem:[%s11295_s1 + $0x728] sm:$0xff]  ;;  %v85_v8 = vld [vmem:[%s11295_s1 + $0x198] sm:$0xff]  ;;  %v11619_v30 = vld [vmem:[#allocation27_spill] sm:$0xff] }
 0xecb   :  { %v963_v45 = vsel %vm951_vm1, %v961_v55, %v962_v37  ;;  %v973_v40 = vrot.slane %v933_v59, 2  ;;  %v974_v51 = vrot.slane %v934_v60, 2  ;;  %v899_v42 = vadd.f32 %v11612_v22, %v791_v3  ;;  %v84_v37 = vld [vmem:[%s11295_s1 + $0x190] sm:$0xff]  ;;  %v11620_v10 = vld [vmem:[#allocation28_spill] sm:$0xff]  ;;  %v11621_v48 = vld [vmem:[#allocation29_spill] sm:$0xff] }
 0xecc   :  { %v969_v13 = vsel %vm951_vm1, %v967_v0, %v968_v1  ;;  %v4888_v2 = vrot.slane %v249_v17, 7  ;;  %v901_v19 = vadd.f32 %v11614_v49, %v793_v9  ;;  %v902_v52 = vadd.f32 %v11615_v7, %v794_v11  ;;  %v11622_v26 = vld [vmem:[#allocation30_spill] sm:$0xff]  ;;  %v11627_v49 = vld [vmem:[#allocation35_spill] sm:$0xff]  ;;  %v11628_v7 = vld [vmem:[#allocation36_spill] sm:$0xff] }
 0xecd   :  { %5297 = vrot.lane.b32.xlu1 %v5293_v43, %s6434_s19  ;;  %v900_v43 = vadd.f32 %v11613_v27, %v792_v6  ;;  %v904_v32 = vadd.f32 %v11616_v53, %v796_v46  ;;  %v905_v44 = vadd.f32 %v11617_v20, %v797_v14  ;;  %v906_v16 = vadd.f32 %v11618_v38, %v798_v25  ;;  %v264_v38 = vld [vmem:[%s11295_s1 + $0x730] sm:$0xff] }
 0xece   :  { %4679 = vrot.lane.b32.xlu0 %v237_v33, %s6435_s28  ;;  %v972_v33 = vsel %vm951_vm1, %v970_v15, %v971_v21  ;;  %v1328_v50 = vmul.f32 %v8641_v24, %v7820_v12  ;;  %v1329_v55 = vmul.f32 %v8649_v23, %v7820_v12  ;;  %v975_v56 = vsel %vm951_vm1, %v973_v40, %v974_v51  ;;  %v270_v12 = vld [vmem:[%s11295_s1 + $0x760] sm:$0xff]  ;;  %v267_v21 = vld [vmem:[%s11295_s1 + $0x748] sm:$0xff]  ;;  %v11624_v51 = vld [vmem:[#allocation32_spill] sm:$0xff] }
 0xecf   :  { %v1321_v57 = vrot.slane %v83_v34, 5  ;;  %v5103_v59 = vrot.slane %v256_v41, 7  ;;  %v984_v60 = vadd.f32 %v8833_v28, %v899_v42  ;;  %v5294_v62 = vrot.slane %v263_v54, 6  ;;  %v253_v28 = vld [vmem:[%s11295_s1 + $0x6d8] sm:$0xff]  ;;  %v11625_v42 = vld [vmem:[#allocation33_spill] sm:$0xff] }
 0xed0   :  { %v986_v63 = vadd.f32 %v8839_v36, %v901_v19  ;;  %v987_v0 = vadd.f32 %v963_v45, %v902_v52  ;;  %v989_v1 = vadd.f32 %v969_v13, %v904_v32  ;;  %v1361_v3 = vrot.slane %v1328_v50, 3  ;;  %v11623_v45 = vld [vmem:[#allocation31_spill] sm:$0xff]  ;;  %v11626_v13 = vld [vmem:[#allocation34_spill] sm:$0xff] }
 0xed1   :  { %5001 = vrot.lane.b32.xlu1 %v4995_v61, %s6435_s28  ;;  %v985_v61 = vadd.f32 %v8836_v31, %v900_v43  ;;  %v991_v31 = vadd.f32 %v975_v56, %v906_v16  ;;  %v1362_v5 = vrot.slane %v1329_v55, 3  ;;  %v1322_v6 = vrot.slane %v84_v37, 5  ;;  %v257_v43 = vld [vmem:[%s11295_s1 + $0x6f8] sm:$0xff] }
 0xed2   :  { %5405 = vrot.lane.b32.xlu0 %v5401_v39, %s6435_s28  ;;  %v990_v39 = vadd.f32 %v972_v33, %v905_v44  ;;  %v1092_v9 = vadd.f32 %v11619_v30, %v984_v60  ;;  %v1330_v36 = vmul.f32 %v8641_v24, %v1321_v57  ;;  %v5509_v17 = vrot.slane %v270_v12, 6  ;;  %v11630_v12 = vld [vmem:[#allocation38_spill] sm:$0xff]  ;;  %v268_v30 = vld [vmem:[%s11295_s1 + $0x750] sm:$0xff] }
 0xed3   :  { %v1093_v11 = vadd.f32 %v11620_v10, %v985_v61  ;;  %v1094_v46 = vadd.f32 %v11621_v48, %v986_v63  ;;  %v1331_v18 = vmul.f32 %v8649_v23, %v1321_v57  ;;  %v1323_v14 = vrot.slane %v85_v8, 5  ;;  %v11629_v61 = vld [vmem:[#allocation37_spill] sm:$0xff] }
 0xed4   :  { %v4996_v15 = vrot.slane %v253_v28, 7  ;;  %v1095_v25 = vadd.f32 %v11622_v26, %v987_v0  ;;  %v1097_v40 = vadd.f32 %v11623_v45, %v989_v1  ;;  %v1098_v22 = vadd.f32 %v11624_v51, %v990_v39  ;;  %v11631_v0 = vld [vmem:[#allocation39_spill] sm:$0xff]  ;;  %v11637_v45 = vld [vmem:[#allocation44_spill] sm:$0xff]  ;;  %v11638_v51 = vld [vmem:[#allocation45_spill] sm:$0xff] }
 0xed5   :  { %4743 = vrot.lane.b32.xlu1 %v241_v4, %s6436_s11  ;;  %v1099_v27 = vadd.f32 %v11625_v42, %v991_v31  ;;  %v1200_v34 = vadd.f32 %v11626_v13, %v1092_v9  ;;  %v8949_v4 = vsel %vm1360_vm2, %v1361_v3, %v1362_v5  ;;  %v1333_v41 = vmul.f32 %v8649_v23, %v1322_v6  ;;  %v11632_v9 = vld [vmem:[#allocation40_spill] sm:$0xff]  ;;  %v11639_v42 = vld [vmem:[#allocation46_spill] sm:$0xff]  ;;  %v282_v13 = vld [vmem:[%s11295_s1 + $0x7c0] sm:$0xff] }
 0xed6   :  { %4895 = vrot.lane.b32.xlu0 %v4888_v2, %s6434_s19  ;;  %v1332_v2 = vmul.f32 %v8641_v24, %v1322_v6  ;;  %v1201_v19 = vadd.f32 %v11627_v49, %v1093_v11  ;;  %v1202_v52 = vadd.f32 %v11628_v7, %v1094_v46  ;;  %v1364_v53 = vrot.slane %v1330_v36, 3  ;;  %v11634_v46 = vld [vmem:[#allocation41_spill] sm:$0xff]  ;;  %v11640_v49 = vld [vmem:[#allocation47_spill] sm:$0xff] }
 0xed7   :  { %v5402_v32 = vrot.slane %v267_v21, 6  ;;  %v1365_v20 = vrot.slane %v1331_v18, 3  ;;  %v1334_v44 = vmul.f32 %v8641_v24, %v1323_v14  ;;  %v1335_v54 = vmul.f32 %v8649_v23, %v1323_v14  ;;  %v271_v24 = vld [vmem:[%s11295_s1 + $0x768] sm:$0xff]  ;;  %v11636_v21 = vld [vmem:[#allocation43_spill] sm:$0xff] }
 0xed8   :  { %v5104_v33 = vrot.slane %v257_v43, 7  ;;  %v1338_v16 = vmul.f32 %v8683_v35, %v1321_v57  ;;  %v1339_v50 = vmul.f32 %v8714_v29, %v1321_v57  ;;  %v1340_v55 = vmul.f32 %v8683_v35, %v1322_v6 }
 0xed9   :  { %5109 = vrot.lane.b32.xlu1 %v5103_v59, %s6436_s11  ;;  %v1341_v56 = vmul.f32 %v8714_v29, %v1322_v6  ;;  %v1367_v23 = vrot.slane %v1332_v2, 3  ;;  %v1368_v37 = vrot.slane %v1333_v41, 3  ;;  %v1342_v59 = vmul.f32 %v8683_v35, %v1323_v14  ;;  %v278_v35 = vld [vmem:[%s11295_s1 + $0x7a0] sm:$0xff] }
 0xeda   :  { %5299 = vrot.lane.b32.xlu0 %v5294_v62, %s6434_s19  ;;  %v1343_v60 = vmul.f32 %v8714_v29, %v1323_v14  ;;  %v1203_v62 = vadd.f32 %v11629_v61, %v1095_v25  ;;  %v1205_v63 = vadd.f32 %v11630_v12, %v1097_v40  ;;  %v1206_v57 = vadd.f32 %v11631_v0, %v1098_v22  ;;  %v11635_v14 = vld [vmem:[#allocation42_spill] sm:$0xff] }
 0xedb   :  { %v5295_v1 = vrot.slane %v264_v38, 6  ;;  %v1366_v39 = vsel %vm1360_vm2, %v1364_v53, %v1365_v20  ;;  %v1370_v8 = vrot.slane %v1334_v44, 3  ;;  %v1371_v28 = vrot.slane %v1335_v54, 3  ;;  %v279_v61 = vld [vmem:[%s11295_s1 + $0x7a8] sm:$0xff] }
 0xedc   :  { %v5510_v31 = vrot.slane %v271_v24, 6  ;;  %v1376_v29 = vrot.slane %v1338_v16, 3  ;;  %v1377_v3 = vrot.slane %v1339_v50, 3  ;;  %v1379_v5 = vrot.slane %v1340_v55, 3 }
 0xedd   :  { %5513 = vrot.lane.b32.xlu1 %v5509_v17, %s6436_s11  ;;  %v1380_v6 = vrot.slane %v1341_v56, 3  ;;  %v1207_v10 = vadd.f32 %v11632_v9, %v1099_v27  ;;  %v1369_v11 = vsel %vm1360_vm2, %v1367_v23, %v1368_v37  ;;  %v1382_v36 = vrot.slane %v1342_v59, 3  ;;  %v272_v56 = vld [vmem:[%s11295_s1 + $0x770] sm:$0xff]  ;;  %v11643_v23 = vld [vmem:[#allocation48_spill] sm:$0xff]  ;;  %v11644_v59 = vld [vmem:[#allocation49_spill] sm:$0xff] }
 0xede   :  { %5003 = vrot.lane.b32.xlu0 %v4996_v15, %s6435_s28  ;;  %v1383_v17 = vrot.slane %v1343_v60, 3  ;;  %v1308_v18 = vadd.f32 %v11634_v46, %v1200_v34  ;;  %v1309_v15 = vadd.f32 %v11635_v14, %v1201_v19  ;;  %v1310_v26 = vadd.f32 %v11636_v21, %v1202_v52  ;;  %v265_v52 = vld [vmem:[%s11295_s1 + $0x738] sm:$0xff]  ;;  %v6388_v9 = vld [vmem:[%s11295_s1 + $0x200] sm:$0xff] }
 0xedf   :  { %v5701_v25 = vrot.slane %v278_v35, 5  ;;  %v1311_v40 = vadd.f32 %v11637_v45, %v1203_v62  ;;  %v1313_v22 = vadd.f32 %v11638_v51, %v1205_v63  ;;  %v1314_v27 = vadd.f32 %v11639_v42, %v1206_v57  ;;  %v11646_v62 = vld [vmem:[#allocation50_spill] sm:$0xff]  ;;  %v11647_v63 = vld [vmem:[#allocation51_spill] sm:$0xff]  ;;  %v11648_v57 = vld [vmem:[#allocation52_spill] sm:$0xff] }
 0xee0   :  { %v5403_v43 = vrot.slane %v268_v30, 6  ;;  %v1372_v34 = vsel %vm1360_vm2, %v1370_v8, %v1371_v28  ;;  %v1378_v2 = vsel %vm1360_vm2, %v1376_v29, %v1377_v3  ;;  %v1381_v41 = vsel %vm1360_vm2, %v1379_v5, %v1380_v6  ;;  %v99_v28 = vld [vmem:[%s11295_s1 + $0x208] sm:$0xff]  ;;  %v11652_v5 = vld [vmem:[#allocation55_spill] sm:$0xff]  ;;  %v11657_v51 = vld [vmem:[#allocation60_spill] sm:$0xff] }
 0xee1   :  { %5407 = vrot.lane.b32.xlu1 %v5402_v32, %s6435_s28  ;;  %v1315_v19 = vadd.f32 %v11640_v49, %v1207_v10  ;;  %v1384_v53 = vsel %vm1360_vm2, %v1382_v36, %v1383_v17  ;;  %v1393_v20 = vadd.f32 %v8949_v4, %v1308_v18  ;;  %v1394_v44 = vadd.f32 %v1366_v39, %v1309_v15  ;;  %v11649_v39 = vld [vmem:[#allocation53_spill] sm:$0xff]  ;;  %v11651_v29 = vld [vmem:[#allocation54_spill] sm:$0xff]  ;;  %v9040_v30 = vld [vmem:[%s11294_s0 + $0x10] sm:$0xff] }
 0xee2   :  { %5111 = vrot.lane.b32.xlu0 %v5104_v33, %s6436_s11  ;;  %v1395_v54 = vadd.f32 %v1369_v11, %v1310_v26  ;;  %v5809_v33 = vrot.slane %v282_v13, 5  ;;  %v1396_v38 = vadd.f32 %v1372_v34, %v1311_v40  ;;  %v1398_v16 = vadd.f32 %v1378_v2, %v1313_v22  ;;  %v101_v11 = vld [vmem:[%s11295_s1 + $0x218] sm:$0xff]  ;;  %v11654_v18 = vld [vmem:[#allocation57_spill] sm:$0xff]  ;;  %v11655_v15 = vld [vmem:[#allocation58_spill] sm:$0xff] }
 0xee3   :  { %v1399_v50 = vadd.f32 %v1381_v41, %v1314_v27  ;;  %v5296_v55 = vrot.slane %v265_v52, 6  ;;  %v1400_v24 = vadd.f32 %v1384_v53, %v1315_v19  ;;  %v1501_v37 = vadd.f32 %v11643_v23, %v1393_v20  ;;  %v11653_v17 = vld [vmem:[#allocation56_spill] sm:$0xff]  ;;  %v11656_v45 = vld [vmem:[#allocation59_spill] sm:$0xff]  ;;  %v11659_v34 = vld [vmem:[#allocation61_spill] sm:$0xff] }
 0xee4   :  { %v8985_v48 = vpop.permute.xlu0 %3933  ;;  %v1502_v4 = vadd.f32 %v11644_v59, %v1394_v44  ;;  %v1503_v12 = vadd.f32 %v11646_v62, %v1395_v54  ;;  %v1504_v0 = vadd.f32 %v11647_v63, %v1396_v38  ;;  %v1725_v10 = vmul.f32 %v6388_v9, %v9040_v30  ;;  %v269_v13 = vld [vmem:[%s11295_s1 + $0x758] sm:$0xff]  ;;  %v11660_v41 = vld [vmem:[#allocation62_spill] sm:$0xff]  ;;  %v9072_v52 = vld [vmem:[%s11294_s0 + $0x50] sm:$0xff] }
 0xee5   :  { %11633 = vst [vmem:[#allocation5_spill] sm:$0xff] %v8985_v48  ;;  %5301 = vrot.lane.b32.xlu1 %v5295_v1, %s6434_s19  ;;  %v1506_v1 = vadd.f32 %v11648_v57, %v1398_v16  ;;  %v1507_v8 = vadd.f32 %v11649_v39, %v1399_v50  ;;  %v1508_v3 = vadd.f32 %v11651_v29, %v1400_v24  ;;  %v5511_v36 = vrot.slane %v272_v56, 6  ;;  %v11662_v44 = vld [vmem:[#allocation63_spill] sm:$0xff]  ;;  %v11664_v16 = vld [vmem:[#allocation65_spill] sm:$0xff]  ;;  %v9087_v23 = vld [vmem:[%s11294_s0 + $0x18] sm:$0x7] }
 0xee6   :  { %5515 = vrot.lane.b32.xlu0 %v5510_v31, %s6436_s11  ;;  %v100_v31 = vld [vmem:[%s11295_s1 + $0x210] sm:$0xff]  ;;  %v1609_v6 = vadd.f32 %v11652_v5, %v1501_v37  ;;  %v1610_v46 = vadd.f32 %v11653_v17, %v1502_v4  ;;  %v1611_v14 = vadd.f32 %v11654_v18, %v1503_v12  ;;  %v1612_v21 = vadd.f32 %v11655_v15, %v1504_v0  ;;  %v283_v4 = vld [vmem:[%s11295_s1 + $0x7c8] sm:$0xff]  ;;  %v11667_v57 = vld [vmem:[#allocation68_spill] sm:$0xff] }
 0xee7   :  { %v9002_v7 = vpop.permute.xlu1 %3935  ;;  %v5702_v26 = vrot.slane %v279_v61, 5  ;;  %v1614_v40 = vadd.f32 %v11656_v45, %v1506_v1  ;;  %v1615_v22 = vadd.f32 %v11657_v51, %v1507_v8  ;;  %v1726_v42 = vmul.f32 %v9040_v30, %v99_v28  ;;  %v11665_v61 = vld [vmem:[#allocation66_spill] sm:$0xff]  ;;  %v11666_v12 = vld [vmem:[#allocation67_spill] sm:$0xff]  ;;  %v273_v8 = vld [vmem:[%s11295_s1 + $0x778] sm:$0xff] }
 0xee8   :  { %11641 = vst [vmem:[#allocation6_spill] sm:$0xff] %v9002_v7  ;;  %v9008_v32 = vpop.permute.xlu0 %3937  ;;  %v1727_v27 = vmul.f32 %v9040_v30, %v100_v31  ;;  %v1616_v2 = vadd.f32 %v11659_v34, %v1508_v3  ;;  %v1717_v49 = vadd.f32 %v11660_v41, %v1609_v6  ;;  %v1728_v19 = vmul.f32 %v9040_v30, %v101_v11  ;;  %v115_v39 = vld [vmem:[%s11295_s1 + $0x288] sm:$0xff]  ;;  %v117_v9 = vld [vmem:[%s11295_s1 + $0x298] sm:$0xff]  ;;  %v280_v18 = vld [vmem:[%s11295_s1 + $0x7b0] sm:$0xff] }
 0xee9   :  { %11642 = vst [vmem:[#allocation7_spill] sm:$0xff] %v9008_v32  ;;  %5705 = vrot.lane.b32.xlu1 %v5701_v25, %s6434_s19  ;;  %v286_v25 = vld [vmem:[%s11295_s1 + $0x7e0] sm:$0xff]  ;;  %v1730_v53 = vmul.f32 %v9072_v52, %v99_v28  ;;  %v1718_v54 = vadd.f32 %v11662_v44, %v1610_v46  ;;  %v1720_v50 = vadd.f32 %v11664_v16, %v1612_v21  ;;  %v5404_v59 = vrot.slane %v269_v13, 6  ;;  %v287_v45 = vld [vmem:[%s11295_s1 + $0x7e8] sm:$0xff]  ;;  %v11672_v41 = vld [vmem:[#allocation72_spill] sm:$0xff] }
 0xeea   :  { %5409 = vrot.lane.b32.xlu0 %v5403_v43, %s6435_s28  ;;  %v1731_v56 = vmul.f32 %v9072_v52, %v100_v31  ;;  %v1945_v24 = vmul.f32 %v9040_v30, %v7843_v58  ;;  %v1946_v37 = vmul.f32 %v9087_v23, %v7843_v58  ;;  %v1722_v62 = vadd.f32 %v11665_v61, %v1614_v40  ;;  %v116_v31 = vld [vmem:[%s11295_s1 + $0x290] sm:$0xff]  ;;  %v11669_v40 = vld [vmem:[#allocation69_spill] sm:$0xff]  ;;  %v11674_v44 = vld [vmem:[#allocation74_spill] sm:$0xff] }
 0xeeb   :  { %v9018_v60 = vpop.permute.xlu1 %3939  ;;  %v1723_v63 = vadd.f32 %v11666_v12, %v1615_v22  ;;  %v1732_v0 = vmul.f32 %v9072_v52, %v101_v11  ;;  %v1724_v1 = vadd.f32 %v11667_v57, %v1616_v2  ;;  %v1733_v28 = vadd.f32 %v1725_v10, %v1717_v49  ;;  %v11670_v22 = vld [vmem:[#allocation70_spill] sm:$0xff] }
 0xeec   :  { %11645 = vst [vmem:[#allocation8_spill] sm:$0xff] %v9018_v60  ;;  %v9033_v35 = vpop.permute.xlu0 %3941  ;;  %v1734_v3 = vadd.f32 %v1726_v42, %v1718_v54  ;;  %v1736_v6 = vadd.f32 %v1728_v19, %v1720_v50  ;;  %v5810_v11 = vrot.slane %v283_v4, 5  ;;  %v1978_v17 = vrot.slane %v1946_v37, 1  ;;  %v11673_v19 = vld [vmem:[#allocation73_spill] sm:$0xff]  ;;  %v11676_v37 = vld [vmem:[#allocation76_spill] sm:$0xff] }
 0xeed   :  { %11650 = vst [vmem:[#allocation9_spill] sm:$0xff] %v9033_v35  ;;  %5813 = vrot.lane.b32.xlu1 %v5809_v33, %s6435_s28  ;;  %v11663_v33 = vld [vmem:[#allocation64_spill] sm:$0xff]  ;;  %v1938_v46 = vrot.slane %v115_v39, 7  ;;  %v5512_v10 = vrot.slane %v273_v8, 6  ;;  %v1739_v15 = vadd.f32 %v1731_v56, %v1723_v63  ;;  %v1740_v21 = vadd.f32 %v1732_v0, %v1724_v1 }
 0xeee   :  { %5303 = vrot.lane.b32.xlu0 %v5296_v55, %s6434_s19  ;;  %v1719_v38 = vadd.f32 %v11663_v33, %v1611_v14  ;;  %v5917_v55 = vrot.slane %v286_v25, 5  ;;  %v1738_v14 = vadd.f32 %v1730_v53, %v1722_v62  ;;  %v1797_v51 = vadd.f32 %v11669_v40, %v1733_v28  ;;  %v281_v63 = vld [vmem:[%s11295_s1 + $0x7b8] sm:$0xff] }
 0xeef   :  { %v9061_v43 = vpop.permute.xlu1 %3943  ;;  %v1798_v42 = vadd.f32 %v11670_v22, %v1734_v3  ;;  %v1940_v34 = vrot.slane %v117_v9, 7  ;;  %v1800_v49 = vadd.f32 %v11672_v41, %v1736_v6  ;;  %v1803_v54 = vadd.f32 %v11674_v44, %v1739_v15  ;;  %v9160_v39 = vld [vmem:[%s11294_s0 + $0x58] sm:$0x7] }
 0xef0   :  { %11658 = vst [vmem:[#allocation10_spill] sm:$0xff] %v9061_v43  ;;  %v9075_v20 = vpop.permute.xlu0 %3945  ;;  %v1735_v5 = vadd.f32 %v1727_v27, %v1719_v38  ;;  %v11671_v27 = vld [vmem:[#allocation71_spill] sm:$0xff]  ;;  %v1802_v53 = vadd.f32 %v11673_v19, %v1738_v14  ;;  %v5703_v33 = vrot.slane %v280_v18, 5  ;;  %v5918_v56 = vrot.slane %v287_v45, 5  ;;  %v11680_v15 = vld [vmem:[#allocation80_spill] sm:$0xff] }
 0xef1   :  { %11661 = vst [vmem:[#allocation11_spill] sm:$0xff] %v9075_v20  ;;  %5517 = vrot.lane.b32.xlu1 %v5511_v36, %s6436_s11  ;;  %v1977_v36 = vrot.slane %v1945_v24, 1  ;;  %v11675_v38 = vld [vmem:[#allocation75_spill] sm:$0xff]  ;;  %v1948_v4 = vmul.f32 %v9087_v23, %v1938_v46  ;;  %v1951_v0 = vmul.f32 %v9040_v30, %v1940_v34  ;;  %v1952_v57 = vmul.f32 %v9087_v23, %v1940_v34 }
 0xef2   :  { %5707 = vrot.lane.b32.xlu0 %v5702_v26, %s6434_s19  ;;  %v1939_v26 = vrot.slane %v116_v31, 7  ;;  %v1799_v13 = vadd.f32 %v11671_v27, %v1735_v5  ;;  %v1804_v16 = vadd.f32 %v11675_v38, %v1740_v21  ;;  %v284_v24 = vld [vmem:[%s11295_s1 + $0x7d0] sm:$0xff]  ;;  %v1955_v1 = vmul.f32 %v9072_v52, %v1938_v46  ;;  %v11677_v31 = vld [vmem:[#allocation77_spill] sm:$0xff]  ;;  %v11678_v5 = vld [vmem:[#allocation78_spill] sm:$0xff] }
 0xef3   :  { %v9102_v58 = vpop.permute.xlu1 %3947  ;;  %v9136_v50 = vsel %vm542_vm0, %v1977_v36, %v1978_v17  ;;  %v1956_v8 = vmul.f32 %v9160_v39, %v1938_v46  ;;  %v1862_v3 = vadd.f32 %v11677_v31, %v1798_v42  ;;  %v11679_v36 = vld [vmem:[#allocation79_spill] sm:$0xff]  ;;  %v1866_v21 = vadd.f32 %v11680_v15, %v1802_v53  ;;  %v285_v42 = vld [vmem:[%s11295_s1 + $0x7d8] sm:$0xff] }
 0xef4   :  { %11668 = vst [vmem:[#allocation12_spill] sm:$0xff] %v9102_v58  ;;  %v9110_v29 = vpop.permute.xlu0 %3973  ;;  %v1949_v61 = vmul.f32 %v9040_v30, %v1939_v26  ;;  %v1950_v62 = vmul.f32 %v9087_v23, %v1939_v26  ;;  %v9167_v6 = vadd.f32 %v11678_v5, %v1799_v13  ;;  %v1957_v9 = vmul.f32 %v9072_v52, %v1939_v26  ;;  %v288_v14 = vld [vmem:[%s11295_s1 + $0x7f0] sm:$0xff]  ;;  %v289_v53 = vld [vmem:[%s11295_s1 + $0x7f8] sm:$0xff] }
 0xef5   :  { %5921 = vrot.lane.b32.xlu1 %v5917_v55, %s6436_s11  ;;  %v1947_v55 = vmul.f32 %v9040_v30, %v1938_v46  ;;  %v9172_v17 = vadd.f32 %v11679_v36, %v1800_v49  ;;  %v1958_v18 = vmul.f32 %v9160_v39, %v1939_v26  ;;  %v5704_v46 = vrot.slane %v281_v63, 5  ;;  %v11689_v58 = vld [vmem:[#allocation87_spill] sm:$0xff] }
 0xef6   :  { %5411 = vrot.lane.b32.xlu0 %v5404_v59, %s6435_s28  ;;  %v9144_v59 = vadd.f32 %v11676_v37, %v1797_v51  ;;  %v1981_v45 = vrot.slane %v1948_v4, 1  ;;  %v1983_v40 = vrot.slane %v1949_v61, 1  ;;  %v1984_v51 = vrot.slane %v1950_v62, 1  ;;  %v11681_v62 = vld [vmem:[#allocation81_spill] sm:$0xff] }
 0xef7   :  { %v9120_v25 = vpop.permute.xlu1 %4081  ;;  %v1986_v27 = vrot.slane %v1951_v0, 1  ;;  %v1987_v26 = vrot.slane %v1952_v57, 1  ;;  %v1992_v13 = vrot.slane %v1955_v1, 1  ;;  %v1993_v41 = vrot.slane %v1956_v8, 1  ;;  %v11682_v0 = vld [vmem:[#allocation82_spill] sm:$0xff] }
 0xef8   :  { %v9128_v2 = vpop.permute.xlu0 %3975  ;;  %v1995_v19 = vrot.slane %v1957_v9, 1  ;;  %v5919_v44 = vrot.slane %v288_v14, 5  ;;  %v1959_v37 = vmul.f32 %v9072_v52, %v1940_v34  ;;  %v1960_v4 = vmul.f32 %v9160_v39, %v1940_v34 }
 0xef9   :  { %5815 = vrot.lane.b32.xlu1 %v5810_v11, %s6435_s28  ;;  %v5811_v11 = vrot.slane %v284_v24, 5  ;;  %v1996_v24 = vrot.slane %v1958_v18, 1  ;;  %v5812_v61 = vrot.slane %v285_v42, 5  ;;  %v1867_v63 = vadd.f32 %v11681_v62, %v1803_v54 }
 0xefa   :  { %5519 = vrot.lane.b32.xlu0 %v5512_v10, %s6436_s11  ;;  %v1980_v10 = vrot.slane %v1947_v55, 1  ;;  %v9201_v55 = vld [vmem:[%s11294_s0 + $0x28] sm:$0x7]  ;;  %v1868_v57 = vadd.f32 %v11682_v0, %v1804_v16  ;;  %v1985_v8 = vsel %vm542_vm0, %v1983_v40, %v1984_v51  ;;  %v1988_v5 = vsel %vm542_vm0, %v1986_v27, %v1987_v26 }
 0xefb   :  { %v9149_v12 = vpop.permute.xlu1 %4083  ;;  %v4094_v36 = vmul.f32 %v9201_v55, %v9120_v25  ;;  %v3988_v18 = vmul.f32 %v9201_v55, %v9128_v2  ;;  %v1997_v14 = vsel %vm542_vm0, %v1995_v19, %v1996_v24  ;;  %v1998_v15 = vrot.slane %v1959_v37, 1  ;;  %v11685_v19 = vld [vmem:[#allocation84_spill] sm:$0xff]  ;;  %v11687_v24 = vld [vmem:[#allocation85_spill] sm:$0xff]  ;;  %v11688_v0 = vld [vmem:[#allocation86_spill] sm:$0xff] }
 0xefc   :  { %v9163_v28 = vpop.permute.xlu0 %4273  ;;  %v1982_v1 = vsel %vm542_vm0, %v1980_v10, %v1981_v45  ;;  %v1999_v45 = vrot.slane %v1960_v4, 1  ;;  %v4096_v42 = vmul.f32 %v9201_v55, %v9149_v12  ;;  %v1927_v37 = vadd.f32 %v11687_v24, %v9167_v6 }
 0xefd   :  { %5709 = vrot.lane.b32.xlu1 %v5703_v33, %s6434_s19  ;;  %v9194_v33 = vld [vmem:[%s11294_s0 + $0x20] sm:$0xff]  ;;  %v4286_v26 = vmul.f32 %v9201_v55, %v9163_v28  ;;  %v4021_v62 = vrot.slane %v3988_v18, 2  ;;  %v1928_v48 = vadd.f32 %v11688_v0, %v9172_v17  ;;  %v2353_v0 = vmul.f32 %v9040_v30, %v7856_v47 }
 0xefe   :  { %5923 = vrot.lane.b32.xlu0 %v5918_v56, %s6436_s11  ;;  %v3985_v38 = vmul.f32 %v9194_v33, %v9110_v29  ;;  %v3986_v56 = vmul.f32 %v9201_v55, %v9110_v29  ;;  %v4093_v34 = vmul.f32 %v9194_v33, %v9120_v25  ;;  %v3987_v10 = vmul.f32 %v9194_v33, %v9128_v2 }
 0xeff   :  { %v9180_v22 = vpop.permute.xlu1 %3977  ;;  %v4095_v51 = vmul.f32 %v9194_v33, %v9149_v12  ;;  %v4285_v27 = vmul.f32 %v9194_v33, %v9163_v28  ;;  %v4318_v24 = vrot.slane %v4286_v26, 3 }
 0xf00   :  { %v9185_v49 = vpop.permute.xlu0 %4381  ;;  %v4017_v54 = vrot.slane %v3985_v38, 2  ;;  %v4018_v16 = vrot.slane %v3986_v56, 2  ;;  %v4125_v38 = vrot.slane %v4093_v34, 2  ;;  %v4126_v56 = vrot.slane %v4094_v36, 2 }
 0xf01   :  { %5817 = vrot.lane.b32.xlu1 %v5811_v11, %s6435_s28  ;;  %v5920_v11 = vrot.slane %v289_v53, 5  ;;  %v4128_v6 = vrot.slane %v4095_v51, 2  ;;  %v4129_v36 = vrot.slane %v4096_v42, 2  ;;  %v4394_v18 = vmul.f32 %v9201_v55, %v9185_v49 }
 0xf02   :  { %5711 = vrot.lane.b32.xlu0 %v5704_v46, %s6434_s19  ;;  %v1994_v46 = vsel %vm542_vm0, %v1992_v13, %v1993_v41  ;;  %v11684_v13 = vld [vmem:[#allocation83_spill] sm:$0xff]  ;;  %v4019_v4 = vsel %vm951_vm1, %v4017_v54, %v4018_v16  ;;  %v2000_v54 = vsel %vm542_vm0, %v1998_v15, %v1999_v45  ;;  %v4127_v17 = vsel %vm951_vm1, %v4125_v38, %v4126_v56 }
 0xf03   :  { %v9212_v31 = vpop.permute.xlu1 %4085  ;;  %v1925_v41 = vadd.f32 %v11684_v13, %v9144_v59  ;;  %v1930_v59 = vadd.f32 %v11689_v58, %v1866_v21  ;;  %v11690_v13 = vld [vmem:[#allocation88_spill] sm:$0xff]  ;;  %v3989_v58 = vmul.f32 %v9194_v33, %v9180_v22  ;;  %v3990_v21 = vmul.f32 %v9201_v55, %v9180_v22 }
 0xf04   :  { %v9215_v9 = vpop.permute.xlu0 %4275  ;;  %v2011_v45 = vadd.f32 %v1985_v8, %v1927_v37  ;;  %v2012_v51 = vadd.f32 %v1988_v5, %v1928_v48  ;;  %v4098_v48 = vmul.f32 %v9201_v55, %v9212_v31  ;;  %v11697_v37 = vld [vmem:[#allocation91_spill] sm:$0xff] }
 0xf05   :  { %5925 = vrot.lane.b32.xlu1 %v5919_v44, %s6436_s11  ;;  %v1926_v44 = vadd.f32 %v11685_v19, %v1862_v3  ;;  %v1931_v3 = vadd.f32 %v11690_v13, %v1867_v63  ;;  %v11691_v19 = vld [vmem:[#allocation89_spill] sm:$0xff]  ;;  %v2009_v63 = vadd.f32 %v9136_v50, %v1925_v41  ;;  %v2014_v42 = vadd.f32 %v1994_v46, %v1930_v59  ;;  %v131_v13 = vld [vmem:[%s11295_s1 + $0x308] sm:$0xff] }
 0xf06   :  { %5819 = vrot.lane.b32.xlu0 %v5812_v61, %s6435_s28  ;;  %v4020_v61 = vrot.slane %v3987_v10, 2  ;;  %v1932_v20 = vadd.f32 %v11691_v19, %v1868_v57  ;;  %v4393_v10 = vmul.f32 %v9194_v33, %v9185_v49  ;;  %v4130_v50 = vsel %vm951_vm1, %v4128_v6, %v4129_v36 }
 0xf07   :  { %v9229_v40 = vpop.permute.xlu1 %4489  ;;  %v2010_v15 = vadd.f32 %v1982_v1, %v1926_v44  ;;  %v4097_v1 = vmul.f32 %v9194_v33, %v9212_v31  ;;  %v4287_v5 = vmul.f32 %v9194_v33, %v9215_v9  ;;  %v4288_v46 = vmul.f32 %v9201_v55, %v9215_v9 }
 0xf08   :  { %11683 = vst [vmem:[#allocation13_spill] sm:$0xff] %v9229_v40  ;;  %v9242_v53 = vpop.permute.xlu0 %3979  ;;  %v4022_v57 = vsel %vm951_vm1, %v4020_v61, %v4021_v62  ;;  %v2016_v26 = vadd.f32 %v2000_v54, %v1932_v20  ;;  %v4024_v61 = vrot.slane %v3990_v21, 2  ;;  %v4425_v8 = vrot.slane %v4393_v10, 3 }
 0xf09   :  { %11686 = vst [vmem:[#allocation14_spill] sm:$0xff] %v9242_v53  ;;  %5927 = vrot.lane.b32.xlu1 %v5920_v11, %s6436_s11  ;;  %v4317_v11 = vrot.slane %v4285_v27, 3  ;;  %v2015_v27 = vadd.f32 %v1997_v14, %v1931_v3  ;;  %v4426_v20 = vrot.slane %v4394_v18, 3  ;;  %v11696_v14 = vld [vmem:[#allocation90_spill] sm:$0xff]  ;;  %v9291_v62 = vadd.f32 %v11697_v37, %v2010_v15  ;;  %v132_v3 = vld [vmem:[%s11295_s1 + $0x310] sm:$0xff] }
 0xf0a   :  { %4041 = vrot.lane.b32.xlu0 %v4019_v4, %s6438_s18  ;;  %v4023_v4 = vrot.slane %v3989_v58, 2  ;;  %v9288_v44 = vadd.f32 %v11696_v14, %v2009_v63  ;;  %v2354_v59 = vmul.f32 %v9087_v23, %v7856_v47  ;;  %v4501_v6 = vmul.f32 %v9194_v33, %v9229_v40 }
 0xf0b   :  { %v9254_v34 = vpop.permute.xlu1 %4383  ;;  %v4319_v41 = vsel %vm1360_vm2, %v4317_v11, %v4318_v24  ;;  %v4502_v36 = vmul.f32 %v9201_v55, %v9229_v40  ;;  %v3991_v47 = vmul.f32 %v9194_v33, %v9242_v53  ;;  %v3992_v11 = vmul.f32 %v9201_v55, %v9242_v53  ;;  %v11699_v24 = vld [vmem:[#allocation92_spill] sm:$0xff] }
 0xf0c   :  { %11692 = vst [vmem:[#allocation15_spill] sm:$0xff] %v9254_v34  ;;  %v9257_v16 = vpop.permute.xlu0 %4087  ;;  %v2119_v54 = vadd.f32 %v11699_v24, %v2011_v45  ;;  %v4025_v58 = vsel %vm951_vm1, %v4023_v4, %v4024_v61  ;;  %v4131_v21 = vrot.slane %v4097_v1, 2  ;;  %v4132_v63 = vrot.slane %v4098_v48, 2  ;;  %v11703_v24 = vld [vmem:[#allocation94_spill] sm:$0xff] }
 0xf0d   :  { %11693 = vst [vmem:[#allocation16_spill] sm:$0xff] %v9257_v16  ;;  %4149 = vrot.lane.b32.xlu1 %v4127_v17, %s6439_s20  ;;  %v4427_v18 = vsel %vm1360_vm2, %v4425_v8, %v4426_v20  ;;  %v4320_v15 = vrot.slane %v4287_v5, 3  ;;  %v2386_v14 = vrot.slane %v2354_v59, 2  ;;  %v9323_v37 = vrot.slane %v131_v13, 6 }
 0xf0e   :  { %4043 = vrot.lane.b32.xlu0 %v4022_v57, %s6438_s18  ;;  %v11701_v57 = vld [vmem:[#allocation93_spill] sm:$0xff]  ;;  %v9325_v45 = vrot.slane %v132_v3, 6  ;;  %v4533_v61 = vrot.slane %v4501_v6, 3  ;;  %v4534_v1 = vrot.slane %v4502_v36, 3  ;;  %v4027_v48 = vrot.slane %v3992_v11, 2  ;;  %v11706_v3 = vld [vmem:[#allocation96_spill] sm:$0xff] }
 0xf0f   :  { %v9272_v38 = vpop.permute.xlu1 %4277  ;;  %v9319_v10 = vadd.f32 %v11701_v57, %v2012_v51  ;;  %v4026_v51 = vrot.slane %v3991_v47, 2  ;;  %v4133_v8 = vsel %vm951_vm1, %v4131_v21, %v4132_v63  ;;  %v4395_v20 = vmul.f32 %v9194_v33, %v9254_v34 }
 0xf10   :  { %11694 = vst [vmem:[#allocation17_spill] sm:$0xff] %v9272_v38  ;;  %v9276_v56 = vpop.permute.xlu0 %4491  ;;  %v4396_v5 = vmul.f32 %v9201_v55, %v9254_v34  ;;  %v4099_v13 = vmul.f32 %v9194_v33, %v9257_v16  ;;  %v2124_v6 = vadd.f32 %v11706_v3, %v2016_v26  ;;  %v2355_v47 = vmul.f32 %v9040_v30, %v9323_v37 }
 0xf11   :  { %11695 = vst [vmem:[#allocation18_spill] sm:$0xff] %v9276_v56  ;;  %4151 = vrot.lane.b32.xlu1 %v4130_v50, %s6439_s20  ;;  %v4321_v50 = vrot.slane %v4288_v46, 3  ;;  %v11705_v46 = vld [vmem:[#allocation95_spill] sm:$0xff]  ;;  %v2357_v11 = vmul.f32 %v9040_v30, %v9325_v45  ;;  %v2358_v21 = vmul.f32 %v9087_v23, %v9325_v45  ;;  %v4535_v26 = vsel %vm1360_vm2, %v4533_v61, %v4534_v1 }
 0xf12   :  { %4341 = vrot.lane.b32.xlu0 %v4319_v41, %s6437_s15  ;;  %v2385_v41 = vrot.slane %v2353_v0, 2  ;;  %v2123_v0 = vadd.f32 %v11705_v46, %v2015_v27  ;;  %v2356_v27 = vmul.f32 %v9087_v23, %v9323_v37  ;;  %v4134_v46 = vrot.slane %v4099_v13, 2  ;;  %v11711_v13 = vld [vmem:[#allocation99_spill] sm:$0xff] }
 0xf13   :  { %v9304_v19 = vpop.permute.xlu1 %4385  ;;  %v4322_v59 = vsel %vm1360_vm2, %v4320_v15, %v4321_v50  ;;  %v133_v15 = vld [vmem:[%s11295_s1 + $0x318] sm:$0xff]  ;;  %v4503_v1 = vmul.f32 %v9194_v33, %v9276_v56  ;;  %v2388_v3 = vrot.slane %v2355_v47, 2  ;;  %v2392_v60 = vrot.slane %v2358_v21, 2  ;;  %v9405_v21 = vld [vmem:[%s11294_s0 + $0x68] sm:$0x7] }
 0xf14   :  { %11698 = vst [vmem:[#allocation19_spill] sm:$0xff] %v9304_v19  ;;  %v9315_v17 = vpop.permute.xlu0 %4609  ;;  %v9347_v36 = vsel %vm951_vm1, %v2385_v41, %v2386_v14  ;;  %v4428_v41 = vrot.slane %v4395_v20, 3  ;;  %v4429_v14 = vrot.slane %v4396_v5, 3  ;;  %v11710_v5 = vld [vmem:[#allocation98_spill] sm:$0xff]  ;;  %v2389_v43 = vrot.slane %v2356_v27, 2 }
 0xf15   :  { %11700 = vst [vmem:[#allocation20_spill] sm:$0xff] %v9315_v17  ;;  %4045 = vrot.lane.b32.xlu1 %v4025_v58, %s6438_s18  ;;  %v2122_v58 = vadd.f32 %v11703_v24, %v2014_v42  ;;  %v4100_v42 = vmul.f32 %v9201_v55, %v9257_v16  ;;  %v4289_v24 = vmul.f32 %v9194_v33, %v9272_v38  ;;  %v2348_v32 = vrot.slane %v133_v15, 6  ;;  %v11712_v15 = vld [vmem:[#allocation100_spill] sm:$0xff] }
 0xf16   :  { %4449 = vrot.lane.b32.xlu0 %v4427_v18, %s6438_s18  ;;  %v4028_v18 = vsel %vm951_vm1, %v4026_v51, %v4027_v48  ;;  %v4504_v51 = vmul.f32 %v9201_v55, %v9276_v56  ;;  %v11709_v48 = vld [vmem:[#allocation97_spill] sm:$0xff]  ;;  %v4536_v27 = vrot.slane %v4503_v1, 3 }
 0xf17   :  { %v9328_v4 = vpop.permute.xlu1 %4279  ;;  %v4135_v61 = vrot.slane %v4100_v42, 2  ;;  %v9378_v20 = vadd.f32 %v11709_v48, %v9288_v44  ;;  %v9386_v42 = vadd.f32 %v11711_v13, %v2119_v54  ;;  %v4430_v44 = vsel %vm1360_vm2, %v4428_v41, %v4429_v14  ;;  %v11713_v14 = vld [vmem:[#allocation101_spill] sm:$0xff] }
 0xf18   :  { %11702 = vst [vmem:[#allocation21_spill] sm:$0xff] %v9328_v4  ;;  %v9331_v57 = vpop.permute.xlu0 %4493  ;;  %v4323_v48 = vrot.slane %v4289_v24, 3  ;;  %v2228_v41 = vadd.f32 %v11712_v15, %v9319_v10  ;;  %v9412_v24 = vadd.f32 %v11713_v14, %v2122_v58  ;;  %v2360_v10 = vmul.f32 %v9087_v23, %v2348_v32 }
 0xf19   :  { %11704 = vst [vmem:[#allocation22_spill] sm:$0xff] %v9331_v57  ;;  %4153 = vrot.lane.b32.xlu1 %v4133_v8, %s6439_s20  ;;  %v4290_v8 = vmul.f32 %v9201_v55, %v9272_v38  ;;  %v4136_v47 = vsel %vm951_vm1, %v4134_v46, %v4135_v61  ;;  %v9416_v46 = vsel %vm951_vm1, %v2388_v3, %v2389_v43  ;;  %v11715_v61 = vld [vmem:[#allocation103_spill] sm:$0xff] }
 0xf1a   :  { %4343 = vrot.lane.b32.xlu0 %v4322_v59, %s6437_s15  ;;  %v9382_v59 = vadd.f32 %v11710_v5, %v9291_v62  ;;  %v9396_v62 = vld [vmem:[%s11294_s0 + $0x60] sm:$0xff]  ;;  %v9420_v1 = vadd.f32 %v11715_v61, %v2124_v6  ;;  %v2363_v58 = vmul.f32 %v9072_v52, %v9323_v37  ;;  %v9434_v43 = vld [vmem:[%s11294_s0 + $0x30] sm:$0xff]  ;;  %v4398_v3 = vmul.f32 %v9201_v55, %v9304_v19 }
 0xf1b   :  { %v9358_v63 = vpop.permute.xlu1 %4673  ;;  %v4324_v56 = vrot.slane %v4290_v8, 3  ;;  %v3993_v54 = vmul.f32 %v9396_v62, %v9110_v29  ;;  %v11714_v8 = vld [vmem:[#allocation102_spill] sm:$0xff]  ;;  %v2365_v14 = vmul.f32 %v9072_v52, %v9325_v45 }
 0xf1c   :  { %11707 = vst [vmem:[#allocation23_spill] sm:$0xff] %v9358_v63  ;;  %v9365_v50 = vpop.permute.xlu0 %4387  ;;  %v2231_v5 = vadd.f32 %v11714_v8, %v2123_v0  ;;  %v2368_v8 = vmul.f32 %v9160_v39, %v2348_v32  ;;  %v4685_v53 = vmul.f32 %v9358_v63, %v9434_v43  ;;  %v11726_v63 = vld [vmem:[#allocation109_spill] sm:$0xff] }
 0xf1d   :  { %11708 = vst [vmem:[#allocation24_spill] sm:$0xff] %v9365_v50  ;;  %4557 = vrot.lane.b32.xlu1 %v4535_v26, %s6439_s20  ;;  %v2391_v26 = vrot.slane %v2357_v11, 2  ;;  %v4537_v11 = vrot.slane %v4504_v51, 3  ;;  %v4325_v6 = vsel %vm1360_vm2, %v4323_v48, %v4324_v56  ;;  %v2366_v56 = vmul.f32 %v9160_v39, %v9325_v45 }
 0xf1e   :  { %4047 = vrot.lane.b32.xlu0 %v4028_v18, %s6438_s18  ;;  %v3994_v18 = vmul.f32 %v9405_v21, %v9110_v29  ;;  %v2359_v29 = vmul.f32 %v9040_v30, %v2348_v32  ;;  %v2367_v48 = vmul.f32 %v9072_v52, %v2348_v32  ;;  %v2400_v45 = vrot.slane %v2363_v58, 2  ;;  %v11720_v58 = vld [vmem:[#allocation104_spill] sm:$0xff] }
 0xf1f   :  { %v9388_v7 = vpop.permute.xlu1 %4611  ;;  %v9423_v51 = vsel %vm951_vm1, %v2391_v26, %v2392_v60  ;;  %v4397_v60 = vmul.f32 %v9194_v33, %v9304_v19  ;;  %v2364_v26 = vmul.f32 %v9160_v39, %v9323_v37  ;;  %v4621_v37 = vmul.f32 %v9315_v17, %v9434_v43 }
 0xf20   :  { %v9390_v35 = vpop.permute.xlu0 %4737  ;;  %v4030_v15 = vrot.slane %v3994_v18, 2  ;;  %v2394_v61 = vrot.slane %v2359_v29, 2  ;;  %v4432_v32 = vrot.slane %v4398_v3, 3  ;;  %v4292_v17 = vmul.f32 %v9201_v55, %v9328_v4  ;;  %v11721_v3 = vld [vmem:[#allocation105_spill] sm:$0xff] }
 0xf21   :  { %4451 = vrot.lane.b32.xlu1 %v4430_v44, %s6438_s18  ;;  %v4538_v44 = vsel %vm1360_vm2, %v4536_v27, %v4537_v11  ;;  %v4102_v27 = vmul.f32 %v9405_v21, %v9120_v25  ;;  %v2395_v11 = vrot.slane %v2360_v10, 2  ;;  %v4431_v19 = vrot.slane %v4397_v60, 3 }
 0xf22   :  { %4155 = vrot.lane.b32.xlu0 %v4136_v47, %s6439_s20  ;;  %v4029_v47 = vrot.slane %v3993_v54, 2  ;;  %v4101_v54 = vmul.f32 %v9396_v62, %v9120_v25  ;;  %v2401_v38 = vrot.slane %v2364_v26, 2  ;;  %v2403_v16 = vrot.slane %v2365_v14, 2 }
 0xf23   :  { %v9427_v13 = vpop.permute.xlu1 %4495  ;;  %v2404_v34 = vrot.slane %v2366_v56, 2  ;;  %v2406_v25 = vrot.slane %v2367_v48, 2  ;;  %v2407_v10 = vrot.slane %v2368_v8, 2  ;;  %v2333_v60 = vadd.f32 %v11720_v58, %v9378_v20  ;;  %v11723_v48 = vld [vmem:[#allocation106_spill] sm:$0xff] }
 0xf24   :  { %11716 = vst [vmem:[#allocation25_spill] sm:$0xff] %v9427_v13  ;;  %v9436_v0 = vpop.permute.xlu0 %4889  ;;  %v4031_v29 = vsel %vm951_vm1, %v4029_v47, %v4030_v15  ;;  %v2334_v26 = vadd.f32 %v11721_v3, %v9382_v59  ;;  %v4137_v15 = vrot.slane %v4101_v54, 2  ;;  %v4433_v14 = vsel %vm1360_vm2, %v4431_v19, %v4432_v32  ;;  %v11725_v19 = vld [vmem:[#allocation108_spill] sm:$0xff] }
 0xf25   :  { %11717 = vst [vmem:[#allocation26_spill] sm:$0xff] %v9436_v0  ;;  %4345 = vrot.lane.b32.xlu1 %v4325_v6, %s6437_s15  ;;  %v4505_v56 = vmul.f32 %v9194_v33, %v9331_v57  ;;  %v4506_v20 = vmul.f32 %v9201_v55, %v9331_v57  ;;  %v2335_v59 = vadd.f32 %v11723_v48, %v9386_v42 }
 0xf26   :  { %4559 = vrot.lane.b32.xlu0 %v4538_v44, %s6439_s20  ;;  %v4291_v44 = vmul.f32 %v9194_v33, %v9328_v4  ;;  %v2396_v8 = vsel %vm951_vm1, %v2394_v61, %v2395_v11  ;;  %v2402_v3 = vsel %vm951_vm1, %v2400_v45, %v2401_v38  ;;  %v2338_v32 = vadd.f32 %v11725_v19, %v9412_v24  ;;  %v11727_v11 = vld [vmem:[#allocation110_spill] sm:$0xff]  ;;  %v11737_v19 = vld [vmem:[#allocation116_spill] sm:$0xff] }
 0xf27   :  { %v9456_v6 = vpop.permute.xlu1 %4675  ;;  %v2339_v40 = vadd.f32 %v11726_v63, %v2231_v5  ;;  %v2417_v57 = vadd.f32 %v9347_v36, %v2333_v60  ;;  %v2405_v42 = vsel %vm951_vm1, %v2403_v16, %v2404_v34  ;;  %v2408_v61 = vsel %vm951_vm1, %v2406_v25, %v2407_v10  ;;  %v11730_v10 = vld [vmem:[#allocation111_spill] sm:$0xff] }
 0xf28   :  { %11718 = vst [vmem:[#allocation27_spill] sm:$0xff] %v9456_v6  ;;  %v9462_v18 = vpop.permute.xlu0 %4997  ;;  %v4326_v54 = vrot.slane %v4291_v44, 3  ;;  %v2418_v38 = vadd.f32 %v9416_v46, %v2334_v26  ;;  %v4539_v63 = vrot.slane %v4505_v56, 3  ;;  %v4540_v5 = vrot.slane %v4506_v20, 3  ;;  %v11731_v26 = vld [vmem:[#allocation112_spill] sm:$0xff] }
 0xf29   :  { %11719 = vst [vmem:[#allocation28_spill] sm:$0xff] %v9462_v18  ;;  %4637 = vrot.lane.b32.xlu1 %v4621_v37, %s6437_s15  ;;  %v4138_v37 = vrot.slane %v4102_v27, 2  ;;  %v4327_v27 = vrot.slane %v4292_v17, 3  ;;  %v2340_v17 = vadd.f32 %v11727_v11, %v9420_v1  ;;  %v3995_v34 = vmul.f32 %v9396_v62, %v9128_v2 }
 0xf2a   :  { %4049 = vrot.lane.b32.xlu0 %v4031_v29, %s6438_s18  ;;  %v11724_v29 = vld [vmem:[#allocation107_spill] sm:$0xff]  ;;  %v3996_v16 = vmul.f32 %v9405_v21, %v9128_v2  ;;  %v2422_v46 = vadd.f32 %v2402_v3, %v2338_v32  ;;  %v2423_v45 = vadd.f32 %v2405_v42, %v2339_v40  ;;  %v2525_v60 = vadd.f32 %v11730_v10, %v2417_v57  ;;  %v11738_v42 = vld [vmem:[#allocation125_spill] sm:$0xff] }
 0xf2b   :  { %v9475_v47 = vpop.permute.xlu1 %4613  ;;  %v2336_v58 = vadd.f32 %v11724_v29, %v2228_v41  ;;  %v4139_v24 = vsel %vm951_vm1, %v4137_v15, %v4138_v37  ;;  %v4328_v36 = vsel %vm1360_vm2, %v4326_v54, %v4327_v27  ;;  %v2424_v25 = vadd.f32 %v2408_v61, %v2340_v17  ;;  %v11732_v15 = vld [vmem:[#allocation113_spill] sm:$0xff]  ;;  %v148_v2 = vld [vmem:[%s11295_s1 + $0x390] sm:$0xff] }
 0xf2c   :  { %11722 = vst [vmem:[#allocation29_spill] sm:$0xff] %v9475_v47  ;;  %v9479_v4 = vpop.permute.xlu0 %4739  ;;  %v4622_v40 = vmul.f32 %v9388_v7, %v9434_v43  ;;  %v4541_v57 = vsel %vm1360_vm2, %v4539_v63, %v4540_v5  ;;  %v4399_v48 = vmul.f32 %v9194_v33, %v9365_v50  ;;  %v11736_v27 = vld [vmem:[#allocation115_spill] sm:$0xff]  ;;  %v4033_v3 = vrot.slane %v3996_v16, 2  ;;  %v11741_v16 = vld [vmem:[#allocation118_spill] sm:$0xff] }
 0xf2d   :  { %4453 = vrot.lane.b32.xlu1 %v4433_v14, %s6438_s18  ;;  %v2420_v1 = vadd.f32 %v2396_v8, %v2336_v58  ;;  %v147_v14 = vld [vmem:[%s11295_s1 + $0x388] sm:$0xff]  ;;  %v2530_v29 = vadd.f32 %v11736_v27, %v2422_v46  ;;  %v4032_v58 = vrot.slane %v3995_v34, 2  ;;  %v2531_v32 = vadd.f32 %v11737_v19, %v2423_v45  ;;  %v149_v46 = vld [vmem:[%s11295_s1 + $0x398] sm:$0xff] }
 0xf2e   :  { %4701 = vrot.lane.b32.xlu0 %v4685_v53, %s6438_s18  ;;  %v2419_v53 = vadd.f32 %v9423_v51, %v2335_v59  ;;  %v2526_v51 = vadd.f32 %v11731_v26, %v2418_v38  ;;  %v4400_v59 = vmul.f32 %v9201_v55, %v9365_v50  ;;  %v11735_v8 = vld [vmem:[#allocation114_spill] sm:$0xff]  ;;  %v2761_v61 = vmul.f32 %v9040_v30, %v11738_v42 }
 0xf2f   :  { %v9501_v44 = vpop.permute.xlu1 %4891  ;;  %v2528_v54 = vadd.f32 %v11735_v8, %v2420_v1  ;;  %v2762_v11 = vmul.f32 %v9087_v23, %v11738_v42  ;;  %v2754_v17 = vrot.slane %v147_v14, 5  ;;  %v2755_v38 = vrot.slane %v148_v2, 5 }
 0xf30   :  { %11728 = vst [vmem:[#allocation30_spill] sm:$0xff] %v9501_v44  ;;  %v9504_v41 = vpop.permute.xlu0 %5105  ;;  %v2527_v37 = vadd.f32 %v11732_v15, %v2419_v53  ;;  %v4103_v5 = vmul.f32 %v9396_v62, %v9149_v12  ;;  %v4104_v53 = vmul.f32 %v9405_v21, %v9149_v12  ;;  %v9556_v1 = vadd.f32 %v11741_v16, %v2525_v60  ;;  %v11743_v15 = vld [vmem:[#allocation119_spill] sm:$0xff] }
 0xf31   :  { %11729 = vst [vmem:[#allocation31_spill] sm:$0xff] %v9504_v41  ;;  %4157 = vrot.lane.b32.xlu1 %v4139_v24, %s6439_s20  ;;  %v4749_v24 = vmul.f32 %v9390_v35, %v9434_v43  ;;  %v4434_v10 = vrot.slane %v4399_v48, 3  ;;  %v4435_v26 = vrot.slane %v4400_v59, 3  ;;  %v9564_v14 = vadd.f32 %v11743_v15, %v2526_v51 }
 0xf32   :  { %4347 = vrot.lane.b32.xlu0 %v4328_v36, %s6437_s15  ;;  %v11740_v36 = vld [vmem:[#allocation117_spill] sm:$0xff]  ;;  %v4034_v2 = vsel %vm951_vm1, %v4032_v58, %v4033_v3  ;;  %v4293_v12 = vmul.f32 %v9396_v62, %v9163_v28  ;;  %v2793_v60 = vrot.slane %v2761_v61, 3  ;;  %v9576_v48 = vmul.f32 %v9087_v23, %v2754_v17 }
 0xf33   :  { %v9521_v56 = vpop.permute.xlu1 %4677  ;;  %v9553_v34 = vadd.f32 %v11740_v36, %v2424_v25  ;;  %v4294_v25 = vmul.f32 %v9405_v21, %v9163_v28  ;;  %v9580_v51 = vmul.f32 %v9040_v30, %v2755_v38  ;;  %v2756_v59 = vrot.slane %v149_v46, 5  ;;  %v11747_v36 = vld [vmem:[#allocation121_spill] sm:$0xff]  ;;  %v11748_v46 = vld [vmem:[#allocation122_spill] sm:$0xff] }
 0xf34   :  { %11733 = vst [vmem:[#allocation32_spill] sm:$0xff] %v9521_v56  ;;  %v9528_v20 = vpop.permute.xlu0 %4999  ;;  %v4140_v27 = vrot.slane %v4103_v5, 2  ;;  %v4141_v58 = vrot.slane %v4104_v53, 2  ;;  %v4686_v28 = vmul.f32 %v9456_v6, %v9434_v43  ;;  %v4436_v19 = vsel %vm1360_vm2, %v4434_v10, %v4435_v26  ;;  %v11749_v10 = vld [vmem:[#allocation123_spill] sm:$0xff] }
 0xf35   :  { %11734 = vst [vmem:[#allocation33_spill] sm:$0xff] %v9528_v20  ;;  %4561 = vrot.lane.b32.xlu1 %v4541_v57, %s6439_s20  ;;  %v9573_v57 = vmul.f32 %v9040_v30, %v2754_v17  ;;  %v4507_v42 = vmul.f32 %v9194_v33, %v9427_v13  ;;  %v4508_v61 = vmul.f32 %v9201_v55, %v9427_v13  ;;  %v4329_v5 = vrot.slane %v4293_v12, 3 }
 0xf36   :  { %4639 = vrot.lane.b32.xlu0 %v4622_v40, %s6437_s15  ;;  %v2794_v40 = vrot.slane %v2762_v11, 3  ;;  %v11746_v11 = vld [vmem:[#allocation120_spill] sm:$0xff]  ;;  %v9597_v16 = vadd.f32 %v11747_v36, %v2528_v54  ;;  %v4330_v53 = vrot.slane %v4294_v25, 3  ;;  %v9601_v15 = vadd.f32 %v11748_v46, %v2530_v29 }
 0xf37   :  { %v9546_v63 = vpop.permute.xlu1 %4615  ;;  %v9604_v26 = vadd.f32 %v11749_v10, %v2531_v32  ;;  %v2766_v55 = vmul.f32 %v9087_v23, %v2755_v38  ;;  %v2796_v54 = vrot.slane %v9573_v57, 3  ;;  %v2797_v29 = vrot.slane %v9576_v48, 3 }
 0xf38   :  { %11739 = vst [vmem:[#allocation34_spill] sm:$0xff] %v9546_v63  ;;  %v9561_v45 = vpop.permute.xlu0 %4741  ;;  %v2767_v12 = vmul.f32 %v9040_v30, %v2756_v59  ;;  %v2768_v32 = vmul.f32 %v9087_v23, %v2756_v59  ;;  %v2771_v36 = vmul.f32 %v9072_v52, %v2754_v17  ;;  %v4331_v57 = vsel %vm1360_vm2, %v4329_v5, %v4330_v53 }
 0xf39   :  { %11742 = vst [vmem:[#allocation35_spill] sm:$0xff] %v9561_v45  ;;  %4765 = vrot.lane.b32.xlu1 %v4749_v24, %s6439_s20  ;;  %v9594_v24 = vadd.f32 %v11746_v11, %v2527_v37  ;;  %v9614_v37 = vld [vmem:[%s11294_s0 + $0x38] sm:$0x7]  ;;  %v4543_v11 = vrot.slane %v4508_v61, 3  ;;  %v4901_v30 = vmul.f32 %v9436_v0, %v9434_v43  ;;  %v2800_v48 = vrot.slane %v2766_v55, 3 }
 0xf3a   :  { %4051 = vrot.lane.b32.xlu0 %v4034_v2, %s6438_s18  ;;  %v9607_v2 = vsel %vm1360_vm2, %v2793_v60, %v2794_v40  ;;  %v2799_v60 = vrot.slane %v9580_v51, 3  ;;  %v4902_v23 = vmul.f32 %v9436_v0, %v9614_v37  ;;  %v2772_v51 = vmul.f32 %v9160_v39, %v2754_v17 }
 0xf3b   :  { %v9582_v8 = vpop.permute.xlu1 %4893  ;;  %v2773_v46 = vmul.f32 %v9072_v52, %v2755_v38  ;;  %v4401_v5 = vmul.f32 %v9396_v62, %v9185_v49  ;;  %v4402_v53 = vmul.f32 %v9405_v21, %v9185_v49  ;;  %v4623_v10 = vmul.f32 %v9475_v47, %v9434_v43 }
 0xf3c   :  { %11744 = vst [vmem:[#allocation36_spill] sm:$0xff] %v9582_v8  ;;  %v9586_v3 = vpop.permute.xlu0 %5107  ;;  %v4934_v49 = vrot.slane %v4902_v23, 1  ;;  %v2809_v0 = vrot.slane %v2772_v51, 3  ;;  %v2776_v13 = vmul.f32 %v9160_v39, %v2756_v59  ;;  %v2798_v50 = vsel %vm1360_vm2, %v2796_v54, %v2797_v29 }
 0xf3d   :  { %11745 = vst [vmem:[#allocation37_spill] sm:$0xff] %v9586_v3  ;;  %4455 = vrot.lane.b32.xlu1 %v4436_v19, %s6438_s18  ;;  %v4542_v19 = vrot.slane %v4507_v42, 3  ;;  %v2803_v42 = vrot.slane %v2768_v32, 3  ;;  %v2808_v32 = vrot.slane %v2771_v36, 3  ;;  %v2811_v6 = vrot.slane %v2773_v46, 3 }
 0xf3e   :  { %4703 = vrot.lane.b32.xlu0 %v4686_v28, %s6438_s18  ;;  %v4142_v28 = vsel %vm951_vm1, %v4140_v27, %v4141_v58  ;;  %v2774_v27 = vmul.f32 %v9160_v39, %v2755_v38  ;;  %v2802_v58 = vrot.slane %v2767_v12, 3  ;;  %v3997_v38 = vmul.f32 %v9396_v62, %v9180_v22 }
 0xf3f   :  { %v9620_v25 = vpop.permute.xlu1 %5297  ;;  %v4544_v55 = vsel %vm1360_vm2, %v4542_v19, %v4543_v11  ;;  %v3998_v12 = vmul.f32 %v9405_v21, %v9180_v22  ;;  %v11751_v19 = vld [vmem:[#allocation124_spill] sm:$0xff]  ;;  %v2801_v22 = vsel %vm1360_vm2, %v2799_v60, %v2800_v48  ;;  %v4437_v23 = vrot.slane %v4401_v5, 3 }
 0xf40   :  { %v9623_v40 = vpop.permute.xlu0 %4679  ;;  %v2812_v47 = vrot.slane %v2774_v27, 3  ;;  %v2640_v11 = vadd.f32 %v11751_v19, %v9553_v34  ;;  %v4438_v51 = vrot.slane %v4402_v53, 3  ;;  %v4035_v46 = vrot.slane %v3997_v38, 2  ;;  %v11754_v53 = vld [vmem:[#allocation127_spill] sm:$0xff] }
 0xf41   :  { %11750 = vst [vmem:[#allocation38_spill] sm:$0xff] %v9623_v40  ;;  %4159 = vrot.lane.b32.xlu1 %v4142_v28, %s6439_s20  ;;  %v2775_v28 = vmul.f32 %v9072_v52, %v2756_v59  ;;  %v4750_v52 = vmul.f32 %v9479_v4, %v9434_v43  ;;  %v4036_v39 = vrot.slane %v3998_v12, 2  ;;  %v2804_v59 = vsel %vm1360_vm2, %v2802_v58, %v2803_v42  ;;  %v11753_v58 = vld [vmem:[#allocation126_spill] sm:$0xff]  ;;  %v11756_v12 = vld [vmem:[#allocation129_spill] sm:$0xff] }
 0xf42   :  { %4349 = vrot.lane.b32.xlu0 %v4331_v57, %s6437_s15  ;;  %v4933_v57 = vrot.slane %v4901_v30, 1  ;;  %v5009_v34 = vmul.f32 %v9462_v18, %v9434_v43  ;;  %v5010_v54 = vmul.f32 %v9462_v18, %v9614_v37  ;;  %v2810_v29 = vsel %vm1360_vm2, %v2808_v32, %v2809_v0  ;;  %v11791_v18 = vld [vmem:[#allocation151_spill] sm:$0xff] }
 0xf43   :  { %v9637_v61 = vpop.permute.xlu1 %5001  ;;  %v2813_v60 = vsel %vm1360_vm2, %v2811_v6, %v2812_v47  ;;  %v2814_v48 = vrot.slane %v2775_v28, 3  ;;  %v2815_v5 = vrot.slane %v2776_v13, 3  ;;  %v2741_v42 = vadd.f32 %v11753_v58, %v9556_v1  ;;  %v11759_v28 = vld [vmem:[#allocation130_spill] sm:$0xff] }
 0xf44   :  { %v9645_v17 = vpop.permute.xlu0 %5405  ;;  %v4935_v27 = vsel %vm542_vm0, %v4933_v57, %v4934_v49  ;;  %v2744_v57 = vadd.f32 %v11756_v12, %v9597_v16  ;;  %v4439_v13 = vsel %vm1360_vm2, %v4437_v23, %v4438_v51  ;;  %v4037_v6 = vsel %vm951_vm1, %v4035_v46, %v4036_v39  ;;  %v11761_v51 = vld [vmem:[#allocation132_spill] sm:$0xff] }
 0xf45   :  { %4563 = vrot.lane.b32.xlu1 %v4544_v55, %s6439_s20  ;;  %v11755_v55 = vld [vmem:[#allocation128_spill] sm:$0xff]  ;;  %v4105_v47 = vmul.f32 %v9396_v62, %v9212_v31  ;;  %v4106_v1 = vmul.f32 %v9405_v21, %v9212_v31  ;;  %v4295_v16 = vmul.f32 %v9396_v62, %v9215_v9  ;;  %v4296_v32 = vmul.f32 %v9405_v21, %v9215_v9 }
 0xf46   :  { %4641 = vrot.lane.b32.xlu0 %v4623_v10, %s6437_s15  ;;  %v2742_v10 = vadd.f32 %v11754_v53, %v9564_v14  ;;  %v2743_v38 = vadd.f32 %v11755_v55, %v9594_v24  ;;  %v5041_v14 = vrot.slane %v5009_v34, 1  ;;  %v5042_v24 = vrot.slane %v5010_v54, 1 }
 0xf47   :  { %v9662_v36 = vpop.permute.xlu1 %4743  ;;  %v2746_v19 = vadd.f32 %v11759_v28, %v9601_v15  ;;  %v2748_v46 = vadd.f32 %v11761_v51, %v2640_v11  ;;  %v2816_v31 = vsel %vm1360_vm2, %v2814_v48, %v2815_v5  ;;  %v2825_v39 = vadd.f32 %v9607_v2, %v2741_v42  ;;  %v11768_v28 = vld [vmem:[#allocation136_spill] sm:$0xff] }
 0xf48   :  { %11752 = vst [vmem:[#allocation39_spill] sm:$0xff] %v9662_v36  ;;  %v9664_v30 = vpop.permute.xlu0 %4895  ;;  %v2827_v34 = vadd.f32 %v2801_v22, %v2743_v38  ;;  %v4687_v54 = vmul.f32 %v9521_v56, %v9434_v43  ;;  %v4143_v15 = vrot.slane %v4105_v47, 2  ;;  %v4144_v53 = vrot.slane %v4106_v1, 2  ;;  %v11765_v38 = vld [vmem:[#allocation133_spill] sm:$0xff]  ;;  %v11767_v47 = vld [vmem:[#allocation135_spill] sm:$0xff]  ;;  %v11790_v56 = vld [vmem:[#allocation150_spill] sm:$0xff] }
 0xf49   :  { %4767 = vrot.lane.b32.xlu1 %v4750_v52, %s6439_s20  ;;  %v11760_v52 = vld [vmem:[#allocation131_spill] sm:$0xff]  ;;  %v2828_v5 = vadd.f32 %v2804_v59, %v2744_v57  ;;  %v5043_v2 = vsel %vm542_vm0, %v5041_v14, %v5042_v24  ;;  %v4333_v22 = vrot.slane %v4296_v32, 3  ;;  %v2830_v42 = vadd.f32 %v2810_v29, %v2746_v19  ;;  %v11770_v57 = vld [vmem:[#allocation137_spill] sm:$0xff]  ;;  %v11772_v32 = vld [vmem:[#allocation138_spill] sm:$0xff] }
 0xf4a   :  { %4957 = vrot.lane.b32.xlu0 %v4935_v27, %s6437_s15  ;;  %v2747_v23 = vadd.f32 %v11760_v52, %v9604_v26  ;;  %v2826_v27 = vadd.f32 %v2798_v50, %v2742_v10  ;;  %v11764_v26 = vld [vmem:[#allocation13_spill] sm:$0xff]  ;;  %v4332_v50 = vrot.slane %v4295_v16, 3  ;;  %v2832_v55 = vadd.f32 %v2816_v31, %v2748_v46  ;;  %v11773_v31 = vld [vmem:[#allocation139_spill] sm:$0xff] }
 0xf4b   :  { %v9684_v49 = vpop.permute.xlu1 %5109  ;;  %v4509_v11 = vmul.f32 %v9396_v62, %v11764_v26  ;;  %v4510_v48 = vmul.f32 %v9405_v21, %v11764_v26  ;;  %v2933_v12 = vadd.f32 %v11765_v38, %v2825_v39  ;;  %v2935_v1 = vadd.f32 %v11767_v47, %v2827_v34  ;;  %v164_v38 = vld [vmem:[%s11295_s1 + $0x410] sm:$0xff] }
 0xf4c   :  { %11757 = vst [vmem:[#allocation40_spill] sm:$0xff] %v9684_v49  ;;  %v9686_v0 = vpop.permute.xlu0 %5299  ;;  %v2831_v10 = vadd.f32 %v2813_v60, %v2747_v23  ;;  %v2936_v52 = vadd.f32 %v11768_v28, %v2828_v5  ;;  %v2938_v14 = vadd.f32 %v11770_v57, %v2830_v42  ;;  %v4145_v29 = vsel %vm951_vm1, %v4143_v15, %v4144_v53  ;;  %v11776_v53 = vld [vmem:[#allocation142_spill] sm:$0xff]  ;;  %v11778_v5 = vld [vmem:[#allocation144_spill] sm:$0xff]  ;;  %v6396_v42 = vld [vmem:[%s11295_s1 + $0x400] sm:$0xff] }
 0xf4d   :  { %11758 = vst [vmem:[#allocation41_spill] sm:$0xff] %v9686_v0  ;;  %4053 = vrot.lane.b32.xlu1 %v4037_v6, %s6438_s18  ;;  %v4545_v60 = vrot.slane %v4509_v11, 3  ;;  %v4546_v16 = vrot.slane %v4510_v48, 3  ;;  %v4334_v23 = vsel %vm1360_vm2, %v4332_v50, %v4333_v22  ;;  %v4903_v51 = vmul.f32 %v9501_v44, %v9434_v43  ;;  %v11777_v11 = vld [vmem:[#allocation143_spill] sm:$0xff]  ;;  %v11779_v50 = vld [vmem:[#allocation145_spill] sm:$0xff] }
 0xf4e   :  { %4457 = vrot.lane.b32.xlu0 %v4439_v13, %s6438_s18  ;;  %v11766_v13 = vld [vmem:[#allocation134_spill] sm:$0xff]  ;;  %v2939_v19 = vadd.f32 %v11772_v32, %v2831_v10  ;;  %v4904_v46 = vmul.f32 %v9501_v44, %v9614_v37  ;;  %v2940_v39 = vadd.f32 %v11773_v31, %v2832_v55  ;;  %v3043_v26 = vadd.f32 %v11776_v53, %v2935_v1  ;;  %v11785_v53 = vld [vmem:[#allocation15_spill] sm:$0xff] }
 0xf4f   :  { %v9709_v9 = vpop.permute.xlu1 %5513  ;;  %v2934_v6 = vadd.f32 %v11766_v13, %v2826_v27  ;;  %v11774_v27 = vld [vmem:[#allocation140_spill] sm:$0xff]  ;;  %v3044_v48 = vadd.f32 %v11777_v11, %v2936_v52  ;;  %v3157_v10 = vmul.f32 %v6396_v42, %v9194_v33  ;;  %v163_v55 = vld [vmem:[%s11295_s1 + $0x408] sm:$0xff]  ;;  %v4547_v1 = vsel %vm1360_vm2, %v4545_v60, %v4546_v16 }
 0xf50   :  { %11762 = vst [vmem:[#allocation42_spill] sm:$0xff] %v9709_v9  ;;  %v9711_v58 = vpop.permute.xlu0 %5003  ;;  %v3041_v34 = vadd.f32 %v11774_v27, %v2933_v12  ;;  %v3047_v22 = vadd.f32 %v11779_v50, %v2939_v19  ;;  %v165_v12 = vld [vmem:[%s11295_s1 + $0x418] sm:$0xff]  ;;  %v5117_v28 = vmul.f32 %v9504_v41, %v9434_v43  ;;  %v5118_v52 = vmul.f32 %v9504_v41, %v9614_v37 }
 0xf51   :  { %11763 = vst [vmem:[#allocation43_spill] sm:$0xff] %v9711_v58  ;;  %4705 = vrot.lane.b32.xlu1 %v4687_v54, %s6438_s18  ;;  %v11775_v54 = vld [vmem:[#allocation141_spill] sm:$0xff]  ;;  %v4936_v57 = vrot.slane %v4903_v51, 1  ;;  %v3158_v60 = vmul.f32 %v9194_v33, %v163_v55  ;;  %v3159_v16 = vmul.f32 %v9194_v33, %v164_v38  ;;  %v3160_v27 = vmul.f32 %v9194_v33, %v165_v12 }
 0xf52   :  { %5065 = vrot.lane.b32.xlu0 %v5043_v2, %s6438_s18  ;;  %v3042_v15 = vadd.f32 %v11775_v54, %v2934_v6  ;;  %v3046_v2 = vadd.f32 %v11778_v5, %v2938_v14  ;;  %v4624_v6 = vmul.f32 %v9546_v63, %v9434_v43  ;;  %v4937_v14 = vrot.slane %v4904_v46, 1  ;;  %v11786_v5 = vld [vmem:[#allocation147_spill] sm:$0xff]  ;;  %v11789_v63 = vld [vmem:[#allocation149_spill] sm:$0xff] }
 0xf53   :  { %v9724_v59 = vpop.permute.xlu1 %5407  ;;  %v3162_v54 = vmul.f32 %v9396_v62, %v163_v55  ;;  %v4751_v51 = vmul.f32 %v9561_v45, %v9434_v43  ;;  %v4403_v11 = vmul.f32 %v9396_v62, %v11785_v53  ;;  %v3149_v50 = vadd.f32 %v11786_v5, %v3041_v34  ;;  %v11788_v55 = vld [vmem:[#allocation148_spill] sm:$0xff] }
 0xf54   :  { %11769 = vst [vmem:[#allocation44_spill] sm:$0xff] %v9724_v59  ;;  %v9727_v24 = vpop.permute.xlu0 %5111  ;;  %v3163_v42 = vmul.f32 %v9396_v62, %v164_v38  ;;  %v3151_v44 = vadd.f32 %v11789_v63, %v3043_v26  ;;  %v3154_v34 = vadd.f32 %v11791_v18, %v3046_v2  ;;  %v11792_v5 = vld [vmem:[#allocation152_spill] sm:$0xff]  ;;  %v179_v63 = vld [vmem:[%s11295_s1 + $0x488] sm:$0xff]  ;;  %v5011_v26 = vmul.f32 %v9528_v20, %v9434_v43 }
 0xf55   :  { %11771 = vst [vmem:[#allocation45_spill] sm:$0xff] %v9727_v24  ;;  %4161 = vrot.lane.b32.xlu1 %v4145_v29, %s6439_s20  ;;  %v11782_v29 = vld [vmem:[#allocation14_spill] sm:$0xff]  ;;  %v3155_v38 = vadd.f32 %v11792_v5, %v3047_v22 }
 0xf56   :  { %4351 = vrot.lane.b32.xlu0 %v4334_v23, %s6437_s15  ;;  %v3999_v32 = vmul.f32 %v9396_v62, %v11782_v29  ;;  %v4000_v19 = vmul.f32 %v9405_v21, %v11782_v29  ;;  %v11783_v23 = vld [vmem:[#allocation146_spill] sm:$0xff]  ;;  %v3150_v29 = vadd.f32 %v11788_v55, %v3042_v15  ;;  %v3164_v15 = vmul.f32 %v9396_v62, %v165_v12 }
 0xf57   :  { %v9758_v13 = vpop.permute.xlu1 %5301  ;;  %v3048_v31 = vadd.f32 %v11783_v23, %v2940_v39  ;;  %v4404_v39 = vmul.f32 %v9405_v21, %v11785_v53  ;;  %v4938_v23 = vsel %vm542_vm0, %v4936_v57, %v4937_v14  ;;  %v3152_v53 = vadd.f32 %v11790_v56, %v3044_v48 }
 0xf58   :  { %11780 = vst [vmem:[#allocation46_spill] sm:$0xff] %v9758_v13  ;;  %v9762_v47 = vpop.permute.xlu0 %5515  ;;  %v4038_v45 = vrot.slane %v3999_v32, 2  ;;  %v4039_v41 = vrot.slane %v4000_v19, 2  ;;  %v4440_v57 = vrot.slane %v4403_v11, 3  ;;  %v3165_v32 = vadd.f32 %v3157_v10, %v3149_v50  ;;  %v11796_v10 = vld [vmem:[#allocation16_spill] sm:$0xff] }
 0xf59   :  { %11781 = vst [vmem:[#allocation47_spill] sm:$0xff] %v9762_v47  ;;  %4565 = vrot.lane.b32.xlu1 %v4547_v1, %s6439_s20  ;;  %v5150_v1 = vrot.slane %v5118_v52, 1  ;;  %v4441_v14 = vrot.slane %v4404_v39, 3  ;;  %v5012_v48 = vmul.f32 %v9528_v20, %v9614_v37  ;;  %v3166_v2 = vadd.f32 %v3158_v60, %v3150_v29 }
 0xf5a   :  { %4643 = vrot.lane.b32.xlu0 %v4624_v6, %s6437_s15  ;;  %v5149_v6 = vrot.slane %v5117_v28, 1  ;;  %v11793_v28 = vld [vmem:[#allocation153_spill] sm:$0xff]  ;;  %v4040_v22 = vsel %vm951_vm1, %v4038_v45, %v4039_v41  ;;  %v4107_v12 = vmul.f32 %v9396_v62, %v11796_v10  ;;  %v4108_v19 = vmul.f32 %v9405_v21, %v11796_v10  ;;  %v180_v41 = vld [vmem:[%s11295_s1 + $0x490] sm:$0xff] }
 0xf5b   :  { %v9782_v46 = vpop.permute.xlu1 %5705  ;;  %v3156_v52 = vadd.f32 %v11793_v28, %v3048_v31  ;;  %v3167_v31 = vadd.f32 %v3159_v16, %v3151_v44  ;;  %v3170_v11 = vadd.f32 %v3162_v54, %v3154_v34  ;;  %v3171_v39 = vadd.f32 %v3163_v42, %v3155_v38  ;;  %v11800_v34 = vld [vmem:[#allocation18_spill] sm:$0xff] }
 0xf5c   :  { %11784 = vst [vmem:[#allocation48_spill] sm:$0xff] %v9782_v46  ;;  %v9790_v33 = vpop.permute.xlu0 %5409  ;;  %v5151_v18 = vsel %vm542_vm0, %v5149_v6, %v5150_v1  ;;  %v9821_v6 = vrot.slane %v179_v63, 7  ;;  %v4442_v60 = vsel %vm1360_vm2, %v4440_v57, %v4441_v14  ;;  %v11798_v1 = vld [vmem:[#allocation17_spill] sm:$0xff]  ;;  %v4688_v44 = vmul.f32 %v9623_v40, %v9434_v43  ;;  %v11801_v28 = vld [vmem:[#allocation154_spill] sm:$0xff]  ;;  %v11803_v14 = vld [vmem:[#allocation156_spill] sm:$0xff] }
 0xf5d   :  { %11787 = vst [vmem:[#allocation49_spill] sm:$0xff] %v9790_v33  ;;  %4769 = vrot.lane.b32.xlu1 %v4751_v51, %s6439_s20  ;;  %v3168_v51 = vadd.f32 %v3160_v27, %v3152_v53  ;;  %v3172_v50 = vadd.f32 %v3164_v15, %v3156_v52  ;;  %v4297_v29 = vmul.f32 %v9396_v62, %v11798_v1  ;;  %v5044_v27 = vrot.slane %v5011_v26, 1  ;;  %v11802_v15 = vld [vmem:[#allocation155_spill] sm:$0xff]  ;;  %v11804_v26 = vld [vmem:[#allocation157_spill] sm:$0xff] }
 0xf5e   :  { %4959 = vrot.lane.b32.xlu0 %v4938_v23, %s6437_s15  ;;  %v5045_v54 = vrot.slane %v5012_v48, 1  ;;  %v4298_v42 = vmul.f32 %v9405_v21, %v11798_v1  ;;  %v4146_v23 = vrot.slane %v4107_v12, 2  ;;  %v4147_v53 = vrot.slane %v4108_v19, 2  ;;  %v11806_v12 = vld [vmem:[#allocation159_spill] sm:$0xff] }
 0xf5f   :  { %v9802_v55 = vpop.permute.xlu1 %5813  ;;  %v4511_v5 = vmul.f32 %v9396_v62, %v11800_v34  ;;  %v4512_v38 = vmul.f32 %v9405_v21, %v11800_v34  ;;  %v3229_v52 = vadd.f32 %v11801_v28, %v3165_v32  ;;  %v3230_v57 = vadd.f32 %v11802_v15, %v3166_v2  ;;  %v11807_v32 = vld [vmem:[#allocation168_spill] sm:$0xff] }
 0xf60   :  { %11794 = vst [vmem:[#allocation50_spill] sm:$0xff] %v9802_v55  ;;  %v9807_v56 = vpop.permute.xlu0 %5303  ;;  %v3231_v63 = vadd.f32 %v11803_v14, %v3167_v31  ;;  %v3232_v48 = vadd.f32 %v11804_v26, %v3168_v51  ;;  %v3235_v19 = vadd.f32 %v11806_v12, %v3171_v39  ;;  %v181_v31 = vld [vmem:[%s11295_s1 + $0x498] sm:$0xff]  ;;  %v9866_v51 = vld [vmem:[%s11294_s0 + $0x28] sm:$0x7]  ;;  %v5046_v1 = vsel %vm542_vm0, %v5044_v27, %v5045_v54 }
 0xf61   :  { %11795 = vst [vmem:[#allocation51_spill] sm:$0xff] %v9807_v56  ;;  %5173 = vrot.lane.b32.xlu1 %v5151_v18, %s6439_s20  ;;  %v9845_v18 = vrot.slane %v180_v41, 7  ;;  %v4336_v34 = vrot.slane %v4298_v42, 3  ;;  %v4148_v15 = vsel %vm951_vm1, %v4146_v23, %v4147_v53  ;;  %v4548_v14 = vrot.slane %v4511_v5, 3  ;;  %v11810_v54 = vld [vmem:[#allocation160_spill] sm:$0xff]  ;;  %v11812_v23 = vld [vmem:[#allocation162_spill] sm:$0xff] }
 0xf62   :  { %4055 = vrot.lane.b32.xlu0 %v4040_v22, %s6438_s18  ;;  %v11805_v22 = vld [vmem:[#allocation158_spill] sm:$0xff]  ;;  %v4549_v26 = vrot.slane %v4512_v38, 3  ;;  %v3236_v42 = vadd.f32 %v11810_v54, %v3172_v50  ;;  %v9891_v53 = vadd.f32 %v11812_v23, %v3230_v57  ;;  %v4905_v38 = vmul.f32 %v9582_v8, %v9434_v43 }
 0xf63   :  { %v9826_v45 = vpop.permute.xlu1 %5517  ;;  %v3234_v10 = vadd.f32 %v11805_v22, %v3170_v11  ;;  %v3378_v11 = vmul.f32 %v9866_v51, %v11807_v32  ;;  %v3380_v22 = vmul.f32 %v9866_v51, %v9821_v6  ;;  %v3382_v27 = vmul.f32 %v9866_v51, %v9845_v18 }
 0xf64   :  { %11797 = vst [vmem:[#allocation52_spill] sm:$0xff] %v9826_v45  ;;  %v9833_v16 = vpop.permute.xlu0 %5707  ;;  %v4550_v54 = vsel %vm1360_vm2, %v4548_v14, %v4549_v26 }
 0xf65   :  { %11799 = vst [vmem:[#allocation53_spill] sm:$0xff] %v9833_v16  ;;  %4459 = vrot.lane.b32.xlu1 %v4442_v60, %s6438_s18  ;;  %v9854_v60 = vld [vmem:[%s11294_s0 + $0x20] sm:$0xff]  ;;  %v3410_v40 = vrot.slane %v3378_v11, 1  ;;  %v5120_v11 = vmul.f32 %v9586_v3, %v9614_v37 }
 0xf66   :  { %4707 = vrot.lane.b32.xlu0 %v4688_v44, %s6438_s18  ;;  %v3377_v2 = vmul.f32 %v9854_v60, %v11807_v32  ;;  %v4335_v44 = vrot.slane %v4297_v29, 3  ;;  %v3379_v28 = vmul.f32 %v9854_v60, %v9821_v6  ;;  %v3381_v12 = vmul.f32 %v9854_v60, %v9845_v18  ;;  %v11811_v32 = vld [vmem:[#allocation161_spill] sm:$0xff] }
 0xf67   :  { %v9861_v41 = vpop.permute.xlu1 %5921  ;;  %v9883_v29 = vrot.slane %v181_v31, 7  ;;  %v9900_v31 = vld [vmem:[%s11294_s0 + $0x70] sm:$0xff] }
 0xf68   :  { %11808 = vst [vmem:[#allocation54_spill] sm:$0xff] %v9861_v41  ;;  %v9870_v39 = vpop.permute.xlu0 %5411  ;;  %v4337_v50 = vsel %vm1360_vm2, %v4335_v44, %v4336_v34  ;;  %v3412_v57 = vrot.slane %v3379_v28, 1  ;;  %v3415_v23 = vrot.slane %v3381_v12, 1  ;;  %v11815_v28 = vld [vmem:[#allocation20_spill] sm:$0xff]  ;;  %v11819_v41 = vld [vmem:[#allocation163_spill] sm:$0xff] }
 0xf69   :  { %11809 = vst [vmem:[#allocation55_spill] sm:$0xff] %v9870_v39  ;;  %5067 = vrot.lane.b32.xlu1 %v5046_v1, %s6438_s18  ;;  %v9888_v1 = vadd.f32 %v11811_v32, %v3229_v52  ;;  %v3409_v39 = vrot.slane %v3377_v2, 1  ;;  %v4906_v52 = vmul.f32 %v9582_v8, %v9614_v37  ;;  %v5119_v2 = vmul.f32 %v9586_v3, %v9434_v43 }
 0xf6a   :  { %4163 = vrot.lane.b32.xlu0 %v4148_v15, %s6439_s20  ;;  %v3413_v32 = vrot.slane %v3380_v22, 1  ;;  %v3383_v44 = vmul.f32 %v9854_v60, %v9883_v29  ;;  %v3384_v34 = vmul.f32 %v9866_v51, %v9883_v29  ;;  %v4625_v14 = vmul.f32 %v11815_v28, %v9900_v31 }
 0xf6b   :  { %v9893_v5 = vpop.permute.xlu1 %5815  ;;  %v4752_v22 = vmul.f32 %v9662_v36, %v9434_v43  ;;  %v5310_v8 = vmul.f32 %v9620_v25, %v9614_v37  ;;  %v9933_v28 = vadd.f32 %v11819_v41, %v3231_v63  ;;  %v11820_v36 = vld [vmem:[#allocation164_spill] sm:$0xff]  ;;  %v9941_v45 = vsel %vm542_vm0, %v3409_v39, %v3410_v40  ;;  %v11822_v63 = vld [vmem:[#allocation166_spill] sm:$0xff] }
 0xf6c   :  { %11813 = vst [vmem:[#allocation56_spill] sm:$0xff] %v9893_v5  ;;  %v9902_v15 = vpop.permute.xlu0 %5519  ;;  %v3416_v5 = vrot.slane %v3382_v27, 1  ;;  %v4940_v27 = vrot.slane %v4906_v52, 1  ;;  %v3296_v16 = vadd.f32 %v11820_v36, %v3232_v48  ;;  %v9944_v56 = vsel %vm542_vm0, %v3412_v57, %v3413_v32 }
 0xf6d   :  { %11814 = vst [vmem:[#allocation57_spill] sm:$0xff] %v9902_v15  ;;  %4353 = vrot.lane.b32.xlu1 %v4337_v50, %s6437_s15  ;;  %v4939_v50 = vrot.slane %v4905_v38, 1  ;;  %v11817_v15 = vld [vmem:[#allocation19_spill] sm:$0xff]  ;;  %v5152_v38 = vrot.slane %v5119_v2, 1  ;;  %v3299_v41 = vadd.f32 %v11822_v63, %v3235_v19  ;;  %v5013_v19 = vmul.f32 %v9637_v61, %v9434_v43 }
 0xf6e   :  { %4567 = vrot.lane.b32.xlu0 %v4550_v54, %s6439_s20  ;;  %v4405_v3 = vmul.f32 %v9396_v62, %v11817_v15  ;;  %v5309_v54 = vmul.f32 %v9620_v25, %v9434_v43  ;;  %v4406_v20 = vmul.f32 %v9405_v21, %v11817_v15  ;;  %v9949_v2 = vsel %vm542_vm0, %v3415_v23, %v3416_v5 }
 0xf6f   :  { %v9920_v26 = vpop.permute.xlu1 %5709  ;;  %v4941_v48 = vsel %vm542_vm0, %v4939_v50, %v4940_v27  ;;  %v5014_v5 = vmul.f32 %v9637_v61, %v9614_v37  ;;  %v3387_v23 = vmul.f32 %v9396_v62, %v9821_v6  ;;  %v3391_v50 = vmul.f32 %v9396_v62, %v9883_v29 }
 0xf70   :  { %11816 = vst [vmem:[#allocation58_spill] sm:$0xff] %v9920_v26  ;;  %v9926_v12 = vpop.permute.xlu0 %5923  ;;  %v5153_v26 = vrot.slane %v5120_v11, 1  ;;  %v3418_v11 = vrot.slane %v3383_v44, 1  ;;  %v5341_v40 = vrot.slane %v5309_v54, 2  ;;  %v4443_v39 = vrot.slane %v4405_v3, 3  ;;  %v11828_v54 = vld [vmem:[#allocation21_spill] sm:$0xff] }
 0xf71   :  { %11818 = vst [vmem:[#allocation59_spill] sm:$0xff] %v9926_v12  ;;  %4645 = vrot.lane.b32.xlu1 %v4625_v14, %s6437_s15  ;;  %v11821_v12 = vld [vmem:[#allocation165_spill] sm:$0xff]  ;;  %v3419_v14 = vrot.slane %v3384_v34, 1  ;;  %v4444_v32 = vrot.slane %v4406_v20, 3  ;;  %v3388_v44 = vmul.f32 %v9405_v21, %v9821_v6  ;;  %v3390_v3 = vmul.f32 %v9405_v21, %v9845_v18  ;;  %v11825_v20 = vld [vmem:[#allocation167_spill] sm:$0xff] }
 0xf72   :  { %v3298_v52 = vadd.f32 %v11821_v12, %v3234_v10  ;;  %4771 = vrot.lane.b32.xlu0 %v4752_v22, %s6439_s20  ;;  %v5342_v10 = vrot.slane %v5310_v8, 2  ;;  %v5154_v57 = vsel %vm542_vm0, %v5152_v38, %v5153_v26  ;;  %v3389_v8 = vmul.f32 %v9396_v62, %v9845_v18 }
 0xf73   :  { %v9951_v15 = vpop.permute.xlu1 %5817  ;;  %v3300_v34 = vadd.f32 %v11825_v20, %v3236_v42  ;;  %v3420_v26 = vsel %vm542_vm0, %v3418_v11, %v3419_v14  ;;  %v3392_v22 = vmul.f32 %v9405_v21, %v9883_v29  ;;  %v4299_v18 = vmul.f32 %v9396_v62, %v11828_v54  ;;  %v11829_v20 = vld [vmem:[#allocation169_spill] sm:$0xff] }
 0xf74   :  { %11823 = vst [vmem:[#allocation60_spill] sm:$0xff] %v9951_v15  ;;  %v9953_v36 = vpop.permute.xlu0 %5711  ;;  %v5343_v27 = vsel %vm951_vm1, %v5341_v40, %v5342_v10  ;;  %v5417_v42 = vmul.f32 %v9645_v17, %v9434_v43  ;;  %v5418_v38 = vmul.f32 %v9645_v17, %v9614_v37  ;;  %v4445_v63 = vsel %vm1360_vm2, %v4443_v39, %v4444_v32 }
 0xf75   :  { %11824 = vst [vmem:[#allocation61_spill] sm:$0xff] %v9953_v36  ;;  %4961 = vrot.lane.b32.xlu1 %v4941_v48, %s6437_s15  ;;  %v5047_v29 = vrot.slane %v5013_v19, 1  ;;  %v5048_v11 = vrot.slane %v5014_v5, 1  ;;  %v4300_v14 = vmul.f32 %v9405_v21, %v11828_v54  ;;  %v3424_v48 = vrot.slane %v3387_v23, 1  ;;  %v11833_v23 = vld [vmem:[#allocation22_spill] sm:$0xff] }
 0xf76   :  { %5175 = vrot.lane.b32.xlu0 %v5154_v57, %s6439_s20  ;;  %v3425_v40 = vrot.slane %v3388_v44, 1  ;;  %v3427_v10 = vrot.slane %v3389_v8, 1  ;;  %v3428_v57 = vrot.slane %v3390_v3, 1  ;;  %v3431_v36 = vrot.slane %v3392_v22, 1  ;;  %v11834_v3 = vld [vmem:[#allocation170_spill] sm:$0xff] }
 0xf77   :  { %v9977_v12 = vpop.permute.xlu1 %5925  ;;  %v5449_v19 = vrot.slane %v5417_v42, 2  ;;  %v5450_v5 = vrot.slane %v5418_v38, 2  ;;  %v4513_v44 = vmul.f32 %v9396_v62, %v11833_v23  ;;  %v4514_v8 = vmul.f32 %v9405_v21, %v11833_v23  ;;  %v11836_v42 = vld [vmem:[#allocation172_spill] sm:$0xff]  ;;  %v11838_v21 = vld [vmem:[#allocation174_spill] sm:$0xff] }
 0xf78   :  { %11826 = vst [vmem:[#allocation62_spill] sm:$0xff] %v9977_v12  ;;  %v9979_v6 = vpop.permute.xlu0 %5819  ;;  %v3430_v12 = vrot.slane %v3391_v50, 1  ;;  %v5049_v50 = vsel %vm542_vm0, %v5047_v29, %v5048_v11  ;;  %v4338_v22 = vrot.slane %v4299_v18, 3  ;;  %v4339_v54 = vrot.slane %v4300_v14, 3 }
 0xf79   :  { %11827 = vst [vmem:[#allocation63_spill] sm:$0xff] %v9979_v6  ;;  %5365 = vrot.lane.b32.xlu1 %v5343_v27, %s6437_s15  ;;  %v3357_v6 = vadd.f32 %v11829_v20, %v9888_v1  ;;  %v11830_v27 = vld [vmem:[#allocation23_spill] sm:$0xff]  ;;  %v3358_v1 = vadd.f32 %v11834_v3, %v9891_v53  ;;  %v3360_v38 = vadd.f32 %v11836_v42, %v3296_v16  ;;  %v4552_v14 = vrot.slane %v4514_v8, 3 }
 0xf7a   :  { %4461 = vrot.lane.b32.xlu0 %v4445_v63, %s6438_s18  ;;  %v4689_v15 = vmul.f32 %v11830_v27, %v9900_v31  ;;  %v11835_v63 = vld [vmem:[#allocation171_spill] sm:$0xff]  ;;  %v11837_v27 = vld [vmem:[#allocation173_spill] sm:$0xff]  ;;  %v3426_v62 = vsel %vm542_vm0, %v3424_v48, %v3425_v40  ;;  %v3363_v23 = vadd.f32 %v11838_v21, %v3299_v41  ;;  %v3432_v18 = vsel %vm542_vm0, %v3430_v12, %v3431_v36  ;;  %v11841_v40 = vld [vmem:[#allocation176_spill] sm:$0xff] }
 0xf7b   :  { %v9997_v39 = vpop.permute.xlu1 %5927  ;;  %v3359_v20 = vadd.f32 %v11835_v63, %v9933_v28  ;;  %v11839_v53 = vld [vmem:[#allocation175_spill] sm:$0xff]  ;;  %v3441_v28 = vadd.f32 %v9941_v45, %v3357_v6  ;;  %v5451_v16 = vsel %vm951_vm1, %v5449_v19, %v5450_v5  ;;  %v3442_v48 = vadd.f32 %v9944_v56, %v3358_v1  ;;  %v11844_v63 = vld [vmem:[#allocation178_spill] sm:$0xff]  ;;  %v11847_v21 = vld [vmem:[#allocation181_spill] sm:$0xff] }
 0xf7c   :  { %11831 = vst [vmem:[#allocation64_spill] sm:$0xff] %v9997_v39  ;;  %v9999_v32 = vpop.permute.xlu0 %4041  ;;  %v3364_v3 = vadd.f32 %v11839_v53, %v3300_v34  ;;  %v4340_v41 = vsel %vm1360_vm2, %v4338_v22, %v4339_v54  ;;  %v4907_v34 = vmul.f32 %v9664_v30, %v9434_v43  ;;  %v4908_v36 = vmul.f32 %v9664_v30, %v9614_v37  ;;  %v11845_v42 = vld [vmem:[#allocation179_spill] sm:$0xff]  ;;  %v11848_v53 = vld [vmem:[#allocation182_spill] sm:$0xff] }
 0xf7d   :  { %11832 = vst [vmem:[#allocation65_spill] sm:$0xff] %v9999_v32  ;;  %4709 = vrot.lane.b32.xlu1 %v4689_v15, %s6438_s18  ;;  %v3362_v32 = vadd.f32 %v11837_v27, %v3298_v52  ;;  %v3429_v15 = vsel %vm542_vm0, %v3427_v10, %v3428_v57  ;;  %v4551_v52 = vrot.slane %v4513_v44, 3  ;;  %v3443_v45 = vadd.f32 %v9949_v2, %v3359_v20  ;;  %v11842_v57 = vld [vmem:[#allocation177_spill] sm:$0xff]  ;;  %v11846_v27 = vld [vmem:[#allocation180_spill] sm:$0xff] }
 0xf7e   :  { %5069 = vrot.lane.b32.xlu0 %v5049_v50, %s6438_s18  ;;  %v3444_v12 = vadd.f32 %v3420_v26, %v3360_v38  ;;  %v3549_v10 = vadd.f32 %v11841_v40, %v3441_v28  ;;  %v3550_v56 = vadd.f32 %v11842_v57, %v3442_v48  ;;  %v3447_v19 = vadd.f32 %v3429_v15, %v3363_v23  ;;  %v11849_v15 = vld [vmem:[#allocation190_spill] sm:$0xff]  ;;  %v196_v28 = vld [vmem:[%s11295_s1 + $0x510] sm:$0xff]  ;;  %v11851_v48 = vld [vmem:[#allocation24_spill] sm:$0xff] }
 0xf7f   :  { %v10019_v29 = vpop.permute.xlu1 %4149  ;;  %v3446_v6 = vadd.f32 %v3426_v62, %v3362_v32  ;;  %v3448_v5 = vadd.f32 %v3432_v18, %v3364_v3  ;;  %v4626_v8 = vmul.f32 %v9388_v7, %v9900_v31  ;;  %v4553_v50 = vsel %vm1360_vm2, %v4551_v52, %v4552_v14  ;;  %v195_v18 = vld [vmem:[%s11295_s1 + $0x508] sm:$0xff]  ;;  %v10079_v14 = vld [vmem:[%s11294_s0 + $0x60] sm:$0xff] }
 0xf80   :  { %11840 = vst [vmem:[#allocation66_spill] sm:$0xff] %v10019_v29  ;;  %v10022_v11 = vpop.permute.xlu0 %4043  ;;  %v5121_v2 = vmul.f32 %v9684_v49, %v9434_v43  ;;  %v5122_v26 = vmul.f32 %v9684_v49, %v9614_v37  ;;  %v4942_v32 = vrot.slane %v4907_v34, 1  ;;  %v4943_v22 = vrot.slane %v4908_v36, 1  ;;  %v197_v34 = vld [vmem:[%s11295_s1 + $0x518] sm:$0xff] }
 0xf81   :  { %5473 = vrot.lane.b32.xlu1 %v5451_v16, %s6438_s18  ;;  %v5311_v54 = vmul.f32 %v9686_v0, %v9434_v43  ;;  %v5312_v7 = vmul.f32 %v9686_v0, %v9614_v37  ;;  %v3551_v20 = vadd.f32 %v11844_v63, %v3443_v45  ;;  %v3552_v38 = vadd.f32 %v11845_v42, %v3444_v12 }
 0xf82   :  { %4355 = vrot.lane.b32.xlu0 %v4340_v41, %s6437_s15  ;;  %v10055_v62 = vadd.f32 %v11846_v27, %v3446_v6  ;;  %v10058_v23 = vadd.f32 %v11847_v21, %v3447_v19  ;;  %v10062_v3 = vadd.f32 %v11848_v53, %v3448_v5  ;;  %v3785_v43 = vmul.f32 %v9854_v60, %v11849_v15 }
 0xf83   :  { %v10036_v44 = vpop.permute.xlu1 %4151  ;;  %v4753_v16 = vmul.f32 %v9390_v35, %v9900_v31  ;;  %v4407_v41 = vmul.f32 %v10079_v14, %v11851_v48  ;;  %v5155_v45 = vrot.slane %v5121_v2, 1  ;;  %v5156_v12 = vrot.slane %v5122_v26, 1  ;;  %v10091_v35 = vld [vmem:[%s11294_s0 + $0x30] sm:$0xff] }
 0xf84   :  { %v10040_v1 = vpop.permute.xlu0 %4341  ;;  %v5525_v6 = vmul.f32 %v10091_v35, %v9709_v9  ;;  %v5526_v40 = vmul.f32 %v9709_v9, %v9614_v37  ;;  %v4944_v57 = vsel %vm542_vm0, %v4942_v32, %v4943_v22  ;;  %v5344_v19 = vrot.slane %v5311_v54, 2  ;;  %v11853_v2 = vld [vmem:[#allocation183_spill] sm:$0xff]  ;;  %v11854_v32 = vld [vmem:[#allocation184_spill] sm:$0xff]  ;;  %v11855_v54 = vld [vmem:[#allocation185_spill] sm:$0xff] }
 0xf85   :  { %11843 = vst [vmem:[#allocation67_spill] sm:$0xff] %v10040_v1  ;;  %4569 = vrot.lane.b32.xlu1 %v4553_v50, %s6439_s20  ;;  %v5345_v5 = vrot.slane %v5312_v7, 2  ;;  %v10107_v26 = vadd.f32 %v11853_v2, %v3549_v10  ;;  %v3786_v63 = vmul.f32 %v9866_v51, %v11849_v15  ;;  %v3778_v42 = vrot.slane %v195_v18, 6 }
 0xf86   :  { %4647 = vrot.lane.b32.xlu0 %v4626_v8, %s6437_s15  ;;  %v10102_v8 = vld [vmem:[%s11294_s0 + $0x68] sm:$0x7]  ;;  %v10111_v27 = vrot.slane %v196_v28, 6  ;;  %v10115_v22 = vadd.f32 %v11854_v32, %v3550_v56  ;;  %v10118_v7 = vadd.f32 %v11855_v54, %v3551_v20  ;;  %v3817_v21 = vrot.slane %v3785_v43, 2 }
 0xf87   :  { %v10074_v52 = vpop.permute.xlu1 %4045  ;;  %v4408_v50 = vmul.f32 %v10102_v8, %v11851_v48  ;;  %v10120_v53 = vrot.slane %v197_v34, 6  ;;  %v5157_v15 = vsel %vm542_vm0, %v5155_v45, %v5156_v12  ;;  %v5557_v18 = vrot.slane %v5525_v6, 2 }
 0xf88   :  { %11850 = vst [vmem:[#allocation68_spill] sm:$0xff] %v10074_v52  ;;  %v10086_v36 = vpop.permute.xlu0 %4449  ;;  %v5558_v28 = vrot.slane %v5526_v40, 2  ;;  %v4446_v48 = vrot.slane %v4407_v41, 3  ;;  %v5346_v56 = vsel %vm951_vm1, %v5344_v19, %v5345_v5  ;;  %v5015_v20 = vmul.f32 %v10091_v35, %v9711_v58  ;;  %v11857_v41 = vld [vmem:[#allocation186_spill] sm:$0xff] }
 0xf89   :  { %11852 = vst [vmem:[#allocation69_spill] sm:$0xff] %v10086_v36  ;;  %4773 = vrot.lane.b32.xlu1 %v4753_v16, %s6439_s20  ;;  %v5016_v43 = vmul.f32 %v9711_v58, %v9614_v37  ;;  %v3818_v34 = vrot.slane %v3786_v63, 2  ;;  %v3787_v2 = vmul.f32 %v9854_v60, %v3778_v42  ;;  %v3788_v32 = vmul.f32 %v9866_v51, %v3778_v42 }
 0xf8a   :  { %4963 = vrot.lane.b32.xlu0 %v4944_v57, %s6437_s15  ;;  %v4447_v57 = vrot.slane %v4408_v50, 3  ;;  %v3789_v45 = vmul.f32 %v9854_v60, %v10111_v27  ;;  %v10139_v12 = vadd.f32 %v11857_v41, %v3552_v38  ;;  %v3790_v6 = vmul.f32 %v9866_v51, %v10111_v27 }
 0xf8b   :  { %v10122_v16 = vpop.permute.xlu1 %4153  ;;  %v3791_v40 = vmul.f32 %v9854_v60, %v10120_v53  ;;  %v3792_v19 = vmul.f32 %v9866_v51, %v10120_v53  ;;  %v5559_v63 = vsel %vm951_vm1, %v5557_v18, %v5558_v28  ;;  %v5419_v54 = vmul.f32 %v10091_v35, %v9724_v59 }
 0xf8c   :  { %11856 = vst [vmem:[#allocation70_spill] sm:$0xff] %v10122_v16  ;;  %v10124_v10 = vpop.permute.xlu0 %4343  ;;  %v5420_v38 = vmul.f32 %v9724_v59, %v9614_v37  ;;  %v4448_v41 = vsel %vm1360_vm2, %v4446_v48, %v4447_v57  ;;  %v5050_v36 = vrot.slane %v5015_v20, 1  ;;  %v5051_v1 = vrot.slane %v5016_v43, 1  ;;  %v11861_v57 = vld [vmem:[#allocation187_spill] sm:$0xff] }
 0xf8d   :  { %5177 = vrot.lane.b32.xlu1 %v5157_v15, %s6439_s20  ;;  %v11859_v15 = vld [vmem:[#allocation25_spill] sm:$0xff]  ;;  %v10163_v18 = vsel %vm951_vm1, %v3817_v21, %v3818_v34  ;;  %v3820_v28 = vrot.slane %v3787_v2, 2  ;;  %v3821_v29 = vrot.slane %v3788_v32, 2  ;;  %v3823_v39 = vrot.slane %v3789_v45, 2  ;;  %v10180_v32 = vld [vmem:[%s11294_s0 + $0x78] sm:$0x7] }
 0xf8e   :  { %5367 = vrot.lane.b32.xlu0 %v5346_v56, %s6437_s15  ;;  %v4515_v56 = vmul.f32 %v10079_v14, %v11859_v15  ;;  %v3824_v59 = vrot.slane %v3790_v6, 2  ;;  %v3826_v58 = vrot.slane %v3791_v40, 2  ;;  %v3827_v9 = vrot.slane %v3792_v19, 2  ;;  %v11862_v45 = vld [vmem:[#allocation188_spill] sm:$0xff] }
 0xf8f   :  { %v10147_v5 = vpop.permute.xlu1 %4557  ;;  %v10172_v20 = vadd.f32 %v11861_v57, %v10055_v62  ;;  %v3795_v21 = vmul.f32 %v10079_v14, %v3778_v42  ;;  %v5452_v34 = vrot.slane %v5419_v54, 2  ;;  %v5453_v2 = vrot.slane %v5420_v38, 2 }
 0xf90   :  { %11858 = vst [vmem:[#allocation71_spill] sm:$0xff] %v10147_v5  ;;  %v10149_v50 = vpop.permute.xlu0 %4047  ;;  %v4516_v5 = vmul.f32 %v10102_v8, %v11859_v15  ;;  %v10184_v6 = vadd.f32 %v11862_v45, %v10058_v23  ;;  %v5052_v62 = vsel %vm542_vm0, %v5050_v36, %v5051_v1  ;;  %v4554_v40 = vrot.slane %v4515_v56, 3  ;;  %v11863_v15 = vld [vmem:[#allocation189_spill] sm:$0xff] }
 0xf91   :  { %5581 = vrot.lane.b32.xlu1 %v5559_v63, %s6439_s20  ;;  %v11860_v63 = vld [vmem:[#allocation27_spill] sm:$0xff]  ;;  %v10193_v54 = vsel %vm951_vm1, %v3820_v28, %v3821_v29  ;;  %v3796_v38 = vmul.f32 %v10102_v8, %v3778_v42  ;;  %v10203_v1 = vsel %vm951_vm1, %v3823_v39, %v3824_v59  ;;  %v10206_v23 = vsel %vm951_vm1, %v3826_v58, %v3827_v9  ;;  %v11865_v29 = vld [vmem:[#allocation26_spill] sm:$0xff] }
 0xf92   :  { %4463 = vrot.lane.b32.xlu0 %v4448_v41, %s6438_s18  ;;  %v4690_v0 = vmul.f32 %v11860_v63, %v9900_v31  ;;  %v4555_v19 = vrot.slane %v4516_v5, 3  ;;  %v10190_v41 = vadd.f32 %v11863_v15, %v10062_v3  ;;  %v3797_v63 = vmul.f32 %v10079_v14, %v10111_v27  ;;  %v11868_v15 = vld [vmem:[#allocation29_spill] sm:$0xff] }
 0xf93   :  { %v10168_v48 = vpop.permute.xlu1 %4451  ;;  %v4909_v36 = vmul.f32 %v11865_v29, %v9900_v31  ;;  %v4910_v42 = vmul.f32 %v11865_v29, %v10180_v32  ;;  %v3832_v5 = vrot.slane %v3795_v21, 2  ;;  %v3798_v56 = vmul.f32 %v10102_v8, %v10111_v27 }
 0xf94   :  { %v10175_v43 = vpop.permute.xlu0 %4155  ;;  %v3799_v28 = vmul.f32 %v10079_v14, %v10120_v53  ;;  %v5454_v9 = vsel %vm951_vm1, %v5452_v34, %v5453_v2  ;;  %v4556_v39 = vsel %vm1360_vm2, %v4554_v40, %v4555_v19  ;;  %v5123_v57 = vmul.f32 %v10091_v35, %v9727_v24 }
 0xf95   :  { %4711 = vrot.lane.b32.xlu1 %v4690_v0, %s6438_s18  ;;  %v210_v0 = vld [vmem:[%s11295_s1 + $0x580] sm:$0xff]  ;;  %v5124_v21 = vmul.f32 %v9727_v24, %v9614_v37  ;;  %v3833_v27 = vrot.slane %v3796_v38, 2  ;;  %v3835_v45 = vrot.slane %v3797_v63, 2  ;;  %v4627_v34 = vmul.f32 %v11868_v15, %v9900_v31 }
 0xf96   :  { %5071 = vrot.lane.b32.xlu0 %v5052_v62, %s6438_s18  ;;  %v10221_v58 = vrot.slane %v210_v0, 5  ;;  %v3800_v62 = vmul.f32 %v10102_v8, %v10120_v53  ;;  %v4945_v0 = vrot.slane %v4909_v36, 1  ;;  %v4946_v40 = vrot.slane %v4910_v42, 1 }
 0xf97   :  { %v10208_v3 = vpop.permute.xlu1 %4345  ;;  %v3836_v38 = vrot.slane %v3798_v56, 2  ;;  %v4754_v63 = vmul.f32 %v9479_v4, %v9900_v31  ;;  %v5158_v36 = vrot.slane %v5123_v57, 1  ;;  %v5159_v42 = vrot.slane %v5124_v21, 1 }
 0xf98   :  { %11864 = vst [vmem:[#allocation72_spill] sm:$0xff] %v10208_v3  ;;  %v10218_v59 = vpop.permute.xlu0 %4559  ;;  %11867 = vst [vmem:[#allocation74_spill] sm:$0xff] %v10221_v58  ;;  %v4201_v19 = vmul.f32 %v10079_v14, %v10221_v58  ;;  %v4202_v29 = vmul.f32 %v10102_v8, %v10221_v58  ;;  %v5527_v15 = vmul.f32 %v10091_v35, %v9762_v47  ;;  %v3838_v24 = vrot.slane %v3799_v28, 2 }
 0xf99   :  { %11866 = vst [vmem:[#allocation73_spill] sm:$0xff] %v10218_v59  ;;  %5475 = vrot.lane.b32.xlu1 %v5454_v9, %s6438_s18  ;;  %v5313_v9 = vmul.f32 %v10091_v35, %v9758_v13  ;;  %v5528_v56 = vmul.f32 %v9762_v47, %v9614_v37  ;;  %v10254_v58 = vsel %vm951_vm1, %v3832_v5, %v3833_v27  ;;  %v3839_v49 = vrot.slane %v3800_v62, 2  ;;  %v11875_v27 = vld [vmem:[#allocation192_spill] sm:$0xff] }
 0xf9a   :  { %4571 = vrot.lane.b32.xlu0 %v4556_v39, %s6439_s20  ;;  %v5314_v39 = vmul.f32 %v9758_v13, %v9614_v37  ;;  %v11871_v13 = vld [vmem:[#allocation196_spill] sm:$0xff]  ;;  %v4947_v3 = vsel %vm542_vm0, %v4945_v0, %v4946_v40  ;;  %v4237_v16 = vrot.slane %v4201_v19, 3  ;;  %v4238_v52 = vrot.slane %v4202_v29, 3 }
 0xf9b   :  { %v10234_v2 = vpop.permute.xlu1 %4637  ;;  %v5347_v59 = vrot.slane %v5313_v9, 2  ;;  %v5717_v5 = vmul.f32 %v10091_v35, %v9782_v46  ;;  %v5718_v28 = vmul.f32 %v9782_v46, %v9614_v37  ;;  %v3766_v62 = vadd.f32 %v11875_v27, %v10115_v22  ;;  %v11877_v37 = vld [vmem:[#allocation193_spill] sm:$0xff]  ;;  %v211_v22 = vld [vmem:[%s11295_s1 + $0x588] sm:$0xff] }
 0xf9c   :  { %11869 = vst [vmem:[#allocation75_spill] sm:$0xff] %v10234_v2  ;;  %v4050_v53 = vpop.permute.xlu0 %4049  ;;  %v11870_v2 = vld [vmem:[#allocation191_spill] sm:$0xff]  ;;  %v5561_v0 = vrot.slane %v5528_v56, 2  ;;  %v3837_v19 = vsel %vm951_vm1, %v3835_v45, %v3836_v38  ;;  %v3840_v29 = vsel %vm951_vm1, %v3838_v24, %v3839_v49  ;;  %v3767_v9 = vadd.f32 %v11877_v37, %v10118_v7  ;;  %v11881_v27 = vld [vmem:[#allocation197_spill] sm:$0xff] }
 0xf9d   :  { %4649 = vrot.lane.b32.xlu1 %v4627_v34, %s6437_s15  ;;  %v3765_v4 = vadd.f32 %v11870_v2, %v10107_v26  ;;  %v11872_v34 = vld [vmem:[#allocation9_spill] sm:$0xff]  ;;  %v5348_v26 = vrot.slane %v5314_v39, 2  ;;  %v5560_v2 = vrot.slane %v5527_v15, 2  ;;  %v11878_v39 = vld [vmem:[#allocation28_spill] sm:$0xff]  ;;  %v4239_v24 = vsel %vm1360_vm2, %v4237_v16, %v4238_v52 }
 0xf9e   :  { %4775 = vrot.lane.b32.xlu0 %v4754_v63, %s6439_s20  ;;  %v3961_v57 = vadd.f32 %v11872_v34, %v11871_v13  ;;  %v5160_v13 = vsel %vm542_vm0, %v5158_v36, %v5159_v42  ;;  %v5017_v45 = vmul.f32 %v11878_v39, %v9900_v31  ;;  %v5018_v49 = vmul.f32 %v11878_v39, %v10180_v32  ;;  %v10302_v52 = vld [vmem:[%s11294_s0 + $0x38] sm:$0x7] }
 0xf9f   :  { %v10259_v21 = vpop.permute.xlu1 %4453  ;;  %v10273_v40 = vadd.f32 %v10163_v18, %v3765_v4  ;;  %v5349_v7 = vsel %vm951_vm1, %v5347_v59, %v5348_v26  ;;  %v5749_v36 = vrot.slane %v5717_v5, 3  ;;  %v5750_v42 = vrot.slane %v5718_v28, 3  ;;  %v11879_v59 = vld [vmem:[#allocation194_spill] sm:$0xff]  ;;  %v11880_v5 = vld [vmem:[#allocation195_spill] sm:$0xff] }
 0xfa0   :  { %11873 = vst [vmem:[#allocation76_spill] sm:$0xff] %v10259_v21  ;;  %v10262_v47 = vpop.permute.xlu0 %4701  ;;  %v4069_v63 = vadd.f32 %v4050_v53, %v3961_v57  ;;  %v3850_v15 = vadd.f32 %v10193_v54, %v3766_v62  ;;  %v5562_v56 = vsel %vm951_vm1, %v5560_v2, %v5561_v0  ;;  %v5421_v4 = vmul.f32 %v10091_v35, %v9790_v33 }
 0xfa1   :  { %11874 = vst [vmem:[#allocation77_spill] sm:$0xff] %v10262_v47  ;;  %4965 = vrot.lane.b32.xlu1 %v4947_v3, %s6437_s15  ;;  %11876 = vst [vmem:[#allocation78_spill] sm:$0xff] %v10273_v40  ;;  %v212_v3 = vld [vmem:[%s11295_s1 + $0x590] sm:$0xff]  ;;  %v5422_v16 = vmul.f32 %v10302_v52, %v9790_v33  ;;  %v3768_v34 = vadd.f32 %v11879_v59, %v10139_v12  ;;  %v10308_v57 = vrot.slane %v211_v22, 5  ;;  %v5053_v12 = vrot.slane %v5017_v45, 1  ;;  %v11906_v33 = vld [vmem:[#allocation54_spill] sm:$0xff] }
 0xfa2   :  { %5179 = vrot.lane.b32.xlu0 %v5160_v13, %s6439_s20  ;;  %v10310_v54 = vrot.slane %v212_v3, 5  ;;  %v3770_v28 = vadd.f32 %v11880_v5, %v10172_v20  ;;  %v3771_v62 = vadd.f32 %v11881_v27, %v10184_v6  ;;  %v11882_v13 = vld [vmem:[#allocation32_spill] sm:$0xff]  ;;  %v5751_v37 = vsel %vm1360_vm2, %v5749_v36, %v5750_v42  ;;  %v11888_v27 = vld [vmem:[#allocation7_spill] sm:$0xff] }
 0xfa3   :  { %v4158_v18 = vpop.permute.xlu1 %4157  ;;  %v4691_v2 = vmul.f32 %v11882_v13, %v9900_v31  ;;  %v5054_v22 = vrot.slane %v5018_v49, 1  ;;  %v5825_v3 = vmul.f32 %v10091_v35, %v9802_v55  ;;  %v5826_v20 = vmul.f32 %v10302_v52, %v9802_v55 }
 0xfa4   :  { %v4177_v38 = vadd.f32 %v4158_v18, %v4069_v63  ;;  %v10291_v53 = vpop.permute.xlu0 %4347  ;;  %v11884_v18 = vld [vmem:[#allocation198_spill] sm:$0xff]  ;;  %v3851_v39 = vadd.f32 %v10203_v1, %v3767_v9  ;;  %v5456_v45 = vrot.slane %v5422_v16, 2  ;;  %v4195_v49 = vmul.f32 %v9854_v60, %v10308_v57 }
 0xfa5   :  { %5369 = vrot.lane.b32.xlu1 %v5349_v7, %s6437_s15  ;;  %v3772_v6 = vadd.f32 %v11884_v18, %v10190_v41  ;;  %v4196_v7 = vmul.f32 %v9866_v51, %v10308_v57  ;;  %v4197_v36 = vmul.f32 %v9854_v60, %v10310_v54  ;;  %v3854_v41 = vadd.f32 %v10254_v58, %v3770_v28 }
 0xfa6   :  { %5583 = vrot.lane.b32.xlu0 %v5562_v56, %s6439_s20  ;;  %v10313_v26 = vadd.f32 %v4239_v24, %v4177_v38  ;;  %v5455_v24 = vrot.slane %v5421_v4, 2  ;;  %v3852_v38 = vadd.f32 %v10206_v23, %v3768_v34  ;;  %v3855_v1 = vadd.f32 %v3837_v19, %v3771_v62  ;;  %v213_v23 = vld [vmem:[%s11295_s1 + $0x598] sm:$0xff]  ;;  %v11886_v56 = vld [vmem:[#allocation30_spill] sm:$0xff] }
 0xfa7   :  { %v10321_v0 = vpop.permute.xlu1 %4561  ;;  %v4198_v9 = vmul.f32 %v9866_v51, %v10310_v54  ;;  %v4911_v4 = vmul.f32 %v11886_v56, %v9900_v31  ;;  %v5055_v59 = vsel %vm542_vm0, %v5053_v12, %v5054_v22  ;;  %v5857_v34 = vrot.slane %v5825_v3, 3  ;;  %v11887_v19 = vld [vmem:[#allocation6_spill] sm:$0xff] }
 0xfa8   :  { %11883 = vst [vmem:[#allocation79_spill] sm:$0xff] %v10321_v0  ;;  %v10323_v63 = vpop.permute.xlu0 %4639  ;;  %v5858_v5 = vrot.slane %v5826_v20, 3  ;;  %v4912_v58 = vmul.f32 %v11886_v56, %v10180_v32  ;;  %v10358_v28 = vadd.f32 %v11887_v19, %v3850_v15  ;;  %v10361_v62 = vadd.f32 %v11888_v27, %v3851_v39  ;;  %v11890_v22 = vld [vmem:[#allocation34_spill] sm:$0xff]  ;;  %v11891_v39 = vld [vmem:[#allocation31_spill] sm:$0xff]  ;;  %v11893_v56 = vld [vmem:[#allocation8_spill] sm:$0xff] }
 0xfa9   :  { %5773 = vrot.lane.b32.xlu1 %v5751_v37, %s6437_s15  ;;  %v3856_v13 = vadd.f32 %v3840_v29, %v3772_v6  ;;  %v4228_v37 = vrot.slane %v4195_v49, 3  ;;  %v4229_v18 = vrot.slane %v4196_v7, 3  ;;  %v10365_v12 = vrot.slane %v213_v23, 5  ;;  %v11895_v27 = vld [vmem:[#allocation11_spill] sm:$0xff] }
 0xfaa   :  { %4713 = vrot.lane.b32.xlu0 %v4691_v2, %s6438_s18  ;;  %v5457_v2 = vsel %vm951_vm1, %v5455_v24, %v5456_v45  ;;  %v4628_v3 = vmul.f32 %v11890_v22, %v9900_v31  ;;  %v4232_v15 = vrot.slane %v4198_v9, 3  ;;  %v5125_v29 = vmul.f32 %v11891_v39, %v9900_v31  ;;  %v11894_v9 = vld [vmem:[#allocation10_spill] sm:$0xff] }
 0xfab   :  { %v10348_v42 = vpop.permute.xlu1 %4765  ;;  %11889 = vst [vmem:[#allocation81_spill] sm:$0xff] %v10365_v12  ;;  %v5126_v6 = vmul.f32 %v11891_v39, %v10180_v32  ;;  %v5859_v45 = vsel %vm1360_vm2, %v5857_v34, %v5858_v5  ;;  %v4948_v49 = vrot.slane %v4911_v4, 1  ;;  %v4949_v7 = vrot.slane %v4912_v58, 1  ;;  %v11897_v34 = vld [vmem:[#allocation12_spill] sm:$0xff] }
 0xfac   :  { %11885 = vst [vmem:[#allocation80_spill] sm:$0xff] %v10348_v42  ;;  %v10352_v16 = vpop.permute.xlu0 %4051  ;;  %v4231_v42 = vrot.slane %v4197_v36, 3  ;;  %v11892_v36 = vld [vmem:[#allocation51_spill] sm:$0xff]  ;;  %v10385_v19 = vadd.f32 %v11894_v9, %v3854_v41  ;;  %v10394_v4 = vadd.f32 %v11897_v34, %v3856_v13  ;;  %v10397_v5 = vsel %vm1360_vm2, %v4228_v37, %v4229_v18  ;;  %v10412_v13 = vld [vmem:[%s11295_s1 + $0x608] sm:$0xff] }
 0xfad   :  { %5073 = vrot.lane.b32.xlu1 %v5055_v59, %s6438_s18  ;;  %v5315_v23 = vmul.f32 %v10091_v35, %v11892_v36  ;;  %v10382_v59 = vadd.f32 %v11893_v56, %v3852_v38  ;;  %v5316_v22 = vmul.f32 %v10302_v52, %v11892_v36  ;;  %v4199_v38 = vmul.f32 %v9854_v60, %v10365_v12  ;;  %v11901_v56 = vld [vmem:[#allocation52_spill] sm:$0xff] }
 0xfae   :  { %5477 = vrot.lane.b32.xlu0 %v5457_v2, %s6438_s18  ;;  %v10388_v2 = vadd.f32 %v11895_v27, %v3855_v1  ;;  %11898 = vst [vmem:[#allocation83_spill] sm:$0xff] %v10394_v4  ;;  %v4200_v41 = vmul.f32 %v9866_v51, %v10365_v12  ;;  %v11899_v1 = vld [vmem:[#allocation35_spill] sm:$0xff]  ;;  %v10407_v39 = vsel %vm1360_vm2, %v4231_v42, %v4232_v15  ;;  %11900 = vst [vmem:[#allocation84_spill] sm:$0xff] %v10412_v13  ;;  %v11902_v27 = vld [vmem:[#allocation53_spill] sm:$0xff] }
 0xfaf   :  { %v10370_v20 = vpop.permute.xlu1 %4455  ;;  %v4755_v58 = vmul.f32 %v11899_v1, %v9900_v31  ;;  %v5161_v18 = vrot.slane %v5125_v29, 1  ;;  %v5162_v60 = vrot.slane %v5126_v6, 1  ;;  %v4950_v51 = vsel %vm542_vm0, %v4948_v49, %v4949_v7  ;;  %v6022_v6 = vld [vmem:[%s11296_s2 + $0x8] sm:$0xff]  ;;  %v6024_v49 = vld [vmem:[%s11296_s2 + $0x18] sm:$0xff]  ;;  %v6021_v7 = vld [vmem:[%s11296_s2] sm:$0xff] }
 0xfb0   :  { %v10376_v24 = vpop.permute.xlu0 %4703  ;;  %11896 = vst [vmem:[#allocation82_spill] sm:$0xff] %v10388_v2  ;;  %v5529_v9 = vmul.f32 %v10091_v35, %v11901_v56  ;;  %v5530_v42 = vmul.f32 %v10302_v52, %v11901_v56  ;;  %v5351_v15 = vrot.slane %v5316_v22, 2  ;;  %v5719_v34 = vmul.f32 %v10091_v35, %v11902_v27  ;;  %6072 = vmatprep.subr.mxu0 %v6022_v6  ;;  %v11908_v12 = vld [vmem:[#allocation39_spill] sm:$0xff] }
 0xfb1   :  { %5881 = vrot.lane.b32.xlu1 %v5859_v45, %s6438_s18  ;;  %v5720_v29 = vmul.f32 %v10302_v52, %v11902_v27  ;;  %v4235_v22 = vrot.slane %v4200_v41, 3  ;;  %v10439_v1 = vmul.f32 %v10091_v35, %v10412_v13  ;;  %v6023_v27 = vld [vmem:[%s11296_s2 + $0x10] sm:$0xff]  ;;  %v5163_v41 = vsel %vm542_vm0, %v5161_v18, %v5162_v60  ;;  %6185 = vmatprep.subr.mxu1 %v6024_v49  ;;  %v243_v18 = vld [vmem:[%s11295_s1 + $0x688] sm:$0xff] }
 0xfb2   :  { %4651 = vrot.lane.b32.xlu0 %v4628_v3, %s6437_s15  ;;  %v5350_v3 = vrot.slane %v5315_v23, 2  ;;  %v4234_v23 = vrot.slane %v4199_v38, 3  ;;  %v10454_v38 = vld [vmem:[%s11295_s1 + $0x610] sm:$0xff]  ;;  %v10461_v36 = vmul.f32 %v10079_v14, %v10308_v57  ;;  %6073 = vmatpush1.msra.mxu0 %v6021_v7  ;;  %v5563_v55 = vrot.slane %v5529_v9, 2 }
 0xfb3   :  { %v10414_v37 = vpop.permute.xlu1 %4159  ;;  %11904 = vst [vmem:[#allocation85_spill] sm:$0xff] %v10454_v38  ;;  %v5564_v13 = vrot.slane %v5530_v42, 2  ;;  %v5933_v40 = vmul.f32 %v10091_v35, %v11906_v33  ;;  %v5934_v46 = vmul.f32 %v10302_v52, %v11906_v33  ;;  %v11395_v60 = vmov 0.0   ;;  %6186 = vmatpush1.msra.mxu1 %v6023_v27 }
 0xfb4   :  { %v10416_v45 = vpop.permute.xlu0 %4349  ;;  %6136 = vmatprep.mubr.f32.mxu0 %v11395_v60  ;;  %v5352_v49 = vsel %vm951_vm1, %v5350_v3, %v5351_v15  ;;  %v5752_v9 = vrot.slane %v5719_v34, 3  ;;  %v5753_v42 = vrot.slane %v5720_v29, 3  ;;  %v4204_v7 = vmul.f32 %v10102_v8, %v10308_v57  ;;  %6249 = vmatprep.mubr.f32.mxu1 %v11395_v60  ;;  %v11911_v29 = vld [vmem:[#allocation36_spill] sm:$0xff] }
 0xfb5   :  { %4777 = vrot.lane.b32.xlu1 %v4755_v58, %s6439_s20  ;;  %v11903_v58 = vld [vmem:[#allocation33_spill] sm:$0xff]  ;;  %v10482_v2 = vmul.f32 %v11908_v12, %v9900_v31  ;;  %v10485_v27 = vsel %vm1360_vm2, %v4234_v23, %v4235_v22  ;;  %v10489_v3 = vmul.f32 %v10091_v35, %v10454_v38  ;;  %v5565_v23 = vsel %vm951_vm1, %v5563_v55, %v5564_v13 }
 0xfb6   :  { %4967 = vrot.lane.b32.xlu0 %v4950_v51, %s6437_s15  ;;  %v10444_v47 = vmul.f32 %v11903_v58, %v9900_v31  ;;  %v5020_v51 = vmul.f32 %v11903_v58, %v10180_v32  ;;  %v11907_v58 = vld [vmem:[#allocation38_spill] sm:$0xff]  ;;  %v5965_v22 = vrot.slane %v5933_v40, 3  ;;  %v5966_v60 = vrot.slane %v5934_v46, 3  ;;  %v10515_v46 = vld [vmem:[%s11295_s1 + $0x618] sm:$0xff]  ;;  %v11916_v40 = vld [vmem:[#allocation37_spill] sm:$0xff] }
 0xfb7   :  { %v10449_v56 = vpop.permute.xlu1 %4563  ;;  %v4692_v33 = vmul.f32 %v11907_v58, %v9900_v31  ;;  %11909 = vst [vmem:[#allocation87_spill] sm:$0xff] %v10489_v3  ;;  %v10497_v58 = vrot.slane %v243_v18, 7  ;;  %v4240_v38 = vrot.slane %v10461_v36, 3  ;;  %v4241_v18 = vrot.slane %v4204_v7, 3  ;;  %11915 = vst [vmem:[#allocation91_spill] sm:$0xff] %v10515_v46 }
 0xfb8   :  { %v10463_v6 = vpop.permute.xlu0 %4641  ;;  %v5056_v57 = vrot.slane %v10444_v47, 1  ;;  %v5057_v34 = vrot.slane %v5020_v51, 1  ;;  %v4914_v55 = vmul.f32 %v11911_v29, %v10180_v32  ;;  %v5127_v36 = vmul.f32 %v11916_v40, %v9900_v31 }
 0xfb9   :  { %11905 = vst [vmem:[#allocation86_spill] sm:$0xff] %v10463_v6  ;;  %5181 = vrot.lane.b32.xlu1 %v5163_v41, %s6439_s20  ;;  %v4913_v41 = vmul.f32 %v11911_v29, %v9900_v31  ;;  %11912 = vst [vmem:[#allocation89_spill] sm:$0xff] %v10497_v58  ;;  %v11914_v6 = vld [vmem:[#allocation55_spill] sm:$0xff]  ;;  %v5128_v13 = vmul.f32 %v11916_v40, %v10180_v32  ;;  %v5318_v7 = vmul.f32 %v9620_v25, %v10180_v32  ;;  %v11918_v40 = vld [vmem:[#allocation56_spill] sm:$0xff] }
 0xfba   :  { %5371 = vrot.lane.b32.xlu0 %v5352_v49, %s6437_s15  ;;  %v5754_v49 = vsel %vm1360_vm2, %v5752_v9, %v5753_v42  ;;  %v5423_v47 = vmul.f32 %v10091_v35, %v11914_v6  ;;  %v5424_v51 = vmul.f32 %v10302_v52, %v11914_v6  ;;  %v5317_v42 = vmul.f32 %v9620_v25, %v9900_v31 }
 0xfbb   :  { %v10492_v15 = vpop.permute.xlu1 %4767  ;;  %v5827_v6 = vmul.f32 %v10091_v35, %v11918_v40  ;;  %v10543_v25 = vmul.f32 %v10091_v35, %v10515_v46 }
 0xfbc   :  { %11910 = vst [vmem:[#allocation88_spill] sm:$0xff] %v10492_v15  ;;  %v10499_v12 = vpop.permute.xlu0 %4957  ;;  %v5458_v3 = vrot.slane %v5423_v47, 2  ;;  %v5459_v4 = vrot.slane %v5424_v51, 2  ;;  %v5353_v15 = vrot.slane %v5317_v42, 2  ;;  %v10552_v47 = vsel %vm1360_vm2, %v4240_v38, %v4241_v18 }
 0xfbd   :  { %11913 = vst [vmem:[#allocation90_spill] sm:$0xff] %v10499_v12  ;;  %5585 = vrot.lane.b32.xlu1 %v5565_v23, %s6439_s20  ;;  %v4066_v12 = vadd.f32 %v10022_v11, %v10358_v28  ;;  %v4811_v11 = vmul.f32 %v10091_v35, %v10497_v58  ;;  %v4812_v28 = vmul.f32 %v10302_v52, %v10497_v58  ;;  %v5860_v51 = vrot.slane %v5827_v6, 3 }
 0xfbe   :  { %5775 = vrot.lane.b32.xlu0 %v5754_v49, %s6437_s15  ;;  %v5967_v49 = vsel %vm1360_vm2, %v5965_v22, %v5966_v60  ;;  %v5058_v58 = vsel %vm542_vm0, %v5056_v57, %v5057_v34  ;;  %v4952_v60 = vrot.slane %v4914_v55, 1  ;;  %v5165_v22 = vrot.slane %v5128_v13, 1 }
 0xfbf   :  { %v10523_v9 = vpop.permute.xlu1 %4053  ;;  %v4174_v29 = vadd.f32 %v10036_v44, %v4066_v12  ;;  %v4951_v44 = vrot.slane %v4913_v41, 1  ;;  %v5164_v12 = vrot.slane %v5127_v36, 1  ;;  %v4844_v21 = vrot.slane %v4811_v11, 1 }
 0xfc0   :  { %11917 = vst [vmem:[#allocation92_spill] sm:$0xff] %v10523_v9  ;;  %v4458_v23 = vpop.permute.xlu0 %4457  ;;  %v5828_v9 = vmul.f32 %v10302_v52, %v11918_v40  ;;  %v4845_v40 = vrot.slane %v4812_v28, 1  ;;  %v5460_v41 = vsel %vm951_vm1, %v5458_v3, %v5459_v4  ;;  %v5021_v55 = vmul.f32 %v9637_v61, %v9900_v31 }
 0xfc1   :  { %5989 = vrot.lane.b32.xlu1 %v5967_v49, %s6439_s20  ;;  %v5354_v49 = vrot.slane %v5318_v7, 2  ;;  %v4258_v57 = vadd.f32 %v10397_v5, %v4174_v29  ;;  %v5022_v5 = vmul.f32 %v9637_v61, %v10180_v32  ;;  %v4953_v38 = vsel %vm542_vm0, %v4951_v44, %v4952_v60  ;;  %v11921_v44 = vld [vmem:[#allocation58_spill] sm:$0xff] }
 0xfc2   :  { %4715 = vrot.lane.b32.xlu0 %v4692_v33, %s6438_s18  ;;  %v5861_v46 = vrot.slane %v5828_v9, 3  ;;  %v4068_v33 = vadd.f32 %v10149_v50, %v10382_v59  ;;  %v5166_v6 = vsel %vm542_vm0, %v5164_v12, %v5165_v22  ;;  %v5425_v50 = vmul.f32 %v9645_v17, %v9900_v31 }
 0xfc3   :  { %v10546_v0 = vpop.permute.xlu1 %4705  ;;  %v4366_v36 = vadd.f32 %v10124_v10, %v4258_v57  ;;  %v10572_v3 = vsel %vm542_vm0, %v4844_v21, %v4845_v40  ;;  %v5355_v61 = vsel %vm951_vm1, %v5353_v15, %v5354_v49  ;;  %v5426_v10 = vmul.f32 %v9645_v17, %v10180_v32  ;;  %v10588_v21 = vld [vmem:[%s11295_s1 + $0x600] sm:$0xff]  ;;  %v11922_v49 = vld [vmem:[#allocation68_spill] sm:$0xff] }
 0xfc4   :  { %v10549_v34 = vpop.permute.xlu0 %5065  ;;  %v4176_v59 = vadd.f32 %v10175_v43, %v4068_v33  ;;  %v4369_v18 = vadd.f32 %v10416_v45, %v10313_v26  ;;  %v5862_v9 = vsel %vm1360_vm2, %v5860_v51, %v5861_v46  ;;  %v11919_v43 = vld [vmem:[#allocation57_spill] sm:$0xff]  ;;  %v5060_v15 = vrot.slane %v5022_v5, 1 }
 0xfc5   :  { %5075 = vrot.lane.b32.xlu1 %v5058_v58, %s6438_s18  ;;  %v4474_v58 = vadd.f32 %v10168_v48, %v4366_v36  ;;  %v5531_v11 = vmul.f32 %v10091_v35, %v11919_v43  ;;  %v5532_v17 = vmul.f32 %v10302_v52, %v11919_v43  ;;  %v5059_v48 = vrot.slane %v5021_v55, 1  ;;  %v11920_v45 = vld [vmem:[#allocation73_spill] sm:$0xff]  ;;  %v11924_v36 = vld [vmem:[#allocation70_spill] sm:$0xff] }
 0xfc6   :  { %5479 = vrot.lane.b32.xlu0 %v5460_v41, %s6438_s18  ;;  %v10595_v26 = vmul.f32 %v9664_v30, %v9900_v31  ;;  %v4477_v28 = vadd.f32 %v4458_v23, %v4369_v18  ;;  %v5461_v42 = vrot.slane %v5425_v50, 2  ;;  %v4593_v7 = vmul.f32 %v10588_v21, %v9900_v31  ;;  %v11923_v41 = vld [vmem:[#allocation59_spill] sm:$0xff] }
 0xfc7   :  { %v10569_v4 = vpop.permute.xlu1 %4161  ;;  %v4582_v46 = vadd.f32 %v11920_v45, %v4474_v58  ;;  %v4260_v29 = vadd.f32 %v10485_v27, %v4176_v59  ;;  %v5721_v60 = vmul.f32 %v10091_v35, %v11921_v44  ;;  %v5722_v12 = vmul.f32 %v10302_v52, %v11921_v44 }
 0xfc8   :  { %v10580_v13 = vpop.permute.xlu0 %4351  ;;  %v5462_v22 = vrot.slane %v5426_v10, 2  ;;  %v4067_v23 = vadd.f32 %v11922_v49, %v10361_v62  ;;  %v4916_v33 = vmul.f32 %v9664_v30, %v10180_v32  ;;  %v5567_v27 = vrot.slane %v5532_v17, 2 }
 0xfc9   :  { %5883 = vrot.lane.b32.xlu1 %v5862_v9, %s6438_s18  ;;  %v4368_v31 = vadd.f32 %v10291_v53, %v4260_v29  ;;  %v5935_v55 = vmul.f32 %v10091_v35, %v11923_v41  ;;  %v5936_v5 = vmul.f32 %v10302_v52, %v11923_v41  ;;  %v4598_v62 = vadd.f32 %v10439_v1, %v4582_v46 }
 0xfca   :  { %4779 = vrot.lane.b32.xlu0 %v10482_v2, %s6439_s20  ;;  %v5566_v2 = vrot.slane %v5531_v11, 2  ;;  %v4175_v50 = vadd.f32 %v11924_v36, %v4067_v23  ;;  %v4070_v59 = vadd.f32 %v10352_v16, %v10385_v19  ;;  %v5755_v10 = vrot.slane %v5721_v60, 3  ;;  %v10664_v23 = vld [vmem:[%s11294_s0 + $0x70] sm:$0xff] }
 0xfcb   :  { %v4566_v40 = vpop.permute.xlu1 %4565  ;;  %v4476_v53 = vadd.f32 %v10370_v20, %v4368_v31  ;;  %v5756_v58 = vrot.slane %v5722_v12, 3  ;;  %v10629_v18 = vmul.f32 %v10079_v14, %v10310_v54  ;;  %v4662_v9 = vadd.f32 %v10323_v63, %v4598_v62 }
 0xfcc   :  { %v4585_v57 = vadd.f32 %v4566_v40, %v4477_v28  ;;  %v4644_v51 = vpop.permute.xlu0 %4643  ;;  %v4178_v1 = vadd.f32 %v10414_v37, %v4070_v59  ;;  %v5061_v16 = vsel %vm542_vm0, %v5059_v48, %v5060_v15  ;;  %v4954_v19 = vrot.slane %v10595_v26, 1 }
 0xfcd   :  { %4969 = vrot.lane.b32.xlu1 %v4953_v38, %s6437_s15  ;;  %v5568_v20 = vsel %vm951_vm1, %v5566_v2, %v5567_v27  ;;  %v5968_v17 = vrot.slane %v5935_v55, 3  ;;  %v5969_v45 = vrot.slane %v5936_v5, 3  ;;  %v4259_v46 = vadd.f32 %v10407_v39, %v4175_v50  ;;  %v11926_v39 = vld [vmem:[#allocation72_spill] sm:$0xff] }
 0xfce   :  { %5183 = vrot.lane.b32.xlu0 %v5166_v6, %s6439_s20  ;;  %v10622_v30 = vadd.f32 %v4593_v7, %v4585_v57  ;;  %v4584_v6 = vadd.f32 %v10449_v56, %v4476_v53  ;;  %v4726_v28 = vadd.f32 %v10376_v24, %v4662_v9  ;;  %v5463_v63 = vsel %vm951_vm1, %v5461_v42, %v5462_v22  ;;  %v11925_v56 = vld [vmem:[#allocation60_spill] sm:$0xff]  ;;  %v244_v24 = vld [vmem:[%s11295_s1 + $0x690] sm:$0xff] }
 0xfcf   :  { %v10625_v38 = vpop.permute.xlu1 %4769  ;;  %v4955_v37 = vrot.slane %v4916_v33, 1  ;;  %v5757_v15 = vsel %vm1360_vm2, %v5755_v10, %v5756_v58  ;;  %v4206_v26 = vmul.f32 %v10102_v8, %v10310_v54  ;;  %v4243_v7 = vrot.slane %v10629_v18, 3  ;;  %v11927_v42 = vld [vmem:[#allocation88_spill] sm:$0xff]  ;;  %v11931_v10 = vld [vmem:[#allocation79_spill] sm:$0xff] }
 0xfd0   :  { %v4960_v11 = vpop.permute.xlu0 %4959  ;;  %v4367_v29 = vadd.f32 %v11926_v39, %v4259_v46  ;;  %v4790_v40 = vadd.f32 %v11927_v42, %v4726_v28  ;;  %v4262_v60 = vadd.f32 %v10552_v47, %v4178_v1  ;;  %v5830_v22 = vmul.f32 %v10302_v52, %v11925_v56  ;;  %v11928_v57 = vld [vmem:[#allocation40_spill] sm:$0xff] }
 0xfd1   :  { %5373 = vrot.lane.b32.xlu1 %v5355_v61, %s6437_s15  ;;  %v5829_v61 = vmul.f32 %v10091_v35, %v11925_v56  ;;  %v4600_v49 = vadd.f32 %v10543_v25, %v4584_v6  ;;  %v5970_v54 = vsel %vm1360_vm2, %v5968_v17, %v5969_v45  ;;  %v5129_v2 = vmul.f32 %v10664_v23, %v11928_v57  ;;  %v11929_v33 = vld [vmem:[#allocation76_spill] sm:$0xff]  ;;  %v11930_v25 = vld [vmem:[#allocation41_spill] sm:$0xff] }
 0xfd2   :  { %5587 = vrot.lane.b32.xlu0 %v5568_v20, %s6439_s20  ;;  %v5130_v47 = vmul.f32 %v11928_v57, %v10180_v32  ;;  %v4475_v31 = vadd.f32 %v11929_v33, %v4367_v29  ;;  %v4370_v27 = vadd.f32 %v10580_v13, %v4262_v60  ;;  %v5319_v55 = vmul.f32 %v10664_v23, %v11930_v25 }
 0xfd3   :  { %v10642_v48 = vpop.permute.xlu1 %5173  ;;  %v10675_v5 = vrot.slane %v244_v24, 7  ;;  %v4664_v36 = vadd.f32 %v4644_v51, %v4600_v49  ;;  %v5863_v62 = vrot.slane %v5829_v61, 3  ;;  %v4956_v59 = vsel %vm542_vm0, %v4954_v19, %v4955_v37  ;;  %v11933_v24 = vld [vmem:[#allocation42_spill] sm:$0xff]  ;;  %v11936_v49 = vld [vmem:[#allocation43_spill] sm:$0xff] }
 0xfd4   :  { %v4056_v12 = vpop.permute.xlu0 %4055  ;;  %v5320_v53 = vmul.f32 %v11930_v25, %v10180_v32  ;;  %v4583_v58 = vadd.f32 %v11931_v10, %v4475_v31  ;;  %v4874_v18 = vadd.f32 %v10572_v3, %v4790_v40  ;;  %v5864_v1 = vrot.slane %v5830_v22, 3  ;;  %v11932_v3 = vld [vmem:[#allocation83_spill] sm:$0xff]  ;;  %v11935_v40 = vld [vmem:[#allocation61_spill] sm:$0xff] }
 0xfd5   :  { %5777 = vrot.lane.b32.xlu1 %v5757_v15, %s6437_s15  ;;  %v4244_v20 = vrot.slane %v4206_v26, 3  ;;  %v5167_v17 = vrot.slane %v5129_v2, 1  ;;  %v5168_v51 = vrot.slane %v5130_v47, 1  ;;  %v5356_v19 = vrot.slane %v5319_v55, 2  ;;  %v11937_v2 = vld [vmem:[#allocation86_spill] sm:$0xff] }
 0xfd6   :  { %5991 = vrot.lane.b32.xlu0 %v5970_v54, %s6439_s20  ;;  %v4982_v45 = vadd.f32 %v4960_v11, %v4874_v18  ;;  %v4813_v46 = vmul.f32 %v10091_v35, %v10675_v5  ;;  %v4814_v28 = vmul.f32 %v10302_v52, %v10675_v5  ;;  %v4072_v37 = vadd.f32 %v4056_v12, %v11932_v3  ;;  %v11934_v11 = vld [vmem:[#allocation87_spill] sm:$0xff]  ;;  %v11941_v3 = vld [vmem:[#allocation92_spill] sm:$0xff] }
 0xfd7   :  { %v4460_v50 = vpop.permute.xlu1 %4459  ;;  %v5357_v61 = vrot.slane %v5320_v53, 2  ;;  %v5534_v26 = vmul.f32 %v11933_v24, %v10180_v32  ;;  %v4599_v39 = vadd.f32 %v11934_v11, %v4583_v58  ;;  %v5865_v42 = vsel %vm1360_vm2, %v5863_v62, %v5864_v1 }
 0xfd8   :  { %v4478_v13 = vadd.f32 %v4460_v50, %v4370_v27  ;;  %v4708_v9 = vpop.permute.xlu0 %4707  ;;  %v5723_v60 = vmul.f32 %v10091_v35, %v11935_v40  ;;  %v5724_v12 = vmul.f32 %v10302_v52, %v11935_v40  ;;  %v5023_v54 = vmul.f32 %v10664_v23, %v11936_v49  ;;  %v11938_v27 = vld [vmem:[#allocation62_spill] sm:$0xff] }
 0xfd9   :  { %v4728_v6 = vadd.f32 %v4708_v9, %v4664_v36  ;;  %5077 = vrot.lane.b32.xlu1 %v5061_v16, %s6438_s18  ;;  %v5533_v16 = vmul.f32 %v10664_v23, %v11933_v24  ;;  %v5024_v57 = vmul.f32 %v11936_v49, %v10180_v32  ;;  %v4663_v47 = vadd.f32 %v11937_v2, %v4599_v39  ;;  %v11942_v24 = vld [vmem:[#allocation63_spill] sm:$0xff] }
 0xfda   :  { %5481 = vrot.lane.b32.xlu0 %v5463_v63, %s6438_s18  ;;  %v4847_v33 = vrot.slane %v4813_v46, 1  ;;  %v4848_v31 = vrot.slane %v4814_v28, 1  ;;  %v5937_v25 = vmul.f32 %v10091_v35, %v11938_v27  ;;  %v4245_v55 = vsel %vm1360_vm2, %v4243_v7, %v4244_v20  ;;  %v11939_v46 = vld [vmem:[#allocation44_spill] sm:$0xff]  ;;  %v11940_v28 = vld [vmem:[#allocation82_spill] sm:$0xff] }
 0xfdb   :  { %v5068_v15 = vpop.permute.xlu1 %5067  ;;  %v5169_v50 = vsel %vm542_vm0, %v5167_v17, %v5168_v51  ;;  %v5358_v62 = vsel %vm951_vm1, %v5356_v19, %v5357_v61  ;;  %v5938_v53 = vmul.f32 %v10302_v52, %v11938_v27  ;;  %v4727_v10 = vadd.f32 %v10546_v0, %v4663_v47 }
 0xfdc   :  { %v10694_v63 = vadd.f32 %v5068_v15, %v4982_v45  ;;  %v4164_v29 = vpop.permute.xlu0 %4163  ;;  %v5569_v18 = vrot.slane %v5533_v16, 2  ;;  %v5758_v9 = vrot.slane %v5723_v60, 3  ;;  %v5759_v45 = vrot.slane %v5724_v12, 3 }
 0xfdd   :  { %v10699_v22 = vadd.f32 %v4164_v29, %v4072_v37  ;;  %5885 = vrot.lane.b32.xlu1 %v5865_v42, %s6438_s18  ;;  %v5062_v7 = vrot.slane %v5023_v54, 1  ;;  %v5063_v20 = vrot.slane %v5024_v57, 1  ;;  %v4791_v17 = vadd.f32 %v10625_v38, %v4727_v10  ;;  %v11943_v29 = vld [vmem:[#allocation45_spill] sm:$0xff] }
 0xfde   :  { %4971 = vrot.lane.b32.xlu0 %v4956_v59, %s6437_s15  ;;  %v5570_v59 = vrot.slane %v5534_v26, 2  ;;  %v4849_v51 = vsel %vm542_vm0, %v4847_v33, %v4848_v31  ;;  %v5971_v19 = vrot.slane %v5937_v25, 3  ;;  %v5427_v0 = vmul.f32 %v10664_v23, %v11939_v46  ;;  %v11944_v57 = vld [vmem:[#allocation81_spill] sm:$0xff] }
 0xfdf   :  { %v4354_v36 = vpop.permute.xlu1 %4353  ;;  %v4071_v37 = vadd.f32 %v11941_v3, %v11940_v28  ;;  %v5972_v15 = vrot.slane %v5938_v53, 3  ;;  %v5428_v61 = vmul.f32 %v11939_v46, %v10180_v32  ;;  %v5831_v16 = vmul.f32 %v10091_v35, %v11942_v24  ;;  %v11947_v46 = vld [vmem:[#allocation48_spill] sm:$0xff]  ;;  %v11948_v3 = vld [vmem:[#allocation78_spill] sm:$0xff] }
 0xfe0   :  { %v4568_v58 = vpop.permute.xlu0 %4567  ;;  %v5571_v11 = vsel %vm951_vm1, %v5569_v18, %v5570_v59  ;;  %v5832_v39 = vmul.f32 %v10302_v52, %v11942_v24  ;;  %v5131_v42 = vmul.f32 %v10664_v23, %v11943_v29  ;;  %v5760_v49 = vsel %vm1360_vm2, %v5758_v9, %v5759_v45  ;;  %v245_v45 = vld [vmem:[%s11295_s1 + $0x698] sm:$0xff] }
 0xfe1   :  { %v10718_v1 = vadd.f32 %v4568_v58, %v4478_v13  ;;  %5185 = vrot.lane.b32.xlu1 %v5169_v50, %s6439_s20  ;;  %v4179_v60 = vadd.f32 %v10569_v4, %v4071_v37  ;;  %v5132_v35 = vmul.f32 %v11943_v29, %v10180_v32  ;;  %v5064_v54 = vsel %vm542_vm0, %v5062_v7, %v5063_v20  ;;  %v11945_v58 = vld [vmem:[#allocation46_spill] sm:$0xff]  ;;  %v11949_v37 = vld [vmem:[#allocation5_spill] sm:$0xff] }
 0xfe2   :  { %5375 = vrot.lane.b32.xlu0 %v5358_v62, %s6437_s15  ;;  %v4207_v2 = vmul.f32 %v10079_v14, %v11944_v57  ;;  %v4208_v4 = vmul.f32 %v10102_v8, %v11944_v57  ;;  %v5973_v47 = vsel %vm1360_vm2, %v5971_v19, %v5972_v15  ;;  %v5464_v33 = vrot.slane %v5427_v0, 2  ;;  %v6404_v15 = vld [vmem:[%s11294_s0 + $0x20] sm:$0xff] }
 0xfe3   :  { %v4646_v13 = vpop.permute.xlu1 %4645  ;;  %v5465_v31 = vrot.slane %v5428_v61, 2  ;;  %v5866_v25 = vrot.slane %v5831_v16, 3  ;;  %v5867_v53 = vrot.slane %v5832_v39, 3  ;;  %v5170_v10 = vrot.slane %v5131_v42, 1  ;;  %v11950_v61 = vld [vmem:[#allocation74_spill] sm:$0xff] }
 0xfe4   :  { %v4665_v38 = vadd.f32 %v4646_v13, %v10622_v30  ;;  %v4772_v26 = vpop.permute.xlu0 %4771  ;;  %v4875_v30 = vadd.f32 %v4849_v51, %v4791_v17  ;;  %v5321_v18 = vmul.f32 %v10664_v23, %v11945_v58  ;;  %v4263_v59 = vadd.f32 %v4245_v55, %v4179_v60  ;;  %v11946_v17 = vld [vmem:[#allocation47_spill] sm:$0xff] }
 0xfe5   :  { %v10739_v12 = vadd.f32 %v4772_v26, %v4728_v6  ;;  %5589 = vrot.lane.b32.xlu1 %v5571_v11, %s6439_s20  ;;  %v5171_v14 = vrot.slane %v5132_v35, 1  ;;  %v5322_v8 = vmul.f32 %v11945_v58, %v10180_v32  ;;  %v4246_v7 = vrot.slane %v4207_v2, 3 }
 0xfe6   :  { %5779 = vrot.lane.b32.xlu0 %v5760_v49, %s6437_s15  ;;  %v4247_v20 = vrot.slane %v4208_v4, 3  ;;  %v5535_v55 = vmul.f32 %v10664_v23, %v11946_v17  ;;  %v4371_v51 = vadd.f32 %v4354_v36, %v4263_v59  ;;  %v5725_v0 = vmul.f32 %v10664_v23, %v11947_v46  ;;  %v6406_v59 = vld [vmem:[%s11294_s0 + $0x28] sm:$0x7] }
 0xfe7   :  { %v4962_v6 = vpop.permute.xlu1 %4961  ;;  %v5726_v28 = vmul.f32 %v11947_v46, %v10180_v32  ;;  %v3957_v13 = vadd.f32 %v11949_v37, %v11948_v3  ;;  %v10780_v16 = vmul.f32 %v6404_v15, %v11950_v61  ;;  %v5466_v36 = vsel %vm951_vm1, %v5464_v33, %v5465_v31 }
 0xfe8   :  { %v4983_v50 = vadd.f32 %v4962_v6, %v4875_v30  ;;  %v5176_v62 = vpop.permute.xlu0 %5175  ;;  %v10783_v11 = vrot.slane %v245_v45, 7  ;;  %v5868_v29 = vsel %vm1360_vm2, %v5866_v25, %v5867_v53  ;;  %v5359_v42 = vrot.slane %v5321_v18, 2  ;;  %v10793_v6 = vld [vmem:[%s11294_s0 + $0x30] sm:$0xff]  ;;  %v11952_v53 = vld [vmem:[#allocation49_spill] sm:$0xff] }
 0xfe9   :  { %v10755_v9 = vadd.f32 %v5176_v62, %v10694_v63  ;;  %5993 = vrot.lane.b32.xlu1 %v5973_v47, %s6439_s20  ;;  %v5536_v63 = vmul.f32 %v11946_v17, %v10180_v32  ;;  %v5360_v60 = vrot.slane %v5322_v8, 2  ;;  %v5172_v49 = vsel %vm542_vm0, %v5170_v10, %v5171_v14  ;;  %v11951_v47 = vld [vmem:[#allocation64_spill] sm:$0xff]  ;;  %v11954_v17 = vld [vmem:[#allocation50_spill] sm:$0xff] }
 0xfea   :  { %5079 = vrot.lane.b32.xlu0 %v5064_v54, %s6438_s18  ;;  %v4248_v35 = vsel %vm1360_vm2, %v4246_v7, %v4247_v20  ;;  %v5572_v30 = vrot.slane %v5535_v55, 2  ;;  %v5761_v2 = vrot.slane %v5725_v0, 3  ;;  %v5762_v4 = vrot.slane %v5726_v28, 3 }
 0xfeb   :  { %v10768_v19 = vpop.permute.xlu1 %5365  ;;  %v5573_v54 = vrot.slane %v5536_v63, 2  ;;  %v5939_v33 = vmul.f32 %v10793_v6, %v11951_v47  ;;  %v5940_v31 = vmul.f32 %v10302_v52, %v11951_v47  ;;  %v5429_v10 = vmul.f32 %v10664_v23, %v11952_v53 }
 0xfec   :  { %v4462_v26 = vpop.permute.xlu0 %4461  ;;  %v4815_v58 = vmul.f32 %v10793_v6, %v10783_v11  ;;  %v4816_v18 = vmul.f32 %v10302_v52, %v10783_v11  ;;  %v4194_v14 = vmul.f32 %v6406_v59, %v11950_v61  ;;  %v5430_v45 = vmul.f32 %v11952_v53, %v10180_v32  ;;  %v11953_v52 = vld [vmem:[#allocation84_spill] sm:$0xff] }
 0xfed   :  { %v4479_v39 = vadd.f32 %v4462_v26, %v4371_v51  ;;  %5483 = vrot.lane.b32.xlu1 %v5466_v36, %s6438_s18  ;;  %v4225_v7 = vrot.slane %v10780_v16, 3  ;;  %v4594_v20 = vmul.f32 %v10664_v23, %v11953_v52  ;;  %v5833_v55 = vmul.f32 %v10664_v23, %v11954_v17  ;;  %v11959_v52 = vld [vmem:[#allocation66_spill] sm:$0xff] }
 0xfee   :  { %5887 = vrot.lane.b32.xlu0 %v5868_v29, %s6438_s18  ;;  %v4264_v51 = vadd.f32 %v4248_v35, %v10699_v22  ;;  %v5574_v46 = vsel %vm951_vm1, %v5572_v30, %v5573_v54  ;;  %v5763_v0 = vsel %vm1360_vm2, %v5761_v2, %v5762_v4  ;;  %v5974_v28 = vrot.slane %v5939_v33, 3  ;;  %v11955_v29 = vld [vmem:[#allocation51_spill] sm:$0xff]  ;;  %v11957_v4 = vld [vmem:[#allocation52_spill] sm:$0xff] }
 0xfef   :  { %v4710_v57 = vpop.permute.xlu1 %4709  ;;  %v5975_v37 = vrot.slane %v5940_v31, 3  ;;  %v5467_v15 = vrot.slane %v5429_v10, 2  ;;  %v4850_v61 = vrot.slane %v4815_v58, 1  ;;  %v4851_v16 = vrot.slane %v4816_v18, 1  ;;  %v10843_v31 = vld [vmem:[%s11294_s0 + $0x78] sm:$0x7] }
 0xff0   :  { %v4729_v25 = vadd.f32 %v4710_v57, %v4665_v38  ;;  %v5070_v62 = vpop.permute.xlu0 %5069  ;;  %v5361_v38 = vsel %vm951_vm1, %v5359_v42, %v5360_v60  ;;  %v5468_v36 = vrot.slane %v5430_v45, 2  ;;  %v5323_v42 = vmul.f32 %v10664_v23, %v11955_v29  ;;  %v11956_v60 = vld [vmem:[#allocation65_spill] sm:$0xff] }
 0xff1   :  { %v10809_v8 = vadd.f32 %v5070_v62, %v4983_v50  ;;  %5187 = vrot.lane.b32.xlu1 %v5172_v49, %s6439_s20  ;;  %v5834_v50 = vmul.f32 %v11954_v17, %v10180_v32  ;;  %v5324_v22 = vmul.f32 %v11955_v29, %v10180_v32  ;;  %v4065_v49 = vadd.f32 %v11956_v60, %v3957_v13  ;;  %v11958_v13 = vld [vmem:[#allocation53_spill] sm:$0xff]  ;;  %v11961_v29 = vld [vmem:[#allocation55_spill] sm:$0xff] }
 0xff2   :  { %5377 = vrot.lane.b32.xlu0 %v5361_v38, %s6437_s15  ;;  %v4226_v35 = vrot.slane %v4194_v14, 3  ;;  %v5869_v30 = vrot.slane %v5833_v55, 3  ;;  %v4602_v2 = vadd.f32 %v4594_v20, %v10718_v1  ;;  %v5537_v33 = vmul.f32 %v10664_v23, %v11957_v4 }
 0xff3   :  { %v10823_v63 = vpop.permute.xlu1 %5473  ;;  %v5870_v54 = vrot.slane %v5834_v50, 3  ;;  %v5538_v32 = vmul.f32 %v10843_v31, %v11957_v4  ;;  %v5727_v62 = vmul.f32 %v10664_v23, %v11958_v13  ;;  %v5976_v58 = vsel %vm1360_vm2, %v5974_v28, %v5975_v37 }
 0xff4   :  { %v4356_v3 = vpop.permute.xlu0 %4355  ;;  %v4852_v1 = vsel %vm542_vm0, %v4850_v61, %v4851_v16  ;;  %v5728_v18 = vmul.f32 %v10843_v31, %v11958_v13  ;;  %v5469_v14 = vsel %vm951_vm1, %v5467_v15, %v5468_v36  ;;  %v5362_v38 = vrot.slane %v5323_v42, 2  ;;  %v11960_v15 = vld [vmem:[#allocation54_spill] sm:$0xff] }
 0xff5   :  { %v10828_v26 = vadd.f32 %v4356_v3, %v4264_v51  ;;  %5591 = vrot.lane.b32.xlu1 %v5574_v46, %s6439_s20  ;;  %v5363_v45 = vrot.slane %v5324_v22, 2  ;;  %v4173_v20 = vadd.f32 %v11959_v52, %v4065_v49  ;;  %v5871_v17 = vsel %vm1360_vm2, %v5869_v30, %v5870_v54  ;;  %v11962_v22 = vld [vmem:[#allocation56_spill] sm:$0xff]  ;;  %v242_v54 = vld [vmem:[%s11295_s1 + $0x680] sm:$0xff] }
 0xff6   :  { %5781 = vrot.lane.b32.xlu0 %v5763_v0, %s6437_s15  ;;  %v4876_v50 = vadd.f32 %v4852_v1, %v10739_v12  ;;  %v5575_v51 = vrot.slane %v5537_v33, 2  ;;  %v5576_v46 = vrot.slane %v5538_v32, 2  ;;  %v5764_v0 = vrot.slane %v5727_v62, 3  ;;  %v11963_v1 = vld [vmem:[#allocation67_spill] sm:$0xff] }
 0xff7   :  { %v4570_v57 = vpop.permute.xlu1 %4569  ;;  %v5765_v37 = vrot.slane %v5728_v18, 3  ;;  %v5941_v61 = vmul.f32 %v10664_v23, %v11960_v15  ;;  %v5364_v36 = vsel %vm951_vm1, %v5362_v38, %v5363_v45  ;;  %v5431_v12 = vmul.f32 %v10664_v23, %v11961_v29 }
 0xff8   :  { %v10849_v53 = vadd.f32 %v4570_v57, %v4479_v39  ;;  %v4648_v10 = vpop.permute.xlu0 %4647  ;;  %v4227_v39 = vsel %vm1360_vm2, %v4225_v7, %v4226_v35  ;;  %v5942_v7 = vmul.f32 %v10843_v31, %v11960_v15  ;;  %v5835_v60 = vmul.f32 %v10664_v23, %v11962_v22 }
 0xff9   :  { %v10855_v59 = vadd.f32 %v4648_v10, %v4602_v2  ;;  %5995 = vrot.lane.b32.xlu1 %v5976_v58, %s6439_s20  ;;  %v4257_v42 = vadd.f32 %v4227_v39, %v4173_v20  ;;  %v5836_v49 = vmul.f32 %v10843_v31, %v11962_v22  ;;  %v5577_v30 = vsel %vm951_vm1, %v5575_v51, %v5576_v46 }
 0xffa   :  { %5485 = vrot.lane.b32.xlu0 %v5469_v14, %s6438_s18  ;;  %v5766_v4 = vsel %vm1360_vm2, %v5764_v0, %v5765_v37  ;;  %v5977_v33 = vrot.slane %v5941_v61, 3  ;;  %v5978_v32 = vrot.slane %v5942_v7, 3  ;;  %v5470_v13 = vrot.slane %v5431_v12, 2 }
 0xffb   :  { %v4774_v55 = vpop.permute.xlu1 %4773  ;;  %v5539_v10 = vmul.f32 %v10664_v23, %v11919_v43  ;;  %v5540_v58 = vmul.f32 %v10843_v31, %v11919_v43  ;;  %v4365_v18 = vadd.f32 %v11963_v1, %v4257_v42  ;;  %v5873_v14 = vrot.slane %v5836_v49, 3 }
 0xffc   :  { %v10864_v28 = vadd.f32 %v4774_v55, %v4729_v25  ;;  %v4964_v3 = vpop.permute.xlu0 %4963  ;;  %v5432_v25 = vmul.f32 %v10843_v31, %v11961_v29  ;;  %v5729_v38 = vmul.f32 %v10664_v23, %v11921_v44  ;;  %v4589_v45 = vmul.f32 %v10793_v6, %v10588_v21 }
 0xffd   :  { %v4984_v16 = vadd.f32 %v4964_v3, %v4876_v50  ;;  %5889 = vrot.lane.b32.xlu1 %v5871_v17, %s6438_s18  ;;  %v4801_v52 = vrot.slane %v242_v54, 7  ;;  %v5730_v39 = vmul.f32 %v10843_v31, %v11921_v44  ;;  %v11964_v17 = vld [vmem:[#allocation69_spill] sm:$0xff]  ;;  %v5979_v50 = vsel %vm1360_vm2, %v5977_v33, %v5978_v32  ;;  %v11965_v44 = vld [vmem:[#allocation71_spill] sm:$0xff] }
 0xffe   :  { %5379 = vrot.lane.b32.xlu0 %v5364_v36, %s6437_s15  ;;  %v5471_v62 = vrot.slane %v5432_v25, 2  ;;  %v4473_v43 = vadd.f32 %v11964_v17, %v4365_v18  ;;  %v5943_v51 = vmul.f32 %v10664_v23, %v11923_v41  ;;  %v5944_v46 = vmul.f32 %v10843_v31, %v11923_v41  ;;  %v11966_v33 = vld [vmem:[#allocation85_spill] sm:$0xff] }
 0xfff   :  { %v5178_v35 = vpop.permute.xlu1 %5177  ;;  %v5578_v3 = vrot.slane %v5539_v10, 2  ;;  %v5579_v37 = vrot.slane %v5540_v58, 2  ;;  %v5767_v7 = vrot.slane %v5729_v38, 3  ;;  %v5837_v36 = vmul.f32 %v10664_v23, %v11925_v56 }
0x1000   :  { %v10886_v57 = vadd.f32 %v5178_v35, %v10809_v8  ;;  %v10888_v2 = vpop.permute.xlu0 %5367  ;;  %v5872_v8 = vrot.slane %v5835_v60, 3  ;;  %v5472_v21 = vsel %vm951_vm1, %v5470_v13, %v5471_v62  ;;  %v4581_v15 = vadd.f32 %v11965_v44, %v4473_v43 }
0x1001   :  { %5593 = vrot.lane.b32.xlu1 %v5577_v30, %s6439_s20  ;;  %v5768_v41 = vrot.slane %v5730_v39, 3  ;;  %v4817_v12 = vmul.f32 %v10664_v23, %v4801_v52  ;;  %v4818_v25 = vmul.f32 %v10843_v31, %v4801_v52  ;;  %v5980_v60 = vrot.slane %v5943_v51, 3  ;;  %v11967_v51 = vld [vmem:[#allocation75_spill] sm:$0xff] }
0x1002   :  { %5783 = vrot.lane.b32.xlu0 %v5766_v4, %s6437_s15  ;;  %v5874_v61 = vsel %vm1360_vm2, %v5872_v8, %v5873_v14  ;;  %v5981_v49 = vrot.slane %v5944_v46, 3  ;;  %v5731_v35 = vmul.f32 %v10664_v23, %v11935_v40  ;;  %v5580_v54 = vsel %vm951_vm1, %v5578_v3, %v5579_v37 }
0x1003   :  { %v10902_v20 = vpop.permute.xlu1 %5581  ;;  %v4597_v4 = vadd.f32 %v4589_v45, %v4581_v15  ;;  %v5875_v32 = vrot.slane %v5837_v36, 3  ;;  %v4853_v10 = vrot.slane %v4817_v12, 1  ;;  %v4854_v58 = vrot.slane %v4818_v25, 1  ;;  %v11968_v12 = vld [vmem:[#allocation77_spill] sm:$0xff] }
0x1004   :  { %v4464_v55 = vpop.permute.xlu0 %4463  ;;  %v5769_v18 = vsel %vm1360_vm2, %v5767_v7, %v5768_v41  ;;  %v5770_v8 = vrot.slane %v5731_v35, 3  ;;  %v5946_v14 = vmul.f32 %v10843_v31, %v11938_v27  ;;  %v5839_v39 = vmul.f32 %v10664_v23, %v11942_v24  ;;  %v258_v41 = vld [vmem:[%s11295_s1 + $0x700] sm:$0xff] }
0x1005   :  { %v4480_v0 = vadd.f32 %v4464_v55, %v10828_v26  ;;  %5997 = vrot.lane.b32.xlu1 %v5979_v50, %s6439_s20  ;;  %v5838_v26 = vmul.f32 %v10843_v31, %v11925_v56  ;;  %v5732_v56 = vmul.f32 %v10843_v31, %v11935_v40  ;;  %v5982_v40 = vsel %vm1360_vm2, %v5980_v60, %v5981_v49  ;;  %v10953_v55 = vld [vmem:[%s11294_s0 + $0x38] sm:$0x7] }
0x1006   :  { %5487 = vrot.lane.b32.xlu0 %v5472_v21, %s6438_s18  ;;  %v5840_v17 = vmul.f32 %v10843_v31, %v11942_v24  ;;  %v4809_v43 = vmul.f32 %v10793_v6, %v4801_v52  ;;  %v4661_v46 = vadd.f32 %v11967_v51, %v4597_v4  ;;  %v4855_v24 = vsel %vm542_vm0, %v4853_v10, %v4854_v58 }
0x1007   :  { %v4712_v29 = vpop.permute.xlu1 %4711  ;;  %v5876_v62 = vrot.slane %v5838_v26, 3  ;;  %v5771_v45 = vrot.slane %v5732_v56, 3  ;;  %v5984_v15 = vrot.slane %v5946_v14, 3  ;;  %v5878_v36 = vrot.slane %v5839_v39, 3 }
0x1008   :  { %v4730_v42 = vadd.f32 %v4712_v29, %v10855_v59  ;;  %v5072_v22 = vpop.permute.xlu0 %5071  ;;  %v4595_v59 = vmul.f32 %v10664_v23, %v11966_v33  ;;  %v5879_v29 = vrot.slane %v5840_v17, 3  ;;  %v4877_v26 = vadd.f32 %v4855_v24, %v10864_v28  ;;  %v11969_v28 = vld [vmem:[#allocation80_spill] sm:$0xff]  ;;  %v11971_v17 = vld [vmem:[#allocation89_spill] sm:$0xff] }
0x1009   :  { %v5092_v30 = vadd.f32 %v5072_v22, %v4984_v16  ;;  %5891 = vrot.lane.b32.xlu1 %v5874_v61, %s6438_s18  ;;  %v5945_v16 = vmul.f32 %v10664_v23, %v11938_v27  ;;  %v4810_v27 = vmul.f32 %v10953_v55, %v4801_v52  ;;  %v5877_v21 = vsel %vm1360_vm2, %v5875_v32, %v5876_v62 }
0x100a   :  { %5595 = vrot.lane.b32.xlu0 %v5580_v54, %s6439_s20  ;;  %v4603_v50 = vadd.f32 %v4595_v59, %v10849_v53  ;;  %v5947_v61 = vmul.f32 %v10664_v23, %v11951_v47  ;;  %v5948_v52 = vmul.f32 %v10843_v31, %v11951_v47  ;;  %v5772_v53 = vsel %vm1360_vm2, %v5770_v8, %v5771_v45  ;;  %v11970_v8 = vld [vmem:[#allocation90_spill] sm:$0xff]  ;;  %v274_v45 = vld [vmem:[%s11295_s1 + $0x780] sm:$0xff] }
0x100b   :  { %v10934_v13 = vpop.permute.xlu1 %5475  ;;  %v5983_v3 = vrot.slane %v5945_v16, 3  ;;  %v4725_v25 = vadd.f32 %v11968_v12, %v4661_v46  ;;  %v4841_v22 = vrot.slane %v4809_v43, 1  ;;  %v4842_v47 = vrot.slane %v4810_v27, 1 }
0x100c   :  { %v4572_v1 = vpop.permute.xlu0 %4571  ;;  %v5986_v54 = vrot.slane %v5947_v61, 3  ;;  %v5987_v56 = vrot.slane %v5948_v52, 3  ;;  %v10976_v4 = vrot.slane %v258_v41, 6  ;;  %v5880_v59 = vsel %vm1360_vm2, %v5878_v36, %v5879_v29 }
0x100d   :  { %v10942_v38 = vadd.f32 %v4572_v1, %v4480_v0  ;;  %5785 = vrot.lane.b32.xlu1 %v5769_v18, %s6437_s15  ;;  %v5985_v35 = vsel %vm1360_vm2, %v5983_v3, %v5984_v15  ;;  %v4789_v32 = vadd.f32 %v11969_v28, %v4725_v25  ;;  %v4843_v62 = vsel %vm542_vm0, %v4841_v22, %v4842_v47  ;;  %v11972_v3 = vld [vmem:[#allocation91_spill] sm:$0xff] }
0x100e   :  { %5999 = vrot.lane.b32.xlu0 %v5982_v40, %s6439_s20  ;;  %v5988_v16 = vsel %vm1360_vm2, %v5986_v54, %v5987_v56  ;;  %v5218_v1 = vmul.f32 %v10953_v55, %v10976_v4  ;;  %v4819_v43 = vmul.f32 %v10664_v23, %v11971_v17  ;;  %v4820_v27 = vmul.f32 %v10843_v31, %v11971_v17 }
0x100f   :  { %v4650_v0 = vpop.permute.xlu1 %4649  ;;  %v4873_v18 = vadd.f32 %v4843_v62, %v4789_v32 }
0x1010   :  { %v4667_v37 = vadd.f32 %v4650_v0, %v4603_v50  ;;  %v4776_v44 = vpop.permute.xlu0 %4775  ;;  %v5250_v51 = vrot.slane %v5218_v1, 2  ;;  %v4857_v36 = vrot.slane %v4820_v27, 1 }
0x1011   :  { %v10965_v7 = vadd.f32 %v4776_v44, %v4730_v42  ;;  %5893 = vrot.lane.b32.xlu1 %v5877_v21, %s6438_s18  ;;  %v4981_v14 = vadd.f32 %v11970_v8, %v4873_v18  ;;  %v11004_v21 = vrot.slane %v274_v45, 5  ;;  %v4596_v44 = vmul.f32 %v10664_v23, %v11972_v3 }
0x1012   :  { %5787 = vrot.lane.b32.xlu0 %v5772_v53, %s6437_s15  ;;  %v4856_v53 = vrot.slane %v4819_v43, 1 }
0x1013   :  { %v4966_v42 = vpop.permute.xlu1 %4965  ;;  %v5089_v0 = vadd.f32 %v10549_v34, %v4981_v14  ;;  %v5626_v34 = vmul.f32 %v10953_v55, %v11004_v21 }
0x1014   :  { %v4985_v60 = vadd.f32 %v4966_v42, %v4877_v26  ;;  %v5180_v49 = vpop.permute.xlu0 %5179  ;;  %v4604_v26 = vadd.f32 %v4596_v44, %v10942_v38  ;;  %v259_v42 = vld [vmem:[%s11295_s1 + $0x708] sm:$0xff] }
0x1015   :  { %v10978_v33 = vadd.f32 %v5180_v49, %v5092_v30  ;;  %6001 = vrot.lane.b32.xlu1 %v5985_v35, %s6439_s20  ;;  %v5217_v30 = vmul.f32 %v10793_v6, %v10976_v4  ;;  %v5197_v15 = vadd.f32 %v10642_v48, %v5089_v0  ;;  %v4858_v48 = vsel %vm542_vm0, %v4856_v53, %v4857_v36  ;;  %v260_v53 = vld [vmem:[%s11295_s1 + $0x710] sm:$0xff] }
0x1016   :  { %5895 = vrot.lane.b32.xlu0 %v5880_v59, %s6438_s18  ;;  %v5658_v49 = vrot.slane %v5626_v34, 3  ;;  %v4878_v54 = vadd.f32 %v4858_v48, %v10965_v7  ;;  %v11032_v32 = vrot.slane %v259_v42, 6  ;;  %v11973_v0 = vmov 0.0  }
0x1017   :  { %v10985_v10 = vpop.permute.xlu1 %5369  ;;  %v5249_v50 = vrot.slane %v5217_v30, 2 }
0x1018   :  { %v10987_v58 = vpop.permute.xlu0 %5583  ;;  %v5219_v7 = vmul.f32 %v10793_v6, %v11032_v32 }
0x1019   :  { %6003 = vrot.lane.b32.xlu1 %v5988_v16, %s6439_s20  ;;  %v5251_v29 = vsel %vm951_vm1, %v5249_v50, %v5250_v51 }
0x101a   :  { %v5281_v12 = vadd.f32 %v5251_v29, %v5197_v15  ;;  %v5252_v45 = vrot.slane %v5219_v7, 2 }
0x101b   :  { %v5774_v40 = vpop.permute.xlu1 %5773 }
0x101c   :  { %v4714_v39 = vpop.permute.xlu0 %4713  ;;  %v5389_v47 = vadd.f32 %v10768_v19, %v5281_v12  ;;  %v11074_v12 = vrot.slane %v260_v53, 6 }
0x101d   :  { %v4731_v46 = vadd.f32 %v4714_v39, %v4667_v37  ;;  %v5625_v37 = vmul.f32 %v10793_v6, %v11004_v21 }
0x101e   :  { %v5497_v56 = vadd.f32 %v10823_v63, %v5389_v47  ;;  %v5220_v63 = vmul.f32 %v10953_v55, %v11032_v32  ;;  %v5222_v42 = vmul.f32 %v10953_v55, %v11074_v12 }
0x101f   :  { %v5074_v24 = vpop.permute.xlu1 %5073 }
0x1020   :  { %v11009_v61 = vadd.f32 %v5074_v24, %v4985_v60  ;;  %v11011_v52 = vpop.permute.xlu0 %5477  ;;  %v5657_v60 = vrot.slane %v5625_v37, 3  ;;  %v5605_v19 = vadd.f32 %v10902_v20, %v5497_v56  ;;  %v275_v20 = vld [vmem:[%s11295_s1 + $0x788] sm:$0xff]  ;;  %v5253_v39 = vrot.slane %v5220_v63, 2 }
0x1021   :  { %v11049_v27 = vrot.slane %v275_v20, 5 }
0x1022   :  { %v5659_v62 = vsel %vm1360_vm2, %v5657_v60, %v5658_v49 }
0x1023   :  { %v5882_v41 = vpop.permute.xlu1 %5881  ;;  %v5689_v1 = vadd.f32 %v5659_v62, %v5605_v19  ;;  %v5627_v24 = vmul.f32 %v10793_v6, %v11049_v27  ;;  %v5628_v3 = vmul.f32 %v10953_v55, %v11049_v27  ;;  %v5226_v19 = vmul.f32 %v10843_v31, %v10976_v4 }
0x1024   :  { %v4652_v25 = vpop.permute.xlu0 %4651 }
0x1025   :  { %v11020_v22 = vadd.f32 %v4652_v25, %v4604_v26  ;;  %v5797_v8 = vadd.f32 %v5774_v40, %v5689_v1  ;;  %v5660_v37 = vrot.slane %v5627_v24, 3  ;;  %v5661_v34 = vrot.slane %v5628_v3, 3 }
0x1027   :  { %v4778_v35 = vpop.permute.xlu1 %4777  ;;  %v5905_v17 = vadd.f32 %v5882_v41, %v5797_v8 }
0x1028   :  { %v11028_v38 = vadd.f32 %v4778_v35, %v4731_v46  ;;  %v4968_v59 = vpop.permute.xlu0 %4967  ;;  %v5254_v46 = vsel %vm951_vm1, %v5252_v45, %v5253_v39  ;;  %v261_v45 = vld [vmem:[%s11295_s1 + $0x718] sm:$0xff] }
0x1029   :  { %v11030_v28 = vadd.f32 %v4968_v59, %v4878_v54  ;;  %v5282_v15 = vadd.f32 %v5254_v46, %v10755_v9  ;;  %v5662_v9 = vsel %vm1360_vm2, %v5660_v37, %v5661_v34  ;;  %v5256_v54 = vrot.slane %v5222_v42, 2 }
0x102a   :  { %v5225_v59 = vmul.f32 %v10664_v23, %v10976_v4  ;;  %v11112_v24 = vrot.slane %v261_v45, 6  ;;  %v5634_v34 = vmul.f32 %v10843_v31, %v11004_v21 }
0x102b   :  { %v11036_v16 = vpop.permute.xlu1 %5181  ;;  %v5390_v36 = vadd.f32 %v10888_v2, %v5282_v15  ;;  %v5221_v2 = vmul.f32 %v10793_v6, %v11074_v12 }
0x102c   :  { %v11038_v30 = vpop.permute.xlu0 %5371  ;;  %v5261_v39 = vrot.slane %v5225_v59, 2  ;;  %v5201_v15 = vadd.f32 %v11036_v16, %v11009_v61  ;;  %v5224_v61 = vmul.f32 %v10953_v55, %v11112_v24 }
0x102d   :  { %v5498_v26 = vadd.f32 %v10934_v13, %v5390_v36  ;;  %v276_v13 = vld [vmem:[%s11295_s1 + $0x790] sm:$0xff] }
0x102e   :  { %v11095_v7 = vrot.slane %v276_v13, 5  ;;  %v5670_v13 = vrot.slane %v5634_v34, 3 }
0x102f   :  { %v11044_v18 = vpop.permute.xlu1 %5585  ;;  %v5606_v25 = vadd.f32 %v10987_v58, %v5498_v26  ;;  %v5255_v58 = vrot.slane %v5221_v2, 2 }
0x1030   :  { %v5776_v14 = vpop.permute.xlu0 %5775  ;;  %v5630_v4 = vmul.f32 %v10953_v55, %v11095_v7 }
0x1031   :  { %v5690_v60 = vadd.f32 %v5662_v9, %v5606_v25  ;;  %v5257_v8 = vsel %vm951_vm1, %v5255_v58, %v5256_v54 }
0x1033   :  { %v5990_v43 = vpop.permute.xlu1 %5989  ;;  %v5798_v56 = vadd.f32 %v5776_v14, %v5690_v60  ;;  %v5262_v14 = vrot.slane %v5226_v19, 2 }
0x1034   :  { %v6013_v50 = vadd.f32 %v5990_v43, %v5905_v17  ;;  %v11051_v51 = vpop.permute.xlu0 %4715  ;;  %v5629_v17 = vmul.f32 %v10793_v6, %v11095_v7 }
0x1035   :  { %v5263_v53 = vsel %vm951_vm1, %v5261_v39, %v5262_v14 }
0x1036   :  { %6346 = vmatmul.mubr.msk.f32.vlgmr.msra.gmra.mrb[0].mxu0 %vm6047_vm3, %v6013_v50  ;;  %6354 = vmatmul.mubr.msk.f32.vlgmr.msra.gmra.mrb[0].mxu1 %vm6047_vm3, %v6013_v50  ;;  %v5283_v50 = vadd.f32 %v5257_v8, %v10886_v57  ;;  %v5663_v36 = vrot.slane %v5629_v17, 3  ;;  %v5633_v57 = vmul.f32 %v10664_v23, %v11004_v21  ;;  %v5285_v9 = vadd.f32 %v5263_v53, %v5201_v15 }
0x1037   :  { %v11056_v40 = vpop.permute.xlu1 %5075  ;;  %6142 = vmatprep.mubr.f32.mxu0 %v11973_v0  ;;  %6255 = vmatprep.mubr.f32.mxu1 %v11973_v0 }
0x1038   :  { %v11064_v44 = vpop.permute.xlu0 %5479  ;;  %v5391_v3 = vadd.f32 %v10985_v10, %v5283_v50  ;;  %v5223_v10 = vmul.f32 %v10793_v6, %v11112_v24  ;;  %v5669_v60 = vrot.slane %v5633_v57, 3 }
0x103a   :  { %v5499_v26 = vadd.f32 %v11011_v52, %v5391_v3  ;;  %v277_v52 = vld [vmem:[%s11295_s1 + $0x798] sm:$0xff]  ;;  %v5258_v54 = vrot.slane %v5223_v10, 2  ;;  %v5227_v10 = vmul.f32 %v10664_v23, %v11032_v32 }
0x103b   :  { %v5884_v29 = vpop.permute.xlu1 %5883 }
0x103c   :  { %v11071_v41 = vpop.permute.xlu0 %4779  ;;  %v5906_v62 = vadd.f32 %v5884_v29, %v5798_v56  ;;  %v5664_v29 = vrot.slane %v5630_v4, 3  ;;  %v5607_v16 = vadd.f32 %v11044_v18, %v5499_v26  ;;  %v5259_v56 = vrot.slane %v5224_v61, 2 }
0x103d   :  { %v11138_v18 = vrot.slane %v277_v52, 5 }
0x103e   :  { %v5665_v2 = vsel %vm1360_vm2, %v5663_v36, %v5664_v29 }
0x103f   :  { %v11077_v48 = vpop.permute.xlu1 %4969  ;;  %v5691_v59 = vadd.f32 %v5665_v2, %v5607_v16  ;;  %v5631_v17 = vmul.f32 %v10793_v6, %v11138_v18  ;;  %v5632_v4 = vmul.f32 %v10953_v55, %v11138_v18 }
0x1040   :  { %v11080_v47 = vpop.permute.xlu0 %5183 }
0x1041   :  { %v5666_v53 = vrot.slane %v5631_v17, 3  ;;  %v5667_v36 = vrot.slane %v5632_v4, 3  ;;  %v5636_v17 = vmul.f32 %v10843_v31, %v11049_v27 }
0x1043   :  { %v5374_v49 = vpop.permute.xlu1 %5373  ;;  %v5668_v57 = vsel %vm1360_vm2, %v5666_v53, %v5667_v36 }
0x1044   :  { %v11086_v35 = vpop.permute.xlu0 %5587  ;;  %v5393_v21 = vadd.f32 %v5374_v49, %v5285_v9  ;;  %v5260_v49 = vsel %vm951_vm1, %v5258_v54, %v5259_v56  ;;  %v4823_v9 = vmul.f32 %v10664_v23, %v10783_v11  ;;  %v5094_v56 = vadd.f32 %v11056_v40, %v11030_v28 }
0x1047   :  { %v5778_v63 = vpop.permute.xlu1 %5777 }
0x1048   :  { %v5992_v1 = vpop.permute.xlu0 %5991  ;;  %v5799_v8 = vadd.f32 %v5778_v63, %v5691_v59  ;;  %v4862_v59 = vrot.slane %v4823_v9, 1 }
0x1049   :  { %v6014_v20 = vadd.f32 %v5992_v1, %v5906_v62  ;;  %v5671_v1 = vsel %vm1360_vm2, %v5669_v60, %v5670_v13 }
0x104b   :  { %6347 = vmatmul.mubr.msk.f32.gmra.mrb[2].mxu0 %vm6047_vm3, %v6014_v20  ;;  %6355 = vmatmul.mubr.msk.f32.gmra.mrb[2].mxu1 %vm6047_vm3, %v6014_v20  ;;  %v11107_v43 = vpop.permute.xlu1 %5077 }
0x104c   :  { %v5482_v46 = vpop.permute.xlu0 %5481  ;;  %6148 = vmatprep.mubr.f32.mxu0 %v11973_v0  ;;  %6261 = vmatprep.mubr.f32.mxu1 %v11973_v0 }
0x104d   :  { %v5501_v19 = vadd.f32 %v5482_v46, %v5393_v21  ;;  %v5284_v46 = vadd.f32 %v5260_v49, %v10978_v33  ;;  %v5264_v21 = vrot.slane %v5227_v10, 2  ;;  %v5230_v49 = vmul.f32 %v10843_v31, %v11074_v12 }
0x104f   :  { %v5886_v37 = vpop.permute.xlu1 %5885  ;;  %v5392_v63 = vadd.f32 %v11038_v30, %v5284_v46  ;;  %v4821_v30 = vmul.f32 %v10664_v23, %v10675_v5 }
0x1050   :  { %v11123_v25 = vpop.permute.xlu0 %4971  ;;  %v5907_v39 = vadd.f32 %v5886_v37, %v5799_v8  ;;  %v4822_v37 = vmul.f32 %v10843_v31, %v10675_v5  ;;  %v4824_v5 = vmul.f32 %v10843_v31, %v10783_v11  ;;  %v5229_v11 = vmul.f32 %v10664_v23, %v11074_v12 }
0x1051   :  { %v5500_v6 = vadd.f32 %v11064_v44, %v5392_v63  ;;  %v5228_v44 = vmul.f32 %v10843_v31, %v11032_v32 }
0x1052   :  { %v4860_v16 = vrot.slane %v4822_v37, 1 }
0x1053   :  { %v11131_v42 = vpop.permute.xlu1 %5185  ;;  %v5608_v33 = vadd.f32 %v11086_v35, %v5500_v6  ;;  %v4859_v35 = vrot.slane %v4821_v30, 1  ;;  %v5265_v52 = vrot.slane %v5228_v44, 2  ;;  %v5673_v30 = vrot.slane %v5636_v17, 3 }
0x1054   :  { %v11133_v58 = vpop.permute.xlu0 %5375 }
0x1055   :  { %v5692_v61 = vadd.f32 %v5668_v57, %v5608_v33  ;;  %v4861_v32 = vsel %vm542_vm0, %v4859_v35, %v4860_v16 }
0x1056   :  { %v4879_v40 = vadd.f32 %v4861_v32, %v11028_v38 }
0x1057   :  { %v5590_v62 = vpop.permute.xlu1 %5589 }
0x1058   :  { %v5609_v20 = vadd.f32 %v5590_v62, %v5501_v19  ;;  %v5780_v45 = vpop.permute.xlu0 %5779  ;;  %v4863_v19 = vrot.slane %v4824_v5, 1  ;;  %v4987_v38 = vadd.f32 %v11077_v48, %v4879_v40 }
0x1059   :  { %v5800_v60 = vadd.f32 %v5780_v45, %v5692_v61  ;;  %v5202_v45 = vadd.f32 %v11080_v47, %v5094_v56 }
0x105a   :  { %v11142_v14 = vadd.f32 %v5671_v1, %v5609_v20  ;;  %v4732_v1 = vadd.f32 %v11051_v51, %v11020_v22  ;;  %v4864_v22 = vsel %vm542_vm0, %v4862_v59, %v4863_v19  ;;  %v6409_v51 = vld [vmem:[%s11294_s0 + $0x70] sm:$0xff]  ;;  %v5095_v63 = vadd.f32 %v11107_v43, %v4987_v38 }
0x105b   :  { %v5994_v50 = vpop.permute.xlu1 %5993  ;;  %v5635_v47 = vmul.f32 %v6409_v51, %v11049_v27  ;;  %v5231_v46 = vmul.f32 %v6409_v51, %v11112_v24 }
0x105c   :  { %v6015_v3 = vadd.f32 %v5994_v50, %v5907_v39  ;;  %v11149_v15 = vpop.permute.xlu0 %5079  ;;  %v4796_v28 = vadd.f32 %v11071_v41, %v4732_v1  ;;  %v5266_v39 = vsel %vm951_vm1, %v5264_v21, %v5265_v52  ;;  %v5267_v41 = vrot.slane %v5229_v11, 2 }
0x105d   :  { %v5286_v4 = vadd.f32 %v5266_v39, %v5202_v45  ;;  %v5268_v50 = vrot.slane %v5230_v49, 2  ;;  %v5203_v33 = vadd.f32 %v11131_v42, %v5095_v63 }
0x105e   :  { %6348 = vmatmul.mubr.msk.f32.gmra.mrb[4].mxu0 %vm6047_vm3, %v6015_v3  ;;  %6356 = vmatmul.mubr.msk.f32.gmra.mrb[4].mxu1 %vm6047_vm3, %v6015_v3  ;;  %v5232_v3 = vmul.f32 %v10843_v31, %v11112_v24  ;;  %v4880_v53 = vadd.f32 %v4864_v22, %v4796_v28  ;;  %v5270_v24 = vrot.slane %v5231_v46, 2 }
0x105f   :  { %v11154_v29 = vpop.permute.xlu1 %5483  ;;  %6154 = vmatprep.mubr.f32.mxu0 %v11973_v0  ;;  %6267 = vmatprep.mubr.f32.mxu1 %v11973_v0  ;;  %v5394_v36 = vadd.f32 %v11133_v58, %v5286_v4  ;;  %v5269_v10 = vsel %vm951_vm1, %v5267_v41, %v5268_v50  ;;  %v5637_v58 = vmul.f32 %v6409_v51, %v11095_v7 }
0x1060   :  { %v5888_v55 = vpop.permute.xlu0 %5887  ;;  %v4988_v48 = vadd.f32 %v11123_v25, %v4880_v53  ;;  %v5271_v44 = vrot.slane %v5232_v3, 2  ;;  %v5638_v25 = vmul.f32 %v10843_v31, %v11095_v7  ;;  %v5639_v7 = vmul.f32 %v6409_v51, %v11138_v18 }
0x1061   :  { %v5908_v54 = vadd.f32 %v5888_v55, %v5800_v60  ;;  %v5672_v55 = vrot.slane %v5635_v47, 3  ;;  %v5502_v57 = vadd.f32 %v11154_v29, %v5394_v36  ;;  %v6027_v3 = vlaneseq }
0x1062   :  { %v5096_v43 = vadd.f32 %v11149_v15, %v4988_v48  ;;  %v5272_v60 = vsel %vm951_vm1, %v5270_v24, %v5271_v44  ;;  %v5675_v15 = vrot.slane %v5637_v58, 3  ;;  %v5676_v52 = vrot.slane %v5638_v25, 3 }
0x1063   :  { %v11165_v34 = vpop.permute.xlu1 %5187  ;;  %v5674_v9 = vsel %vm1360_vm2, %v5672_v55, %v5673_v30  ;;  %v6028_v63 = vshrl.u32 %v6027_v3, 7 }
0x1064   :  { %v11167_v26 = vpop.permute.xlu0 %5377  ;;  %v5204_v42 = vadd.f32 %v11165_v34, %v5096_v43  ;;  %v5640_v34 = vmul.f32 %v10843_v31, %v11138_v18  ;;  %v5677_v1 = vsel %vm1360_vm2, %v5675_v15, %v5676_v52 }
0x1065   :  { %v6029_v53 = vsub.s32 0, %v6028_v63  ;;  %v6037_v36 = vsub.s32 2, %v6028_v63  ;;  %v6033_v55 = vsub.s32 1, %v6028_v63  ;;  %v6041_v48 = vsub.s32 3, %v6028_v63 }
0x1066   :  { %v5288_v56 = vadd.f32 %v5272_v60, %v5204_v42  ;;  %v5679_v45 = vrot.slane %v5640_v34, 3 }
0x1067   :  { %v5592_v2 = vpop.permute.xlu1 %5591 }
0x1068   :  { %v5782_v13 = vpop.permute.xlu0 %5781  ;;  %v5610_v35 = vadd.f32 %v5592_v2, %v5502_v57 }
0x1069   :  { %v5801_v27 = vadd.f32 %v5782_v13, %v11142_v14  ;;  %v5287_v14 = vadd.f32 %v5269_v10, %v5203_v33 }
0x106a   :  { %v5694_v2 = vadd.f32 %v5674_v9, %v5610_v35 }
0x106b   :  { %v5996_v62 = vpop.permute.xlu1 %5995  ;;  %v5395_v13 = vadd.f32 %v11167_v26, %v5287_v14 }
0x106c   :  { %v6016_v8 = vadd.f32 %v5996_v62, %v5908_v54  ;;  %v5486_v20 = vpop.permute.xlu0 %5485 }
0x106d   :  { %v5503_v54 = vadd.f32 %v5486_v20, %v5395_v13 }
0x106e   :  { %6349 = vmatmul.mubr.msk.f32.gmra.mrb[6].mxu0 %vm6047_vm3, %v6016_v8  ;;  %6357 = vmatmul.mubr.msk.f32.gmra.mrb[6].mxu1 %vm6047_vm3, %v6016_v8  ;;  %v5678_v8 = vrot.slane %v5639_v7, 3 }
0x106f   :  { %v5890_v23 = vpop.permute.xlu1 %5889  ;;  %6160 = vmatprep.mubr.f32.mxu0 %v11973_v0  ;;  %6273 = vmatprep.mubr.f32.mxu1 %v11973_v0 }
0x1070   :  { %v5380_v12 = vpop.permute.xlu0 %5379  ;;  %v5909_v61 = vadd.f32 %v5890_v23, %v5801_v27  ;;  %v5680_v18 = vsel %vm1360_vm2, %v5678_v8, %v5679_v45 }
0x1071   :  { %v5396_v59 = vadd.f32 %v5380_v12, %v5288_v56 }
0x1073   :  { %v5594_v6 = vpop.permute.xlu1 %5593 }
0x1074   :  { %v5784_v37 = vpop.permute.xlu0 %5783  ;;  %v5611_v19 = vadd.f32 %v5594_v6, %v5503_v54  ;;  %v6025_v6 = vld [vmem:[%s11297_s3] sm:$0xf]  ;;  %s6441_s3 = smov [#allocation2]  }
0x1075   :  { %v5802_v32 = vadd.f32 %v5784_v37, %v5694_v2  ;;  %v11242_v33 = vrot.slane %v6025_v6, %v6029_v53  ;;  %v11244_v27 = vrot.slane %v6025_v6, %v6037_v36  ;;  %v11248_v30 = vrot.slane %v6025_v6, %v6041_v48  ;;  %s6335_s21 = sshll.u32 %s6441_s3, 4  ;;  %s6336_s21 = int_to_ptr.vmem [resolvable:$true] %s6335_s21 }
0x1076   :  { %v5695_v22 = vadd.f32 %v5677_v1, %v5611_v19  ;;  %s6410_s22 = scalar_lea.vmem %s6336_s21, 4096  ;;  %p6415_p1 = scmp.lt.s32.totalorder %s6336_s21, %s6336_s21 }
0x1077   :  { %v5998_v16 = vpop.permute.xlu1 %5997  ;;  %p6411_p0 = scmp.ne.s32.totalorder %s6336_s21, %s6410_s22  ;;  %p6416_p2 = scmp.lt.s32.totalorder %s6410_s22, %s6410_s22 }
0x1078   :  { %v6017_v29 = vadd.f32 %v5998_v16, %v5909_v61  ;;  %v5488_v5 = vpop.permute.xlu0 %5487 }
0x1079   :  { %v5504_v49 = vadd.f32 %v5488_v5, %v5396_v59  ;;  %p6417_p3 = por %p6416_p2, %p6415_p1 }
0x107a   :  { %6350 = vmatmul.mubr.msk.f32.gmra.mrb[8].mxu0 %vm6047_vm3, %v6017_v29  ;;  %6358 = vmatmul.mubr.msk.f32.gmra.mrb[8].mxu1 %vm6047_vm3, %v6017_v29 }
0x107b   :  { %v5892_v21 = vpop.permute.xlu1 %5891  ;;  %6166 = vmatprep.mubr.f32.mxu0 %v11973_v0  ;;  %6279 = vmatprep.mubr.f32.mxu1 %v11973_v0  ;;  %p6418_p4 = pnand %p6417_p3, %p6411_p0 }
0x107c   :  { %v5596_v26 = vpop.permute.xlu0 %5595  ;;  %v5910_v62 = vadd.f32 %v5892_v21, %v5802_v32 }
0x107d   :  { %v5612_v39 = vadd.f32 %v5596_v26, %v5504_v49 }
0x107f   :  { %v5786_v11 = vpop.permute.xlu1 %5785  ;;  %v5696_v47 = vadd.f32 %v5680_v18, %v5612_v39 }
0x1080   :  { %v6000_v28 = vpop.permute.xlu0 %5999  ;;  %v5803_v20 = vadd.f32 %v5786_v11, %v5695_v22 }
0x1081   :  { %v6018_v40 = vadd.f32 %v6000_v28, %v5910_v62 }
0x1083   :  { %6351 = vmatmul.mubr.msk.f32.gmra.mrb[10].mxu0 %vm6047_vm3, %v6018_v40  ;;  %6359 = vmatmul.mubr.msk.f32.gmra.mrb[10].mxu1 %vm6047_vm3, %v6018_v40  ;;  %v5894_v31 = vpop.permute.xlu1 %5893 }
0x1084   :  { %v5788_v23 = vpop.permute.xlu0 %5787  ;;  %6172 = vmatprep.mubr.f32.mxu0 %v11973_v0  ;;  %6285 = vmatprep.mubr.f32.mxu1 %v11973_v0  ;;  %v5911_v51 = vadd.f32 %v5894_v31, %v5803_v20 }
0x1085   :  { %v5804_v41 = vadd.f32 %v5788_v23, %v5696_v47 }
0x1087   :  { %v6002_v38 = vpop.permute.xlu1 %6001 }
0x1088   :  { %v6019_v12 = vadd.f32 %v6002_v38, %v5911_v51  ;;  %v5896_v17 = vpop.permute.xlu0 %5895 }
0x1089   :  { %v5912_v4 = vadd.f32 %v5896_v17, %v5804_v41 }
0x108a   :  { %6352 = vmatmul.mubr.msk.f32.gmra.mrb[12].mxu0 %vm6047_vm3, %v6019_v12  ;;  %6360 = vmatmul.mubr.msk.f32.gmra.mrb[12].mxu1 %vm6047_vm3, %v6019_v12 }
0x108b   :  { %v6004_v50 = vpop.permute.xlu1 %6003  ;;  %6178 = vmatprep.mubr.f32.mxu0 %v11973_v0  ;;  %6291 = vmatprep.mubr.f32.mxu1 %v11973_v0  ;;  %v11246_v0 = vrot.slane %v6025_v6, %v6033_v55 }
0x108c   :  { %v6020_v46 = vadd.f32 %v6004_v50, %v5912_v4 }
0x108e   :  { %6353 = vmatmul.mubr.msk.f32.gmra.mrb[14].mxu0 %vm6047_vm3, %v6020_v46  ;;  %6361 = vmatmul.mubr.msk.f32.gmra.mrb[14].mxu1 %vm6047_vm3, %v6020_v46 }
0x1109   :  { %v6138_v37 = vpop.f32.mrb[0].mxu0  ;;  %v6251_v57 = vpop.f32.mrb[0].mxu1 }
0x110a   :  { %v6139_v10 = vadd.f32 %v6138_v37, %v11242_v33  ;;  %v6252_v24 = vadd.f32 %v6251_v57, %v11244_v27  ;;  %v6140_v44 = vpop.f32.mrb[1].mxu0  ;;  %v6253_v43 = vpop.f32.mrb[1].mxu1 }
0x110b   :  { %v6141_v61 = vadd.f32 %v6140_v44, %v11246_v0  ;;  %v6254_v58 = vadd.f32 %v6253_v43, %v11248_v30 }
0x110c   :  { %6298 = vst [vmem:[#allocation2] sm:$0xff] %v6139_v10  ;;  %6300 = vst [vmem:[#allocation2 + $0x10] sm:$0xff] %v6252_v24 }
0x110d   :  { %6299 = vst [vmem:[#allocation2 + $0x8] sm:$0xff] %v6141_v61  ;;  %6301 = vst [vmem:[#allocation2 + $0x18] sm:$0xff] %v6254_v58 }
0x111e   :  { %v6144_v35 = vpop.f32.mrb[2].mxu0  ;;  %v6257_v16 = vpop.f32.mrb[2].mxu1 }
0x111f   :  { %v6145_v25 = vadd.f32 %v6144_v35, %v11242_v33  ;;  %v6258_v42 = vadd.f32 %v6257_v16, %v11244_v27  ;;  %v6146_v14 = vpop.f32.mrb[3].mxu0  ;;  %v6259_v9 = vpop.f32.mrb[3].mxu1 }
0x1120   :  { %v6147_v29 = vadd.f32 %v6146_v14, %v11246_v0  ;;  %v6260_v5 = vadd.f32 %v6259_v9, %v11248_v30 }
0x1121   :  { %6302 = vst [vmem:[#allocation2 + $0x20] sm:$0xff] %v6145_v25  ;;  %6304 = vst [vmem:[#allocation2 + $0x30] sm:$0xff] %v6258_v42 }
0x1122   :  { %6303 = vst [vmem:[#allocation2 + $0x28] sm:$0xff] %v6147_v29  ;;  %6305 = vst [vmem:[#allocation2 + $0x38] sm:$0xff] %v6260_v5 }
0x1131   :  { %v6150_v60 = vpop.f32.mrb[4].mxu0  ;;  %v6263_v13 = vpop.f32.mrb[4].mxu1 }
0x1132   :  { %v6151_v15 = vadd.f32 %v6150_v60, %v11242_v33  ;;  %v6264_v2 = vadd.f32 %v6263_v13, %v11244_v27  ;;  %v6152_v21 = vpop.f32.mrb[5].mxu0  ;;  %v6265_v52 = vpop.f32.mrb[5].mxu1 }
0x1133   :  { %v6153_v7 = vadd.f32 %v6152_v21, %v11246_v0  ;;  %v6266_v34 = vadd.f32 %v6265_v52, %v11248_v30 }
0x1134   :  { %6306 = vst [vmem:[#allocation2 + $0x40] sm:$0xff] %v6151_v15  ;;  %6308 = vst [vmem:[#allocation2 + $0x50] sm:$0xff] %v6264_v2 }
0x1135   :  { %6307 = vst [vmem:[#allocation2 + $0x48] sm:$0xff] %v6153_v7  ;;  %6309 = vst [vmem:[#allocation2 + $0x58] sm:$0xff] %v6266_v34 }
0x1141   :  { %v6156_v54 = vpop.f32.mrb[6].mxu0  ;;  %v6269_v56 = vpop.f32.mrb[6].mxu1 }
0x1142   :  { %v6157_v26 = vadd.f32 %v6156_v54, %v11242_v33  ;;  %v6270_v32 = vadd.f32 %v6269_v56, %v11244_v27  ;;  %v6158_v59 = vpop.f32.mrb[7].mxu0  ;;  %v6271_v19 = vpop.f32.mrb[7].mxu1 }
0x1143   :  { %v6159_v62 = vadd.f32 %v6158_v59, %v11246_v0  ;;  %v6272_v1 = vadd.f32 %v6271_v19, %v11248_v30 }
0x1144   :  { %6310 = vst [vmem:[#allocation2 + $0x60] sm:$0xff] %v6157_v26  ;;  %6312 = vst [vmem:[#allocation2 + $0x70] sm:$0xff] %v6270_v32 }
0x1145   :  { %6311 = vst [vmem:[#allocation2 + $0x68] sm:$0xff] %v6159_v62  ;;  %6313 = vst [vmem:[#allocation2 + $0x78] sm:$0xff] %v6272_v1 }
0x114d   :  { %v6162_v11 = vpop.f32.mrb[8].mxu0  ;;  %v6275_v8 = vpop.f32.mrb[8].mxu1 }
0x114e   :  { %v6163_v45 = vadd.f32 %v6162_v11, %v11242_v33  ;;  %v6276_v49 = vadd.f32 %v6275_v8, %v11244_v27  ;;  %v6164_v28 = vpop.f32.mrb[9].mxu0  ;;  %v6277_v40 = vpop.f32.mrb[9].mxu1 }
0x114f   :  { %v6165_v39 = vadd.f32 %v6164_v28, %v11246_v0  ;;  %v6278_v22 = vadd.f32 %v6277_v40, %v11248_v30 }
0x1150   :  { %6314 = vst [vmem:[#allocation2 + $0x80] sm:$0xff] %v6163_v45  ;;  %6316 = vst [vmem:[#allocation2 + $0x90] sm:$0xff] %v6276_v49 }
0x1151   :  { %6315 = vst [vmem:[#allocation2 + $0x88] sm:$0xff] %v6165_v39  ;;  %6317 = vst [vmem:[#allocation2 + $0x98] sm:$0xff] %v6278_v22 }
0x1156   :  { %v6168_v31 = vpop.f32.mrb[10].mxu0  ;;  %v6281_v18 = vpop.f32.mrb[10].mxu1 }
0x1157   :  { %v6169_v20 = vadd.f32 %v6168_v31, %v11242_v33  ;;  %v6282_v23 = vadd.f32 %v6281_v18, %v11244_v27  ;;  %v6170_v51 = vpop.f32.mrb[11].mxu0  ;;  %v6283_v47 = vpop.f32.mrb[11].mxu1 }
0x1158   :  { %v6171_v38 = vadd.f32 %v6170_v51, %v11246_v0  ;;  %v6284_v41 = vadd.f32 %v6283_v47, %v11248_v30 }
0x1159   :  { %6318 = vst [vmem:[#allocation2 + $0xa0] sm:$0xff] %v6169_v20  ;;  %6320 = vst [vmem:[#allocation2 + $0xb0] sm:$0xff] %v6282_v23 }
0x115a   :  { %6319 = vst [vmem:[#allocation2 + $0xa8] sm:$0xff] %v6171_v38  ;;  %6321 = vst [vmem:[#allocation2 + $0xb8] sm:$0xff] %v6284_v41 }
0x115d   :  { %v6174_v12 = vpop.f32.mrb[12].mxu0  ;;  %v6287_v17 = vpop.f32.mrb[12].mxu1 }
0x115e   :  { %v6175_v4 = vadd.f32 %v6174_v12, %v11242_v33  ;;  %v6288_v50 = vadd.f32 %v6287_v17, %v11244_v27  ;;  %v6176_v46 = vpop.f32.mrb[13].mxu0  ;;  %v6289_v3 = vpop.f32.mrb[13].mxu1 }
0x115f   :  { %v6177_v63 = vadd.f32 %v6176_v46, %v11246_v0  ;;  %v6290_v53 = vadd.f32 %v6289_v3, %v11248_v30 }
0x1160   :  { %6322 = vst [vmem:[#allocation2 + $0xc0] sm:$0xff] %v6175_v4  ;;  %6324 = vst [vmem:[#allocation2 + $0xd0] sm:$0xff] %v6288_v50 }
0x1161   :  { %6323 = vst [vmem:[#allocation2 + $0xc8] sm:$0xff] %v6177_v63  ;;  %6325 = vst [vmem:[#allocation2 + $0xd8] sm:$0xff] %v6290_v53  ;;  %v6180_v36 = vpop.f32.mrb[14].mxu0  ;;  %v6293_v6 = vpop.f32.mrb[14].mxu1 }
0x1162   :  { %v6181_v55 = vadd.f32 %v6180_v36, %v11242_v33  ;;  %v6294_v48 = vadd.f32 %v6293_v6, %v11244_v27  ;;  %v6182_v37 = vpop.f32.mrb[15].mxu0  ;;  %v6295_v57 = vpop.f32.mrb[15].mxu1 }
0x1163   :  { %v6183_v10 = vadd.f32 %v6182_v37, %v11246_v0  ;;  %v6296_v24 = vadd.f32 %v6295_v57, %v11248_v30 }
0x1164   :  { %6326 = vst [vmem:[#allocation2 + $0xe0] sm:$0xff] %v6181_v55  ;;  %6328 = vst [vmem:[#allocation2 + $0xf0] sm:$0xff] %v6294_v48 }
0x1165   :  { %6327 = vst [vmem:[#allocation2 + $0xe8] sm:$0xff] %v6183_v10  ;;  %6329 = vst [vmem:[#allocation2 + $0xf8] sm:$0xff] %v6296_v24 }
0x1166   :  { %6421 = shalt.err (!%p6418_p4)
}
0x1167   :  { %s6422_s11 = scalar_lea.hbm %s11298_s4, 4096 }
0x1168   :  { %p6423_p5 = scmp.ne.s32.totalorder %s11298_s4, %s6422_s11  ;;  %p6426_p6 = scmp.lt.u32.totalorder %s6422_s11, %s11298_s4 }
0x116a   :  { %p6428_p7 = pnand %p6426_p6, %p6423_p5 }
0x116c   :  { %6431 = shalt.err (!%p6428_p7)
}
0x116d   :  { %s6442_s2 = smov 512   ;;  %s6443_s27 = smov 32  }
0x116e   :  { %6341 = dma.vmem_to_hbm [thread:$0]  %s6336_s21, 4096, %s11298_s4, [#allocation3], %s6442_s2, %s6442_s2, %s6443_s27  }
0x116f   :  { %6432 = dma.done.wait [#allocation3], 4096  }
0x1170   :  { %6433 = vsyncadd [#allocation3], 4294963200 }
0x1171   :  { %6345 = vsyncpa [#allocation3], 1 }

</bundles_post_ra>
